<compile_context>
chip_gen: v5e
topology: v5e:2x2
jax: 0.10.0
libtpu: 0.0.40
codegen_flags: <defaults>
</compile_context>

<pallas_src>
import functools

import jax
import jax.numpy as jnp
from jax.experimental import pallas as pl
from jax.experimental.pallas import tpu as pltpu

BN_EPS = 1e-5
LANE = 128
SUBLANE = 8


def _round_up(v, m):
    return (v + m - 1) // m * m


def _conv_bn_kernel(xp_ref, w_ref, g_ref, be_ref, *rest, hw, fuse_residual):
    """3x3 conv (stride 1, pad 1) + training-mode BatchNorm for one Cout block.

    xp_ref : (N, H+2, Wp2, Cp)  zero-halo-padded input (all Cin), matmul dtype
    w_ref  : (9, Cp, Cblk)      taps row-major over (ky, kx), matmul dtype
    g_ref, be_ref : (1, Cblk)   BatchNorm gamma / beta (f32)

    fuse_residual=False: rest = (out_ref,)  out_ref (N, H+2, Wp2, Cblk)
        -> ReLU(BN(conv)) written to the interior, halo zeroed (halo only),
           ready to be the padded input of the next conv.
    fuse_residual=True : rest = (res_ref, out_ref)
        res_ref (N, H, W, Cblk) f32, out_ref (N, H, W, Cblk) f32
        -> ReLU(BN(conv) + res).
    """
    H, W = hw
    if fuse_residual:
        res_ref, out_ref = rest
    else:
        (out_ref,) = rest

    N, _, _, Cp = xp_ref.shape
    Cblk = w_ref.shape[2]
    rows = N * H * W

    # 9 accumulating matmuls (K = Cp) on the shifted padded views: no 9x
    # im2col scratch; f32 MXU accumulation handles the tap sum (MRB in-place
    # on v7x, MRF pop + VPU add elsewhere).
    # TODO(synk): for C < 128 the taps could be packed along K
    # (K = round_up(9*C, 128)) to avoid 9 K=128 matmuls; irrelevant for real
    # MuZero trunks with C >= 128.
    acc = None
    for k in range(9):
        dy, dx = divmod(k, 3)
        view = xp_ref[:, dy:dy + H, dx:dx + W, :].reshape(rows, Cp)
        part = jnp.dot(view, w_ref[k], preferred_element_type=jnp.float32)
        acc = part if acc is None else acc + part

    # Training-mode BatchNorm: per-channel stats over all (N,H,W) rows.
    # Per-channel stats are independent across output-channel blocks, so the
    # channel grid is exact.  Conv bias intentionally omitted (cancelled by
    # the batch-mean subtraction).
    # TODO(synk): single-pass variance (E[y^2]-E[y]^2, clamped) can differ by
    # a few ulps from PyTorch's two-pass variance when |mean| >> std.
    mean = jnp.mean(acc, axis=0, keepdims=True)
    var = jnp.maximum(jnp.mean(acc * acc, axis=0, keepdims=True) - mean * mean, 0.0)
    scale = g_ref[...] * jax.lax.rsqrt(var + BN_EPS)
    shift = be_ref[...] - mean * scale
    y = acc * scale + shift

    if fuse_residual:
        out_ref[...] = jnp.maximum(
            y.reshape(N, H, W, Cblk) + res_ref[...], 0.0).astype(out_ref.dtype)
    else:
        y = jnp.maximum(y, 0.0).reshape(N, H, W, Cblk).astype(out_ref.dtype)
        Wp2 = out_ref.shape[2]
        # Zero only the 1-px halo (+ sublane-alignment columns); the interior
        # is written right below, so no full-buffer memset on the store slot.
        zrow = jnp.zeros((N, 1, Wp2, Cblk), out_ref.dtype)
        out_ref[:, 0:1, :, :] = zrow
        out_ref[:, H + 1:H + 2, :, :] = zrow
        out_ref[:, 1:H + 1, 0:1, :] = jnp.zeros((N, H, 1, Cblk), out_ref.dtype)
        out_ref[:, 1:H + 1, W + 1:Wp2, :] = jnp.zeros(
            (N, H, Wp2 - W - 1, Cblk), out_ref.dtype)
        out_ref[:, 1:H + 1, 1:W + 1, :] = y


def _vmem_limit_bytes(demand_bytes):
    # Generation-aware cap: ~112 MiB usable on v5e/v6e (128 MiB VMEM),
    # ~48 MiB on v7x (64 MiB per TensorCore).
    try:
        cap = int(pltpu.get_tpu_info().vmem_capacity_bytes)
    except Exception:  # conservative fallback that fits every generation
        cap = 64 * 2 ** 20
    usable = max(32 * 2 ** 20, cap - 16 * 2 ** 20)   # headroom for compiler scratch
    want = max(32 * 2 ** 20, 2 * int(demand_bytes))  # 2x headroom over estimate
    return int(min(usable, want))


def residual_block(x_nchw, params, *, matmul_dtype=jnp.bfloat16, channel_block=LANE):
    """MuZero ResidualBlock forward (NCHW in / NCHW out).

    matmul_dtype=jnp.bfloat16 (default) runs the convs at the native bf16 MXU
    rate with f32 accumulation; pass jnp.float32 for a reference-accurate path.
    """
    N, C, H, W = x_nchw.shape
    Cp = _round_up(C, LANE)                      # lane-dense / MXU-aligned channels
    channel_block = min(channel_block, Cp)
    assert Cp % channel_block == 0 and channel_block % LANE == 0
    n_blk = Cp // channel_block
    Hp2 = H + 2
    Wp2 = _round_up(W + 2, SUBLANE)              # sublane-aligned padded width
    msize = jnp.dtype(matmul_dtype).itemsize

    x = jnp.transpose(x_nchw, (0, 2, 3, 1)).astype(jnp.float32)     # NCHW -> NHWC
    if Cp != C:
        x = jnp.pad(x, ((0, 0), (0, 0), (0, 0), (0, Cp - C)))
    # Zero-halo (+ sublane alignment) padding once, on the XLA/HBM side;
    # matmul operands are materialized in bf16 here, not cast in-kernel.
    xp = jnp.pad(x, ((0, 0), (1, 1), (1, Wp2 - W - 1), (0, 0))).astype(matmul_dtype)

    def prep_w(w_pt):  # (Cout, Cin, 3, 3) -> (9, Cp, Cp), taps row-major (ky, kx)
        w = jnp.transpose(w_pt.astype(jnp.float32), (2, 3, 1, 0))   # ky,kx,ci,co
        w = jnp.pad(w, ((0, 0), (0, 0), (0, Cp - C), (0, Cp - C)))
        return w.reshape(9, Cp, Cp).astype(matmul_dtype)

    def prep_v(v, fill):
        return jnp.pad(v.astype(jnp.float32), (0, Cp - C),
                       constant_values=fill).reshape(1, Cp)

    # Conv biases (b1, b2) are NOT passed: exactly cancelled by the batch-mean
    # subtraction of training-mode BatchNorm.
    w1 = prep_w(params["w1"]); g1 = prep_v(params["g1"], 1.0); be1 = prep_v(params["be1"], 0.0)
    w2 = prep_w(params["w2"]); g2 = prep_v(params["g2"], 1.0); be2 = prep_v(params["be2"], 0.0)

    # Rough per-call VMEM demand (double-buffered blocks + transients).
    act_pad = N * Hp2 * Wp2
    rows = N * H * W
    demand = (2 * act_pad * Cp * msize                       # padded input (resident)
              + 2 * act_pad * channel_block * msize          # padded conv1 output block
              + 2 * 9 * Cp * channel_block * msize           # weight block
              + 2 * 2 * rows * channel_block * 4             # residual + final output
              + rows * Cp * msize                            # shifted-view transient
              + 2 * rows * channel_block * 4)                # acc / y transients
    vmem_limit = _vmem_limit_bytes(demand)
    # TODO(synk): for trunks whose padded activations exceed usable VMEM (e.g.
    # very large batch on v7x's 64 MiB), add a batch/spatial grid with two-pass
    # BatchNorm statistics instead of this whole-activation design.

    cparams = pltpu.CompilerParams(
        dimension_semantics=("parallel",),       # channel blocks -> both v7x TCs
        vmem_limit_bytes=vmem_limit)

    # ---- Call 1: Conv1 + BN1 + ReLU, emitted directly in padded layout ----
    h1p = pl.pallas_call(
        functools.partial(_conv_bn_kernel, hw=(H, W), fuse_residual=False),
        out_shape=jax.ShapeDtypeStruct((N, Hp2, Wp2, Cp), matmul_dtype),
        grid=(n_blk,),
        in_specs=[
            pl.BlockSpec((N, Hp2, Wp2, Cp), lambda j: (0, 0, 0, 0)),
            pl.BlockSpec((9, Cp, channel_block), lambda j: (0, 0, j)),
            pl.BlockSpec((1, channel_block), lambda j: (0, j)),
            pl.BlockSpec((1, channel_block), lambda j: (0, j)),
        ],
        out_specs=pl.BlockSpec((N, Hp2, Wp2, channel_block), lambda j: (0, 0, 0, j)),
        compiler_params=cparams,
    )(xp, w1, g1, be1)

    # ---- Call 2: Conv2 + BN2 + residual add + final ReLU ----
    out_nhwc = pl.pallas_call(
        functools.partial(_conv_bn_kernel, hw=(H, W), fuse_residual=True),
        out_shape=jax.ShapeDtypeStruct((N, H, W, Cp), jnp.float32),
        grid=(n_blk,),
        in_specs=[
            pl.BlockSpec((N, Hp2, Wp2, Cp), lambda j: (0, 0, 0, 0)),
            pl.BlockSpec((9, Cp, channel_block), lambda j: (0, 0, j)),
            pl.BlockSpec((1, channel_block), lambda j: (0, j)),
            pl.BlockSpec((1, channel_block), lambda j: (0, j)),
            pl.BlockSpec((N, H, W, channel_block), lambda j: (0, 0, 0, j)),
        ],
        out_specs=pl.BlockSpec((N, H, W, channel_block), lambda j: (0, 0, 0, j)),
        compiler_params=cparams,
    )(h1p, w2, g2, be2, x)

    out = jnp.transpose(out_nhwc, (0, 3, 1, 2))   # NHWC -> NCHW
    return out[:, :C] if Cp != C else out


def init_params(key, kernels_count):
    C = kernels_count
    ks = jax.random.split(key, 8)
    fan_in = C * 3 * 3
    bound = 1.0 / jnp.sqrt(fan_in)
    return {
        "w1": jax.random.uniform(ks[0], (C, C, 3, 3), jnp.float32, -bound, bound),
        "b1": jax.random.uniform(ks[1], (C,), jnp.float32, -bound, bound),
        "g1": 1.0 + 0.1 * jax.random.normal(ks[2], (C,), jnp.float32),
        "be1": 0.1 * jax.random.normal(ks[3], (C,), jnp.float32),
        "w2": jax.random.uniform(ks[4], (C, C, 3, 3), jnp.float32, -bound, bound),
        "b2": jax.random.uniform(ks[5], (C,), jnp.float32, -bound, bound),
        "g2": 1.0 + 0.1 * jax.random.normal(ks[6], (C,), jnp.float32),
        "be2": 0.1 * jax.random.normal(ks[7], (C,), jnp.float32),
    }


def _reference(x_nchw, params):
    """Pure-JAX reference of the PyTorch module (training-mode BN, with bias)."""
    def conv(x, w, b):
        y = jax.lax.conv_general_dilated(
            x, w, window_strides=(1, 1), padding=((1, 1), (1, 1)),
            dimension_numbers=("NCHW", "OIHW", "NCHW"))
        return y + b.reshape(1, -1, 1, 1)

    def bn(y, g, b):
        mean = jnp.mean(y, axis=(0, 2, 3), keepdims=True)
        var = jnp.var(y, axis=(0, 2, 3), keepdims=True)
        return ((y - mean) * jax.lax.rsqrt(var + BN_EPS)
                * g.reshape(1, -1, 1, 1) + b.reshape(1, -1, 1, 1))

    h = jax.nn.relu(bn(conv(x_nchw, params["w1"], params["b1"]),
                       params["g1"], params["be1"]))
    h = bn(conv(h, params["w2"], params["b2"]), params["g2"], params["be2"])
    return jax.nn.relu(h + x_nchw)


if __name__ == "__main__":
    key = jax.random.PRNGKey(0)
    k_x, k_p = jax.random.split(key)

    N, C, H, W = 2, 4, 16, 16  # NCHW, PyTorch convention
    x = jax.random.normal(k_x, (N, C, H, W), jnp.float32)
    params = init_params(k_p, C)

    # Default bf16-MXU path.
    out = jax.block_until_ready(residual_block(x, params))
    assert out.shape == (N, C, H, W)
    assert bool(jnp.all(out >= 0.0))  # final ReLU

    # f32 path cross-checked against a pure-JAX reference.
    out_f32 = jax.block_until_ready(residual_block(x, params, matmul_dtype=jnp.float32))
    ref = jax.block_until_ready(_reference(x, params))
    assert bool(jnp.allclose(out_f32, ref, rtol=1e-3, atol=1e-3)), (
        float(jnp.max(jnp.abs(out_f32 - ref))))

    print("KERNEL_OK")
</pallas_src>

<mosaic_0001>
module attributes {stable_mosaic.version = 11 : i64} {
  func.func @_conv_bn_kernel(%arg0: i32, %arg1: memref<2x18x24x128xbf16, #tpu.memory_space<vmem>>, %arg2: memref<9x128x128xbf16, #tpu.memory_space<vmem>>, %arg3: memref<1x128xf32, #tpu.memory_space<vmem>>, %arg4: memref<1x128xf32, #tpu.memory_space<vmem>>, %arg5: memref<2x18x24x128xbf16, #tpu.memory_space<vmem>>) attributes {dimension_semantics = [#tpu.dimension_semantics<parallel>], iteration_bounds = array<i64: 1>, scalar_prefetch = 0 : i64, scratch_operands = 0 : i64, tpu.core_type = #tpu.core_type<tc>, window_params = [{pipeline_mode = #tpu.pipeline_mode<synchronous>, transform_indices = @transform_0, window_bounds = array<i64: 2, 18, 24, 128>}, {transform_indices = @transform_1, window_bounds = array<i64: 9, 128, 128>}, {transform_indices = @transform_2, window_bounds = array<i64: 1, 128>}, {transform_indices = @transform_3, window_bounds = array<i64: 1, 128>}, {transform_indices = @transform_4, window_bounds = array<i64: 2, 18, 24, 128>}]} {
    %c0 = arith.constant 0 : index
    %c0_0 = arith.constant 0 : index
    %c0_1 = arith.constant 0 : index
    %c0_2 = arith.constant 0 : index
    %0 = vector.load %arg1[%c0, %c0_0, %c0_1, %c0_2] : memref<2x18x24x128xbf16, #tpu.memory_space<vmem>>, vector<2x16x16x128xbf16>
    %1 = vector.shape_cast %0 : vector<2x16x16x128xbf16> to vector<512x128xbf16>
    %c0_3 = arith.constant 0 : index
    %c0_4 = arith.constant 0 : index
    %c0_5 = arith.constant 0 : index
    %2 = vector.load %arg2[%c0_3, %c0_4, %c0_5] : memref<9x128x128xbf16, #tpu.memory_space<vmem>>, vector<1x128x128xbf16>
    %3 = vector.shape_cast %2 : vector<1x128x128xbf16> to vector<128x128xbf16>
    %cst = arith.constant dense<0.000000e+00> : vector<512x128xf32>
    %4 = tpu.matmul %1, %3, %cst {dimension_numbers = #tpu.dot_dimension_numbers<[1], [0], [0], [1], [0, 0, 1, 1], [], []>} : vector<512x128xbf16>, vector<128x128xbf16>, vector<512x128xf32> -> vector<512x128xf32>
    %c0_6 = arith.constant 0 : index
    %c0_7 = arith.constant 0 : index
    %c1 = arith.constant 1 : index
    %c0_8 = arith.constant 0 : index
    %5 = vector.load %arg1[%c0_6, %c0_7, %c1, %c0_8] : memref<2x18x24x128xbf16, #tpu.memory_space<vmem>>, vector<2x16x16x128xbf16>
    %6 = vector.shape_cast %5 : vector<2x16x16x128xbf16> to vector<512x128xbf16>
    %c1_9 = arith.constant 1 : index
    %c0_10 = arith.constant 0 : index
    %c0_11 = arith.constant 0 : index
    %7 = vector.load %arg2[%c1_9, %c0_10, %c0_11] : memref<9x128x128xbf16, #tpu.memory_space<vmem>>, vector<1x128x128xbf16>
    %8 = vector.shape_cast %7 : vector<1x128x128xbf16> to vector<128x128xbf16>
    %cst_12 = arith.constant dense<0.000000e+00> : vector<512x128xf32>
    %9 = tpu.matmul %6, %8, %cst_12 {dimension_numbers = #tpu.dot_dimension_numbers<[1], [0], [0], [1], [0, 0, 1, 1], [], []>} : vector<512x128xbf16>, vector<128x128xbf16>, vector<512x128xf32> -> vector<512x128xf32>
    %10 = arith.addf %4, %9 : vector<512x128xf32>
    %c0_13 = arith.constant 0 : index
    %c0_14 = arith.constant 0 : index
    %c2 = arith.constant 2 : index
    %c0_15 = arith.constant 0 : index
    %11 = vector.load %arg1[%c0_13, %c0_14, %c2, %c0_15] : memref<2x18x24x128xbf16, #tpu.memory_space<vmem>>, vector<2x16x16x128xbf16>
    %12 = vector.shape_cast %11 : vector<2x16x16x128xbf16> to vector<512x128xbf16>
    %c2_16 = arith.constant 2 : index
    %c0_17 = arith.constant 0 : index
    %c0_18 = arith.constant 0 : index
    %13 = vector.load %arg2[%c2_16, %c0_17, %c0_18] : memref<9x128x128xbf16, #tpu.memory_space<vmem>>, vector<1x128x128xbf16>
    %14 = vector.shape_cast %13 : vector<1x128x128xbf16> to vector<128x128xbf16>
    %cst_19 = arith.constant dense<0.000000e+00> : vector<512x128xf32>
    %15 = tpu.matmul %12, %14, %cst_19 {dimension_numbers = #tpu.dot_dimension_numbers<[1], [0], [0], [1], [0, 0, 1, 1], [], []>} : vector<512x128xbf16>, vector<128x128xbf16>, vector<512x128xf32> -> vector<512x128xf32>
    %16 = arith.addf %10, %15 : vector<512x128xf32>
    %c0_20 = arith.constant 0 : index
    %c1_21 = arith.constant 1 : index
    %c0_22 = arith.constant 0 : index
    %c0_23 = arith.constant 0 : index
    %17 = vector.load %arg1[%c0_20, %c1_21, %c0_22, %c0_23] : memref<2x18x24x128xbf16, #tpu.memory_space<vmem>>, vector<2x16x16x128xbf16>
    %18 = vector.shape_cast %17 : vector<2x16x16x128xbf16> to vector<512x128xbf16>
    %c3 = arith.constant 3 : index
    %c0_24 = arith.constant 0 : index
    %c0_25 = arith.constant 0 : index
    %19 = vector.load %arg2[%c3, %c0_24, %c0_25] : memref<9x128x128xbf16, #tpu.memory_space<vmem>>, vector<1x128x128xbf16>
    %20 = vector.shape_cast %19 : vector<1x128x128xbf16> to vector<128x128xbf16>
    %cst_26 = arith.constant dense<0.000000e+00> : vector<512x128xf32>
    %21 = tpu.matmul %18, %20, %cst_26 {dimension_numbers = #tpu.dot_dimension_numbers<[1], [0], [0], [1], [0, 0, 1, 1], [], []>} : vector<512x128xbf16>, vector<128x128xbf16>, vector<512x128xf32> -> vector<512x128xf32>
    %22 = arith.addf %16, %21 : vector<512x128xf32>
    %c0_27 = arith.constant 0 : index
    %c1_28 = arith.constant 1 : index
    %c1_29 = arith.constant 1 : index
    %c0_30 = arith.constant 0 : index
    %23 = vector.load %arg1[%c0_27, %c1_28, %c1_29, %c0_30] : memref<2x18x24x128xbf16, #tpu.memory_space<vmem>>, vector<2x16x16x128xbf16>
    %24 = vector.shape_cast %23 : vector<2x16x16x128xbf16> to vector<512x128xbf16>
    %c4 = arith.constant 4 : index
    %c0_31 = arith.constant 0 : index
    %c0_32 = arith.constant 0 : index
    %25 = vector.load %arg2[%c4, %c0_31, %c0_32] : memref<9x128x128xbf16, #tpu.memory_space<vmem>>, vector<1x128x128xbf16>
    %26 = vector.shape_cast %25 : vector<1x128x128xbf16> to vector<128x128xbf16>
    %cst_33 = arith.constant dense<0.000000e+00> : vector<512x128xf32>
    %27 = tpu.matmul %24, %26, %cst_33 {dimension_numbers = #tpu.dot_dimension_numbers<[1], [0], [0], [1], [0, 0, 1, 1], [], []>} : vector<512x128xbf16>, vector<128x128xbf16>, vector<512x128xf32> -> vector<512x128xf32>
    %28 = arith.addf %22, %27 : vector<512x128xf32>
    %c0_34 = arith.constant 0 : index
    %c1_35 = arith.constant 1 : index
    %c2_36 = arith.constant 2 : index
    %c0_37 = arith.constant 0 : index
    %29 = vector.load %arg1[%c0_34, %c1_35, %c2_36, %c0_37] : memref<2x18x24x128xbf16, #tpu.memory_space<vmem>>, vector<2x16x16x128xbf16>
    %30 = vector.shape_cast %29 : vector<2x16x16x128xbf16> to vector<512x128xbf16>
    %c5 = arith.constant 5 : index
    %c0_38 = arith.constant 0 : index
    %c0_39 = arith.constant 0 : index
    %31 = vector.load %arg2[%c5, %c0_38, %c0_39] : memref<9x128x128xbf16, #tpu.memory_space<vmem>>, vector<1x128x128xbf16>
    %32 = vector.shape_cast %31 : vector<1x128x128xbf16> to vector<128x128xbf16>
    %cst_40 = arith.constant dense<0.000000e+00> : vector<512x128xf32>
    %33 = tpu.matmul %30, %32, %cst_40 {dimension_numbers = #tpu.dot_dimension_numbers<[1], [0], [0], [1], [0, 0, 1, 1], [], []>} : vector<512x128xbf16>, vector<128x128xbf16>, vector<512x128xf32> -> vector<512x128xf32>
    %34 = arith.addf %28, %33 : vector<512x128xf32>
    %c0_41 = arith.constant 0 : index
    %c2_42 = arith.constant 2 : index
    %c0_43 = arith.constant 0 : index
    %c0_44 = arith.constant 0 : index
    %35 = vector.load %arg1[%c0_41, %c2_42, %c0_43, %c0_44] : memref<2x18x24x128xbf16, #tpu.memory_space<vmem>>, vector<2x16x16x128xbf16>
    %36 = vector.shape_cast %35 : vector<2x16x16x128xbf16> to vector<512x128xbf16>
    %c6 = arith.constant 6 : index
    %c0_45 = arith.constant 0 : index
    %c0_46 = arith.constant 0 : index
    %37 = vector.load %arg2[%c6, %c0_45, %c0_46] : memref<9x128x128xbf16, #tpu.memory_space<vmem>>, vector<1x128x128xbf16>
    %38 = vector.shape_cast %37 : vector<1x128x128xbf16> to vector<128x128xbf16>
    %cst_47 = arith.constant dense<0.000000e+00> : vector<512x128xf32>
    %39 = tpu.matmul %36, %38, %cst_47 {dimension_numbers = #tpu.dot_dimension_numbers<[1], [0], [0], [1], [0, 0, 1, 1], [], []>} : vector<512x128xbf16>, vector<128x128xbf16>, vector<512x128xf32> -> vector<512x128xf32>
    %40 = arith.addf %34, %39 : vector<512x128xf32>
    %c0_48 = arith.constant 0 : index
    %c2_49 = arith.constant 2 : index
    %c1_50 = arith.constant 1 : index
    %c0_51 = arith.constant 0 : index
    %41 = vector.load %arg1[%c0_48, %c2_49, %c1_50, %c0_51] : memref<2x18x24x128xbf16, #tpu.memory_space<vmem>>, vector<2x16x16x128xbf16>
    %42 = vector.shape_cast %41 : vector<2x16x16x128xbf16> to vector<512x128xbf16>
    %c7 = arith.constant 7 : index
    %c0_52 = arith.constant 0 : index
    %c0_53 = arith.constant 0 : index
    %43 = vector.load %arg2[%c7, %c0_52, %c0_53] : memref<9x128x128xbf16, #tpu.memory_space<vmem>>, vector<1x128x128xbf16>
    %44 = vector.shape_cast %43 : vector<1x128x128xbf16> to vector<128x128xbf16>
    %cst_54 = arith.constant dense<0.000000e+00> : vector<512x128xf32>
    %45 = tpu.matmul %42, %44, %cst_54 {dimension_numbers = #tpu.dot_dimension_numbers<[1], [0], [0], [1], [0, 0, 1, 1], [], []>} : vector<512x128xbf16>, vector<128x128xbf16>, vector<512x128xf32> -> vector<512x128xf32>
    %46 = arith.addf %40, %45 : vector<512x128xf32>
    %c0_55 = arith.constant 0 : index
    %c2_56 = arith.constant 2 : index
    %c2_57 = arith.constant 2 : index
    %c0_58 = arith.constant 0 : index
    %47 = vector.load %arg1[%c0_55, %c2_56, %c2_57, %c0_58] : memref<2x18x24x128xbf16, #tpu.memory_space<vmem>>, vector<2x16x16x128xbf16>
    %48 = vector.shape_cast %47 : vector<2x16x16x128xbf16> to vector<512x128xbf16>
    %c8 = arith.constant 8 : index
    %c0_59 = arith.constant 0 : index
    %c0_60 = arith.constant 0 : index
    %49 = vector.load %arg2[%c8, %c0_59, %c0_60] : memref<9x128x128xbf16, #tpu.memory_space<vmem>>, vector<1x128x128xbf16>
    %50 = vector.shape_cast %49 : vector<1x128x128xbf16> to vector<128x128xbf16>
    %cst_61 = arith.constant dense<0.000000e+00> : vector<512x128xf32>
    %51 = tpu.matmul %48, %50, %cst_61 {dimension_numbers = #tpu.dot_dimension_numbers<[1], [0], [0], [1], [0, 0, 1, 1], [], []>} : vector<512x128xbf16>, vector<128x128xbf16>, vector<512x128xf32> -> vector<512x128xf32>
    %52 = arith.addf %46, %51 : vector<512x128xf32>
    %cst_62 = arith.constant dense<0.000000e+00> : vector<128xf32>
    %53 = vector.multi_reduction <add>, %52, %cst_62 [0] : vector<512x128xf32> to vector<128xf32>
    %54 = vector.shape_cast %53 : vector<128xf32> to vector<1x128xf32>
    %cst_63 = arith.constant 5.120000e+02 : f32
    %55 = vector.broadcast %cst_63 : f32 to vector<1x128xf32>
    %56 = arith.divf %54, %55 : vector<1x128xf32>
    %57 = arith.mulf %52, %52 : vector<512x128xf32>
    %cst_64 = arith.constant dense<0.000000e+00> : vector<128xf32>
    %58 = vector.multi_reduction <add>, %57, %cst_64 [0] : vector<512x128xf32> to vector<128xf32>
    %59 = vector.shape_cast %58 : vector<128xf32> to vector<1x128xf32>
    %cst_65 = arith.constant 5.120000e+02 : f32
    %60 = vector.broadcast %cst_65 : f32 to vector<1x128xf32>
    %61 = arith.divf %59, %60 : vector<1x128xf32>
    %62 = arith.mulf %56, %56 : vector<1x128xf32>
    %63 = arith.subf %61, %62 : vector<1x128xf32>
    %cst_66 = arith.constant 0.000000e+00 : f32
    %64 = vector.broadcast %cst_66 : f32 to vector<1x128xf32>
    %65 = arith.maximumf %63, %64 : vector<1x128xf32>
    %c0_67 = arith.constant 0 : index
    %c0_68 = arith.constant 0 : index
    %66 = vector.load %arg3[%c0_67, %c0_68] : memref<1x128xf32, #tpu.memory_space<vmem>>, vector<1x128xf32>
    %cst_69 = arith.constant 9.99999974E-6 : f32
    %67 = vector.broadcast %cst_69 : f32 to vector<1x128xf32>
    %68 = arith.addf %65, %67 : vector<1x128xf32>
    %69 = math.rsqrt %68 : vector<1x128xf32>
    %70 = arith.mulf %66, %69 : vector<1x128xf32>
    %c0_70 = arith.constant 0 : index
    %c0_71 = arith.constant 0 : index
    %71 = vector.load %arg4[%c0_70, %c0_71] : memref<1x128xf32, #tpu.memory_space<vmem>>, vector<1x128xf32>
    %72 = arith.mulf %56, %70 : vector<1x128xf32>
    %73 = arith.subf %71, %72 : vector<1x128xf32>
    %74 = vector.broadcast %70 : vector<1x128xf32> to vector<512x128xf32>
    %75 = arith.mulf %52, %74 : vector<512x128xf32>
    %76 = vector.broadcast %73 : vector<1x128xf32> to vector<512x128xf32>
    %77 = arith.addf %75, %76 : vector<512x128xf32>
    %cst_72 = arith.constant 0.000000e+00 : f32
    %78 = vector.broadcast %cst_72 : f32 to vector<512x128xf32>
    %79 = arith.maximumf %77, %78 : vector<512x128xf32>
    %80 = vector.shape_cast %79 : vector<512x128xf32> to vector<2x16x16x128xf32>
    %81 = arith.truncf %80 : vector<2x16x16x128xf32> to vector<2x16x16x128xbf16>
    %cst_73 = arith.constant 0.000000e+00 : bf16
    %82 = vector.broadcast %cst_73 : bf16 to vector<2x1x24x128xbf16>
    %c0_74 = arith.constant 0 : index
    %c0_75 = arith.constant 0 : index
    %c0_76 = arith.constant 0 : index
    %c0_77 = arith.constant 0 : index
    %83 = vector.load %arg5[%c0_74, %c0_75, %c0_76, %c0_77] : memref<2x18x24x128xbf16, #tpu.memory_space<vmem>>, vector<2x1x24x128xbf16>
    tpu.vector_store %arg5[%c0_74, %c0_75, %c0_76, %c0_77], %82 {strides = array<i32>} : memref<2x18x24x128xbf16, #tpu.memory_space<vmem>>, vector<2x1x24x128xbf16>,
    %c0_78 = arith.constant 0 : index
    %c17 = arith.constant 17 : index
    %c0_79 = arith.constant 0 : index
    %c0_80 = arith.constant 0 : index
    %84 = vector.load %arg5[%c0_78, %c17, %c0_79, %c0_80] : memref<2x18x24x128xbf16, #tpu.memory_space<vmem>>, vector<2x1x24x128xbf16>
    tpu.vector_store %arg5[%c0_78, %c17, %c0_79, %c0_80], %82 {strides = array<i32>} : memref<2x18x24x128xbf16, #tpu.memory_space<vmem>>, vector<2x1x24x128xbf16>,
    %cst_81 = arith.constant 0.000000e+00 : bf16
    %85 = vector.broadcast %cst_81 : bf16 to vector<2x16x1x128xbf16>
    %c0_82 = arith.constant 0 : index
    %c1_83 = arith.constant 1 : index
    %c0_84 = arith.constant 0 : index
    %c0_85 = arith.constant 0 : index
    %86 = vector.load %arg5[%c0_82, %c1_83, %c0_84, %c0_85] : memref<2x18x24x128xbf16, #tpu.memory_space<vmem>>, vector<2x16x1x128xbf16>
    tpu.vector_store %arg5[%c0_82, %c1_83, %c0_84, %c0_85], %85 {strides = array<i32>} : memref<2x18x24x128xbf16, #tpu.memory_space<vmem>>, vector<2x16x1x128xbf16>,
    %cst_86 = arith.constant 0.000000e+00 : bf16
    %87 = vector.broadcast %cst_86 : bf16 to vector<2x16x7x128xbf16>
    %c0_87 = arith.constant 0 : index
    %c1_88 = arith.constant 1 : index
    %c17_89 = arith.constant 17 : index
    %c0_90 = arith.constant 0 : index
    %88 = vector.load %arg5[%c0_87, %c1_88, %c17_89, %c0_90] : memref<2x18x24x128xbf16, #tpu.memory_space<vmem>>, vector<2x16x7x128xbf16>
    tpu.vector_store %arg5[%c0_87, %c1_88, %c17_89, %c0_90], %87 {strides = array<i32>} : memref<2x18x24x128xbf16, #tpu.memory_space<vmem>>, vector<2x16x7x128xbf16>,
    %c0_91 = arith.constant 0 : index
    %c1_92 = arith.constant 1 : index
    %c1_93 = arith.constant 1 : index
    %c0_94 = arith.constant 0 : index
    %89 = vector.load %arg5[%c0_91, %c1_92, %c1_93, %c0_94] : memref<2x18x24x128xbf16, #tpu.memory_space<vmem>>, vector<2x16x16x128xbf16>
    tpu.vector_store %arg5[%c0_91, %c1_92, %c1_93, %c0_94], %81 {strides = array<i32>} : memref<2x18x24x128xbf16, #tpu.memory_space<vmem>>, vector<2x16x16x128xbf16>,
    return
  }
  func.func @transform_0(%arg0: i32) -> (i32, i32, i32, i32) {
    %c0_i32 = arith.constant 0 : i32
    %c0_i32_0 = arith.constant 0 : i32
    %c0_i32_1 = arith.constant 0 : i32
    %c0_i32_2 = arith.constant 0 : i32
    %c0_i32_3 = arith.constant 0 : i32
    return %c0_i32, %c0_i32_0, %c0_i32_1, %c0_i32_2 : i32, i32, i32, i32
  }
  func.func @transform_1(%arg0: i32) -> (i32, i32, i32) {
    %c0_i32 = arith.constant 0 : i32
    %c0_i32_0 = arith.constant 0 : i32
    %c0_i32_1 = arith.constant 0 : i32
    return %c0_i32, %c0_i32_0, %arg0 : i32, i32, i32
  }
  func.func @transform_2(%arg0: i32) -> (i32, i32) {
    %c0_i32 = arith.constant 0 : i32
    %c0_i32_0 = arith.constant 0 : i32
    return %c0_i32, %arg0 : i32, i32
  }
  func.func @transform_3(%arg0: i32) -> (i32, i32) {
    %c0_i32 = arith.constant 0 : i32
    %c0_i32_0 = arith.constant 0 : i32
    return %c0_i32, %arg0 : i32, i32
  }
  func.func @transform_4(%arg0: i32) -> (i32, i32, i32, i32) {
    %c0_i32 = arith.constant 0 : i32
    %c0_i32_0 = arith.constant 0 : i32
    %c0_i32_1 = arith.constant 0 : i32
    %c0_i32_2 = arith.constant 0 : i32
    return %c0_i32, %c0_i32_0, %c0_i32_1, %arg0 : i32, i32, i32, i32
  }
}

</mosaic_0001>

<bundles_post_ra>
// kernel: tpu_custom_call.1
= control target key start
LH: loop header
LB: loop body
LE: loop exit
PB: predicated region body
PF: predicated region fallthrough
CT: control target
= control target key end

     0   :  { %9 = vsyncpa [#allocation3], 0  ;;  %s13984_s0 = inlined_call_operand.hbm [shape: bf16[2,18,24,128], index: 0, kind: input, shape index: {}]   ;;  %s13985_s1 = inlined_call_operand.hbm [shape: bf16[9,128,128], index: 1, kind: input, shape index: {}]   ;;  %s13986_s2 = inlined_call_operand.vmem [shape: f32[1,128], index: 2, kind: input, shape index: {}]   ;;  %s13987_s3 = inlined_call_operand.vmem [shape: f32[1,128], index: 3, kind: input, shape index: {}]   ;;  %s13988_s4 = inlined_call_operand.hbm [shape: bf16[2,18,24,128], index: 4, kind: output, shape index: {}]  }
   0x1   :  { %10 = vsyncpa [#allocation6], 0 }
   0x2   :  { %11 = vsyncpa [#allocation4], 0  ;;  %s16_s17 = sshll.u32 %s13984_s0, 4  ;;  %s10461_s18 = smov [#allocation2]   ;;  %s17_s17 = int_to_ptr.hbm [resolvable:$true] %s16_s17 }
   0x3   :  { %s18_s19 = sshll.u32 %s10461_s18, 4  ;;  %s29_s22 = sshll.u32 %s13985_s1, 4  ;;  %s19_s19 = int_to_ptr.vmem [resolvable:$true] %s18_s19  ;;  %s30_s22 = int_to_ptr.hbm [resolvable:$true] %s29_s22 }
   0x4   :  { %s10462_s23 = smov 64   ;;  %s10463_s24 = smov 4  }
   0x5   :  { %24 = dma.hbm_to_vmem [thread:$0]  %s17_s17, 6912, %s19_s19, [#allocation3], %s10462_s23, %s10462_s23, %s10463_s24  }
   0x6   :  { %s10464_s25 = smov [#allocation5]  }
   0x7   :  { %s31_s26 = sshll.u32 %s10464_s25, 4  ;;  %s32_s26 = int_to_ptr.vmem [resolvable:$true] %s31_s26 }
   0x8   :  { %37 = dma.hbm_to_vmem [thread:$0]  %s30_s22, 9216, %s32_s26, [#allocation6], %s10462_s23, %s10462_s23, %s10463_s24  }
   0x9   :  { %10455 = dma.done.wait [#allocation3], 6912  }
   0xa   :  { %10456 = vsyncadd [#allocation3], 4294960384 }
   0xb   :  { %10457 = dma.done.wait [#allocation6], 9216  }
   0xc   :  { %10458 = vsyncadd [#allocation6], 4294958080  ;;  %v10105_v0 = vld [vmem:[#allocation5 + $0x78] sm:$0xff]  ;;  %vm163_vm0 = vsmask.f32 3328  ;;  %v10104_v1 = vld [vmem:[#allocation5 + $0x70] sm:$0xff] }
   0xd   :  { %10226 = vmatpush.bf16.msra.mxu1 %v10105_v0  ;;  %10227 = vmatpush.bf16.msra.mxu2 %v10105_v0  ;;  %v67_v2 = vld [vmem:[#allocation2 + $0x60] sm:$0xf]  ;;  %vm164_vm1 = vsmask.f32 7440  ;;  %v68_v3 = vld [vmem:[#allocation2 + $0x64] sm:$0xf] }
   0xe   :  { %10228 = vmatpush.bf16.msra.mxu3 %v10105_v0  ;;  %1127 = vmatpush.bf16.msra.mxu0 %v10105_v0  ;;  %v139_v4 = vld [vmem:[#allocation2 + $0x68] sm:$0x1]  ;;  %v359_v5 = vshrl.u32 %v67_v2, 16  ;;  %v362_v6 = vshll.u32 %v67_v2, 16  ;;  %v10103_v7 = vld [vmem:[#allocation5 + $0x68] sm:$0xff]  ;;  %v368_v8 = vshll.u32 %v68_v3, 16  ;;  %vm10507_vm2 = vmor %vm163_vm0, %vm164_vm1 }
   0xf   :  { %v372_v9 = vshrl.u32 %v68_v3, 16  ;;  %v378_v10 = vshll.u32 %v139_v4, 16  ;;  %v83_v11 = vld [vmem:[#allocation2 + $0xd8] sm:$0xf]  ;;  %v84_v14 = vld [vmem:[#allocation2 + $0xdc] sm:$0xf] }
  0x10   :  { %v361_v12 = vrot.slane %v359_v5, 4  ;;  %v364_v13 = vrot.slane %v362_v6, 5  ;;  %v147_v15 = vld [vmem:[#allocation2 + $0xe0] sm:$0x1]  ;;  %v370_v16 = vrot.slane %v368_v8, 5  ;;  %v551_v19 = vshrl.u32 %v83_v11, 16 }
  0x11   :  { %10229 = vmatpush.bf16.msra.mxu1 %v10104_v1  ;;  %10230 = vmatpush.bf16.msra.mxu2 %v10104_v1  ;;  %v374_v17 = vrot.slane %v372_v9, 4  ;;  %v380_v18 = vrot.slane %v378_v10, 5  ;;  %v99_v20 = vld [vmem:[#allocation2 + $0x138] sm:$0xf]  ;;  %v554_v22 = vshll.u32 %v83_v11, 16  ;;  %v560_v23 = vshll.u32 %v84_v14, 16 }
  0x12   :  { %10231 = vmatpush.bf16.msra.mxu3 %v10104_v1  ;;  %1128 = vmatpush.bf16.msra.mxu0 %v10104_v1  ;;  %v365_v21 = vor.u32 %v364_v13, %v361_v12  ;;  %v564_v24 = vshrl.u32 %v84_v14, 16  ;;  %v553_v27 = vrot.slane %v551_v19, 4  ;;  %v570_v28 = vshll.u32 %v147_v15, 16  ;;  %v100_v29 = vld [vmem:[#allocation2 + $0x13c] sm:$0xf]  ;;  %v10102_v35 = vld [vmem:[#allocation5 + $0x60] sm:$0xff] }
  0x13   :  { %v375_v26 = vor.u32 %v374_v17, %v370_v16  ;;  %v743_v30 = vshrl.u32 %v99_v20, 16  ;;  %v556_v32 = vrot.slane %v554_v22, 5  ;;  %v562_v33 = vrot.slane %v560_v23, 5  ;;  %v155_v43 = vld [vmem:[#allocation2 + $0x140] sm:$0x1]  ;;  %v10101_v54 = vld [vmem:[#allocation5 + $0x58] sm:$0xff] }
  0x14   :  { %v366_v31 = vrot.slane %v365_v21, 4  ;;  %v566_v34 = vrot.slane %v564_v24, 4  ;;  %v572_v37 = vrot.slane %v570_v28, 5  ;;  %v746_v39 = vshll.u32 %v99_v20, 16  ;;  %v51_v45 = vld [vmem:[#allocation2] sm:$0xf] }
  0x15   :  { %10232 = vmatpush.bf16.msra.mxu1 %v10103_v7  ;;  %10233 = vmatpush.bf16.msra.mxu2 %v10103_v7  ;;  %v376_v36 = vrot.slane %v375_v26, 4  ;;  %v745_v38 = vrot.slane %v743_v30, 4  ;;  %v557_v41 = vor.u32 %v556_v32, %v553_v27  ;;  %v752_v44 = vshll.u32 %v100_v29, 16  ;;  %v52_v58 = vld [vmem:[#allocation2 + $0x4] sm:$0xf]  ;;  %s9276_s5 = sshll.u32 %s13988_s4, 4  ;;  %s9277_s5 = int_to_ptr.hbm [resolvable:$true] %s9276_s5 }
  0x16   :  { %10234 = vmatpush.bf16.msra.mxu3 %v10103_v7  ;;  %1129 = vmatpush.bf16.msra.mxu0 %v10103_v7  ;;  %v371_v40 = vsel %vm10507_vm2, %v366_v31, %v370_v16  ;;  %v567_v42 = vor.u32 %v566_v34, %v562_v33  ;;  %v748_v48 = vrot.slane %v746_v39, 5  ;;  %v756_v49 = vshrl.u32 %v100_v29, 16  ;;  %v131_v4 = vld [vmem:[#allocation2 + $0x8] sm:$0x1]  ;;  %v69_v9 = vld [vmem:[#allocation2 + $0x6c] sm:$0xf] }
  0x17   :  { %v381_v46 = vsel %vm10507_vm2, %v376_v36, %v380_v18  ;;  %v10515_v47 = vunpack.c.l.b16 %v371_v40  ;;  %v558_v51 = vrot.slane %v557_v41, 4  ;;  %v754_v53 = vrot.slane %v752_v44, 5  ;;  %v10100_v10 = vld [vmem:[#allocation5 + $0x50] sm:$0xff]  ;;  %v70_v15 = vld [vmem:[#allocation2 + $0x70] sm:$0xf]  ;;  %v10099_v31 = vld [vmem:[#allocation5 + $0x48] sm:$0xff] }
  0x18   :  { %v10517_v50 = vunpack.c.l.b16 %v381_v46  ;;  %v568_v52 = vrot.slane %v567_v42, 4  ;;  %v749_v55 = vor.u32 %v748_v48, %v745_v38  ;;  %v758_v56 = vrot.slane %v756_v49, 4  ;;  %v140_v22 = vld [vmem:[#allocation2 + $0x74] sm:$0x1]  ;;  %v85_v30 = vld [vmem:[#allocation2 + $0xe4] sm:$0xf] }
  0x19   :  { %10235 = vmatpush.bf16.msra.mxu1 %v10102_v35  ;;  %10236 = vmatpush.bf16.msra.mxu2 %v10102_v35  ;;  %v762_v57 = vshll.u32 %v155_v43, 16  ;;  %v167_v59 = vshrl.u32 %v51_v45, 16  ;;  %v563_v61 = vsel %vm10507_vm2, %v558_v51, %v562_v33  ;;  %v170_v63 = vshll.u32 %v51_v45, 16  ;;  %v86_v36 = vld [vmem:[#allocation2 + $0xe8] sm:$0xf] }
  0x1a   :  { %10237 = vmatpush.bf16.msra.mxu3 %v10102_v35  ;;  %1130 = vmatpush.bf16.msra.mxu0 %v10102_v35  ;;  %v1023_v60 = vpack.c.b16 %v10517_v50, %v10515_v47  ;;  %v573_v62 = vsel %vm10507_vm2, %v568_v52, %v572_v37  ;;  %v10525_v0 = vunpack.c.l.b16 %v563_v61  ;;  %v750_v2 = vrot.slane %v749_v55, 4  ;;  %v148_v46 = vld [vmem:[#allocation2 + $0xec] sm:$0x1]  ;;  %v10098_v52 = vld [vmem:[#allocation5 + $0x40] sm:$0xff] }
  0x1b   :  { %v10527_v1 = vunpack.c.l.b16 %v573_v62  ;;  %v759_v3 = vor.u32 %v758_v56, %v754_v53  ;;  %v764_v5 = vrot.slane %v762_v57, 5  ;;  %v169_v6 = vrot.slane %v167_v59, 4  ;;  %v101_v57 = vld [vmem:[#allocation2 + $0x144] sm:$0xf]  ;;  %v8281_v25 = vld [vmem:[#allocation7 + $0x144] sm:$0x1] }
  0x1c   :  { %v172_v7 = vrot.slane %v170_v63, 5  ;;  %v176_v8 = vshll.u32 %v52_v58, 16  ;;  %v755_v12 = vsel %vm10507_vm2, %v750_v2, %v754_v53  ;;  %v180_v14 = vshrl.u32 %v52_v58, 16  ;;  %v10113_v58 = vld [vmem:[#allocation5 + $0xb8] sm:$0xff] }
  0x1d   :  { %10238 = vmatpush.bf16.msra.mxu1 %v10101_v54  ;;  %10239 = vmatpush.bf16.msra.mxu2 %v10101_v54  ;;  %v1031_v11 = vpack.c.b16 %v10527_v1, %v10525_v0  ;;  %v760_v13 = vrot.slane %v759_v3, 4  ;;  %v10533_v16 = vunpack.c.l.b16 %v755_v12  ;;  %v186_v19 = vshll.u32 %v131_v4, 16  ;;  %v10153_v2 = vld [vmem:[#allocation5 + $0xf8] sm:$0xff]  ;;  %v132_v1 = vld [vmem:[#allocation2 + $0x14] sm:$0x1] }
  0x1e   :  { %10240 = vmatpush.bf16.msra.mxu3 %v10101_v54  ;;  %1131 = vmatpush.bf16.msra.mxu0 %v10101_v54  ;;  %v173_v17 = vor.u32 %v172_v7, %v169_v6  ;;  %v178_v18 = vrot.slane %v176_v8, 5  ;;  %v182_v21 = vrot.slane %v180_v14, 4  ;;  %v383_v23 = vshrl.u32 %v69_v9, 16  ;;  %v102_v7 = vld [vmem:[#allocation2 + $0x148] sm:$0xf] }
  0x1f   :  { %v765_v20 = vsel %vm10507_vm2, %v760_v13, %v764_v5  ;;  %v386_v24 = vshll.u32 %v69_v9, 16  ;;  %v188_v28 = vrot.slane %v186_v19, 5  ;;  %v392_v29 = vshll.u32 %v70_v15, 16  ;;  %v156_v12 = vld [vmem:[#allocation2 + $0x14c] sm:$0x1] }
  0x20   :  { %v10537_v26 = vunpack.c.l.b16 %v765_v20  ;;  %v174_v27 = vrot.slane %v173_v17, 4  ;;  %v183_v32 = vor.u32 %v182_v21, %v178_v18  ;;  %v385_v33 = vrot.slane %v383_v23, 4  ;;  %v53_v19 = vld [vmem:[#allocation2 + $0xc] sm:$0xf] }
  0x21   :  { %10241 = vmatpush.bf16.msra.mxu1 %v10100_v10  ;;  %10242 = vmatpush.bf16.msra.mxu2 %v10100_v10  ;;  %v388_v34 = vrot.slane %v386_v24, 5  ;;  %v396_v35 = vshrl.u32 %v70_v15, 16  ;;  %v394_v39 = vrot.slane %v392_v29, 5  ;;  %v402_v40 = vshll.u32 %v140_v22, 16  ;;  %v10097_v20 = vld [vmem:[#allocation5 + $0x38] sm:$0xff] }
  0x22   :  { %10243 = vmatpush.bf16.msra.mxu3 %v10100_v10  ;;  %1132 = vmatpush.bf16.msra.mxu0 %v10100_v10  ;;  %v1039_v37 = vpack.c.b16 %v10537_v26, %v10533_v16  ;;  %v179_v38 = vsel %vm10507_vm2, %v174_v27, %v178_v18  ;;  %v184_v41 = vrot.slane %v183_v32, 4  ;;  %v575_v48 = vshrl.u32 %v85_v30, 16  ;;  %v10161_v21 = vld [vmem:[#allocation5 + $0x138] sm:$0xff]  ;;  %v10112_v32 = vld [vmem:[#allocation5 + $0xb0] sm:$0xff] }
  0x23   :  { %v10543_v42 = vunpack.c.l.b16 %v179_v38  ;;  %v389_v43 = vor.u32 %v388_v34, %v385_v33  ;;  %v398_v44 = vrot.slane %v396_v35, 4  ;;  %v404_v45 = vrot.slane %v402_v40, 5  ;;  %v10152_v33 = vld [vmem:[#allocation5 + $0xf0] sm:$0xff]  ;;  %v54_v38 = vld [vmem:[#allocation2 + $0x10] sm:$0xf] }
  0x24   :  { %v578_v49 = vshll.u32 %v85_v30, 16  ;;  %v584_v51 = vshll.u32 %v86_v36, 16  ;;  %v189_v53 = vsel %vm10507_vm2, %v184_v41, %v188_v28  ;;  %v588_v56 = vshrl.u32 %v86_v36, 16  ;;  %v10160_v16 = vld [vmem:[#allocation5 + $0x130] sm:$0xff] }
  0x25   :  { %10244 = vmatpush.bf16.msra.mxu1 %v10099_v31  ;;  %10245 = vmatpush.bf16.msra.mxu2 %v10099_v31  ;;  %v390_v54 = vrot.slane %v389_v43, 4  ;;  %v399_v55 = vor.u32 %v398_v44, %v394_v39  ;;  %v952_v59 = vunpack.c.l.b16 %v189_v53  ;;  %v577_v61 = vrot.slane %v575_v48, 4  ;;  %v10096_v44 = vld [vmem:[#allocation5 + $0x30] sm:$0xff]  ;;  %v10111_v48 = vld [vmem:[#allocation5 + $0xa8] sm:$0xff] }
  0x26   :  { %10246 = vmatpush.bf16.msra.mxu3 %v10099_v31  ;;  %1133 = vmatpush.bf16.msra.mxu0 %v10099_v31  ;;  %v580_v62 = vrot.slane %v578_v49, 5  ;;  %v586_v63 = vrot.slane %v584_v51, 5  ;;  %v590_v5 = vrot.slane %v588_v56, 4  ;;  %v594_v6 = vshll.u32 %v148_v46, 16  ;;  %v10151_v49 = vld [vmem:[#allocation5 + $0xe8] sm:$0xff] }
  0x27   :  { %v395_v3 = vsel %vm10507_vm2, %v390_v54, %v394_v39  ;;  %v400_v4 = vrot.slane %v399_v55, 4  ;;  %v1015_v8 = vpack.c.b16 %v952_v59, %v10543_v42  ;;  %v767_v13 = vshrl.u32 %v101_v57, 16  ;;  %v72_v54 = vld [vmem:[#allocation2 + $0x7c] sm:$0xf] }
  0x28   :  { %v10550_v9 = vunpack.c.l.b16 %v395_v3  ;;  %v581_v10 = vor.u32 %v580_v62, %v577_v61  ;;  %v591_v15 = vor.u32 %v590_v5, %v586_v63  ;;  %v596_v17 = vrot.slane %v594_v6, 5  ;;  %v141_v61 = vld [vmem:[#allocation2 + $0x80] sm:$0x1]  ;;  %v10095_v5 = vld [vmem:[#allocation5 + $0x28] sm:$0xff] }
  0x29   :  { %10247 = vmatpush.bf16.msra.mxu1 %v10098_v52  ;;  %10248 = vmatpush.bf16.msra.mxu2 %v10098_v52  ;;  %v405_v14 = vsel %vm10507_vm2, %v400_v4, %v404_v45  ;;  %v770_v18 = vshll.u32 %v101_v57, 16  ;;  %v769_v24 = vrot.slane %v767_v13, 4  ;;  %v776_v27 = vshll.u32 %v102_v7, 16  ;;  %v87_v4 = vld [vmem:[#allocation2 + $0xf0] sm:$0xf]  ;;  %v10159_v6 = vld [vmem:[#allocation5 + $0x128] sm:$0xff] }
  0x2a   :  { %10249 = vmatpush.bf16.msra.mxu3 %v10098_v52  ;;  %1134 = vmatpush.bf16.msra.mxu0 %v10098_v52  ;;  %v10554_v22 = vunpack.c.l.b16 %v405_v14  ;;  %v582_v23 = vrot.slane %v581_v10, 4  ;;  %v592_v28 = vrot.slane %v591_v15, 4  ;;  %v780_v30 = vshrl.u32 %v102_v7, 16 }
  0x2b   :  { %v772_v29 = vrot.slane %v770_v18, 5  ;;  %v786_v31 = vshll.u32 %v156_v12, 16  ;;  %v778_v36 = vrot.slane %v776_v27, 5  ;;  %v191_v39 = vshrl.u32 %v53_v19, 16 }
  0x2c   :  { %1175 = vmatmul.bf16.vlgmr.msra.gmra.mxu1 %v1023_v60  ;;  %1215 = vmatmul.bf16.vlgmr.msra.gmra.mxu2 %v1031_v11  ;;  %v1024_v34 = vpack.c.b16 %v10554_v22, %v10550_v9  ;;  %v587_v35 = vsel %vm10507_vm2, %v582_v23, %v586_v63  ;;  %v597_v47 = vsel %vm10507_vm2, %v592_v28, %v596_v17  ;;  %v782_v0 = vrot.slane %v780_v30, 4  ;;  %v71_v11 = vld [vmem:[#allocation2 + $0x78] sm:$0xf]  ;;  %v10110_v9 = vld [vmem:[#allocation5 + $0xa0] sm:$0xff] }
  0x2d   :  { %2221 = vmatpush.bf16.msrb.mxu2 %v10113_v58  ;;  %1255 = vmatmul.bf16.vlgmr.msra.gmra.mxu3 %v1039_v37  ;;  %v10571_v50 = vunpack.c.l.b16 %v587_v35  ;;  %v773_v60 = vor.u32 %v772_v29, %v769_v24  ;;  %v10573_v40 = vunpack.c.l.b16 %v597_v47  ;;  %v788_v41 = vrot.slane %v786_v31, 5  ;;  %v149_v30 = vld [vmem:[#allocation2 + $0xf8] sm:$0x1]  ;;  %v103_v31 = vld [vmem:[#allocation2 + $0x150] sm:$0xf] }
  0x2e   :  { %2776 = vmatpush.bf16.msrb.mxu3 %v10153_v2  ;;  %1135 = vmatmul.bf16.vlgmr.msra.gmra.mxu0 %v1015_v8  ;;  %v193_v42 = vrot.slane %v191_v39, 4  ;;  %v194_v43 = vshll.u32 %v53_v19, 16  ;;  %v783_v37 = vor.u32 %v782_v0, %v778_v36  ;;  %v200_v45 = vshll.u32 %v54_v38, 16 }
  0x2f   :  { %1536 = vmatpush.bf16.msrb.mxu1 %v10097_v20  ;;  %4066 = vmatpush.bf16.msrb.mxu0 %v10161_v21  ;;  %v774_v26 = vrot.slane %v773_v60, 4  ;;  %v204_v46 = vshrl.u32 %v54_v38, 16  ;;  %v1032_v51 = vpack.c.b16 %v10573_v40, %v10571_v50  ;;  %v210_v53 = vshll.u32 %v132_v1, 16  ;;  %v88_v21 = vld [vmem:[#allocation2 + $0xf4] sm:$0xf] }
  0x30   :  { %v196_v52 = vrot.slane %v194_v43, 5  ;;  %v407_v55 = vshrl.u32 %v71_v11, 16  ;;  %v784_v57 = vrot.slane %v783_v37, 4  ;;  %v202_v58 = vrot.slane %v200_v45, 5  ;;  %v157_v37 = vld [vmem:[#allocation2 + $0x158] sm:$0x1] }
  0x31   :  { %2222 = vmatpush.bf16.msrb.mxu2 %v10112_v32  ;;  %v779_v56 = vsel %vm10507_vm2, %v774_v26, %v778_v36  ;;  %v206_v59 = vrot.slane %v204_v46, 4  ;;  %v212_v2 = vrot.slane %v210_v53, 5  ;;  %v410_v10 = vshll.u32 %v71_v11, 16 }
  0x32   :  { %2777 = vmatpush.bf16.msrb.mxu3 %v10152_v33  ;;  %v1001_v62 = vunpack.c.l.b16 %v779_v56  ;;  %v197_v63 = vor.u32 %v196_v52, %v193_v42  ;;  %v409_v3 = vrot.slane %v407_v55, 4  ;;  %v789_v7 = vsel %vm10507_vm2, %v784_v57, %v788_v41  ;;  %v104_v41 = vld [vmem:[#allocation2 + $0x154] sm:$0xf]  ;;  %v55_v52 = vld [vmem:[#allocation2 + $0x18] sm:$0xf] }
  0x33   :  { %1537 = vmatpush.bf16.msrb.mxu1 %v10096_v44  ;;  %4067 = vmatpush.bf16.msrb.mxu0 %v10160_v16  ;;  %v207_v8 = vor.u32 %v206_v59, %v202_v58  ;;  %v416_v12 = vshll.u32 %v72_v54, 16  ;;  %v1002_v13 = vunpack.c.l.b16 %v789_v7  ;;  %v420_v15 = vshrl.u32 %v72_v54, 16  ;;  %v133_v7 = vld [vmem:[#allocation2 + $0x20] sm:$0x1] }
  0x34   :  { %v198_v14 = vrot.slane %v197_v63, 4  ;;  %v426_v17 = vshll.u32 %v141_v61, 16  ;;  %v412_v19 = vrot.slane %v410_v10, 5  ;;  %v599_v23 = vshrl.u32 %v87_v4, 16  ;;  %v73_v10 = vld [vmem:[#allocation2 + $0x84] sm:$0xf] }
  0x35   :  { %2223 = vmatpush.bf16.msrb.mxu2 %v10111_v48  ;;  %v208_v18 = vrot.slane %v207_v8, 4  ;;  %v418_v20 = vrot.slane %v416_v12, 5  ;;  %v1040_v24 = vpack.c.b16 %v1002_v13, %v1001_v62  ;;  %v422_v28 = vrot.slane %v420_v15, 4 }
  0x36   :  { %2778 = vmatpush.bf16.msrb.mxu3 %v10151_v49  ;;  %v203_v27 = vsel %vm10507_vm2, %v198_v14, %v202_v58  ;;  %v428_v29 = vrot.slane %v426_v17, 5  ;;  %v413_v35 = vor.u32 %v412_v19, %v409_v3  ;;  %v601_v36 = vrot.slane %v599_v23, 4  ;;  %v56_v3 = vld [vmem:[#allocation2 + $0x1c] sm:$0xf]  ;;  %v10094_v23 = vld [vmem:[#allocation5 + $0x20] sm:$0xff] }
  0x37   :  { %1538 = vmatpush.bf16.msrb.mxu1 %v10095_v5  ;;  %4068 = vmatpush.bf16.msrb.mxu0 %v10159_v6  ;;  %v213_v32 = vsel %vm10507_vm2, %v208_v18, %v212_v2  ;;  %v953_v33 = vunpack.c.l.b16 %v203_v27  ;;  %v423_v39 = vor.u32 %v422_v28, %v418_v20  ;;  %v602_v47 = vshll.u32 %v87_v4, 16 }
  0x38   :  { %v954_v38 = vunpack.c.l.b16 %v213_v32  ;;  %v608_v60 = vshll.u32 %v88_v21, 16  ;;  %v414_v0 = vrot.slane %v413_v35, 4  ;;  %v612_v1 = vshrl.u32 %v88_v21, 16  ;;  %v10150_v21 = vld [vmem:[#allocation5 + $0xe0] sm:$0xff] }
  0x39   :  { %v618_v11 = vshll.u32 %v149_v30, 16  ;;  %v791_v42 = vshrl.u32 %v103_v31, 16  ;;  %v424_v44 = vrot.slane %v423_v39, 4  ;;  %v604_v16 = vrot.slane %v602_v47, 5  ;;  %2224 = vmatpush.bf16.msrb.mxu2 %v10110_v9 }
  0x3a   :  { %v1016_v43 = vpack.c.b16 %v954_v38, %v953_v33  ;;  %v610_v26 = vrot.slane %v608_v60, 5  ;;  %v419_v45 = vsel %vm10507_vm2, %v414_v0, %v418_v20  ;;  %v614_v46 = vrot.slane %v612_v1, 4  ;;  %v142_v38 = vld [vmem:[#allocation2 + $0x8c] sm:$0x1]  ;;  %2779 = vmatpush.bf16.msrb.mxu3 %v10150_v21  ;;  %v89_v1 = vld [vmem:[#allocation2 + $0xfc] sm:$0xf] }
  0x3b   :  { %v620_v48 = vrot.slane %v618_v11, 5  ;;  %v793_v49 = vrot.slane %v791_v42, 4  ;;  %v429_v53 = vsel %vm10507_vm2, %v424_v44, %v428_v29  ;;  %v10595_v54 = vunpack.c.l.b16 %v419_v45  ;;  %1539 = vmatpush.bf16.msrb.mxu1 %v10094_v23  ;;  %v90_v45 = vld [vmem:[#allocation2 + $0x100] sm:$0xf] }
  0x3c   :  { %1180 = vmatmul.bf16.gmra.mxu1 %v1024_v34  ;;  %1220 = vmatmul.bf16.gmra.mxu2 %v1032_v51  ;;  %v605_v55 = vor.u32 %v604_v16, %v601_v36  ;;  %v794_v56 = vshll.u32 %v103_v31, 16  ;;  %v10597_v57 = vunpack.c.l.b16 %v429_v53  ;;  %v615_v58 = vor.u32 %v614_v46, %v610_v26  ;;  %v74_v36 = vld [vmem:[#allocation2 + $0x88] sm:$0xf] }
  0x3d   :  { %1260 = vmatmul.bf16.gmra.mxu3 %v1040_v24  ;;  %v800_v59 = vshll.u32 %v104_v41, 16  ;;  %v804_v61 = vshrl.u32 %v104_v41, 16  ;;  %v810_v62 = vshll.u32 %v157_v37, 16  ;;  %v215_v50 = vshrl.u32 %v55_v52, 16  ;;  %v10158_v24 = vld [vmem:[#allocation5 + $0x120] sm:$0xff] }
  0x3e   :  { %1140 = vmatmul.bf16.gmra.mxu0 %v1016_v43  ;;  %v606_v22 = vrot.slane %v605_v55, 4  ;;  %v796_v34 = vrot.slane %v794_v56, 5  ;;  %v1025_v40 = vpack.c.b16 %v10597_v57, %v10595_v54  ;;  %v616_v51 = vrot.slane %v615_v58, 4  ;;  %v57_v54 = vld [vmem:[#allocation2 + $0x24] sm:$0xf] }
  0x3f   :  { %v802_v63 = vrot.slane %v800_v59, 5  ;;  %v806_v2 = vrot.slane %v804_v61, 4  ;;  %v812_v6 = vrot.slane %v810_v62, 5  ;;  %v217_v8 = vrot.slane %v215_v50, 4  ;;  %4069 = vmatpush.bf16.msrb.mxu0 %v10158_v24  ;;  %v105_v61 = vld [vmem:[#allocation2 + $0x15c] sm:$0xf] }
  0x40   :  { %v611_v4 = vsel %vm10507_vm2, %v606_v22, %v610_v26  ;;  %v797_v5 = vor.u32 %v796_v34, %v793_v49  ;;  %v621_v12 = vsel %vm10507_vm2, %v616_v51, %v620_v48  ;;  %v218_v15 = vshll.u32 %v55_v52, 16  ;;  %v150_v52 = vld [vmem:[#allocation2 + $0x104] sm:$0x1] }
  0x41   :  { %v987_v13 = vunpack.c.l.b16 %v611_v4  ;;  %v807_v14 = vor.u32 %v806_v2, %v802_v63  ;;  %v988_v17 = vunpack.c.l.b16 %v621_v12  ;;  %v224_v19 = vshll.u32 %v56_v3, 16 }
  0x42   :  { %v798_v18 = vrot.slane %v797_v5, 4  ;;  %v228_v20 = vshrl.u32 %v56_v3, 16  ;;  %v220_v28 = vrot.slane %v218_v15, 5  ;;  %v234_v29 = vshll.u32 %v133_v7, 16 }
  0x43   :  { %v808_v27 = vrot.slane %v807_v14, 4  ;;  %v431_v30 = vshrl.u32 %v73_v10, 16  ;;  %v1033_v31 = vpack.c.b16 %v988_v17, %v987_v13  ;;  %v226_v33 = vrot.slane %v224_v19, 5  ;;  %v158_v14 = vld [vmem:[#allocation2 + $0x164] sm:$0x1] }
  0x44   :  { %v803_v32 = vsel %vm10507_vm2, %v798_v18, %v802_v63  ;;  %v230_v35 = vrot.slane %v228_v20, 4  ;;  %v221_v60 = vor.u32 %v220_v28, %v217_v8  ;;  %v236_v0 = vrot.slane %v234_v29, 5  ;;  %v10109_v29 = vld [vmem:[#allocation5 + $0x98] sm:$0xff] }
  0x45   :  { %v813_v39 = vsel %vm10507_vm2, %v808_v27, %v812_v6  ;;  %v1003_v47 = vunpack.c.l.b16 %v803_v32  ;;  %v433_v42 = vrot.slane %v431_v30, 4  ;;  %v434_v43 = vshll.u32 %v73_v10, 16  ;;  %v106_v6 = vld [vmem:[#allocation2 + $0x160] sm:$0xf]  ;;  %2225 = vmatpush.bf16.msrb.mxu2 %v10109_v29 }
  0x46   :  { %v1004_v11 = vunpack.c.l.b16 %v813_v39  ;;  %v231_v41 = vor.u32 %v230_v35, %v226_v33  ;;  %v222_v44 = vrot.slane %v221_v60, 4  ;;  %v440_v16 = vshll.u32 %v74_v36, 16 }
  0x47   :  { %v444_v26 = vshrl.u32 %v74_v36, 16  ;;  %v450_v37 = vshll.u32 %v142_v38, 16  ;;  %v436_v49 = vrot.slane %v434_v43, 5  ;;  %v623_v53 = vshrl.u32 %v89_v1, 16 }
  0x48   :  { %v1041_v46 = vpack.c.b16 %v1004_v11, %v1003_v47  ;;  %v232_v48 = vrot.slane %v231_v41, 4  ;;  %v227_v55 = vsel %vm10507_vm2, %v222_v44, %v226_v33  ;;  %v442_v56 = vrot.slane %v440_v16, 5  ;;  %v58_v47 = vld [vmem:[#allocation2 + $0x28] sm:$0xf]  ;;  %v134_v11 = vld [vmem:[#allocation2 + $0x2c] sm:$0x1] }
  0x49   :  { %v446_v58 = vrot.slane %v444_v26, 4  ;;  %v452_v59 = vrot.slane %v450_v37, 5  ;;  %v955_v22 = vunpack.c.l.b16 %v227_v55  ;;  %v437_v34 = vor.u32 %v436_v49, %v433_v42  ;;  %v75_v42 = vld [vmem:[#allocation2 + $0x90] sm:$0xf]  ;;  %v10149_v49 = vld [vmem:[#allocation5 + $0xd8] sm:$0xff] }
  0x4a   :  { %v237_v9 = vsel %vm10507_vm2, %v232_v48, %v236_v0  ;;  %v625_v62 = vrot.slane %v623_v53, 4  ;;  %v626_v63 = vshll.u32 %v89_v1, 16  ;;  %v632_v2 = vshll.u32 %v90_v45, 16  ;;  %v10157_v53 = vld [vmem:[#allocation5 + $0x118] sm:$0xff]  ;;  %2780 = vmatpush.bf16.msrb.mxu3 %v10149_v49 }
  0x4b   :  { %v956_v50 = vunpack.c.l.b16 %v237_v9  ;;  %v447_v51 = vor.u32 %v446_v58, %v442_v56  ;;  %v438_v3 = vrot.slane %v437_v34, 4  ;;  %v636_v4 = vshrl.u32 %v90_v45, 16  ;;  %4070 = vmatpush.bf16.msrb.mxu0 %v10157_v53 }
  0x4c   :  { %1185 = vmatmul.bf16.gmra.mxu1 %v1025_v40  ;;  %1225 = vmatmul.bf16.gmra.mxu2 %v1033_v31  ;;  %v642_v5 = vshll.u32 %v150_v52, 16  ;;  %v815_v7 = vshrl.u32 %v105_v61, 16  ;;  %v628_v12 = vrot.slane %v626_v63, 5  ;;  %v634_v13 = vrot.slane %v632_v2, 5  ;;  %v10093_v52 = vld [vmem:[#allocation5 + $0x18] sm:$0xff] }
  0x4d   :  { %1265 = vmatmul.bf16.gmra.mxu3 %v1041_v46  ;;  %v1017_v8 = vpack.c.b16 %v956_v50, %v955_v22  ;;  %v448_v10 = vrot.slane %v447_v51, 4  ;;  %v443_v15 = vsel %vm10507_vm2, %v438_v3, %v442_v56  ;;  %v638_v17 = vrot.slane %v636_v4, 4  ;;  %v143_v50 = vld [vmem:[#allocation2 + $0x98] sm:$0x1]  ;;  %1540 = vmatpush.bf16.msrb.mxu1 %v10093_v52  ;;  %v91_v4 = vld [vmem:[#allocation2 + $0x108] sm:$0xf] }
  0x4e   :  { %v644_v18 = vrot.slane %v642_v5, 5  ;;  %v817_v19 = vrot.slane %v815_v7, 4  ;;  %v10620_v40 = vunpack.c.l.b16 %v443_v15  ;;  %v629_v20 = vor.u32 %v628_v12, %v625_v62  ;;  %v76_v62 = vld [vmem:[#allocation2 + $0x94] sm:$0xf]  ;;  %v92_v15 = vld [vmem:[#allocation2 + $0x10c] sm:$0xf] }
  0x4f   :  { %1145 = vmatmul.bf16.gmra.mxu0 %v1017_v8  ;;  %v453_v57 = vsel %vm10507_vm2, %v448_v10, %v452_v59  ;;  %v818_v21 = vshll.u32 %v105_v61, 16  ;;  %v639_v24 = vor.u32 %v638_v17, %v634_v13  ;;  %v824_v27 = vshll.u32 %v106_v6, 16 }
  0x50   :  { %v10622_v23 = vunpack.c.l.b16 %v453_v57  ;;  %v828_v28 = vshrl.u32 %v106_v6, 16  ;;  %v630_v30 = vrot.slane %v629_v20, 4  ;;  %v834_v32 = vshll.u32 %v158_v14, 16 }
  0x51   :  { %v820_v31 = vrot.slane %v818_v21, 5  ;;  %v239_v33 = vshrl.u32 %v57_v54, 16  ;;  %v640_v36 = vrot.slane %v639_v24, 4  ;;  %v826_v38 = vrot.slane %v824_v27, 5  ;;  %v107_v24 = vld [vmem:[#allocation2 + $0x168] sm:$0xf] }
  0x52   :  { %v1026_v35 = vpack.c.b16 %v10622_v23, %v10620_v40  ;;  %v830_v39 = vrot.slane %v828_v28, 4  ;;  %v635_v60 = vsel %vm10507_vm2, %v630_v30, %v634_v13  ;;  %v836_v1 = vrot.slane %v834_v32, 5 }
  0x53   :  { %v821_v0 = vor.u32 %v820_v31, %v817_v19  ;;  %v241_v41 = vrot.slane %v239_v33, 4  ;;  %v645_v43 = vsel %vm10507_vm2, %v640_v36, %v644_v18  ;;  %v989_v44 = vunpack.c.l.b16 %v635_v60 }
  0x54   :  { %v831_v16 = vor.u32 %v830_v39, %v826_v38  ;;  %v242_v26 = vshll.u32 %v57_v54, 16  ;;  %v990_v37 = vunpack.c.l.b16 %v645_v43  ;;  %v248_v46 = vshll.u32 %v58_v47, 16  ;;  %v151_v54 = vld [vmem:[#allocation2 + $0x110] sm:$0x1] }
  0x55   :  { %v822_v45 = vrot.slane %v821_v0, 4  ;;  %v252_v48 = vshrl.u32 %v58_v47, 16  ;;  %v258_v58 = vshll.u32 %v134_v11, 16  ;;  %v455_v59 = vshrl.u32 %v75_v42, 16  ;;  %v108_v47 = vld [vmem:[#allocation2 + $0x16c] sm:$0xf] }
  0x56   :  { %v832_v55 = vrot.slane %v831_v16, 4  ;;  %v244_v56 = vrot.slane %v242_v26, 5  ;;  %v1034_v61 = vpack.c.b16 %v990_v37, %v989_v44  ;;  %v250_v22 = vrot.slane %v248_v46, 5  ;;  %v59_v37 = vld [vmem:[#allocation2 + $0x30] sm:$0xf] }
  0x57   :  { %v827_v9 = vsel %vm10507_vm2, %v822_v45, %v826_v38  ;;  %v254_v34 = vrot.slane %v252_v48, 4  ;;  %v260_v3 = vrot.slane %v258_v58, 5  ;;  %v457_v7 = vrot.slane %v455_v59, 4  ;;  %v10108_v58 = vld [vmem:[#allocation5 + $0x90] sm:$0xff] }
  0x58   :  { %v837_v51 = vsel %vm10507_vm2, %v832_v55, %v836_v1  ;;  %v1005_v63 = vunpack.c.l.b16 %v827_v9  ;;  %v245_v2 = vor.u32 %v244_v56, %v241_v41  ;;  %v458_v8 = vshll.u32 %v75_v42, 16  ;;  %v159_v42 = vld [vmem:[#allocation2 + $0x170] sm:$0x1]  ;;  %2226 = vmatpush.bf16.msrb.mxu2 %v10108_v58 }
  0x59   :  { %v1006_v5 = vunpack.c.l.b16 %v837_v51  ;;  %v255_v6 = vor.u32 %v254_v34, %v250_v22  ;;  %v464_v12 = vshll.u32 %v76_v62, 16  ;;  %v468_v13 = vshrl.u32 %v76_v62, 16 }
  0x5a   :  { %v246_v10 = vrot.slane %v245_v2, 4  ;;  %v474_v14 = vshll.u32 %v143_v50, 16  ;;  %v460_v19 = vrot.slane %v458_v8, 5  ;;  %v647_v57 = vshrl.u32 %v91_v4, 16 }
  0x5b   :  { %v1042_v17 = vpack.c.b16 %v1006_v5, %v1005_v63  ;;  %v256_v18 = vrot.slane %v255_v6, 4  ;;  %v466_v20 = vrot.slane %v464_v12, 5  ;;  %v470_v21 = vrot.slane %v468_v13, 4  ;;  %v60_v63 = vld [vmem:[#allocation2 + $0x34] sm:$0xf] }
  0x5c   :  { %1190 = vmatmul.bf16.gmra.mxu1 %v1026_v35  ;;  %1230 = vmatmul.bf16.gmra.mxu2 %v1034_v61  ;;  %v251_v40 = vsel %vm10507_vm2, %v246_v10, %v250_v22  ;;  %v476_v23 = vrot.slane %v474_v14, 5  ;;  %v461_v29 = vor.u32 %v460_v19, %v457_v7  ;;  %v649_v30 = vrot.slane %v647_v57, 4  ;;  %v135_v5 = vld [vmem:[#allocation2 + $0x38] sm:$0x1]  ;;  %v77_v7 = vld [vmem:[#allocation2 + $0x9c] sm:$0xf] }
  0x5d   :  { %1270 = vmatmul.bf16.gmra.mxu3 %v1042_v17  ;;  %v261_v27 = vsel %vm10507_vm2, %v256_v18, %v260_v3  ;;  %v957_v28 = vunpack.c.l.b16 %v251_v40  ;;  %v471_v32 = vor.u32 %v470_v21, %v466_v20  ;;  %v650_v33 = vshll.u32 %v91_v4, 16  ;;  %v10148_v19 = vld [vmem:[#allocation5 + $0xd0] sm:$0xff] }
  0x5e   :  { %v958_v31 = vunpack.c.l.b16 %v261_v27  ;;  %v656_v36 = vshll.u32 %v92_v15, 16  ;;  %v462_v35 = vrot.slane %v461_v29, 4  ;;  %v660_v38 = vshrl.u32 %v92_v15, 16  ;;  %v10156_v57 = vld [vmem:[#allocation5 + $0x110] sm:$0xff]  ;;  %2781 = vmatpush.bf16.msrb.mxu3 %v10148_v19 }
  0x5f   :  { %v666_v39 = vshll.u32 %v151_v54, 16  ;;  %v839_v60 = vshrl.u32 %v107_v24, 16  ;;  %v472_v1 = vrot.slane %v471_v32, 4  ;;  %v652_v11 = vrot.slane %v650_v33, 5  ;;  %v10092_v54 = vld [vmem:[#allocation5 + $0x10] sm:$0xff]  ;;  %4071 = vmatpush.bf16.msrb.mxu0 %v10156_v57 }
  0x60   :  { %v1018_v0 = vpack.c.b16 %v958_v31, %v957_v28  ;;  %v658_v41 = vrot.slane %v656_v36, 5  ;;  %v467_v43 = vsel %vm10507_vm2, %v462_v35, %v466_v20  ;;  %v662_v44 = vrot.slane %v660_v38, 4  ;;  %v144_v31 = vld [vmem:[#allocation2 + $0xa4] sm:$0x1]  ;;  %1541 = vmatpush.bf16.msrb.mxu1 %v10092_v54  ;;  %v93_v38 = vld [vmem:[#allocation2 + $0x114] sm:$0xf] }
  0x61   :  { %v668_v16 = vrot.slane %v666_v39, 5  ;;  %v841_v26 = vrot.slane %v839_v60, 4  ;;  %v477_v45 = vsel %vm10507_vm2, %v472_v1, %v476_v23  ;;  %v975_v46 = vunpack.c.l.b16 %v467_v43  ;;  %v94_v43 = vld [vmem:[#allocation2 + $0x118] sm:$0xf] }
  0x62   :  { %1150 = vmatmul.bf16.gmra.mxu0 %v1018_v0  ;;  %v653_v48 = vor.u32 %v652_v11, %v649_v30  ;;  %v842_v49 = vshll.u32 %v107_v24, 16  ;;  %v976_v52 = vunpack.c.l.b16 %v477_v45  ;;  %v663_v53 = vor.u32 %v662_v44, %v658_v41  ;;  %v78_v30 = vld [vmem:[#allocation2 + $0xa0] sm:$0xf] }
  0x63   :  { %v848_v55 = vshll.u32 %v108_v47, 16  ;;  %v852_v56 = vshrl.u32 %v108_v47, 16  ;;  %v858_v9 = vshll.u32 %v159_v42, 16  ;;  %v263_v22 = vshrl.u32 %v59_v37, 16 }
  0x64   :  { %v654_v59 = vrot.slane %v653_v48, 4  ;;  %v844_v61 = vrot.slane %v842_v49, 5  ;;  %v1027_v34 = vpack.c.b16 %v976_v52, %v975_v46  ;;  %v664_v62 = vrot.slane %v663_v53, 4  ;;  %v109_v53 = vld [vmem:[#allocation2 + $0x174] sm:$0xf] }
  0x65   :  { %v850_v50 = vrot.slane %v848_v55, 5  ;;  %v854_v51 = vrot.slane %v852_v56, 4  ;;  %v860_v4 = vrot.slane %v858_v9, 5  ;;  %v265_v6 = vrot.slane %v263_v22, 4 }
  0x66   :  { %v659_v2 = vsel %vm10507_vm2, %v654_v59, %v658_v41  ;;  %v845_v3 = vor.u32 %v844_v61, %v841_v26  ;;  %v669_v8 = vsel %vm10507_vm2, %v664_v62, %v668_v16  ;;  %v266_v13 = vshll.u32 %v59_v37, 16  ;;  %v152_v37 = vld [vmem:[#allocation2 + $0x11c] sm:$0x1] }
  0x67   :  { %v991_v10 = vunpack.c.l.b16 %v659_v2  ;;  %v855_v12 = vor.u32 %v854_v51, %v850_v50  ;;  %v992_v14 = vunpack.c.l.b16 %v669_v8  ;;  %v272_v17 = vshll.u32 %v60_v63, 16 }
  0x68   :  { %v846_v15 = vrot.slane %v845_v3, 4  ;;  %v276_v18 = vshrl.u32 %v60_v63, 16  ;;  %v268_v20 = vrot.slane %v266_v13, 5  ;;  %v282_v21 = vshll.u32 %v135_v5, 16  ;;  %v110_v63 = vld [vmem:[#allocation2 + $0x178] sm:$0xf] }
  0x69   :  { %v856_v40 = vrot.slane %v855_v12, 4  ;;  %v479_v23 = vshrl.u32 %v77_v7, 16  ;;  %v1035_v24 = vpack.c.b16 %v992_v14, %v991_v10  ;;  %v274_v28 = vrot.slane %v272_v17, 5  ;;  %v61_v14 = vld [vmem:[#allocation2 + $0x3c] sm:$0xf] }
  0x6a   :  { %v851_v27 = vsel %vm10507_vm2, %v846_v15, %v850_v50  ;;  %v278_v29 = vrot.slane %v276_v18, 4  ;;  %v269_v36 = vor.u32 %v268_v20, %v265_v6  ;;  %v284_v35 = vrot.slane %v282_v21, 5  ;;  %v10107_v21 = vld [vmem:[#allocation5 + $0x88] sm:$0xff] }
  0x6b   :  { %v861_v32 = vsel %vm10507_vm2, %v856_v40, %v860_v4  ;;  %v1007_v33 = vunpack.c.l.b16 %v851_v27  ;;  %v481_v60 = vrot.slane %v479_v23, 4  ;;  %v482_v0 = vshll.u32 %v77_v7, 16  ;;  %v160_v7 = vld [vmem:[#allocation2 + $0x17c] sm:$0x1]  ;;  %2227 = vmatpush.bf16.msrb.mxu2 %v10107_v21 }
  0x6c   :  { %1195 = vmatmul.bf16.gmra.mxu1 %v1027_v34  ;;  %1235 = vmatmul.bf16.gmra.mxu2 %v1035_v24  ;;  %v1008_v39 = vunpack.c.l.b16 %v861_v32  ;;  %v279_v47 = vor.u32 %v278_v29, %v274_v28  ;;  %v270_v1 = vrot.slane %v269_v36, 4  ;;  %v488_v11 = vshll.u32 %v78_v30, 16 }
  0x6d   :  { %v492_v41 = vshrl.u32 %v78_v30, 16  ;;  %v498_v42 = vshll.u32 %v144_v31, 16  ;;  %v484_v26 = vrot.slane %v482_v0, 5  ;;  %v671_v45 = vshrl.u32 %v93_v38, 16 }
  0x6e   :  { %v1043_v44 = vpack.c.b16 %v1008_v39, %v1007_v33  ;;  %v280_v16 = vrot.slane %v279_v47, 4  ;;  %v275_v46 = vsel %vm10507_vm2, %v270_v1, %v274_v28  ;;  %v490_v48 = vrot.slane %v488_v11, 5  ;;  %v10658_v33 = vld [vmem:[#allocation2 + $0x40] sm:$0xf]  ;;  %v10662_v39 = vld [vmem:[#allocation2 + $0x44] sm:$0x1] }
  0x6f   :  { %v494_v49 = vrot.slane %v492_v41, 4  ;;  %v500_v52 = vrot.slane %v498_v42, 5  ;;  %v959_v56 = vunpack.c.l.b16 %v275_v46  ;;  %v485_v58 = vor.u32 %v484_v26, %v481_v60  ;;  %v79_v60 = vld [vmem:[#allocation2 + $0xa8] sm:$0xf]  ;;  %v10147_v26 = vld [vmem:[#allocation5 + $0xc8] sm:$0xff] }
  0x70   :  { %1275 = vmatmul.bf16.gmra.mxu3 %v1043_v44  ;;  %v285_v55 = vsel %vm10507_vm2, %v280_v16, %v284_v35  ;;  %v673_v59 = vrot.slane %v671_v45, 4  ;;  %v674_v22 = vshll.u32 %v93_v38, 16  ;;  %v680_v34 = vshll.u32 %v94_v43, 16  ;;  %v10155_v45 = vld [vmem:[#allocation5 + $0x108] sm:$0xff] }
  0x71   :  { %v960_v61 = vunpack.c.l.b16 %v285_v55  ;;  %v495_v9 = vor.u32 %v494_v49, %v490_v48  ;;  %v486_v62 = vrot.slane %v485_v58, 4  ;;  %v684_v50 = vshrl.u32 %v94_v43, 16  ;;  %2782 = vmatpush.bf16.msrb.mxu3 %v10147_v26  ;;  %4072 = vmatpush.bf16.msrb.mxu0 %v10155_v45 }
  0x72   :  { %v690_v51 = vshll.u32 %v152_v37, 16  ;;  %v863_v2 = vshrl.u32 %v109_v53, 16  ;;  %v676_v5 = vrot.slane %v674_v22, 5  ;;  %v682_v6 = vrot.slane %v680_v34, 5  ;;  %v10091_v37 = vld [vmem:[#allocation5 + $0x8] sm:$0xff] }
  0x73   :  { %v1019_v3 = vpack.c.b16 %v960_v61, %v959_v56  ;;  %v496_v4 = vrot.slane %v495_v9, 4  ;;  %v491_v8 = vsel %vm10507_vm2, %v486_v62, %v490_v48  ;;  %v686_v10 = vrot.slane %v684_v50, 4  ;;  %v145_v61 = vld [vmem:[#allocation2 + $0xb0] sm:$0x1]  ;;  %1542 = vmatpush.bf16.msrb.mxu1 %v10091_v37  ;;  %v95_v50 = vld [vmem:[#allocation2 + $0x120] sm:$0xf] }
  0x74   :  { %v692_v12 = vrot.slane %v690_v51, 5  ;;  %v865_v13 = vrot.slane %v863_v2, 4  ;;  %v977_v17 = vunpack.c.l.b16 %v491_v8  ;;  %v677_v18 = vor.u32 %v676_v5, %v673_v59  ;;  %v80_v59 = vld [vmem:[#allocation2 + $0xac] sm:$0xf]  ;;  %v96_v8 = vld [vmem:[#allocation2 + $0x124] sm:$0xf] }
  0x75   :  { %1155 = vmatmul.bf16.gmra.mxu0 %v1019_v3  ;;  %v501_v15 = vsel %vm10507_vm2, %v496_v4, %v500_v52  ;;  %v866_v19 = vshll.u32 %v109_v53, 16  ;;  %v687_v57 = vor.u32 %v686_v10, %v682_v6  ;;  %v872_v40 = vshll.u32 %v110_v63, 16 }
  0x76   :  { %v978_v54 = vunpack.c.l.b16 %v501_v15  ;;  %v876_v20 = vshrl.u32 %v110_v63, 16  ;;  %v678_v23 = vrot.slane %v677_v18, 4  ;;  %v882_v27 = vshll.u32 %v160_v7, 16 }
  0x77   :  { %v868_v24 = vrot.slane %v866_v19, 5  ;;  %v287_v28 = vshrl.u32 %v61_v14, 16  ;;  %v688_v30 = vrot.slane %v687_v57, 4  ;;  %v874_v31 = vrot.slane %v872_v40, 5  ;;  %v111_v57 = vld [vmem:[#allocation2 + $0x180] sm:$0xf] }
  0x78   :  { %v1028_v29 = vpack.c.b16 %v978_v54, %v977_v17  ;;  %v878_v32 = vrot.slane %v876_v20, 4  ;;  %v683_v36 = vsel %vm10507_vm2, %v678_v23, %v682_v6  ;;  %v884_v38 = vrot.slane %v882_v27, 5 }
  0x79   :  { %v869_v35 = vor.u32 %v868_v24, %v865_v13  ;;  %v289_v47 = vrot.slane %v287_v28, 4  ;;  %v693_v0 = vsel %vm10507_vm2, %v688_v30, %v692_v12  ;;  %v993_v1 = vunpack.c.l.b16 %v683_v36  ;;  %v112_v36 = vld [vmem:[#allocation2 + $0x184] sm:$0xf] }
  0x7a   :  { %v879_v11 = vor.u32 %v878_v32, %v874_v31  ;;  %v290_v41 = vshll.u32 %v61_v14, 16  ;;  %v994_v42 = vunpack.c.l.b16 %v693_v0  ;;  %v296_v44 = vshll.u32 %v10658_v33, 16  ;;  %v153_v14 = vld [vmem:[#allocation2 + $0x128] sm:$0x1] }
  0x7b   :  { %v870_v43 = vrot.slane %v869_v35, 4  ;;  %v300_v16 = vshrl.u32 %v10658_v33, 16  ;;  %v306_v49 = vshll.u32 %v10662_v39, 16  ;;  %v503_v52 = vshrl.u32 %v79_v60, 16 }
  0x7c   :  { %1200 = vmatmul.bf16.gmra.mxu1 %v1028_v29  ;;  %v880_v46 = vrot.slane %v879_v11, 4  ;;  %v292_v48 = vrot.slane %v290_v41, 5  ;;  %v1036_v53 = vpack.c.b16 %v994_v42, %v993_v1  ;;  %v298_v56 = vrot.slane %v296_v44, 5  ;;  %v161_v1 = vld [vmem:[#allocation2 + $0x188] sm:$0x1] }
  0x7d   :  { %v875_v55 = vsel %vm10507_vm2, %v870_v43, %v874_v31  ;;  %v302_v58 = vrot.slane %v300_v16, 4  ;;  %v308_v62 = vrot.slane %v306_v49, 5  ;;  %v505_v2 = vrot.slane %v503_v52, 4  ;;  %v63_v44 = vld [vmem:[#allocation2 + $0x48] sm:$0xf] }
  0x7e   :  { %v885_v9 = vsel %vm10507_vm2, %v880_v46, %v884_v38  ;;  %v1009_v22 = vunpack.c.l.b16 %v875_v55  ;;  %v293_v34 = vor.u32 %v292_v48, %v289_v47  ;;  %1240 = vmatmul.bf16.gmra.mxu2 %v1036_v53  ;;  %v506_v3 = vshll.u32 %v79_v60, 16  ;;  %v10106_v53 = vld [vmem:[#allocation5 + $0x80] sm:$0xff] }
  0x7f   :  { %v1010_v51 = vunpack.c.l.b16 %v885_v9  ;;  %v303_v63 = vor.u32 %v302_v58, %v298_v56  ;;  %v512_v5 = vshll.u32 %v80_v59, 16  ;;  %v516_v6 = vshrl.u32 %v80_v59, 16  ;;  %2228 = vmatpush.bf16.msrb.mxu2 %v10106_v53 }
  0x80   :  { %v294_v4 = vrot.slane %v293_v34, 4  ;;  %v522_v7 = vshll.u32 %v145_v61, 16  ;;  %v508_v13 = vrot.slane %v506_v3, 5  ;;  %v695_v15 = vshrl.u32 %v95_v50, 16 }
  0x81   :  { %v1044_v10 = vpack.c.b16 %v1010_v51, %v1009_v22  ;;  %v304_v12 = vrot.slane %v303_v63, 4  ;;  %v514_v18 = vrot.slane %v512_v5, 5  ;;  %v518_v19 = vrot.slane %v516_v6, 4 }
  0x82   :  { %v299_v17 = vsel %vm10507_vm2, %v294_v4, %v298_v56  ;;  %v524_v54 = vrot.slane %v522_v7, 5  ;;  %v509_v21 = vor.u32 %v508_v13, %v505_v2  ;;  %v697_v23 = vrot.slane %v695_v15, 4  ;;  %v10685_v2 = vld [vmem:[#allocation2 + $0x50] sm:$0x1]  ;;  %v81_v4 = vld [vmem:[#allocation2 + $0xb4] sm:$0xf] }
  0x83   :  { %1280 = vmatmul.bf16.gmra.mxu3 %v1044_v10  ;;  %v309_v40 = vsel %vm10507_vm2, %v304_v12, %v308_v62  ;;  %v961_v20 = vunpack.c.l.b16 %v299_v17  ;;  %v519_v27 = vor.u32 %v518_v19, %v514_v18  ;;  %v698_v28 = vshll.u32 %v95_v50, 16  ;;  %v10681_v62 = vld [vmem:[#allocation2 + $0x4c] sm:$0xf]  ;;  %v10146_v15 = vld [vmem:[#allocation5 + $0xc0] sm:$0xff] }
  0x84   :  { %v962_v24 = vunpack.c.l.b16 %v309_v40  ;;  %v704_v29 = vshll.u32 %v96_v8, 16  ;;  %v510_v30 = vrot.slane %v509_v21, 4  ;;  %v708_v31 = vshrl.u32 %v96_v8, 16  ;;  %v10090_v17 = vld [vmem:[#allocation5] sm:$0xff]  ;;  %2783 = vmatpush.bf16.msrb.mxu3 %v10146_v15 }
  0x85   :  { %v714_v32 = vshll.u32 %v153_v14, 16  ;;  %v887_v35 = vshrl.u32 %v111_v57, 16  ;;  %v520_v47 = vrot.slane %v519_v27, 4  ;;  %v700_v60 = vrot.slane %v698_v28, 5  ;;  %v82_v27 = vld [vmem:[#allocation2 + $0xb8] sm:$0xf]  ;;  %1543 = vmatpush.bf16.msrb.mxu1 %v10090_v17 }
  0x86   :  { %v1020_v38 = vpack.c.b16 %v962_v24, %v961_v20  ;;  %v706_v0 = vrot.slane %v704_v29, 5  ;;  %v515_v11 = vsel %vm10507_vm2, %v510_v30, %v514_v18  ;;  %v710_v41 = vrot.slane %v708_v31, 4  ;;  %v10154_v18 = vld [vmem:[#allocation5 + $0x100] sm:$0xff]  ;;  %v146_v28 = vld [vmem:[#allocation2 + $0xbc] sm:$0x1] }
  0x87   :  { %v716_v42 = vrot.slane %v714_v32, 5  ;;  %v889_v43 = vrot.slane %v887_v35, 4  ;;  %v525_v16 = vsel %vm10507_vm2, %v520_v47, %v524_v54  ;;  %v979_v26 = vunpack.c.l.b16 %v515_v11  ;;  %4073 = vmatpush.bf16.msrb.mxu0 %v10154_v18  ;;  %v65_v17 = vld [vmem:[#allocation2 + $0x54] sm:$0xf] }
  0x88   :  { %1160 = vmatmul.bf16.gmra.mxu0 %v1020_v38  ;;  %v701_v37 = vor.u32 %v700_v60, %v697_v23  ;;  %v890_v45 = vshll.u32 %v111_v57, 16  ;;  %v980_v46 = vunpack.c.l.b16 %v525_v16  ;;  %v711_v48 = vor.u32 %v710_v41, %v706_v0 }
  0x89   :  { %v896_v49 = vshll.u32 %v112_v36, 16  ;;  %v900_v52 = vshrl.u32 %v112_v36, 16  ;;  %v906_v58 = vshll.u32 %v161_v1, 16  ;;  %v311_v59 = vshrl.u32 %v63_v44, 16  ;;  %v97_v36 = vld [vmem:[#allocation2 + $0x12c] sm:$0xf] }
  0x8a   :  { %v702_v55 = vrot.slane %v701_v37, 4  ;;  %v892_v56 = vrot.slane %v890_v45, 5  ;;  %v1029_v61 = vpack.c.b16 %v980_v46, %v979_v26  ;;  %v712_v9 = vrot.slane %v711_v48, 4  ;;  %v154_v26 = vld [vmem:[#allocation2 + $0x134] sm:$0x1] }
  0x8b   :  { %v898_v22 = vrot.slane %v896_v49, 5  ;;  %v902_v34 = vrot.slane %v900_v52, 4  ;;  %v908_v63 = vrot.slane %v906_v58, 5  ;;  %v313_v3 = vrot.slane %v311_v59, 4  ;;  %v113_v52 = vld [vmem:[#allocation2 + $0x18c] sm:$0xf] }
  0x8c   :  { %v707_v50 = vsel %vm10507_vm2, %v702_v55, %v706_v0  ;;  %v893_v51 = vor.u32 %v892_v56, %v889_v43  ;;  %1205 = vmatmul.bf16.gmra.mxu1 %v1029_v61  ;;  %v717_v5 = vsel %vm10507_vm2, %v712_v9, %v716_v42  ;;  %v314_v8 = vshll.u32 %v63_v44, 16  ;;  %v98_v42 = vld [vmem:[#allocation2 + $0x130] sm:$0xf] }
  0x8d   :  { %v995_v6 = vunpack.c.l.b16 %v707_v50  ;;  %v903_v7 = vor.u32 %v902_v34, %v898_v22  ;;  %v996_v10 = vunpack.c.l.b16 %v717_v5  ;;  %v320_v13 = vshll.u32 %v10681_v62, 16 }
  0x8e   :  { %v894_v12 = vrot.slane %v893_v51, 4  ;;  %v324_v14 = vshrl.u32 %v10681_v62, 16  ;;  %v316_v54 = vrot.slane %v314_v8, 5  ;;  %v330_v57 = vshll.u32 %v10685_v2, 16  ;;  %v162_v8 = vld [vmem:[#allocation2 + $0x194] sm:$0x1] }
  0x8f   :  { %v904_v19 = vrot.slane %v903_v7, 4  ;;  %v527_v40 = vshrl.u32 %v81_v4, 16  ;;  %v1037_v20 = vpack.c.b16 %v996_v10, %v995_v6  ;;  %v322_v23 = vrot.slane %v320_v13, 5  ;;  %v10209_v10 = vld [vmem:[#allocation5 + $0x1b8] sm:$0xff] }
  0x90   :  { %v899_v21 = vsel %vm10507_vm2, %v894_v12, %v898_v22  ;;  %v326_v24 = vrot.slane %v324_v14, 4  ;;  %v317_v31 = vor.u32 %v316_v54, %v313_v3  ;;  %v332_v32 = vrot.slane %v330_v57, 5  ;;  %5399 = vmatpush.bf16.msra.mxu2 %v10209_v10 }
  0x91   :  { %v909_v29 = vsel %vm10507_vm2, %v904_v19, %v908_v63  ;;  %v1011_v30 = vunpack.c.l.b16 %v899_v21  ;;  %1245 = vmatmul.bf16.gmra.mxu2 %v1037_v20  ;;  %v529_v47 = vrot.slane %v527_v40, 4  ;;  %v530_v60 = vshll.u32 %v81_v4, 16  ;;  %v114_v63 = vld [vmem:[#allocation2 + $0x190] sm:$0xf] }
  0x92   :  { %v1012_v35 = vunpack.c.l.b16 %v909_v29  ;;  %v327_v38 = vor.u32 %v326_v24, %v322_v23  ;;  %v318_v0 = vrot.slane %v317_v31, 4  ;;  %v536_v1 = vshll.u32 %v82_v27, 16  ;;  %v10704_v29 = vld [vmem:[#allocation2 + $0x58] sm:$0xf] }
  0x93   :  { %v540_v11 = vshrl.u32 %v82_v27, 16  ;;  %v546_v41 = vshll.u32 %v146_v28, 16  ;;  %v532_v16 = vrot.slane %v530_v60, 5  ;;  %v719_v37 = vshrl.u32 %v97_v36, 16  ;;  %v10225_v60 = vld [vmem:[#allocation5 + $0x238] sm:$0xff] }
  0x94   :  { %v1045_v43 = vpack.c.b16 %v1012_v35, %v1011_v30  ;;  %v328_v44 = vrot.slane %v327_v38, 4  ;;  %v323_v45 = vsel %vm10507_vm2, %v318_v0, %v322_v23  ;;  %v538_v46 = vrot.slane %v536_v1, 5  ;;  %v10217_v38 = vld [vmem:[#allocation5 + $0x1f8] sm:$0xff]  ;;  %7467 = vmatpush.bf16.msra.mxu0 %v10225_v60 }
  0x95   :  { %v542_v48 = vrot.slane %v540_v11, 4  ;;  %v548_v49 = vrot.slane %v546_v41, 5  ;;  %v963_v55 = vunpack.c.l.b16 %v323_v45  ;;  %v533_v56 = vor.u32 %v532_v16, %v529_v47  ;;  %v10169_v47 = vld [vmem:[#allocation5 + $0x178] sm:$0xff]  ;;  %v10708_v41 = vld [vmem:[#allocation2 + $0x5c] sm:$0x1]  ;;  %6689 = vmatpush.bf16.msra.mxu3 %v10217_v38 }
  0x96   :  { %1285 = vmatmul.bf16.gmra.mxu3 %v1045_v43  ;;  %v333_v53 = vsel %vm10507_vm2, %v328_v44, %v332_v32  ;;  %v721_v58 = vrot.slane %v719_v37, 4  ;;  %v722_v9 = vshll.u32 %v97_v36, 16  ;;  %v728_v22 = vshll.u32 %v98_v42, 16  ;;  %4844 = vmatpush.bf16.msra.mxu1 %v10169_v47 }
  0x97   :  { %v964_v59 = vunpack.c.l.b16 %v333_v53  ;;  %v543_v61 = vor.u32 %v542_v48, %v538_v46  ;;  %v534_v34 = vrot.slane %v533_v56, 4  ;;  %v732_v50 = vshrl.u32 %v98_v42, 16 }
  0x98   :  { %v738_v51 = vshll.u32 %v154_v26, 16  ;;  %v911_v3 = vshrl.u32 %v113_v52, 16  ;;  %v724_v6 = vrot.slane %v722_v9, 5  ;;  %v730_v7 = vrot.slane %v728_v22, 5  ;;  %v3009_v9 = vld [vmem:[#allocation2 + $0xc] sm:$0xf] }
  0x99   :  { %v1021_v4 = vpack.c.b16 %v964_v59, %v963_v55  ;;  %v544_v5 = vrot.slane %v543_v61, 4  ;;  %v539_v12 = vsel %vm10507_vm2, %v534_v34, %v538_v46  ;;  %v734_v13 = vrot.slane %v732_v50, 4  ;;  %v1705_v55 = vld [vmem:[#allocation2] sm:$0xe] }
  0x9a   :  { %v740_v14 = vrot.slane %v738_v51, 5  ;;  %v913_v15 = vrot.slane %v911_v3, 4  ;;  %v981_v19 = vunpack.c.l.b16 %v539_v12  ;;  %v725_v54 = vor.u32 %v724_v6, %v721_v58  ;;  %v10262_v12 = vld [vmem:[#allocation2 + $0x8] sm:$0x1] }
  0x9b   :  { %1165 = vmatmul.bf16.gmra.mxu0 %v1021_v4  ;;  %v549_v18 = vsel %vm10507_vm2, %v544_v5, %v548_v49  ;;  %v914_v57 = vshll.u32 %v113_v52, 16  ;;  %v735_v20 = vor.u32 %v734_v13, %v730_v7  ;;  %v920_v21 = vshll.u32 %v114_v63, 16 }
  0x9c   :  { %v982_v40 = vunpack.c.l.b16 %v549_v18  ;;  %v924_v23 = vshrl.u32 %v114_v63, 16  ;;  %v726_v24 = vrot.slane %v725_v54, 4  ;;  %v930_v28 = vshll.u32 %v162_v8, 16  ;;  %v3010_v63 = vld [vmem:[#allocation2 + $0x10] sm:$0xf] }
  0x9d   :  { %v916_v27 = vrot.slane %v914_v57, 5  ;;  %v335_v30 = vshrl.u32 %v65_v17, 16  ;;  %v736_v32 = vrot.slane %v735_v20, 4  ;;  %v922_v36 = vrot.slane %v920_v21, 5  ;;  %v10261_v8 = vld [vmem:[#allocation2 + $0x4] sm:$0xf] }
  0x9e   :  { %v1030_v31 = vpack.c.b16 %v982_v40, %v981_v19  ;;  %v926_v35 = vrot.slane %v924_v23, 4  ;;  %v731_v0 = vsel %vm10507_vm2, %v726_v24, %v730_v7  ;;  %v932_v11 = vrot.slane %v930_v28, 5  ;;  %v3011_v40 = vld [vmem:[#allocation2 + $0x14] sm:$0x1] }
  0x9f   :  { %v917_v1 = vor.u32 %v916_v27, %v913_v15  ;;  %v337_v42 = vrot.slane %v335_v30, 4  ;;  %v741_v43 = vsel %vm10507_vm2, %v736_v32, %v740_v14  ;;  %v997_v44 = vunpack.c.l.b16 %v731_v0  ;;  %v10058_v0 = vld [vmem:[#allocation2] sm:$0xff] }
  0xa0   :  { %1210 = vmatmul.bf16.gmra.mxu1 %v1030_v31  ;;  %v927_v16 = vor.u32 %v926_v35, %v922_v36  ;;  %v338_v26 = vshll.u32 %v65_v17, 16  ;;  %v998_v37 = vunpack.c.l.b16 %v741_v43  ;;  %v344_v46 = vshll.u32 %v10704_v29, 16 }
  0xa1   :  { %v918_v45 = vrot.slane %v917_v1, 4  ;;  %v348_v48 = vshrl.u32 %v10704_v29, 16  ;;  %v354_v53 = vshll.u32 %v10708_v41, 16  ;;  %vm1801_vm3 = vcmask 1042432  }
  0xa2   :  { %v928_v49 = vrot.slane %v927_v16, 4  ;;  %v340_v52 = vrot.slane %v338_v26, 5  ;;  %v1038_v56 = vpack.c.b16 %v998_v37, %v997_v44  ;;  %v346_v59 = vrot.slane %v344_v46, 5  ;;  %v3012_v37 = vld [vmem:[#allocation2 + $0x18] sm:$0xf] }
  0xa3   :  { %v923_v58 = vsel %vm10507_vm2, %v918_v45, %v922_v36  ;;  %v350_v61 = vrot.slane %v348_v48, 4  ;;  %v356_v51 = vrot.slane %v354_v53, 5  ;;  %vm1802_vm4 = vcmask 1046532   ;;  %v3013_v48 = vld [vmem:[#allocation2 + $0x1c] sm:$0xf] }
  0xa4   :  { %v933_v22 = vsel %vm10507_vm2, %v928_v49, %v932_v11  ;;  %v1013_v34 = vunpack.c.l.b16 %v923_v58  ;;  %v341_v50 = vor.u32 %v340_v52, %v337_v42  ;;  %1250 = vmatmul.bf16.gmra.mxu2 %v1038_v56  ;;  %v9482_v5 = vrot.slane %v1705_v55, 9  ;;  %vm10720_vm5 = vmor %vm1801_vm3, %vm1802_vm4  ;;  %v1706_v56 = vld [vmem:[#allocation2 + $0xc] sm:$0xe]  ;;  %v10263_v58 = vld [vmem:[#allocation2 + $0x10] sm:$0xf] }
  0xa5   :  { %v1014_v3 = vunpack.c.l.b16 %v933_v22  ;;  %v351_v4 = vor.u32 %v350_v61, %v346_v59  ;;  %v1806_v10 = vrot.slane %v10261_v8, 5  ;;  %v1809_v13 = vrot.slane %v10262_v12, 5 }
  0xa6   :  { %v342_v6 = vrot.slane %v341_v50, 4  ;;  %v3106_v14 = vshrl.u32 %v3009_v9, 16  ;;  %v3109_v18 = vshll.u32 %v3009_v9, 16  ;;  %v3115_v19 = vshll.u32 %v3010_v63, 16 }
  0xa7   :  { %v1046_v15 = vpack.c.b16 %v1014_v3, %v1013_v34  ;;  %v352_v17 = vrot.slane %v351_v4, 4  ;;  %v1808_v57 = vrot.slane %v1806_v10, 4  ;;  %v1807_v27 = vsel %vm10720_vm5, %v9482_v5, %v1806_v10  ;;  %v10264_v4 = vld [vmem:[#allocation2 + $0x14] sm:$0x1] }
  0xa8   :  { %v347_v54 = vsel %vm10507_vm2, %v342_v6, %v346_v59  ;;  %v3108_v20 = vrot.slane %v3106_v14, 4  ;;  %v3111_v28 = vrot.slane %v3109_v18, 5  ;;  %v3117_v36 = vrot.slane %v3115_v19, 5  ;;  %v3014_v18 = vld [vmem:[#allocation2 + $0x20] sm:$0x1] }
  0xa9   :  { %1290 = vmatmul.bf16.gmra.mxu3 %v1046_v15  ;;  %v357_v21 = vsel %vm10507_vm2, %v352_v17, %v356_v51  ;;  %v965_v23 = vunpack.c.l.b16 %v347_v54  ;;  %v10728_v24 = vpop.f32.mrf.mxu1  ;;  %v1810_v32 = vsel %vm10720_vm5, %v1808_v57, %v1809_v13  ;;  %v3119_v35 = vshrl.u32 %v3010_v63, 16  ;;  %v10114_v51 = vld [vmem:[#allocation2 + $0xc] sm:$0xff] }
  0xaa   :  { %v966_v30 = vunpack.c.l.b16 %v357_v21  ;;  %v3112_v38 = vor.u32 %v3111_v28, %v3108_v20  ;;  %v3125_v47 = vshll.u32 %v3011_v40, 16  ;;  %v2045_v11 = vunpack.c.l.b16 %v1807_v27  ;;  %v10059_v28 = vld [vmem:[#allocation2 + $0xc] sm:$0xff] }
  0xab   :  { %v10732_v31 = vpop.f32.mrf.mxu0  ;;  %v3121_v1 = vrot.slane %v3119_v35, 4  ;;  %v2046_v42 = vunpack.c.l.b16 %v1810_v32  ;;  %v1813_v59 = vrot.slane %v10263_v58, 5  ;;  %v3130_v61 = vshrl.u32 %v3012_v37, 16  ;;  %v3015_v35 = vld [vmem:[#allocation2 + $0x24] sm:$0xf] }
  0xac   :  { %v1022_v60 = vpack.c.b16 %v966_v30, %v965_v23  ;;  %v3113_v43 = vrot.slane %v3112_v38, 4  ;;  %v3127_v16 = vrot.slane %v3125_v47, 5  ;;  %v3133_v9 = vshll.u32 %v3012_v37, 16 }
  0xad   :  { %v3122_v44 = vor.u32 %v3121_v1, %v3117_v36  ;;  %v2109_v49 = vpack.c.b16 %v2046_v42, %v2045_v11  ;;  %v3139_v34 = vshll.u32 %v3013_v48, 16  ;;  %v3143_v50 = vshrl.u32 %v3013_v48, 16 }
  0xae   :  { %1170 = vmatmul.bf16.gmra.mxu0 %v1022_v60  ;;  %v3118_v53 = vsel %vm10507_vm2, %v3113_v43, %v3117_v36  ;;  %v9483_v3 = vrot.slane %v1706_v56, 9  ;;  %v1816_v5 = vrot.slane %v10264_v4, 5  ;;  %v1815_v8 = vrot.slane %v1813_v59, 4  ;;  %v1707_v43 = vld [vmem:[#allocation2 + $0x18] sm:$0xe] }
  0xaf   :  { %v10736_v26 = vpop.f32.mrf.mxu2  ;;  %v3123_v45 = vrot.slane %v3122_v44, 4  ;;  %v3890_v63 = vunpack.c.l.b16 %v3118_v53  ;;  %v3132_v10 = vrot.slane %v3130_v61, 4  ;;  %v3135_v12 = vrot.slane %v3133_v9, 5  ;;  %v10265_v44 = vld [vmem:[#allocation2 + $0x1c] sm:$0xf] }
  0xb0   :  { %1544 = vmatmul.bf16.vlgmr.msrb.gmra.mxu1 %v10058_v0  ;;  %v10738_v46 = vpop.f32.mrf.mxu3  ;;  %v3141_v14 = vrot.slane %v3139_v34, 5  ;;  %v3145_v15 = vrot.slane %v3143_v50, 4  ;;  %v1814_v40 = vsel %vm10720_vm5, %v9483_v3, %v1813_v59  ;;  %v1817_v20 = vsel %vm10720_vm5, %v1815_v8, %v1816_v5  ;;  %v3016_v0 = vld [vmem:[#allocation2 + $0x28] sm:$0xf]  ;;  %v10115_v61 = vld [vmem:[#allocation2 + $0x18] sm:$0xff] }
  0xb1   :  { %14090 = vst [vmem:[#allocation11_spill] sm:$0xff] %v10738_v46  ;;  %v10740_v52 = vpop.f32.mrf.mxu1  ;;  %v3128_v22 = vsel %vm10507_vm2, %v3123_v45, %v3127_v16  ;;  %v3136_v21 = vor.u32 %v3135_v12, %v3132_v10  ;;  %v3149_v27 = vshll.u32 %v3014_v18, 16  ;;  %v2047_v30 = vunpack.c.l.b16 %v1814_v40  ;;  %v10266_v34 = vld [vmem:[#allocation2 + $0x20] sm:$0x1]  ;;  %v3017_v8 = vld [vmem:[#allocation2 + $0x2c] sm:$0x1] }
  0xb2   :  { %v3891_v6 = vunpack.c.l.b16 %v3128_v22  ;;  %v3146_v23 = vor.u32 %v3145_v15, %v3141_v14  ;;  %v2048_v32 = vunpack.c.l.b16 %v1817_v20  ;;  %v1820_v16 = vrot.slane %v10265_v44, 5 }
  0xb3   :  { %v10744_v55 = vpop.f32.mrf.mxu0  ;;  %v3137_v36 = vrot.slane %v3136_v21, 4  ;;  %v3151_v47 = vrot.slane %v3149_v27, 5  ;;  %v3154_v37 = vshrl.u32 %v3015_v35, 16  ;;  %v3163_v53 = vshll.u32 %v3016_v0, 16 }
  0xb4   :  { %2229 = vmatmul.bf16.vlgmr.msrb.gmra.mxu2 %v2109_v49  ;;  %v3954_v54 = vpack.c.b16 %v3891_v6, %v3890_v63  ;;  %v3147_v38 = vrot.slane %v3146_v23, 4  ;;  %v2110_v11 = vpack.c.b16 %v2048_v32, %v2047_v30  ;;  %v3157_v49 = vshll.u32 %v3015_v35, 16  ;;  %v10060_v23 = vld [vmem:[#allocation2 + $0x18] sm:$0xff] }
  0xb5   :  { %v3142_v45 = vsel %vm10507_vm2, %v3137_v36, %v3141_v14  ;;  %v3167_v56 = vshrl.u32 %v3016_v0, 16  ;;  %v9484_v59 = vrot.slane %v1707_v43, 9  ;;  %v1822_v22 = vrot.slane %v1820_v16, 4  ;;  %v3019_v0 = vld [vmem:[#allocation2 + $0x34] sm:$0xf] }
  0xb6   :  { %v3152_v58 = vsel %vm10507_vm2, %v3147_v38, %v3151_v47  ;;  %v3892_v9 = vunpack.c.l.b16 %v3142_v45  ;;  %v1823_v50 = vrot.slane %v10266_v34, 5  ;;  %v3159_v3 = vrot.slane %v3157_v49, 5  ;;  %v3018_v47 = vld [vmem:[#allocation2 + $0x30] sm:$0xf]  ;;  %v1708_v49 = vld [vmem:[#allocation2 + $0x24] sm:$0xe] }
  0xb7   :  { %v10748_v13 = vpop.f32.mrf.mxu2  ;;  %v3893_v63 = vunpack.c.l.b16 %v3152_v58  ;;  %v3165_v4 = vrot.slane %v3163_v53, 5  ;;  %v3169_v5 = vrot.slane %v3167_v56, 4  ;;  %v1821_v14 = vsel %vm10720_vm5, %v9484_v59, %v1820_v16 }
  0xb8   :  { %14091 = vst [vmem:[#allocation12_spill] sm:$0xff] %v10748_v13  ;;  %v10750_v17 = vpop.f32.mrf.mxu3  ;;  %v1824_v15 = vsel %vm10720_vm5, %v1822_v22, %v1823_v50  ;;  %v3173_v20 = vshll.u32 %v3017_v8, 16  ;;  %v2049_v27 = vunpack.c.l.b16 %v1821_v14  ;;  %v3178_v53 = vshrl.u32 %v3018_v47, 16 }
  0xb9   :  { %14092 = vst [vmem:[#allocation13_spill] sm:$0xff] %v10750_v17  ;;  %2784 = vmatmul.bf16.vlgmr.msrb.gmra.mxu3 %v10114_v51  ;;  %v10752_v19 = vpop.f32.mrf.mxu1  ;;  %v3156_v51 = vrot.slane %v3154_v37, 4  ;;  %v3955_v18 = vpack.c.b16 %v3893_v63, %v3892_v9  ;;  %v3170_v40 = vor.u32 %v3169_v5, %v3165_v4  ;;  %v10267_v37 = vld [vmem:[#allocation2 + $0x28] sm:$0xf]  ;;  %v3181_v56 = vshll.u32 %v3018_v47, 16 }
  0xba   :  { %v3175_v36 = vrot.slane %v3173_v20, 5  ;;  %v1827_v45 = vrot.slane %v10267_v37, 5  ;;  %v3187_v58 = vshll.u32 %v3019_v0, 16  ;;  %v3191_v59 = vshrl.u32 %v3019_v0, 16  ;;  %v10268_v63 = vld [vmem:[#allocation2 + $0x2c] sm:$0x1] }
  0xbb   :  { %v10754_v57 = vpop.f32.mrf.mxu0  ;;  %v3171_v32 = vrot.slane %v3170_v40, 4  ;;  %v9485_v50 = vrot.slane %v1708_v49, 9  ;;  %v3180_v5 = vrot.slane %v3178_v53, 4  ;;  %v3183_v8 = vrot.slane %v3181_v56, 5  ;;  %v10208_v20 = vld [vmem:[#allocation5 + $0x1b0] sm:$0xff] }
  0xbc   :  { %v3189_v14 = vrot.slane %v3187_v58, 5  ;;  %5400 = vmatpush.bf16.msra.mxu2 %v10208_v20  ;;  %v10061_v47 = vld [vmem:[#allocation2 + $0x24] sm:$0xff]  ;;  %v1858_v46 = vrot.slane %v10708_v41, 5  ;;  %vm8206_vm6 = vcmask 1040384   ;;  %vm8207_vm7 = vsmask.f32 256 }
  0xbd   :  { %v3176_v16 = vsel %vm10507_vm2, %v3171_v32, %v3175_v36  ;;  %v10168_v37 = vld [vmem:[#allocation5 + $0x170] sm:$0xff]  ;;  %vm11523_vm8 = vmand %vm8206_vm6, %vm8207_vm7  ;;  %vm8305_vm9 = vcmask 1043456   ;;  %vm8306_vm10 = vsmask.f32 7938  ;;  %vm8404_vm0 = vsmask.f32 4368 }
  0xbe   :  { %4074 = vmatmul.bf16.vlgmr.msrb.gmra.mxu0 %v3954_v54  ;;  %v3160_v54 = vor.u32 %v3159_v3, %v3156_v51  ;;  %v3895_v34 = vunpack.c.l.b16 %v3176_v16  ;;  %v1829_v51 = vrot.slane %v1827_v45, 4  ;;  %v1830_v3 = vrot.slane %v10268_v63, 5  ;;  %v10216_v16 = vld [vmem:[#allocation5 + $0x1f0] sm:$0xff]  ;;  %4845 = vmatpush.bf16.msra.mxu1 %v10168_v37  ;;  %vm11535_vm11 = vmand %vm8305_vm9, %vm8306_vm10 }
  0xbf   :  { %v10760_v60 = vpop.f32.mrf.mxu2  ;;  %v10224_v49 = vld [vmem:[#allocation5 + $0x230] sm:$0xff]  ;;  %6690 = vmatpush.bf16.msra.mxu3 %v10216_v16  ;;  %vm12876_vm1 = vmor %vm8207_vm7, %vm8404_vm0 }
  0xc0   :  { %14093 = vst [vmem:[#allocation14_spill] sm:$0xff] %v10760_v60  ;;  %1549 = vmatmul.bf16.gmra.mxu1 %v10059_v28  ;;  %v10762_v1 = vpop.f32.mrf.mxu3  ;;  %v2050_v28 = vunpack.c.l.b16 %v1824_v15  ;;  %v3161_v30 = vrot.slane %v3160_v54, 4  ;;  %v3193_v15 = vrot.slane %v3191_v59, 4  ;;  %v3020_v54 = vld [vmem:[#allocation2 + $0x38] sm:$0x1]  ;;  %7468 = vmatpush.bf16.msra.mxu0 %v10224_v49 }
  0xc1   :  { %14094 = vst [vmem:[#allocation15_spill] sm:$0xff] %v10762_v1  ;;  %v10764_v42 = vpop.f32.mrf.mxu1  ;;  %v3197_v36 = vshll.u32 %v3020_v54, 16  ;;  %v3029_v1 = vld [vmem:[#allocation2 + $0x5c] sm:$0x1] }
  0xc2   :  { %v3166_v44 = vsel %vm10507_vm2, %v3161_v30, %v3165_v4  ;;  %v3184_v30 = vor.u32 %v3183_v8, %v3180_v5  ;;  %v3194_v32 = vor.u32 %v3193_v15, %v3189_v14  ;;  %v1709_v8 = vld [vmem:[#allocation2 + $0x30] sm:$0xe] }
  0xc3   :  { %v10768_v48 = vpop.f32.mrf.mxu0  ;;  %v3894_v9 = vunpack.c.l.b16 %v3166_v44  ;;  %v3021_v44 = vld [vmem:[#allocation2 + $0x3c] sm:$0xf] }
  0xc4   :  { %2234 = vmatmul.bf16.gmra.mxu2 %v2110_v11  ;;  %v2111_v11 = vpack.c.b16 %v2050_v28, %v2049_v27  ;;  %v1828_v27 = vsel %vm10720_vm5, %v9485_v50, %v1827_v45  ;;  %v1831_v28 = vsel %vm10720_vm5, %v1829_v51, %v1830_v3  ;;  %v3185_v56 = vrot.slane %v3184_v30, 4  ;;  %v10269_v51 = vld [vmem:[#allocation2 + $0x34] sm:$0xf] }
  0xc5   :  { %v2051_v0 = vunpack.c.l.b16 %v1828_v27  ;;  %v3195_v58 = vrot.slane %v3194_v32, 4  ;;  %v3199_v45 = vrot.slane %v3197_v36, 5  ;;  %v1834_v63 = vrot.slane %v10269_v51, 5  ;;  %v10270_v27 = vld [vmem:[#allocation2 + $0x38] sm:$0x1]  ;;  %v10117_v30 = vld [vmem:[#allocation2 + $0x30] sm:$0xff] }
  0xc6   :  { %v3202_v3 = vshrl.u32 %v3021_v44, 16  ;;  %v3205_v5 = vshll.u32 %v3021_v44, 16  ;;  %v3190_v20 = vsel %vm10507_vm2, %v3185_v56, %v3189_v14  ;;  %v9486_v32 = vrot.slane %v1709_v8, 9 }
  0xc7   :  { %v10772_v6 = vpop.f32.mrf.mxu2  ;;  %v1836_v36 = vrot.slane %v1834_v63, 4 }
  0xc8   :  { %14095 = vst [vmem:[#allocation16_spill] sm:$0xff] %v10772_v6  ;;  %v10774_v10 = vpop.f32.mrf.mxu3 }
  0xc9   :  { %14096 = vst [vmem:[#allocation17_spill] sm:$0xff] %v10774_v10  ;;  %2789 = vmatmul.bf16.gmra.mxu3 %v10115_v61  ;;  %v10776_v12 = vpop.f32.mrf.mxu1  ;;  %v10116_v61 = vld [vmem:[#allocation2 + $0x24] sm:$0xff] }
  0xcc   :  { %v10782_v21 = vpop.f32.mrf.mxu0 }
  0xce   :  { %4079 = vmatmul.bf16.gmra.mxu0 %v3955_v18 }
  0xcf   :  { %v10784_v35 = vpop.f32.mrf.mxu2 }
  0xd0   :  { %14097 = vst [vmem:[#allocation18_spill] sm:$0xff] %v10784_v35  ;;  %1554 = vmatmul.bf16.gmra.mxu1 %v10060_v23  ;;  %v10786_v38 = vpop.f32.mrf.mxu3  ;;  %v3956_v23 = vpack.c.b16 %v3895_v34, %v3894_v9 }
  0xd1   :  { %14098 = vst [vmem:[#allocation19_spill] sm:$0xff] %v10786_v38  ;;  %v10788_v43 = vpop.f32.mrf.mxu1  ;;  %v3026_v38 = vld [vmem:[#allocation2 + $0x50] sm:$0x1] }
  0xd4   :  { %2239 = vmatmul.bf16.gmra.mxu2 %v2111_v11  ;;  %v10794_v22 = vpop.f32.mrf.mxu0  ;;  %v2052_v11 = vunpack.c.l.b16 %v1831_v28  ;;  %v1837_v28 = vrot.slane %v10270_v27, 5 }
  0xd6   :  { %v2112_v34 = vpack.c.b16 %v2052_v11, %v2051_v0  ;;  %v3207_v0 = vrot.slane %v3205_v5, 5  ;;  %v3896_v11 = vunpack.c.l.b16 %v3190_v20 }
  0xd7   :  { %v10796_v4 = vpop.f32.mrf.mxu2 }
  0xd8   :  { %14099 = vst [vmem:[#allocation20_spill] sm:$0xff] %v10796_v4  ;;  %v10798_v18 = vpop.f32.mrf.mxu3  ;;  %v10274_v4 = vld [vmem:[#allocation2 + $0x74] sm:$0x1] }
  0xd9   :  { %14100 = vst [vmem:[#allocation21_spill] sm:$0xff] %v10798_v18  ;;  %2794 = vmatmul.bf16.gmra.mxu3 %v10116_v61  ;;  %v10800_v40 = vpop.f32.mrf.mxu1  ;;  %v3022_v61 = vld [vmem:[#allocation2 + $0x40] sm:$0xf] }
  0xda   :  { %v3211_v15 = vshll.u32 %v3022_v61, 16  ;;  %v3215_v54 = vshrl.u32 %v3022_v61, 16  ;;  %v3023_v61 = vld [vmem:[#allocation2 + $0x44] sm:$0x1] }
  0xdb   :  { %v3221_v8 = vshll.u32 %v3023_v61, 16 }
  0xdc   :  { %v3213_v16 = vrot.slane %v3211_v15, 5  ;;  %v3217_v37 = vrot.slane %v3215_v54, 4  ;;  %v10062_v15 = vld [vmem:[#allocation2 + $0x30] sm:$0xff] }
  0xde   :  { %4084 = vmatmul.bf16.gmra.mxu0 %v3956_v23  ;;  %v3200_v23 = vsel %vm10507_vm2, %v3195_v58, %v3199_v45  ;;  %v1835_v58 = vsel %vm10720_vm5, %v9486_v32, %v1834_v63  ;;  %v1838_v45 = vsel %vm10720_vm5, %v1836_v36, %v1837_v28  ;;  %v3218_v5 = vor.u32 %v3217_v37, %v3213_v16 }
  0xdf   :  { %v10806_v53 = vpop.f32.mrf.mxu0  ;;  %v10808_v59 = vpop.f32.mrf.mxu2  ;;  %v3897_v44 = vunpack.c.l.b16 %v3200_v23  ;;  %v2053_v54 = vunpack.c.l.b16 %v1835_v58  ;;  %v2054_v20 = vunpack.c.l.b16 %v1838_v45  ;;  %v1841_v37 = vrot.slane %v10658_v33, 5  ;;  %v1710_v45 = vld [vmem:[#allocation2 + $0x3c] sm:$0xe] }
  0xe0   :  { %14101 = vst [vmem:[#allocation22_spill] sm:$0xff] %v10808_v59  ;;  %1559 = vmatmul.bf16.gmra.mxu1 %v10061_v47  ;;  %v10810_v9 = vpop.f32.mrf.mxu3  ;;  %v3204_v47 = vrot.slane %v3202_v3, 4  ;;  %v3219_v27 = vrot.slane %v3218_v5, 4 }
  0xe1   :  { %14102 = vst [vmem:[#allocation23_spill] sm:$0xff] %v10810_v9  ;;  %v10812_v50 = vpop.f32.mrf.mxu1  ;;  %v3957_v3 = vpack.c.b16 %v3897_v44, %v3896_v11  ;;  %v3025_v9 = vld [vmem:[#allocation2 + $0x4c] sm:$0xf]  ;;  %v2113_v63 = vpack.c.b16 %v2054_v20, %v2053_v54  ;;  %v1843_v54 = vrot.slane %v1841_v37, 4  ;;  %v1844_v20 = vrot.slane %v10662_v39, 5 }
  0xe2   :  { %v3239_v61 = vshrl.u32 %v3025_v9, 16 }
  0xe4   :  { %2244 = vmatmul.bf16.gmra.mxu2 %v2112_v34  ;;  %v3208_v34 = vor.u32 %v3207_v0, %v3204_v47  ;;  %v3235_v0 = vshll.u32 %v3025_v9, 16 }
  0xe6   :  { %v3209_v23 = vrot.slane %v3208_v34, 4 }
  0xe7   :  { %v10818_v49 = vpop.f32.mrf.mxu2  ;;  %v10820_v51 = vpop.f32.mrf.mxu0 }
  0xe8   :  { %14103 = vst [vmem:[#allocation24_spill] sm:$0xff] %v10818_v49  ;;  %v10822_v14 = vpop.f32.mrf.mxu3  ;;  %v3214_v28 = vsel %vm10507_vm2, %v3209_v23, %v3213_v16  ;;  %v3241_v23 = vrot.slane %v3239_v61, 4 }
  0xe9   :  { %2799 = vmatmul.bf16.gmra.mxu3 %v10117_v30  ;;  %14104 = vst [vmem:[#allocation25_spill] sm:$0xff] %v10822_v14  ;;  %v10824_v56 = vpop.f32.mrf.mxu1  ;;  %v3223_v30 = vrot.slane %v3221_v8, 5  ;;  %v3024_v14 = vld [vmem:[#allocation2 + $0x48] sm:$0xf]  ;;  %v3898_v34 = vunpack.c.l.b16 %v3214_v28  ;;  %v1845_v28 = vsel %vm10720_vm5, %v1843_v54, %v1844_v20 }
  0xea   :  { %v3226_v36 = vshrl.u32 %v3024_v14, 16  ;;  %v3229_v47 = vshll.u32 %v3024_v14, 16  ;;  %v9487_v14 = vrot.slane %v1710_v45, 9  ;;  %v2056_v45 = vunpack.c.l.b16 %v1845_v28  ;;  %v1711_v28 = vld [vmem:[#allocation2 + $0x48] sm:$0xe] }
  0xeb   :  { %v3224_v44 = vsel %vm10507_vm2, %v3219_v27, %v3223_v30 }
  0xec   :  { %v3899_v16 = vunpack.c.l.b16 %v3224_v44  ;;  %v3228_v5 = vrot.slane %v3226_v36, 4  ;;  %v3231_v8 = vrot.slane %v3229_v47, 5  ;;  %v3245_v47 = vshll.u32 %v3026_v38, 16  ;;  %v10063_v44 = vld [vmem:[#allocation2 + $0x3c] sm:$0xff] }
  0xee   :  { %4089 = vmatmul.bf16.gmra.mxu0 %v3957_v3  ;;  %v10118_v3 = vld [vmem:[#allocation2 + $0x3c] sm:$0xff]  ;;  %v3958_v33 = vpack.c.b16 %v3899_v16, %v3898_v34  ;;  %v3232_v30 = vor.u32 %v3231_v8, %v3228_v5  ;;  %v3247_v5 = vrot.slane %v3245_v47, 5  ;;  %v3028_v8 = vld [vmem:[#allocation2 + $0x58] sm:$0xf] }
  0xef   :  { %v10830_v18 = vpop.f32.mrf.mxu2  ;;  %v3259_v38 = vshll.u32 %v3028_v8, 16 }
  0xf0   :  { %14105 = vst [vmem:[#allocation26_spill] sm:$0xff] %v10830_v18  ;;  %1564 = vmatmul.bf16.gmra.mxu1 %v10062_v15  ;;  %v3237_v15 = vrot.slane %v3235_v0, 5  ;;  %v3233_v34 = vrot.slane %v3232_v30, 4  ;;  %v3263_v30 = vshrl.u32 %v3028_v8, 16 }
  0xf1   :  { %v10834_v32 = vpop.f32.mrf.mxu1 }
  0xf2   :  { %v10836_v11 = vpop.f32.mrf.mxu0  ;;  %v3242_v36 = vor.u32 %v3241_v23, %v3237_v15  ;;  %v3238_v20 = vsel %vm10507_vm2, %v3233_v34, %v3237_v15  ;;  %v9488_v15 = vrot.slane %v1711_v28, 9  ;;  %v10064_v28 = vld [vmem:[#allocation2 + $0x48] sm:$0xff] }
  0xf3   :  { %v10841_v58 = vpop.f32.mrf.mxu3 }
  0xf4   :  { %14106 = vst [vmem:[#allocation27_spill] sm:$0xff] %v10841_v58  ;;  %2249 = vmatmul.bf16.gmra.mxu2 %v2113_v63  ;;  %v1842_v63 = vsel %vm10720_vm5, %v9487_v14, %v1841_v37  ;;  %v3243_v16 = vrot.slane %v3242_v36, 4 }
  0xf5   :  { %v2055_v61 = vunpack.c.l.b16 %v1842_v63 }
  0xf6   :  { %v3248_v23 = vsel %vm10507_vm2, %v3243_v16, %v3247_v5  ;;  %v1851_v16 = vrot.slane %v10685_v2, 5  ;;  %v3265_v5 = vrot.slane %v3263_v30, 4 }
  0xf7   :  { %v10844_v27 = vpop.f32.mrf.mxu2  ;;  %v2114_v58 = vpack.c.b16 %v2056_v45, %v2055_v61  ;;  %v10119_v61 = vld [vmem:[#allocation2 + $0x48] sm:$0xff]  ;;  %v3900_v45 = vunpack.c.l.b16 %v3238_v20  ;;  %v3269_v20 = vshll.u32 %v3029_v1, 16 }
  0xf8   :  { %14107 = vst [vmem:[#allocation28_spill] sm:$0xff] %v10844_v27 }
  0xf9   :  { %2804 = vmatmul.bf16.gmra.mxu3 %v10118_v3  ;;  %v10846_v9 = vpop.f32.mrf.mxu1  ;;  %v3027_v3 = vld [vmem:[#allocation2 + $0x54] sm:$0xf] }
  0xfa   :  { %v10852_v0 = vpop.f32.mrf.mxu0  ;;  %v3250_v37 = vshrl.u32 %v3027_v3, 16  ;;  %v3253_v14 = vshll.u32 %v3027_v3, 16  ;;  %v3901_v3 = vunpack.c.l.b16 %v3248_v23 }
  0xfb   :  { %v10854_v39 = vpop.f32.mrf.mxu3 }
  0xfc   :  { %14108 = vst [vmem:[#allocation29_spill] sm:$0xff] %v10854_v39  ;;  %v3252_v36 = vrot.slane %v3250_v37, 4  ;;  %v3255_v47 = vrot.slane %v3253_v14, 5  ;;  %v3261_v39 = vrot.slane %v3259_v38, 5  ;;  %v3959_v8 = vpack.c.b16 %v3901_v3, %v3900_v45  ;;  %v3030_v45 = vld [vmem:[#allocation2 + $0x60] sm:$0xf] }
  0xfd   :  { %v3031_v3 = vld [vmem:[#allocation2 + $0x64] sm:$0xf] }
  0xfe   :  { %4094 = vmatmul.bf16.gmra.mxu0 %v3958_v33  ;;  %v1848_v33 = vrot.slane %v10681_v62, 5  ;;  %v3256_v62 = vor.u32 %v3255_v47, %v3252_v36  ;;  %v3266_v38 = vor.u32 %v3265_v5, %v3261_v39 }
 0x100   :  { %1569 = vmatmul.bf16.gmra.mxu1 %v10063_v44  ;;  %v1850_v34 = vrot.slane %v1848_v33, 4  ;;  %v3267_v47 = vrot.slane %v3266_v38, 4 }
 0x101   :  { %v10856_v54 = vpop.f32.mrf.mxu1  ;;  %v10862_v63 = vpop.f32.mrf.mxu2 }
 0x102   :  { %14109 = vst [vmem:[#allocation30_spill] sm:$0xff] %v10862_v63  ;;  %v1852_v14 = vsel %vm10720_vm5, %v1850_v34, %v1851_v16  ;;  %v3277_v34 = vshll.u32 %v3030_v45, 16  ;;  %v3283_v16 = vshll.u32 %v3031_v3, 16 }
 0x103   :  { %v2058_v30 = vunpack.c.l.b16 %v1852_v14  ;;  %v1712_v14 = vld [vmem:[#allocation2 + $0x54] sm:$0xe] }
 0x104   :  { %2254 = vmatmul.bf16.gmra.mxu2 %v2114_v58  ;;  %v1849_v58 = vsel %vm10720_vm5, %v9488_v15, %v1848_v33  ;;  %v3274_v15 = vshrl.u32 %v3030_v45, 16 }
 0x105   :  { %v10865_v44 = vpop.f32.mrf.mxu0  ;;  %v2057_v2 = vunpack.c.l.b16 %v1849_v58 }
 0x106   :  { %v10867_v10 = vpop.f32.mrf.mxu3 }
 0x107   :  { %14110 = vst [vmem:[#allocation31_spill] sm:$0xff] %v10867_v10  ;;  %v3257_v10 = vrot.slane %v3256_v62, 4  ;;  %v2115_v1 = vpack.c.b16 %v2058_v30, %v2057_v2  ;;  %v1855_v62 = vrot.slane %v10704_v29, 5  ;;  %v3285_v2 = vrot.slane %v3283_v16, 5 }
 0x108   :  { %v9489_v30 = vrot.slane %v1712_v14, 9  ;;  %v10065_v14 = vld [vmem:[#allocation2 + $0x54] sm:$0xff] }
 0x109   :  { %2809 = vmatmul.bf16.gmra.mxu3 %v10119_v61  ;;  %v10870_v37 = vpop.f32.mrf.mxu1  ;;  %v10876_v23 = vpop.f32.mrf.mxu2  ;;  %v3271_v61 = vrot.slane %v3269_v20, 5  ;;  %v3262_v33 = vsel %vm10507_vm2, %v3257_v10, %v3261_v39  ;;  %v10120_v20 = vld [vmem:[#allocation2 + $0x54] sm:$0xff]  ;;  %v3276_v10 = vrot.slane %v3274_v15, 4  ;;  %v3279_v39 = vrot.slane %v3277_v34, 5 }
 0x10a   :  { %14111 = vst [vmem:[#allocation32_spill] sm:$0xff] %v10876_v23  ;;  %v3902_v38 = vunpack.c.l.b16 %v3262_v33  ;;  %v1857_v45 = vrot.slane %v1855_v62, 4 }
 0x10b   :  { %v3272_v5 = vsel %vm10507_vm2, %v3267_v47, %v3271_v61  ;;  %v3032_v61 = vld [vmem:[#allocation2 + $0x68] sm:$0x1]  ;;  %v3280_v33 = vor.u32 %v3279_v39, %v3276_v10  ;;  %v10215_v39 = vld [vmem:[#allocation5 + $0x1e8] sm:$0xff] }
 0x10c   :  { %v1859_v15 = vsel %vm10720_vm5, %v1857_v45, %v1858_v46  ;;  %v3293_v16 = vshll.u32 %v3032_v61, 16  ;;  %6691 = vmatpush.bf16.msra.mxu3 %v10215_v39 }
 0x10d   :  { %v10878_v36 = vpop.f32.mrf.mxu0  ;;  %v3281_v63 = vrot.slane %v3280_v33, 4 }
 0x10e   :  { %4099 = vmatmul.bf16.gmra.mxu0 %v3959_v8  ;;  %v10880_v17 = vpop.f32.mrf.mxu3  ;;  %v3287_v8 = vshrl.u32 %v3031_v3, 16  ;;  %v3295_v10 = vrot.slane %v3293_v16, 5 }
 0x10f   :  { %14112 = vst [vmem:[#allocation33_spill] sm:$0xff] %v10880_v17 }
 0x110   :  { %1574 = vmatmul.bf16.gmra.mxu1 %v10064_v28  ;;  %v3903_v28 = vunpack.c.l.b16 %v3272_v5  ;;  %v3289_v47 = vrot.slane %v3287_v8, 4  ;;  %v10207_v5 = vld [vmem:[#allocation5 + $0x1a8] sm:$0xff] }
 0x111   :  { %v10887_v58 = vpop.f32.mrf.mxu1  ;;  %5401 = vmatpush.bf16.msra.mxu2 %v10207_v5 }
 0x112   :  { %v3960_v3 = vpack.c.b16 %v3903_v28, %v3902_v38  ;;  %v3290_v34 = vor.u32 %v3289_v47, %v3285_v2  ;;  %v3033_v38 = vld [vmem:[#allocation2 + $0x6c] sm:$0xf] }
 0x113   :  { %v3298_v46 = vshrl.u32 %v3033_v38, 16  ;;  %v3301_v45 = vshll.u32 %v3033_v38, 16 }
 0x114   :  { %2259 = vmatmul.bf16.gmra.mxu2 %v2115_v1  ;;  %v10889_v17 = vpop.f32.mrf.mxu2  ;;  %v1856_v1 = vsel %vm10720_vm5, %v9489_v30, %v1855_v62  ;;  %v3291_v28 = vrot.slane %v3290_v34, 4  ;;  %v3034_v62 = vld [vmem:[#allocation2 + $0x70] sm:$0xf]  ;;  %v10167_v30 = vld [vmem:[#allocation5 + $0x168] sm:$0xff]  ;;  %v10271_v34 = vld [vmem:[#allocation2 + $0x64] sm:$0xf] }
 0x115   :  { %14113 = vst [vmem:[#allocation34_spill] sm:$0xff] %v10889_v17  ;;  %v2059_v8 = vunpack.c.l.b16 %v1856_v1  ;;  %v2060_v17 = vunpack.c.l.b16 %v1859_v15  ;;  %v3307_v1 = vshll.u32 %v3034_v62, 16  ;;  %4846 = vmatpush.bf16.msra.mxu1 %v10167_v30  ;;  %v1862_v16 = vrot.slane %v10271_v34, 5 }
 0x116   :  { %v3296_v15 = vsel %vm10507_vm2, %v3291_v28, %v3295_v10  ;;  %v3311_v5 = vshrl.u32 %v3034_v62, 16  ;;  %v3300_v38 = vrot.slane %v3298_v46, 4  ;;  %v3303_v39 = vrot.slane %v3301_v45, 5  ;;  %v3035_v10 = vld [vmem:[#allocation2 + $0x74] sm:$0x1] }
 0x117   :  { %v2116_v61 = vpack.c.b16 %v2060_v17, %v2059_v8  ;;  %v3905_v8 = vunpack.c.l.b16 %v3296_v15 }
 0x118   :  { %v10892_v29 = vpop.f32.mrf.mxu0  ;;  %v3313_v28 = vrot.slane %v3311_v5, 4  ;;  %v3304_v62 = vor.u32 %v3303_v39, %v3300_v38  ;;  %v3036_v39 = vld [vmem:[#allocation2 + $0x78] sm:$0xf] }
 0x119   :  { %2814 = vmatmul.bf16.gmra.mxu3 %v10120_v20  ;;  %v10894_v23 = vpop.f32.mrf.mxu3 }
 0x11a   :  { %14114 = vst [vmem:[#allocation35_spill] sm:$0xff] %v10894_v23  ;;  %v10223_v23 = vld [vmem:[#allocation5 + $0x228] sm:$0xff]  ;;  %v3305_v5 = vrot.slane %v3304_v62, 4  ;;  %v10273_v62 = vld [vmem:[#allocation2 + $0x70] sm:$0xf] }
 0x11b   :  { %7469 = vmatpush.bf16.msra.mxu0 %v10223_v23 }
 0x11c   :  { %v10902_v20 = vpop.f32.mrf.mxu2 }
 0x11d   :  { %v10900_v41 = vpop.f32.mrf.mxu1  ;;  %14115 = vst [vmem:[#allocation36_spill] sm:$0xff] %v10902_v20  ;;  %v10121_v20 = vld [vmem:[#allocation2 + $0x60] sm:$0xff] }
 0x11e   :  { %4104 = vmatmul.bf16.gmra.mxu0 %v3960_v3  ;;  %v3286_v3 = vsel %vm10507_vm2, %v3281_v63, %v3285_v2  ;;  %v1864_v63 = vrot.slane %v1862_v16, 4  ;;  %v10272_v2 = vld [vmem:[#allocation2 + $0x68] sm:$0x1] }
 0x11f   :  { %v3904_v17 = vunpack.c.l.b16 %v3286_v3  ;;  %v1865_v18 = vrot.slane %v10272_v2, 5 }
 0x120   :  { %1579 = vmatmul.bf16.gmra.mxu1 %v10065_v14  ;;  %v10904_v47 = vpop.f32.mrf.mxu0  ;;  %v1713_v14 = vld [vmem:[#allocation2 + $0x60] sm:$0xe] }
 0x121   :  { %v10906_v33 = vpop.f32.mrf.mxu3  ;;  %v9490_v27 = vrot.slane %v1713_v14, 9  ;;  %v3961_v46 = vpack.c.b16 %v3905_v8, %v3904_v17  ;;  %v10066_v14 = vld [vmem:[#allocation2 + $0x60] sm:$0xff]  ;;  %v3037_v17 = vld [vmem:[#allocation2 + $0x7c] sm:$0xf]  ;;  %v3322_v8 = vshrl.u32 %v3036_v39, 16 }
 0x122   :  { %14116 = vst [vmem:[#allocation37_spill] sm:$0xff] %v10906_v33  ;;  %v3309_v33 = vrot.slane %v3307_v1, 5  ;;  %v3317_v1 = vshll.u32 %v3035_v10, 16 }
 0x123   :  { %v1863_v45 = vsel %vm10720_vm5, %v9490_v27, %v1862_v16 }
 0x124   :  { %2264 = vmatmul.bf16.gmra.mxu2 %v2116_v61  ;;  %v1866_v61 = vsel %vm10720_vm5, %v1864_v63, %v1865_v18  ;;  %v3314_v3 = vor.u32 %v3313_v28, %v3309_v33  ;;  %v2061_v49 = vunpack.c.l.b16 %v1863_v45  ;;  %v3319_v38 = vrot.slane %v3317_v1, 5 }
 0x125   :  { %v10912_v30 = vpop.f32.mrf.mxu1  ;;  %v3310_v18 = vsel %vm10507_vm2, %v3305_v5, %v3309_v33  ;;  %v3325_v63 = vshll.u32 %v3036_v39, 16  ;;  %v3331_v28 = vshll.u32 %v3037_v17, 16  ;;  %v1869_v45 = vrot.slane %v10273_v62, 5  ;;  %v3038_v62 = vld [vmem:[#allocation2 + $0x80] sm:$0x1] }
 0x127   :  { %v10914_v34 = vpop.f32.mrf.mxu2  ;;  %v3333_v5 = vrot.slane %v3331_v28, 5  ;;  %v1871_v59 = vrot.slane %v1869_v45, 4  ;;  %v3341_v28 = vshll.u32 %v3038_v62, 16  ;;  %v10275_v62 = vld [vmem:[#allocation2 + $0x7c] sm:$0xf] }
 0x128   :  { %14117 = vst [vmem:[#allocation38_spill] sm:$0xff] %v10914_v34  ;;  %v2062_v34 = vunpack.c.l.b16 %v1866_v61 }
 0x129   :  { %2819 = vmatmul.bf16.gmra.mxu3 %v10121_v20  ;;  %v3315_v20 = vrot.slane %v3314_v3, 4  ;;  %v1714_v3 = vld [vmem:[#allocation2 + $0x6c] sm:$0xe] }
 0x12a   :  { %v2117_v16 = vpack.c.b16 %v2062_v34, %v2061_v49  ;;  %v3324_v49 = vrot.slane %v3322_v8, 4  ;;  %v3327_v34 = vrot.slane %v3325_v63, 5  ;;  %v9491_v39 = vrot.slane %v1714_v3, 9 }
 0x12b   :  { %v10920_v23 = vpop.f32.mrf.mxu0  ;;  %v3320_v10 = vsel %vm10507_vm2, %v3315_v20, %v3319_v38  ;;  %v1872_v20 = vrot.slane %v10274_v4, 5  ;;  %v10067_v4 = vld [vmem:[#allocation2 + $0x6c] sm:$0xff] }
 0x12c   :  { %v10922_v15 = vpop.f32.mrf.mxu3 }
 0x12d   :  { %14118 = vst [vmem:[#allocation39_spill] sm:$0xff] %v10922_v15  ;;  %v1545_v2 = vpop.f32.mrf.mxu1  ;;  %v3906_v15 = vunpack.c.l.b16 %v3310_v18  ;;  %v3328_v18 = vor.u32 %v3327_v34, %v3324_v49  ;;  %v1873_v8 = vsel %vm10720_vm5, %v1871_v59, %v1872_v20 }
 0x12e   :  { %4109 = vmatmul.bf16.gmra.mxu0 %v3961_v46  ;;  %v3335_v46 = vshrl.u32 %v3037_v17, 16  ;;  %v1546_v17 = vadd.f32 %v1545_v2, %v10732_v31  ;;  %v2064_v13 = vunpack.c.l.b16 %v1873_v8  ;;  %v1715_v8 = vld [vmem:[#allocation2 + $0x78] sm:$0xe] }
 0x12f   :  { %v10924_v27 = vpop.f32.mrf.mxu2 }
 0x130   :  { %14119 = vst [vmem:[#allocation40_spill] sm:$0xff] %v10924_v27  ;;  %1584 = vmatmul.bf16.gmra.mxu1 %v10066_v14  ;;  %v10122_v14 = vld [vmem:[#allocation2 + $0x6c] sm:$0xff]  ;;  %v3907_v27 = vunpack.c.l.b16 %v3320_v10  ;;  %v3337_v38 = vrot.slane %v3335_v46, 4  ;;  %v3039_v46 = vld [vmem:[#allocation2 + $0x84] sm:$0xf] }
 0x131   :  { %v3346_v49 = vshrl.u32 %v3039_v46, 16  ;;  %v3349_v34 = vshll.u32 %v3039_v46, 16 }
 0x132   :  { %v3962_v6 = vpack.c.b16 %v3907_v27, %v3906_v15  ;;  %v3338_v63 = vor.u32 %v3337_v38, %v3333_v5  ;;  %v3343_v27 = vrot.slane %v3341_v28, 5 }
 0x133   :  { %v10930_v61 = vpop.f32.mrf.mxu0 }
 0x134   :  { %v10932_v1 = vpop.f32.mrf.mxu3  ;;  %2269 = vmatmul.bf16.gmra.mxu2 %v2117_v16  ;;  %v1870_v16 = vsel %vm10720_vm5, %v9491_v39, %v1869_v45  ;;  %v3339_v15 = vrot.slane %v3338_v63, 4 }
 0x135   :  { %14120 = vst [vmem:[#allocation41_spill] sm:$0xff] %v10932_v1  ;;  %v1547_v33 = vpop.f32.mrf.mxu1  ;;  %v2063_v2 = vunpack.c.l.b16 %v1870_v16  ;;  %v1876_v16 = vrot.slane %v10275_v62, 5 }
 0x136   :  { %v1548_v45 = vadd.f32 %v1547_v33, %v10744_v55  ;;  %v3344_v55 = vsel %vm10507_vm2, %v3339_v15, %v3343_v27  ;;  %v3348_v33 = vrot.slane %v3346_v49, 4 }
 0x137   :  { %v2230_v35 = vpop.f32.mrf.mxu2 }
 0x138   :  { %v2390_v1 = vadd.f32 %v2230_v35, %v1546_v17  ;;  %v3329_v35 = vrot.slane %v3328_v18, 4  ;;  %v3351_v18 = vrot.slane %v3349_v34, 5 }
 0x139   :  { %2824 = vmatmul.bf16.gmra.mxu3 %v10122_v14  ;;  %v3040_v14 = vld [vmem:[#allocation2 + $0x88] sm:$0xf] }
 0x13a   :  { %v3355_v20 = vshll.u32 %v3040_v14, 16  ;;  %v3359_v38 = vshrl.u32 %v3040_v14, 16  ;;  %v10276_v14 = vld [vmem:[#allocation2 + $0x80] sm:$0x1] }
 0x13b   :  { %v4075_v10 = vpop.f32.mrf.mxu0 }
 0x13c   :  { %v2785_v3 = vpop.f32.mrf.mxu3  ;;  %v3357_v63 = vrot.slane %v3355_v20, 5  ;;  %v3361_v28 = vrot.slane %v3359_v38, 4 }
 0x13d   :  { %v2945_v60 = vadd.f32 %v2785_v3, %v2390_v1  ;;  %v1550_v31 = vpop.f32.mrf.mxu1  ;;  %v2118_v1 = vpack.c.b16 %v2064_v13, %v2063_v2  ;;  %v9492_v13 = vrot.slane %v1715_v8, 9  ;;  %v1878_v2 = vrot.slane %v1876_v16, 4 }
 0x13e   :  { %4114 = vmatmul.bf16.gmra.mxu0 %v3962_v6  ;;  %v3334_v6 = vsel %vm10507_vm2, %v3329_v35, %v3333_v5  ;;  %v1551_v5 = vadd.f32 %v1550_v31, %v10754_v57  ;;  %v3352_v35 = vor.u32 %v3351_v18, %v3348_v33  ;;  %v3362_v49 = vor.u32 %v3361_v28, %v3357_v63 }
 0x13f   :  { %v10940_v59 = vadd.f32 %v4075_v10, %v2945_v60  ;;  %v2232_v39 = vpop.f32.mrf.mxu2  ;;  %v3908_v62 = vunpack.c.l.b16 %v3334_v6  ;;  %v1877_v38 = vsel %vm10720_vm5, %v9492_v13, %v1876_v16 }
 0x140   :  { %1589 = vmatmul.bf16.gmra.mxu1 %v10067_v4  ;;  %v2391_v17 = vadd.f32 %v2232_v39, %v1548_v45  ;;  %v10123_v4 = vld [vmem:[#allocation2 + $0x78] sm:$0xff]  ;;  %v1879_v45 = vrot.slane %v10276_v14, 5  ;;  %v3041_v39 = vld [vmem:[#allocation2 + $0x8c] sm:$0x1]  ;;  %v3353_v6 = vrot.slane %v3352_v35, 4  ;;  %v2065_v57 = vunpack.c.l.b16 %v1877_v38 }
 0x141   :  { %14121 = vst [vmem:[#allocation42_spill] sm:$0xff] %v10940_v59  ;;  %v3909_v59 = vunpack.c.l.b16 %v3344_v55  ;;  %v3365_v34 = vshll.u32 %v3041_v39, 16 }
 0x143   :  { %v4077_v3 = vpop.f32.mrf.mxu0  ;;  %v3367_v33 = vrot.slane %v3365_v34, 5 }
 0x144   :  { %v2787_v60 = vpop.f32.mrf.mxu3  ;;  %2274 = vmatmul.bf16.gmra.mxu2 %v2118_v1  ;;  %v3963_v1 = vpack.c.b16 %v3909_v59, %v3908_v62 }
 0x145   :  { %v2946_v10 = vadd.f32 %v2787_v60, %v2391_v17  ;;  %v1552_v46 = vpop.f32.mrf.mxu1  ;;  %v1880_v17 = vsel %vm10720_vm5, %v1878_v2, %v1879_v45  ;;  %v10068_v60 = vld [vmem:[#allocation2 + $0x78] sm:$0xff]  ;;  %v3358_v2 = vsel %vm10507_vm2, %v3353_v6, %v3357_v63 }
 0x146   :  { %v2066_v31 = vunpack.c.l.b16 %v1880_v17  ;;  %v1553_v14 = vadd.f32 %v1552_v46, %v10768_v48  ;;  %v1716_v48 = vld [vmem:[#allocation2 + $0x84] sm:$0xe]  ;;  %v3910_v38 = vunpack.c.l.b16 %v3358_v2 }
 0x147   :  { %v10947_v15 = vadd.f32 %v4077_v3, %v2946_v10  ;;  %v2235_v27 = vpop.f32.mrf.mxu2  ;;  %v3363_v3 = vrot.slane %v3362_v49, 4  ;;  %v3042_v10 = vld [vmem:[#allocation2 + $0x90] sm:$0xf] }
 0x148   :  { %v2392_v20 = vadd.f32 %v2235_v27, %v1551_v5  ;;  %v2119_v59 = vpack.c.b16 %v2066_v31, %v2065_v57  ;;  %v3370_v62 = vshrl.u32 %v3042_v10, 16  ;;  %v3373_v5 = vshll.u32 %v3042_v10, 16  ;;  %v10277_v27 = vld [vmem:[#allocation2 + $0x88] sm:$0xf] }
 0x149   :  { %2829 = vmatmul.bf16.gmra.mxu3 %v10123_v4  ;;  %v3043_v4 = vld [vmem:[#allocation2 + $0x94] sm:$0xf]  ;;  %v3368_v45 = vsel %vm10507_vm2, %v3363_v3, %v3367_v33  ;;  %v1883_v49 = vrot.slane %v10277_v27, 5  ;;  %v9493_v57 = vrot.slane %v1716_v48, 9  ;;  %v10278_v3 = vld [vmem:[#allocation2 + $0x8c] sm:$0x1] }
 0x14a   :  { %v3379_v35 = vshll.u32 %v3043_v4, 16  ;;  %v3383_v34 = vshrl.u32 %v3043_v4, 16  ;;  %v3911_v17 = vunpack.c.l.b16 %v3368_v45  ;;  %v3372_v63 = vrot.slane %v3370_v62, 4 }
 0x14b   :  { %v4080_v8 = vpop.f32.mrf.mxu0  ;;  %v3375_v6 = vrot.slane %v3373_v5, 5  ;;  %v1885_v31 = vrot.slane %v1883_v49, 4  ;;  %v1886_v33 = vrot.slane %v10278_v3, 5  ;;  %v1884_v45 = vsel %vm10720_vm5, %v9493_v57, %v1883_v49  ;;  %v10214_v57 = vld [vmem:[#allocation5 + $0x1e0] sm:$0xff] }
 0x14c   :  { %v2790_v55 = vpop.f32.mrf.mxu3  ;;  %v3964_v2 = vpack.c.b16 %v3911_v17, %v3910_v38  ;;  %v3046_v17 = vld [vmem:[#allocation2 + $0xa0] sm:$0xf]  ;;  %6692 = vmatpush.bf16.msra.mxu3 %v10214_v57 }
 0x14d   :  { %v2947_v18 = vadd.f32 %v2790_v55, %v2392_v20  ;;  %v1555_v28 = vpop.f32.mrf.mxu1  ;;  %v3376_v62 = vor.u32 %v3375_v6, %v3372_v63 }
 0x14e   :  { %4119 = vmatmul.bf16.gmra.mxu0 %v3963_v1  ;;  %v1556_v10 = vadd.f32 %v1555_v28, %v10782_v21  ;;  %v10069_v28 = vld [vmem:[#allocation2 + $0x84] sm:$0xff] }
 0x14f   :  { %v10954_v16 = vadd.f32 %v4080_v8, %v2947_v18  ;;  %v2237_v13 = vpop.f32.mrf.mxu2  ;;  %v10124_v8 = vld [vmem:[#allocation2 + $0x84] sm:$0xff]  ;;  %v3385_v18 = vrot.slane %v3383_v34, 4  ;;  %v10206_v34 = vld [vmem:[#allocation5 + $0x1a0] sm:$0xff]  ;;  %v3377_v49 = vrot.slane %v3376_v62, 4 }
 0x150   :  { %1594 = vmatmul.bf16.gmra.mxu1 %v10068_v60  ;;  %v2393_v39 = vadd.f32 %v2237_v13, %v1553_v14  ;;  %v10960_v60 = vrot.slane %v3379_v35, 5  ;;  %v3044_v13 = vld [vmem:[#allocation2 + $0x98] sm:$0x1]  ;;  %5402 = vmatpush.bf16.msra.mxu2 %v10206_v34 }
 0x151   :  { %v3389_v27 = vshll.u32 %v3044_v13, 16  ;;  %v3407_v13 = vshrl.u32 %v3046_v17, 16 }
 0x152   :  { %v3386_v5 = vor.u32 %v3385_v18, %v10960_v60 }
 0x153   :  { %v4082_v20 = vpop.f32.mrf.mxu0  ;;  %v3391_v6 = vrot.slane %v3389_v27, 5  ;;  %v10222_v27 = vld [vmem:[#allocation5 + $0x220] sm:$0xff] }
 0x154   :  { %v2792_v46 = vpop.f32.mrf.mxu3  ;;  %2279 = vmatmul.bf16.gmra.mxu2 %v2119_v59  ;;  %7470 = vmatpush.bf16.msra.mxu0 %v10222_v27 }
 0x155   :  { %v2948_v1 = vadd.f32 %v2792_v46, %v2393_v39  ;;  %v1557_v55 = vpop.f32.mrf.mxu1  ;;  %v1887_v39 = vsel %vm10720_vm5, %v1885_v31, %v1886_v33  ;;  %v10166_v31 = vld [vmem:[#allocation5 + $0x160] sm:$0xff] }
 0x156   :  { %v2068_v38 = vunpack.c.l.b16 %v1887_v39  ;;  %v1558_v63 = vadd.f32 %v1557_v55, %v10794_v22  ;;  %v1717_v39 = vld [vmem:[#allocation2 + $0x90] sm:$0xe]  ;;  %4847 = vmatpush.bf16.msra.mxu1 %v10166_v31  ;;  %v3382_v22 = vsel %vm10507_vm2, %v3377_v49, %v10960_v60  ;;  %v10280_v31 = vld [vmem:[#allocation2 + $0x98] sm:$0x1] }
 0x157   :  { %v10963_v4 = vadd.f32 %v4082_v20, %v2948_v1  ;;  %v2240_v14 = vpop.f32.mrf.mxu2  ;;  %v3045_v20 = vld [vmem:[#allocation2 + $0x9c] sm:$0xf]  ;;  %v2067_v1 = vunpack.c.l.b16 %v1884_v45  ;;  %v3912_v60 = vunpack.c.l.b16 %v3382_v22 }
 0x158   :  { %v2394_v59 = vadd.f32 %v2240_v14, %v1556_v10  ;;  %v3394_v3 = vshrl.u32 %v3045_v20, 16  ;;  %v3397_v10 = vshll.u32 %v3045_v20, 16  ;;  %v3403_v14 = vshll.u32 %v3046_v17, 16 }
 0x159   :  { %2834 = vmatmul.bf16.gmra.mxu3 %v10124_v8  ;;  %v3387_v8 = vrot.slane %v3386_v5, 4  ;;  %v2120_v45 = vpack.c.b16 %v2068_v38, %v2067_v1  ;;  %v10125_v38 = vld [vmem:[#allocation2 + $0x90] sm:$0xff] }
 0x15a   :  { %v3405_v20 = vrot.slane %v3403_v14, 5 }
 0x15b   :  { %v4085_v35 = vpop.f32.mrf.mxu0  ;;  %v3392_v55 = vsel %vm10507_vm2, %v3387_v8, %v3391_v6 }
 0x15c   :  { %v2795_v21 = vpop.f32.mrf.mxu3  ;;  %v3913_v49 = vunpack.c.l.b16 %v3392_v55 }
 0x15d   :  { %v2949_v48 = vadd.f32 %v2795_v21, %v2394_v59  ;;  %v1560_v46 = vpop.f32.mrf.mxu1  ;;  %v9494_v21 = vrot.slane %v1717_v39, 9 }
 0x15e   :  { %4124 = vmatmul.bf16.gmra.mxu0 %v3964_v2  ;;  %v10279_v2 = vld [vmem:[#allocation2 + $0x94] sm:$0xf]  ;;  %v1561_v8 = vadd.f32 %v1560_v46, %v10806_v53 }
 0x15f   :  { %v10971_v33 = vadd.f32 %v4085_v35, %v2949_v48  ;;  %v2242_v18 = vpop.f32.mrf.mxu2  ;;  %v1890_v62 = vrot.slane %v10279_v2, 5  ;;  %v3396_v35 = vrot.slane %v3394_v3, 4  ;;  %v3409_v48 = vrot.slane %v3407_v13, 4 }
 0x160   :  { %1599 = vmatmul.bf16.gmra.mxu1 %v10069_v28  ;;  %v2395_v59 = vadd.f32 %v2242_v18, %v1558_v63  ;;  %v3399_v28 = vrot.slane %v3397_v10, 5  ;;  %v1893_v63 = vrot.slane %v10280_v31, 5  ;;  %v3047_v18 = vld [vmem:[#allocation2 + $0xa4] sm:$0x1]  ;;  %v3965_v2 = vpack.c.b16 %v3913_v49, %v3912_v60 }
 0x161   :  { %v1892_v57 = vrot.slane %v1890_v62, 4  ;;  %v1891_v10 = vsel %vm10720_vm5, %v9494_v21, %v1890_v62  ;;  %v3410_v13 = vor.u32 %v3409_v48, %v3405_v20  ;;  %v3048_v62 = vld [vmem:[#allocation2 + $0xa8] sm:$0xf] }
 0x162   :  { %v3400_v14 = vor.u32 %v3399_v28, %v3396_v35  ;;  %v2069_v22 = vunpack.c.l.b16 %v1891_v10  ;;  %v3049_v35 = vld [vmem:[#allocation2 + $0xac] sm:$0xf]  ;;  %v3418_v60 = vshrl.u32 %v3048_v62, 16  ;;  %v3421_v49 = vshll.u32 %v3048_v62, 16 }
 0x163   :  { %v4087_v5 = vpop.f32.mrf.mxu0  ;;  %v1894_v39 = vsel %vm10720_vm5, %v1892_v57, %v1893_v63 }
 0x164   :  { %v2797_v34 = vpop.f32.mrf.mxu3  ;;  %2284 = vmatmul.bf16.gmra.mxu2 %v2120_v45  ;;  %v2070_v53 = vunpack.c.l.b16 %v1894_v39  ;;  %v3401_v46 = vrot.slane %v3400_v14, 4  ;;  %v3431_v14 = vshrl.u32 %v3049_v35, 16 }
 0x165   :  { %v2950_v1 = vadd.f32 %v2797_v34, %v2395_v59  ;;  %v1562_v17 = vpop.f32.mrf.mxu1  ;;  %v3413_v59 = vshll.u32 %v3047_v18, 16  ;;  %v10070_v34 = vld [vmem:[#allocation2 + $0x90] sm:$0xff] }
 0x166   :  { %v1563_v21 = vadd.f32 %v1562_v17, %v10820_v51  ;;  %v3406_v57 = vsel %vm10507_vm2, %v3401_v46, %v3405_v20  ;;  %v1718_v51 = vld [vmem:[#allocation2 + $0x9c] sm:$0xe]  ;;  %v3420_v20 = vrot.slane %v3418_v60, 4  ;;  %v10282_v46 = vld [vmem:[#allocation2 + $0xa4] sm:$0x1] }
 0x167   :  { %v10979_v6 = vadd.f32 %v4087_v5, %v2950_v1  ;;  %v2245_v3 = vpop.f32.mrf.mxu2  ;;  %v3411_v5 = vrot.slane %v3410_v13, 4  ;;  %v3415_v1 = vrot.slane %v3413_v59, 5  ;;  %v3914_v59 = vunpack.c.l.b16 %v3406_v57 }
 0x168   :  { %v2396_v45 = vadd.f32 %v2245_v3, %v1561_v8  ;;  %v3427_v8 = vshll.u32 %v3049_v35, 16  ;;  %v10281_v3 = vld [vmem:[#allocation2 + $0xa0] sm:$0xf] }
 0x169   :  { %14122 = vst [vmem:[#allocation43_spill] sm:$0xff] %v10979_v6  ;;  %2839 = vmatmul.bf16.gmra.mxu3 %v10125_v38  ;;  %v2121_v38 = vpack.c.b16 %v2070_v53, %v2069_v22  ;;  %v3416_v63 = vsel %vm10507_vm2, %v3411_v5, %v3415_v1  ;;  %v1897_v10 = vrot.slane %v10281_v3, 5  ;;  %v3423_v22 = vrot.slane %v3421_v49, 5 }
 0x16a   :  { %v1900_v5 = vrot.slane %v10282_v46, 5  ;;  %v3433_v1 = vrot.slane %v3431_v14, 4  ;;  %v10071_v14 = vld [vmem:[#allocation2 + $0x9c] sm:$0xff] }
 0x16b   :  { %v4090_v27 = vpop.f32.mrf.mxu0  ;;  %v1899_v53 = vrot.slane %v1897_v10, 4 }
 0x16c   :  { %v2800_v55 = vpop.f32.mrf.mxu3 }
 0x16d   :  { %v2951_v31 = vadd.f32 %v2800_v55, %v2396_v45  ;;  %v1565_v6 = vpop.f32.mrf.mxu1  ;;  %v3915_v45 = vunpack.c.l.b16 %v3416_v63  ;;  %v3429_v55 = vrot.slane %v3427_v8, 5  ;;  %v1901_v63 = vsel %vm10720_vm5, %v1899_v53, %v1900_v5 }
 0x16e   :  { %4129 = vmatmul.bf16.gmra.mxu0 %v3965_v2  ;;  %v10126_v2 = vld [vmem:[#allocation2 + $0x9c] sm:$0xff] }
 0x16f   :  { %v10986_v28 = vadd.f32 %v4090_v27, %v2951_v31  ;;  %v2247_v48 = vpop.f32.mrf.mxu2  ;;  %v1566_v31 = vadd.f32 %v1565_v6, %v10836_v11  ;;  %v3434_v60 = vor.u32 %v3433_v1, %v3429_v55  ;;  %v3051_v11 = vld [vmem:[#allocation2 + $0xb4] sm:$0xf] }
 0x170   :  { %1604 = vmatmul.bf16.gmra.mxu1 %v10070_v34  ;;  %v2397_v18 = vadd.f32 %v2247_v48, %v1563_v21  ;;  %v9495_v34 = vrot.slane %v1718_v51, 9  ;;  %v3050_v21 = vld [vmem:[#allocation2 + $0xb0] sm:$0x1]  ;;  %v3966_v48 = vpack.c.b16 %v3915_v45, %v3914_v59 }
 0x171   :  { %v3437_v8 = vshll.u32 %v3050_v21, 16  ;;  %v3435_v45 = vrot.slane %v3434_v60, 4  ;;  %v10283_v21 = vld [vmem:[#allocation2 + $0xac] sm:$0xf] }
 0x173   :  { %v4092_v13 = vpop.f32.mrf.mxu0 }
 0x174   :  { %v2802_v17 = vpop.f32.mrf.mxu3  ;;  %2289 = vmatmul.bf16.gmra.mxu2 %v2121_v38  ;;  %v1898_v38 = vsel %vm10720_vm5, %v9495_v34, %v1897_v10  ;;  %v3442_v34 = vshrl.u32 %v3051_v11, 16 }
 0x175   :  { %v2952_v39 = vadd.f32 %v2802_v17, %v2397_v18  ;;  %v1567_v27 = vpop.f32.mrf.mxu1  ;;  %v3424_v18 = vor.u32 %v3423_v22, %v3420_v20  ;;  %v2071_v51 = vunpack.c.l.b16 %v1898_v38  ;;  %v2072_v17 = vunpack.c.l.b16 %v1901_v63 }
 0x176   :  { %v1568_v10 = vadd.f32 %v1567_v27, %v10852_v0  ;;  %v3445_v22 = vshll.u32 %v3051_v11, 16  ;;  %v3444_v27 = vrot.slane %v3442_v34, 4 }
 0x177   :  { %v10993_v62 = vadd.f32 %v4092_v13, %v2952_v39  ;;  %v2250_v35 = vpop.f32.mrf.mxu2  ;;  %v3052_v39 = vld [vmem:[#allocation2 + $0xb8] sm:$0xf]  ;;  %v3425_v59 = vrot.slane %v3424_v18, 4 }
 0x178   :  { %v2398_v57 = vadd.f32 %v2250_v35, %v1566_v31  ;;  %v3451_v46 = vshll.u32 %v3052_v39, 16  ;;  %v3455_v5 = vshrl.u32 %v3052_v39, 16  ;;  %v2122_v31 = vpack.c.b16 %v2072_v17, %v2071_v51  ;;  %v1719_v35 = vld [vmem:[#allocation2 + $0xa8] sm:$0xe]  ;;  %v10284_v51 = vld [vmem:[#allocation2 + $0xb0] sm:$0x1] }
 0x179   :  { %2844 = vmatmul.bf16.gmra.mxu3 %v10126_v2  ;;  %v3439_v2 = vrot.slane %v3437_v8, 5  ;;  %v9496_v18 = vrot.slane %v1719_v35, 9  ;;  %v3447_v60 = vrot.slane %v3445_v22, 5  ;;  %v1907_v17 = vrot.slane %v10284_v51, 5  ;;  %v3053_v39 = vld [vmem:[#allocation2 + $0xbc] sm:$0x1] }
 0x17a   :  { %v3457_v8 = vrot.slane %v3455_v5, 4 }
 0x17b   :  { %v4095_v49 = vpop.f32.mrf.mxu0  ;;  %v3440_v0 = vsel %vm10507_vm2, %v3435_v45, %v3439_v2  ;;  %v3448_v34 = vor.u32 %v3447_v60, %v3444_v27  ;;  %v3055_v27 = vld [vmem:[#allocation2 + $0xc4] sm:$0xf] }
 0x17c   :  { %v2805_v3 = vpop.f32.mrf.mxu3 }
 0x17d   :  { %v2953_v6 = vadd.f32 %v2805_v3, %v2398_v57  ;;  %v1570_v13 = vpop.f32.mrf.mxu1  ;;  %v1904_v57 = vrot.slane %v10283_v21, 5 }
 0x17e   :  { %4134 = vmatmul.bf16.gmra.mxu0 %v3966_v48  ;;  %v3430_v48 = vsel %vm10507_vm2, %v3425_v59, %v3429_v55  ;;  %v1571_v55 = vadd.f32 %v1570_v13, %v10865_v44  ;;  %v3449_v13 = vrot.slane %v3448_v34, 4  ;;  %v3479_v34 = vshrl.u32 %v3055_v27, 16 }
 0x17f   :  { %v11000_v53 = vadd.f32 %v4095_v49, %v2953_v6  ;;  %v2252_v20 = vpop.f32.mrf.mxu2  ;;  %v3453_v49 = vrot.slane %v3451_v46, 5  ;;  %v1906_v6 = vrot.slane %v1904_v57, 4  ;;  %v1905_v2 = vsel %vm10720_vm5, %v9496_v18, %v1904_v57  ;;  %v3054_v57 = vld [vmem:[#allocation2 + $0xc0] sm:$0xf] }
 0x180   :  { %1609 = vmatmul.bf16.gmra.mxu1 %v10071_v14  ;;  %v2399_v1 = vadd.f32 %v2252_v20, %v1568_v10  ;;  %v10127_v14 = vld [vmem:[#allocation2 + $0xa8] sm:$0xff]  ;;  %v3916_v10 = vunpack.c.l.b16 %v3430_v48  ;;  %v3917_v20 = vunpack.c.l.b16 %v3440_v0  ;;  %v3461_v46 = vshll.u32 %v3053_v39, 16 }
 0x181   :  { %v3458_v22 = vor.u32 %v3457_v8, %v3453_v49  ;;  %v2073_v21 = vunpack.c.l.b16 %v1905_v2  ;;  %v10072_v0 = vld [vmem:[#allocation2 + $0xa8] sm:$0xff] }
 0x183   :  { %v4097_v38 = vpop.f32.mrf.mxu0 }
 0x184   :  { %v2807_v63 = vpop.f32.mrf.mxu3  ;;  %2294 = vmatmul.bf16.gmra.mxu2 %v2122_v31  ;;  %v3967_v31 = vpack.c.b16 %v3917_v20, %v3916_v10  ;;  %v3466_v10 = vshrl.u32 %v3054_v57, 16  ;;  %v3469_v20 = vshll.u32 %v3054_v57, 16 }
 0x185   :  { %v2954_v3 = vadd.f32 %v2807_v63, %v2399_v1  ;;  %v1572_v11 = vpop.f32.mrf.mxu1  ;;  %v1908_v1 = vsel %vm10720_vm5, %v1906_v6, %v1907_v17  ;;  %v3463_v63 = vrot.slane %v3461_v46, 5  ;;  %v3454_v6 = vsel %vm10507_vm2, %v3449_v13, %v3453_v49  ;;  %v10286_v13 = vld [vmem:[#allocation2 + $0xbc] sm:$0x1] }
 0x186   :  { %v2074_v44 = vunpack.c.l.b16 %v1908_v1  ;;  %v1573_v18 = vadd.f32 %v1572_v11, %v10878_v36  ;;  %v1720_v36 = vld [vmem:[#allocation2 + $0xb4] sm:$0xe]  ;;  %v3918_v46 = vunpack.c.l.b16 %v3454_v6  ;;  %v3468_v49 = vrot.slane %v3466_v10, 4 }
 0x187   :  { %v11007_v59 = vadd.f32 %v4097_v38, %v2954_v3  ;;  %v2255_v45 = vpop.f32.mrf.mxu2  ;;  %v3459_v38 = vrot.slane %v3458_v22, 4 }
 0x188   :  { %v2400_v5 = vadd.f32 %v2255_v45, %v1571_v55  ;;  %v3475_v55 = vshll.u32 %v3055_v27, 16  ;;  %v10285_v45 = vld [vmem:[#allocation2 + $0xb8] sm:$0xf] }
 0x189   :  { %2849 = vmatmul.bf16.gmra.mxu3 %v10127_v14  ;;  %v2123_v14 = vpack.c.b16 %v2074_v44, %v2073_v21  ;;  %v3464_v17 = vsel %vm10507_vm2, %v3459_v38, %v3463_v63  ;;  %v1911_v2 = vrot.slane %v10285_v45, 5  ;;  %v3471_v21 = vrot.slane %v3469_v20, 5  ;;  %v10205_v45 = vld [vmem:[#allocation5 + $0x198] sm:$0xff] }
 0x18a   :  { %v1914_v38 = vrot.slane %v10286_v13, 5  ;;  %v3481_v63 = vrot.slane %v3479_v34, 4  ;;  %v3057_v34 = vld [vmem:[#allocation2 + $0xe4] sm:$0xf]  ;;  %5403 = vmatpush.bf16.msra.mxu2 %v10205_v45 }
 0x18b   :  { %v4100_v35 = vpop.f32.mrf.mxu0  ;;  %v1913_v44 = vrot.slane %v1911_v2, 4 }
 0x18c   :  { %v2810_v48 = vpop.f32.mrf.mxu3 }
 0x18d   :  { %v2955_v3 = vadd.f32 %v2810_v48, %v2400_v5  ;;  %v1575_v51 = vpop.f32.mrf.mxu1  ;;  %v3919_v5 = vunpack.c.l.b16 %v3464_v17  ;;  %v11020_v48 = vrot.slane %v3475_v55, 5  ;;  %v1915_v17 = vsel %vm10720_vm5, %v1913_v44, %v1914_v38 }
 0x18e   :  { %4139 = vmatmul.bf16.gmra.mxu0 %v3967_v31  ;;  %v10128_v31 = vld [vmem:[#allocation2 + $0xb4] sm:$0xff]  ;;  %v3490_v44 = vshrl.u32 %v3057_v34, 16 }
 0x18f   :  { %v11014_v60 = vadd.f32 %v4100_v35, %v2955_v3  ;;  %v2257_v8 = vpop.f32.mrf.mxu2  ;;  %v1576_v3 = vadd.f32 %v1575_v51, %v10892_v29  ;;  %v3482_v10 = vor.u32 %v3481_v63, %v11020_v48  ;;  %v10073_v51 = vld [vmem:[#allocation2 + $0xb4] sm:$0xff]  ;;  %v3493_v63 = vshll.u32 %v3057_v34, 16 }
 0x190   :  { %1614 = vmatmul.bf16.gmra.mxu1 %v10072_v0  ;;  %v2401_v39 = vadd.f32 %v2257_v8, %v1573_v18  ;;  %v9497_v0 = vrot.slane %v1720_v36, 9  ;;  %v3056_v18 = vld [vmem:[#allocation2 + $0xc8] sm:$0x1]  ;;  %v3968_v8 = vpack.c.b16 %v3919_v5, %v3918_v46  ;;  %v2076_v46 = vunpack.c.l.b16 %v1915_v17 }
 0x191   :  { %v3485_v55 = vshll.u32 %v3056_v18, 16  ;;  %v3058_v5 = vld [vmem:[#allocation2 + $0xe8] sm:$0xf] }
 0x192   :  { %v1912_v6 = vsel %vm10720_vm5, %v9497_v0, %v1911_v2  ;;  %v10165_v0 = vld [vmem:[#allocation5 + $0x158] sm:$0xff] }
 0x193   :  { %v4102_v22 = vpop.f32.mrf.mxu0  ;;  %4848 = vmatpush.bf16.msra.mxu1 %v10165_v0 }
 0x194   :  { %v2812_v11 = vpop.f32.mrf.mxu3  ;;  %2299 = vmatmul.bf16.gmra.mxu2 %v2123_v14 }
 0x195   :  { %v2956_v1 = vadd.f32 %v2812_v11, %v2401_v39  ;;  %v1577_v35 = vpop.f32.mrf.mxu1  ;;  %v3472_v39 = vor.u32 %v3471_v21, %v3468_v49  ;;  %v2075_v11 = vunpack.c.l.b16 %v1912_v6  ;;  %v3487_v21 = vrot.slane %v3485_v55, 5  ;;  %v1721_v6 = vld [vmem:[#allocation2 + $0xd8] sm:$0xe] }
 0x196   :  { %v1578_v49 = vadd.f32 %v1577_v35, %v10904_v47  ;;  %v9498_v45 = vrot.slane %v1721_v6, 9 }
 0x197   :  { %v11023_v57 = vadd.f32 %v4102_v22, %v2956_v1  ;;  %v2260_v27 = vpop.f32.mrf.mxu2  ;;  %v3473_v2 = vrot.slane %v3472_v39, 4  ;;  %v3483_v1 = vrot.slane %v3482_v10, 4  ;;  %v3492_v10 = vrot.slane %v3490_v44, 4 }
 0x198   :  { %v2402_v14 = vadd.f32 %v2260_v27, %v1576_v3  ;;  %v3499_v3 = vshll.u32 %v3058_v5, 16  ;;  %v3503_v27 = vshrl.u32 %v3058_v5, 16 }
 0x199   :  { %2854 = vmatmul.bf16.gmra.mxu3 %v10128_v31  ;;  %v10213_v31 = vld [vmem:[#allocation5 + $0x1d8] sm:$0xff]  ;;  %v3478_v47 = vsel %vm10507_vm2, %v3473_v2, %v11020_v48  ;;  %v3488_v35 = vsel %vm10507_vm2, %v3483_v1, %v3487_v21 }
 0x19a   :  { %6693 = vmatpush.bf16.msra.mxu3 %v10213_v31  ;;  %v3505_v34 = vrot.slane %v3503_v27, 4  ;;  %v10288_v31 = vld [vmem:[#allocation2 + $0xe0] sm:$0x1]  ;;  %v3920_v48 = vunpack.c.l.b16 %v3478_v47  ;;  %v3921_v2 = vunpack.c.l.b16 %v3488_v35 }
 0x19b   :  { %v4105_v20 = vpop.f32.mrf.mxu0  ;;  %v1921_v0 = vrot.slane %v10288_v31, 5 }
 0x19c   :  { %v2815_v29 = vpop.f32.mrf.mxu3  ;;  %v3969_v6 = vpack.c.b16 %v3921_v2, %v3920_v48 }
 0x19d   :  { %v2957_v22 = vadd.f32 %v2815_v29, %v2402_v14  ;;  %v1580_v36 = vpop.f32.mrf.mxu1  ;;  %v2124_v14 = vpack.c.b16 %v2076_v46, %v2075_v11  ;;  %v3495_v29 = vrot.slane %v3493_v63, 5  ;;  %v10129_v11 = vld [vmem:[#allocation2 + $0xc0] sm:$0xff] }
 0x19e   :  { %4144 = vmatmul.bf16.gmra.mxu0 %v3968_v8  ;;  %v10287_v8 = vld [vmem:[#allocation2 + $0xdc] sm:$0xf]  ;;  %v1581_v1 = vadd.f32 %v1580_v36, %v10920_v23 }
 0x19f   :  { %v11031_v13 = vadd.f32 %v4105_v20, %v2957_v22  ;;  %v2262_v38 = vpop.f32.mrf.mxu2  ;;  %v1918_v17 = vrot.slane %v10287_v8, 5  ;;  %v10221_v20 = vld [vmem:[#allocation5 + $0x218] sm:$0xff]  ;;  %v3496_v63 = vor.u32 %v3495_v29, %v3492_v10  ;;  %v3061_v10 = vld [vmem:[#allocation2 + $0xf4] sm:$0xf] }
 0x1a0   :  { %1619 = vmatmul.bf16.gmra.mxu1 %v10073_v51  ;;  %v2403_v18 = vadd.f32 %v2262_v38, %v1578_v49  ;;  %v3501_v51 = vrot.slane %v3499_v3, 5  ;;  %v3059_v49 = vld [vmem:[#allocation2 + $0xec] sm:$0x1]  ;;  %7471 = vmatpush.bf16.msra.mxu0 %v10221_v20  ;;  %v10074_v20 = vld [vmem:[#allocation2 + $0xd8] sm:$0xff] }
 0x1a1   :  { %v1920_v5 = vrot.slane %v1918_v17, 4  ;;  %v1919_v38 = vsel %vm10720_vm5, %v9498_v45, %v1918_v17  ;;  %v3509_v27 = vshll.u32 %v3059_v49, 16  ;;  %v3497_v36 = vrot.slane %v3496_v63, 4  ;;  %v3060_v17 = vld [vmem:[#allocation2 + $0xf0] sm:$0xf] }
 0x1a2   :  { %v3506_v3 = vor.u32 %v3505_v34, %v3501_v51  ;;  %v2077_v47 = vunpack.c.l.b16 %v1919_v38  ;;  %v3514_v48 = vshrl.u32 %v3060_v17, 16  ;;  %v3517_v2 = vshll.u32 %v3060_v17, 16 }
 0x1a3   :  { %v4107_v39 = vpop.f32.mrf.mxu0  ;;  %v3527_v63 = vshrl.u32 %v3061_v10, 16 }
 0x1a4   :  { %v2817_v55 = vpop.f32.mrf.mxu3  ;;  %2304 = vmatmul.bf16.gmra.mxu2 %v2124_v14  ;;  %v1922_v14 = vsel %vm10720_vm5, %v1920_v5, %v1921_v0  ;;  %v3502_v5 = vsel %vm10507_vm2, %v3497_v36, %v3501_v51  ;;  %v3516_v51 = vrot.slane %v3514_v48, 4  ;;  %v10290_v36 = vld [vmem:[#allocation2 + $0xec] sm:$0x1] }
 0x1a5   :  { %v2958_v22 = vadd.f32 %v2817_v55, %v2403_v18  ;;  %v1582_v46 = vpop.f32.mrf.mxu1  ;;  %v2078_v23 = vunpack.c.l.b16 %v1922_v14  ;;  %v3511_v55 = vrot.slane %v3509_v27, 5  ;;  %v3922_v27 = vunpack.c.l.b16 %v3502_v5 }
 0x1a6   :  { %v1583_v45 = vadd.f32 %v1582_v46, %v10930_v61  ;;  %v1722_v61 = vld [vmem:[#allocation2 + $0xe4] sm:$0xe] }
 0x1a7   :  { %v11039_v21 = vadd.f32 %v4107_v39, %v2958_v22  ;;  %v2265_v44 = vpop.f32.mrf.mxu2  ;;  %v3507_v39 = vrot.slane %v3506_v3, 4 }
 0x1a8   :  { %v2404_v18 = vadd.f32 %v2265_v44, %v1581_v1  ;;  %v3523_v1 = vshll.u32 %v3061_v10, 16  ;;  %v10289_v44 = vld [vmem:[#allocation2 + $0xe8] sm:$0xf] }
 0x1a9   :  { %2859 = vmatmul.bf16.gmra.mxu3 %v10129_v11  ;;  %v2125_v11 = vpack.c.b16 %v2078_v23, %v2077_v47  ;;  %v3512_v0 = vsel %vm10507_vm2, %v3507_v39, %v3511_v55  ;;  %v1925_v38 = vrot.slane %v10289_v44, 5  ;;  %v3519_v47 = vrot.slane %v3517_v2, 5 }
 0x1aa   :  { %v1928_v39 = vrot.slane %v10290_v36, 5  ;;  %v3529_v55 = vrot.slane %v3527_v63, 4  ;;  %v10075_v63 = vld [vmem:[#allocation2 + $0xe4] sm:$0xff] }
 0x1ab   :  { %v4110_v8 = vpop.f32.mrf.mxu0  ;;  %v1927_v23 = vrot.slane %v1925_v38, 4 }
 0x1ac   :  { %v2820_v35 = vpop.f32.mrf.mxu3 }
 0x1ad   :  { %v2959_v22 = vadd.f32 %v2820_v35, %v2404_v18  ;;  %v1585_v31 = vpop.f32.mrf.mxu1  ;;  %v3923_v18 = vunpack.c.l.b16 %v3512_v0  ;;  %v3525_v35 = vrot.slane %v3523_v1, 5  ;;  %v1929_v0 = vsel %vm10720_vm5, %v1927_v23, %v1928_v39 }
 0x1ae   :  { %4149 = vmatmul.bf16.gmra.mxu0 %v3969_v6  ;;  %v10130_v6 = vld [vmem:[#allocation2 + $0xe4] sm:$0xff] }
 0x1af   :  { %v11046_v29 = vadd.f32 %v4110_v8, %v2959_v22  ;;  %v2267_v34 = vpop.f32.mrf.mxu2  ;;  %v1586_v22 = vadd.f32 %v1585_v31, %v10728_v24  ;;  %v3530_v48 = vor.u32 %v3529_v55, %v3525_v35  ;;  %v3063_v24 = vld [vmem:[#allocation2 + $0xfc] sm:$0xf] }
 0x1b0   :  { %1624 = vmatmul.bf16.gmra.mxu1 %v10074_v20  ;;  %v2405_v49 = vadd.f32 %v2267_v34, %v1583_v45  ;;  %v9499_v20 = vrot.slane %v1722_v61, 9  ;;  %v3062_v45 = vld [vmem:[#allocation2 + $0xf8] sm:$0x1]  ;;  %v3970_v34 = vpack.c.b16 %v3923_v18, %v3922_v27 }
 0x1b1   :  { %v3533_v1 = vshll.u32 %v3062_v45, 16  ;;  %v3531_v18 = vrot.slane %v3530_v48, 4  ;;  %v10291_v45 = vld [vmem:[#allocation2 + $0xf4] sm:$0xf] }
 0x1b3   :  { %v4112_v3 = vpop.f32.mrf.mxu0 }
 0x1b4   :  { %v2822_v46 = vpop.f32.mrf.mxu3  ;;  %2309 = vmatmul.bf16.gmra.mxu2 %v2125_v11  ;;  %v1926_v11 = vsel %vm10720_vm5, %v9499_v20, %v1925_v38  ;;  %v3538_v20 = vshrl.u32 %v3063_v24, 16 }
 0x1b5   :  { %v2960_v14 = vadd.f32 %v2822_v46, %v2405_v49  ;;  %v1587_v8 = vpop.f32.mrf.mxu1  ;;  %v3520_v49 = vor.u32 %v3519_v47, %v3516_v51  ;;  %v2079_v61 = vunpack.c.l.b16 %v1926_v11  ;;  %v2080_v46 = vunpack.c.l.b16 %v1929_v0 }
 0x1b6   :  { %v1588_v38 = vadd.f32 %v1587_v8, %v10740_v52  ;;  %v3541_v47 = vshll.u32 %v3063_v24, 16  ;;  %v3540_v8 = vrot.slane %v3538_v20, 4 }
 0x1b7   :  { %v11053_v17 = vadd.f32 %v4112_v3, %v2960_v14  ;;  %v2270_v10 = vpop.f32.mrf.mxu2  ;;  %v3064_v14 = vld [vmem:[#allocation2 + $0x100] sm:$0xf]  ;;  %v3521_v27 = vrot.slane %v3520_v49, 4 }
 0x1b8   :  { %v2406_v5 = vadd.f32 %v2270_v10, %v1586_v22  ;;  %v3547_v36 = vshll.u32 %v3064_v14, 16  ;;  %v3551_v39 = vshrl.u32 %v3064_v14, 16  ;;  %v2126_v22 = vpack.c.b16 %v2080_v46, %v2079_v61  ;;  %v1723_v10 = vld [vmem:[#allocation2 + $0xf0] sm:$0xe]  ;;  %v10292_v61 = vld [vmem:[#allocation2 + $0xf8] sm:$0x1] }
 0x1b9   :  { %2864 = vmatmul.bf16.gmra.mxu3 %v10130_v6  ;;  %v3535_v6 = vrot.slane %v3533_v1, 5  ;;  %v9500_v49 = vrot.slane %v1723_v10, 9  ;;  %v3543_v48 = vrot.slane %v3541_v47, 5  ;;  %v1935_v46 = vrot.slane %v10292_v61, 5  ;;  %v3065_v14 = vld [vmem:[#allocation2 + $0x104] sm:$0x1] }
 0x1ba   :  { %v3553_v1 = vrot.slane %v3551_v39, 4 }
 0x1bb   :  { %v4115_v2 = vpop.f32.mrf.mxu0  ;;  %v3536_v52 = vsel %vm10507_vm2, %v3531_v18, %v3535_v6  ;;  %v3544_v20 = vor.u32 %v3543_v48, %v3540_v8  ;;  %v3067_v8 = vld [vmem:[#allocation2 + $0x10c] sm:$0xf] }
 0x1bc   :  { %v2825_v44 = vpop.f32.mrf.mxu3 }
 0x1bd   :  { %v2961_v31 = vadd.f32 %v2825_v44, %v2406_v5  ;;  %v1590_v3 = vpop.f32.mrf.mxu1  ;;  %v1932_v5 = vrot.slane %v10291_v45, 5 }
 0x1be   :  { %4154 = vmatmul.bf16.gmra.mxu0 %v3970_v34  ;;  %v3526_v34 = vsel %vm10507_vm2, %v3521_v27, %v3525_v35  ;;  %v1591_v35 = vadd.f32 %v1590_v3, %v10752_v19  ;;  %v3545_v3 = vrot.slane %v3544_v20, 4  ;;  %v3575_v20 = vshrl.u32 %v3067_v8, 16 }
 0x1bf   :  { %v11060_v23 = vadd.f32 %v4115_v2, %v2961_v31  ;;  %v2272_v51 = vpop.f32.mrf.mxu2  ;;  %v3549_v2 = vrot.slane %v3547_v36, 5  ;;  %v1934_v31 = vrot.slane %v1932_v5, 4  ;;  %v1933_v6 = vsel %vm10720_vm5, %v9500_v49, %v1932_v5  ;;  %v3066_v5 = vld [vmem:[#allocation2 + $0x108] sm:$0xf] }
 0x1c0   :  { %1629 = vmatmul.bf16.gmra.mxu1 %v10075_v63  ;;  %v2407_v55 = vadd.f32 %v2272_v51, %v1588_v38  ;;  %v10131_v63 = vld [vmem:[#allocation2 + $0xf0] sm:$0xff]  ;;  %v3924_v38 = vunpack.c.l.b16 %v3526_v34  ;;  %v3925_v51 = vunpack.c.l.b16 %v3536_v52  ;;  %v3557_v36 = vshll.u32 %v3065_v14, 16 }
 0x1c1   :  { %v3554_v47 = vor.u32 %v3553_v1, %v3549_v2  ;;  %v2081_v45 = vunpack.c.l.b16 %v1933_v6  ;;  %v10076_v52 = vld [vmem:[#allocation2 + $0xf0] sm:$0xff] }
 0x1c3   :  { %v4117_v11 = vpop.f32.mrf.mxu0 }
 0x1c4   :  { %v2827_v0 = vpop.f32.mrf.mxu3  ;;  %2314 = vmatmul.bf16.gmra.mxu2 %v2126_v22  ;;  %v3971_v22 = vpack.c.b16 %v3925_v51, %v3924_v38  ;;  %v3562_v38 = vshrl.u32 %v3066_v5, 16  ;;  %v3565_v51 = vshll.u32 %v3066_v5, 16 }
 0x1c5   :  { %v2962_v44 = vadd.f32 %v2827_v0, %v2407_v55  ;;  %v1592_v24 = vpop.f32.mrf.mxu1  ;;  %v1936_v55 = vsel %vm10720_vm5, %v1934_v31, %v1935_v46  ;;  %v3559_v0 = vrot.slane %v3557_v36, 5  ;;  %v3550_v31 = vsel %vm10507_vm2, %v3545_v3, %v3549_v2  ;;  %v10294_v3 = vld [vmem:[#allocation2 + $0x104] sm:$0x1] }
 0x1c6   :  { %v2082_v19 = vunpack.c.l.b16 %v1936_v55  ;;  %v1593_v49 = vadd.f32 %v1592_v24, %v10764_v42  ;;  %v1724_v42 = vld [vmem:[#allocation2 + $0xfc] sm:$0xe]  ;;  %v3926_v36 = vunpack.c.l.b16 %v3550_v31  ;;  %v3564_v2 = vrot.slane %v3562_v38, 4 }
 0x1c7   :  { %v11067_v27 = vadd.f32 %v4117_v11, %v2962_v44  ;;  %v2275_v18 = vpop.f32.mrf.mxu2  ;;  %v3555_v11 = vrot.slane %v3554_v47, 4 }
 0x1c8   :  { %v2408_v39 = vadd.f32 %v2275_v18, %v1591_v35  ;;  %v3571_v35 = vshll.u32 %v3067_v8, 16  ;;  %v10293_v18 = vld [vmem:[#allocation2 + $0x100] sm:$0xf] }
 0x1c9   :  { %2869 = vmatmul.bf16.gmra.mxu3 %v10131_v63  ;;  %v2127_v63 = vpack.c.b16 %v2082_v19, %v2081_v45  ;;  %v3560_v46 = vsel %vm10507_vm2, %v3555_v11, %v3559_v0  ;;  %v1939_v6 = vrot.slane %v10293_v18, 5  ;;  %v3567_v45 = vrot.slane %v3565_v51, 5  ;;  %v10204_v18 = vld [vmem:[#allocation5 + $0x190] sm:$0xff] }
 0x1ca   :  { %v1942_v11 = vrot.slane %v10294_v3, 5  ;;  %v3577_v0 = vrot.slane %v3575_v20, 4  ;;  %v3069_v20 = vld [vmem:[#allocation2 + $0x114] sm:$0xf]  ;;  %5404 = vmatpush.bf16.msra.mxu2 %v10204_v18 }
 0x1cb   :  { %v4120_v10 = vpop.f32.mrf.mxu0  ;;  %v1941_v19 = vrot.slane %v1939_v6, 4 }
 0x1cc   :  { %v2830_v34 = vpop.f32.mrf.mxu3 }
 0x1cd   :  { %v2963_v44 = vadd.f32 %v2830_v34, %v2408_v39  ;;  %v1595_v61 = vpop.f32.mrf.mxu1  ;;  %v3927_v39 = vunpack.c.l.b16 %v3560_v46  ;;  %v11080_v34 = vrot.slane %v3571_v35, 5  ;;  %v1943_v46 = vsel %vm10720_vm5, %v1941_v19, %v1942_v11 }
 0x1ce   :  { %4159 = vmatmul.bf16.gmra.mxu0 %v3971_v22  ;;  %v10132_v22 = vld [vmem:[#allocation2 + $0xfc] sm:$0xff]  ;;  %v3586_v19 = vshrl.u32 %v3069_v20, 16 }
 0x1cf   :  { %v11074_v48 = vadd.f32 %v4120_v10, %v2963_v44  ;;  %v2277_v1 = vpop.f32.mrf.mxu2  ;;  %v1596_v44 = vadd.f32 %v1595_v61, %v10776_v12  ;;  %v3578_v38 = vor.u32 %v3577_v0, %v11080_v34  ;;  %v10077_v61 = vld [vmem:[#allocation2 + $0xfc] sm:$0xff]  ;;  %v3589_v0 = vshll.u32 %v3069_v20, 16 }
 0x1d0   :  { %1634 = vmatmul.bf16.gmra.mxu1 %v10076_v52  ;;  %v2409_v14 = vadd.f32 %v2277_v1, %v1593_v49  ;;  %v9501_v52 = vrot.slane %v1724_v42, 9  ;;  %v3068_v49 = vld [vmem:[#allocation2 + $0x110] sm:$0x1]  ;;  %v3972_v1 = vpack.c.b16 %v3927_v39, %v3926_v36  ;;  %v2084_v36 = vunpack.c.l.b16 %v1943_v46  ;;  %v3070_v39 = vld [vmem:[#allocation2 + $0x118] sm:$0xf] }
 0x1d1   :  { %v3581_v35 = vshll.u32 %v3068_v49, 16 }
 0x1d2   :  { %v1940_v31 = vsel %vm10720_vm5, %v9501_v52, %v1939_v6  ;;  %v10164_v52 = vld [vmem:[#allocation5 + $0x150] sm:$0xff] }
 0x1d3   :  { %v4122_v47 = vpop.f32.mrf.mxu0  ;;  %4849 = vmatpush.bf16.msra.mxu1 %v10164_v52 }
 0x1d4   :  { %v2832_v24 = vpop.f32.mrf.mxu3  ;;  %2319 = vmatmul.bf16.gmra.mxu2 %v2127_v63 }
 0x1d5   :  { %v2964_v55 = vadd.f32 %v2832_v24, %v2409_v14  ;;  %v1597_v10 = vpop.f32.mrf.mxu1  ;;  %v3568_v14 = vor.u32 %v3567_v45, %v3564_v2  ;;  %v2083_v24 = vunpack.c.l.b16 %v1940_v31  ;;  %v3583_v45 = vrot.slane %v3581_v35, 5  ;;  %v1725_v31 = vld [vmem:[#allocation2 + $0x108] sm:$0xe] }
 0x1d6   :  { %v1598_v2 = vadd.f32 %v1597_v10, %v10788_v43  ;;  %v9502_v18 = vrot.slane %v1725_v31, 9 }
 0x1d7   :  { %v11083_v5 = vadd.f32 %v4122_v47, %v2964_v55  ;;  %v2280_v8 = vpop.f32.mrf.mxu2  ;;  %v3569_v6 = vrot.slane %v3568_v14, 4  ;;  %v3579_v55 = vrot.slane %v3578_v38, 4  ;;  %v3588_v38 = vrot.slane %v3586_v19, 4 }
 0x1d8   :  { %v2410_v63 = vadd.f32 %v2280_v8, %v1596_v44  ;;  %v3595_v44 = vshll.u32 %v3070_v39, 16  ;;  %v3599_v8 = vshrl.u32 %v3070_v39, 16 }
 0x1d9   :  { %2874 = vmatmul.bf16.gmra.mxu3 %v10132_v22  ;;  %v10212_v22 = vld [vmem:[#allocation5 + $0x1d0] sm:$0xff]  ;;  %v3574_v43 = vsel %vm10507_vm2, %v3569_v6, %v11080_v34  ;;  %v3584_v10 = vsel %vm10507_vm2, %v3579_v55, %v3583_v45 }
 0x1da   :  { %6694 = vmatpush.bf16.msra.mxu3 %v10212_v22  ;;  %v3601_v20 = vrot.slane %v3599_v8, 4  ;;  %v10296_v22 = vld [vmem:[#allocation2 + $0x110] sm:$0x1]  ;;  %v3928_v34 = vunpack.c.l.b16 %v3574_v43  ;;  %v3929_v6 = vunpack.c.l.b16 %v3584_v10 }
 0x1db   :  { %v4125_v51 = vpop.f32.mrf.mxu0  ;;  %v1949_v52 = vrot.slane %v10296_v22, 5 }
 0x1dc   :  { %v2835_v12 = vpop.f32.mrf.mxu3  ;;  %v3973_v31 = vpack.c.b16 %v3929_v6, %v3928_v34 }
 0x1dd   :  { %v2965_v47 = vadd.f32 %v2835_v12, %v2410_v63  ;;  %v1600_v42 = vpop.f32.mrf.mxu1  ;;  %v2128_v63 = vpack.c.b16 %v2084_v36, %v2083_v24  ;;  %v3591_v12 = vrot.slane %v3589_v0, 5  ;;  %v10133_v24 = vld [vmem:[#allocation2 + $0x108] sm:$0xff] }
 0x1de   :  { %4164 = vmatmul.bf16.gmra.mxu0 %v3972_v1  ;;  %v10295_v1 = vld [vmem:[#allocation2 + $0x10c] sm:$0xf]  ;;  %v1601_v55 = vadd.f32 %v1600_v42, %v10800_v40 }
 0x1df   :  { %v11091_v3 = vadd.f32 %v4125_v51, %v2965_v47  ;;  %v2282_v11 = vpop.f32.mrf.mxu2  ;;  %v1946_v46 = vrot.slane %v10295_v1, 5  ;;  %v10220_v51 = vld [vmem:[#allocation5 + $0x210] sm:$0xff]  ;;  %v3592_v0 = vor.u32 %v3591_v12, %v3588_v38 }
 0x1e0   :  { %1639 = vmatmul.bf16.gmra.mxu1 %v10077_v61  ;;  %v2411_v49 = vadd.f32 %v2282_v11, %v1598_v2  ;;  %v3597_v61 = vrot.slane %v3595_v44, 5  ;;  %v3071_v2 = vld [vmem:[#allocation2 + $0x11c] sm:$0x1]  ;;  %7472 = vmatpush.bf16.msra.mxu0 %v10220_v51  ;;  %v10078_v51 = vld [vmem:[#allocation2 + $0x108] sm:$0xff]  ;;  %v3073_v38 = vld [vmem:[#allocation2 + $0x124] sm:$0xf] }
 0x1e1   :  { %v1948_v39 = vrot.slane %v1946_v46, 4  ;;  %v1947_v11 = vsel %vm10720_vm5, %v9502_v18, %v1946_v46  ;;  %v3605_v8 = vshll.u32 %v3071_v2, 16  ;;  %v3593_v42 = vrot.slane %v3592_v0, 4  ;;  %v3072_v46 = vld [vmem:[#allocation2 + $0x120] sm:$0xf] }
 0x1e2   :  { %v3602_v44 = vor.u32 %v3601_v20, %v3597_v61  ;;  %v2085_v43 = vunpack.c.l.b16 %v1947_v11  ;;  %v3610_v34 = vshrl.u32 %v3072_v46, 16  ;;  %v3613_v6 = vshll.u32 %v3072_v46, 16 }
 0x1e3   :  { %v4127_v14 = vpop.f32.mrf.mxu0  ;;  %v3623_v0 = vshrl.u32 %v3073_v38, 16 }
 0x1e4   :  { %v2837_v35 = vpop.f32.mrf.mxu3  ;;  %2324 = vmatmul.bf16.gmra.mxu2 %v2128_v63  ;;  %v1950_v63 = vsel %vm10720_vm5, %v1948_v39, %v1949_v52  ;;  %v3598_v39 = vsel %vm10507_vm2, %v3593_v42, %v3597_v61  ;;  %v3612_v61 = vrot.slane %v3610_v34, 4  ;;  %v10298_v42 = vld [vmem:[#allocation2 + $0x11c] sm:$0x1] }
 0x1e5   :  { %v2966_v47 = vadd.f32 %v2837_v35, %v2411_v49  ;;  %v1602_v36 = vpop.f32.mrf.mxu1  ;;  %v2086_v40 = vunpack.c.l.b16 %v1950_v63  ;;  %v3607_v35 = vrot.slane %v3605_v8, 5  ;;  %v3930_v8 = vunpack.c.l.b16 %v3598_v39 }
 0x1e6   :  { %v1603_v18 = vadd.f32 %v1602_v36, %v10812_v50  ;;  %v1726_v50 = vld [vmem:[#allocation2 + $0x114] sm:$0xe] }
 0x1e7   :  { %v11099_v45 = vadd.f32 %v4127_v14, %v2966_v47  ;;  %v2285_v19 = vpop.f32.mrf.mxu2  ;;  %v3603_v14 = vrot.slane %v3602_v44, 4 }
 0x1e8   :  { %v2412_v49 = vadd.f32 %v2285_v19, %v1601_v55  ;;  %v3619_v55 = vshll.u32 %v3073_v38, 16  ;;  %v10297_v19 = vld [vmem:[#allocation2 + $0x118] sm:$0xf] }
 0x1e9   :  { %2879 = vmatmul.bf16.gmra.mxu3 %v10133_v24  ;;  %v2129_v24 = vpack.c.b16 %v2086_v40, %v2085_v43  ;;  %v3608_v52 = vsel %vm10507_vm2, %v3603_v14, %v3607_v35  ;;  %v1953_v11 = vrot.slane %v10297_v19, 5  ;;  %v3615_v43 = vrot.slane %v3613_v6, 5 }
 0x1ea   :  { %v1956_v14 = vrot.slane %v10298_v42, 5  ;;  %v3625_v35 = vrot.slane %v3623_v0, 4  ;;  %v10079_v0 = vld [vmem:[#allocation2 + $0x114] sm:$0xff] }
 0x1eb   :  { %v4130_v1 = vpop.f32.mrf.mxu0  ;;  %v1955_v40 = vrot.slane %v1953_v11, 4 }
 0x1ec   :  { %v2840_v10 = vpop.f32.mrf.mxu3 }
 0x1ed   :  { %v2967_v47 = vadd.f32 %v2840_v10, %v2412_v49  ;;  %v1605_v22 = vpop.f32.mrf.mxu1  ;;  %v3931_v49 = vunpack.c.l.b16 %v3608_v52  ;;  %v3621_v10 = vrot.slane %v3619_v55, 5  ;;  %v1957_v52 = vsel %vm10720_vm5, %v1955_v40, %v1956_v14 }
 0x1ee   :  { %4169 = vmatmul.bf16.gmra.mxu0 %v3973_v31  ;;  %v10134_v31 = vld [vmem:[#allocation2 + $0x114] sm:$0xff] }
 0x1ef   :  { %v11106_v12 = vadd.f32 %v4130_v1, %v2967_v47  ;;  %v2287_v20 = vpop.f32.mrf.mxu2  ;;  %v1606_v47 = vadd.f32 %v1605_v22, %v10824_v56  ;;  %v3626_v34 = vor.u32 %v3625_v35, %v3621_v10  ;;  %v3075_v56 = vld [vmem:[#allocation2 + $0x12c] sm:$0xf] }
 0x1f0   :  { %1644 = vmatmul.bf16.gmra.mxu1 %v10078_v51  ;;  %v2413_v2 = vadd.f32 %v2287_v20, %v1603_v18  ;;  %v9503_v51 = vrot.slane %v1726_v50, 9  ;;  %v3074_v18 = vld [vmem:[#allocation2 + $0x128] sm:$0x1]  ;;  %v3974_v20 = vpack.c.b16 %v3931_v49, %v3930_v8 }
 0x1f1   :  { %v3629_v55 = vshll.u32 %v3074_v18, 16  ;;  %v3627_v49 = vrot.slane %v3626_v34, 4  ;;  %v10299_v18 = vld [vmem:[#allocation2 + $0x124] sm:$0xf] }
 0x1f3   :  { %v4132_v44 = vpop.f32.mrf.mxu0 }
 0x1f4   :  { %v2842_v36 = vpop.f32.mrf.mxu3  ;;  %2329 = vmatmul.bf16.gmra.mxu2 %v2129_v24  ;;  %v1954_v24 = vsel %vm10720_vm5, %v9503_v51, %v1953_v11  ;;  %v3634_v51 = vshrl.u32 %v3075_v56, 16 }
 0x1f5   :  { %v2968_v63 = vadd.f32 %v2842_v36, %v2413_v2  ;;  %v1607_v1 = vpop.f32.mrf.mxu1  ;;  %v3616_v2 = vor.u32 %v3615_v43, %v3612_v61  ;;  %v2087_v50 = vunpack.c.l.b16 %v1954_v24  ;;  %v2088_v36 = vunpack.c.l.b16 %v1957_v52 }
 0x1f6   :  { %v1608_v11 = vadd.f32 %v1607_v1, %v10834_v32  ;;  %v3637_v43 = vshll.u32 %v3075_v56, 16  ;;  %v3636_v1 = vrot.slane %v3634_v51, 4 }
 0x1f7   :  { %v11113_v46 = vadd.f32 %v4132_v44, %v2968_v63  ;;  %v2290_v38 = vpop.f32.mrf.mxu2  ;;  %v3076_v63 = vld [vmem:[#allocation2 + $0x130] sm:$0xf]  ;;  %v3617_v8 = vrot.slane %v3616_v2, 4 }
 0x1f8   :  { %v2414_v39 = vadd.f32 %v2290_v38, %v1606_v47  ;;  %v3643_v42 = vshll.u32 %v3076_v63, 16  ;;  %v3647_v14 = vshrl.u32 %v3076_v63, 16  ;;  %v2130_v47 = vpack.c.b16 %v2088_v36, %v2087_v50  ;;  %v1727_v38 = vld [vmem:[#allocation2 + $0x120] sm:$0xe]  ;;  %v10300_v50 = vld [vmem:[#allocation2 + $0x128] sm:$0x1] }
 0x1f9   :  { %2884 = vmatmul.bf16.gmra.mxu3 %v10134_v31  ;;  %v3631_v31 = vrot.slane %v3629_v55, 5  ;;  %v9504_v2 = vrot.slane %v1727_v38, 9  ;;  %v3639_v34 = vrot.slane %v3637_v43, 5  ;;  %v1963_v36 = vrot.slane %v10300_v50, 5  ;;  %v3077_v63 = vld [vmem:[#allocation2 + $0x134] sm:$0x1] }
 0x1fa   :  { %v3649_v55 = vrot.slane %v3647_v14, 4 }
 0x1fb   :  { %v4135_v6 = vpop.f32.mrf.mxu0  ;;  %v3632_v32 = vsel %vm10507_vm2, %v3627_v49, %v3631_v31  ;;  %v3640_v51 = vor.u32 %v3639_v34, %v3636_v1  ;;  %v3079_v1 = vld [vmem:[#allocation2 + $0x13c] sm:$0xf] }
 0x1fc   :  { %v2845_v19 = vpop.f32.mrf.mxu3 }
 0x1fd   :  { %v2969_v22 = vadd.f32 %v2845_v19, %v2414_v39  ;;  %v1610_v44 = vpop.f32.mrf.mxu1  ;;  %v1960_v39 = vrot.slane %v10299_v18, 5 }
 0x1fe   :  { %4174 = vmatmul.bf16.gmra.mxu0 %v3974_v20  ;;  %v3622_v20 = vsel %vm10507_vm2, %v3617_v8, %v3621_v10  ;;  %v1611_v10 = vadd.f32 %v1610_v44, %v10846_v9  ;;  %v3641_v44 = vrot.slane %v3640_v51, 4  ;;  %v3671_v51 = vshrl.u32 %v3079_v1, 16 }
 0x1ff   :  { %v11120_v40 = vadd.f32 %v4135_v6, %v2969_v22  ;;  %v2292_v61 = vpop.f32.mrf.mxu2  ;;  %v3645_v6 = vrot.slane %v3643_v42, 5  ;;  %v1962_v22 = vrot.slane %v1960_v39, 4  ;;  %v1961_v31 = vsel %vm10720_vm5, %v9504_v2, %v1960_v39  ;;  %v3078_v39 = vld [vmem:[#allocation2 + $0x138] sm:$0xf] }
 0x200   :  { %1649 = vmatmul.bf16.gmra.mxu1 %v10079_v0  ;;  %v2415_v35 = vadd.f32 %v2292_v61, %v1608_v11  ;;  %v10135_v0 = vld [vmem:[#allocation2 + $0x120] sm:$0xff]  ;;  %v3932_v11 = vunpack.c.l.b16 %v3622_v20  ;;  %v3933_v61 = vunpack.c.l.b16 %v3632_v32  ;;  %v3653_v42 = vshll.u32 %v3077_v63, 16 }
 0x201   :  { %v3650_v43 = vor.u32 %v3649_v55, %v3645_v6  ;;  %v2089_v18 = vunpack.c.l.b16 %v1961_v31  ;;  %v10080_v32 = vld [vmem:[#allocation2 + $0x120] sm:$0xff] }
 0x203   :  { %v4137_v24 = vpop.f32.mrf.mxu0 }
 0x204   :  { %v2847_v52 = vpop.f32.mrf.mxu3  ;;  %2334 = vmatmul.bf16.gmra.mxu2 %v2130_v47  ;;  %v3975_v47 = vpack.c.b16 %v3933_v61, %v3932_v11  ;;  %v3658_v11 = vshrl.u32 %v3078_v39, 16  ;;  %v3661_v61 = vshll.u32 %v3078_v39, 16 }
 0x205   :  { %v2970_v19 = vadd.f32 %v2847_v52, %v2415_v35  ;;  %v1612_v56 = vpop.f32.mrf.mxu1  ;;  %v1964_v35 = vsel %vm10720_vm5, %v1962_v22, %v1963_v36  ;;  %v3655_v52 = vrot.slane %v3653_v42, 5  ;;  %v3646_v22 = vsel %vm10507_vm2, %v3641_v44, %v3645_v6  ;;  %v10302_v44 = vld [vmem:[#allocation2 + $0x134] sm:$0x1] }
 0x206   :  { %v2090_v9 = vunpack.c.l.b16 %v1964_v35  ;;  %v1613_v2 = vadd.f32 %v1612_v56, %v10856_v54  ;;  %v1728_v54 = vld [vmem:[#allocation2 + $0x12c] sm:$0xe]  ;;  %v3934_v42 = vunpack.c.l.b16 %v3646_v22  ;;  %v3660_v6 = vrot.slane %v3658_v11, 4 }
 0x207   :  { %v11127_v8 = vadd.f32 %v4137_v24, %v2970_v19  ;;  %v2295_v49 = vpop.f32.mrf.mxu2  ;;  %v3651_v24 = vrot.slane %v3650_v43, 4 }
 0x208   :  { %v2416_v14 = vadd.f32 %v2295_v49, %v1611_v10  ;;  %v3667_v10 = vshll.u32 %v3079_v1, 16  ;;  %v10301_v49 = vld [vmem:[#allocation2 + $0x130] sm:$0xf] }
 0x209   :  { %2889 = vmatmul.bf16.gmra.mxu3 %v10135_v0  ;;  %v2131_v0 = vpack.c.b16 %v2090_v9, %v2089_v18  ;;  %v3656_v36 = vsel %vm10507_vm2, %v3651_v24, %v3655_v52  ;;  %v1967_v31 = vrot.slane %v10301_v49, 5  ;;  %v3663_v18 = vrot.slane %v3661_v61, 5  ;;  %v10203_v49 = vld [vmem:[#allocation5 + $0x188] sm:$0xff] }
 0x20a   :  { %v1970_v24 = vrot.slane %v10302_v44, 5  ;;  %v3673_v52 = vrot.slane %v3671_v51, 4  ;;  %v3081_v51 = vld [vmem:[#allocation2 + $0x144] sm:$0xf]  ;;  %5405 = vmatpush.bf16.msra.mxu2 %v10203_v49 }
 0x20b   :  { %v4140_v38 = vpop.f32.mrf.mxu0  ;;  %v1969_v9 = vrot.slane %v1967_v31, 4 }
 0x20c   :  { %v2850_v20 = vpop.f32.mrf.mxu3 }
 0x20d   :  { %v2971_v19 = vadd.f32 %v2850_v20, %v2416_v14  ;;  %v1615_v50 = vpop.f32.mrf.mxu1  ;;  %v3935_v14 = vunpack.c.l.b16 %v3656_v36  ;;  %v11140_v20 = vrot.slane %v3667_v10, 5  ;;  %v1971_v36 = vsel %vm10720_vm5, %v1969_v9, %v1970_v24 }
 0x20e   :  { %4179 = vmatmul.bf16.gmra.mxu0 %v3975_v47  ;;  %v10136_v47 = vld [vmem:[#allocation2 + $0x12c] sm:$0xff]  ;;  %v3682_v9 = vshrl.u32 %v3081_v51, 16 }
 0x20f   :  { %v11134_v34 = vadd.f32 %v4140_v38, %v2971_v19  ;;  %v2297_v55 = vpop.f32.mrf.mxu2  ;;  %v1616_v19 = vadd.f32 %v1615_v50, %v10870_v37  ;;  %v3674_v11 = vor.u32 %v3673_v52, %v11140_v20  ;;  %v10081_v50 = vld [vmem:[#allocation2 + $0x12c] sm:$0xff]  ;;  %v3685_v52 = vshll.u32 %v3081_v51, 16 }
 0x210   :  { %1654 = vmatmul.bf16.gmra.mxu1 %v10080_v32  ;;  %v2417_v63 = vadd.f32 %v2297_v55, %v1613_v2  ;;  %v9505_v32 = vrot.slane %v1728_v54, 9  ;;  %v3080_v2 = vld [vmem:[#allocation2 + $0x140] sm:$0x1]  ;;  %v3976_v55 = vpack.c.b16 %v3935_v14, %v3934_v42  ;;  %v2092_v42 = vunpack.c.l.b16 %v1971_v36  ;;  %v3082_v14 = vld [vmem:[#allocation2 + $0x148] sm:$0xf] }
 0x211   :  { %v3677_v10 = vshll.u32 %v3080_v2, 16 }
 0x212   :  { %v1968_v22 = vsel %vm10720_vm5, %v9505_v32, %v1967_v31  ;;  %v10163_v32 = vld [vmem:[#allocation5 + $0x148] sm:$0xff] }
 0x213   :  { %v4142_v43 = vpop.f32.mrf.mxu0  ;;  %4850 = vmatpush.bf16.msra.mxu1 %v10163_v32 }
 0x214   :  { %v2852_v56 = vpop.f32.mrf.mxu3  ;;  %2339 = vmatmul.bf16.gmra.mxu2 %v2131_v0 }
 0x215   :  { %v2972_v35 = vadd.f32 %v2852_v56, %v2417_v63  ;;  %v1617_v38 = vpop.f32.mrf.mxu1  ;;  %v3664_v63 = vor.u32 %v3663_v18, %v3660_v6  ;;  %v2091_v56 = vunpack.c.l.b16 %v1968_v22  ;;  %v3679_v18 = vrot.slane %v3677_v10, 5  ;;  %v1729_v22 = vld [vmem:[#allocation2 + $0x138] sm:$0xe] }
 0x216   :  { %v1618_v6 = vadd.f32 %v1617_v38, %v10887_v58  ;;  %v9506_v49 = vrot.slane %v1729_v22, 9 }
 0x217   :  { %v11143_v39 = vadd.f32 %v4142_v43, %v2972_v35  ;;  %v2300_v1 = vpop.f32.mrf.mxu2  ;;  %v3665_v31 = vrot.slane %v3664_v63, 4  ;;  %v3675_v35 = vrot.slane %v3674_v11, 4  ;;  %v3684_v11 = vrot.slane %v3682_v9, 4 }
 0x218   :  { %v2418_v0 = vadd.f32 %v2300_v1, %v1616_v19  ;;  %v3691_v19 = vshll.u32 %v3082_v14, 16  ;;  %v3695_v1 = vshrl.u32 %v3082_v14, 16 }
 0x219   :  { %2894 = vmatmul.bf16.gmra.mxu3 %v10136_v47  ;;  %v10211_v47 = vld [vmem:[#allocation5 + $0x1c8] sm:$0xff]  ;;  %v3670_v58 = vsel %vm10507_vm2, %v3665_v31, %v11140_v20  ;;  %v3680_v38 = vsel %vm10507_vm2, %v3675_v35, %v3679_v18 }
 0x21a   :  { %6695 = vmatpush.bf16.msra.mxu3 %v10211_v47  ;;  %v3697_v51 = vrot.slane %v3695_v1, 4  ;;  %v10304_v47 = vld [vmem:[#allocation2 + $0x140] sm:$0x1]  ;;  %v3936_v20 = vunpack.c.l.b16 %v3670_v58  ;;  %v3937_v31 = vunpack.c.l.b16 %v3680_v38 }
 0x21b   :  { %v4145_v61 = vpop.f32.mrf.mxu0  ;;  %v1977_v32 = vrot.slane %v10304_v47, 5 }
 0x21c   :  { %v2855_v37 = vpop.f32.mrf.mxu3  ;;  %v3977_v22 = vpack.c.b16 %v3937_v31, %v3936_v20 }
 0x21d   :  { %v2973_v43 = vadd.f32 %v2855_v37, %v2418_v0  ;;  %v1620_v54 = vpop.f32.mrf.mxu1  ;;  %v2132_v0 = vpack.c.b16 %v2092_v42, %v2091_v56  ;;  %v3687_v37 = vrot.slane %v3685_v52, 5  ;;  %v10137_v56 = vld [vmem:[#allocation2 + $0x138] sm:$0xff] }
 0x21e   :  { %4184 = vmatmul.bf16.gmra.mxu0 %v3976_v55  ;;  %v10303_v55 = vld [vmem:[#allocation2 + $0x13c] sm:$0xf]  ;;  %v1621_v35 = vadd.f32 %v1620_v54, %v10900_v41 }
 0x21f   :  { %v11151_v44 = vadd.f32 %v4145_v61, %v2973_v43  ;;  %v2302_v24 = vpop.f32.mrf.mxu2  ;;  %v1974_v36 = vrot.slane %v10303_v55, 5  ;;  %v10219_v61 = vld [vmem:[#allocation5 + $0x208] sm:$0xff]  ;;  %v3688_v52 = vor.u32 %v3687_v37, %v3684_v11  ;;  %v3085_v11 = vld [vmem:[#allocation2 + $0x154] sm:$0xf] }
 0x220   :  { %1659 = vmatmul.bf16.gmra.mxu1 %v10081_v50  ;;  %v2419_v2 = vadd.f32 %v2302_v24, %v1618_v6  ;;  %v3693_v50 = vrot.slane %v3691_v19, 5  ;;  %v3083_v6 = vld [vmem:[#allocation2 + $0x14c] sm:$0x1]  ;;  %7473 = vmatpush.bf16.msra.mxu0 %v10219_v61  ;;  %v10082_v61 = vld [vmem:[#allocation2 + $0x138] sm:$0xff] }
 0x221   :  { %14123 = vst [vmem:[#allocation44_spill] sm:$0xff] %v11151_v44  ;;  %v1976_v14 = vrot.slane %v1974_v36, 4  ;;  %v1975_v24 = vsel %vm10720_vm5, %v9506_v49, %v1974_v36  ;;  %v3701_v1 = vshll.u32 %v3083_v6, 16  ;;  %v3689_v54 = vrot.slane %v3688_v52, 4  ;;  %v3084_v36 = vld [vmem:[#allocation2 + $0x150] sm:$0xf] }
 0x222   :  { %v3698_v19 = vor.u32 %v3697_v51, %v3693_v50  ;;  %v2093_v58 = vunpack.c.l.b16 %v1975_v24  ;;  %v3706_v20 = vshrl.u32 %v3084_v36, 16  ;;  %v3709_v31 = vshll.u32 %v3084_v36, 16  ;;  %v11560_v44 = vld [vmem:[#allocation2 + $0x8c] sm:$0x1] }
 0x223   :  { %v4147_v63 = vpop.f32.mrf.mxu0  ;;  %v3719_v52 = vshrl.u32 %v3085_v11, 16 }
 0x224   :  { %v2857_v10 = vpop.f32.mrf.mxu3  ;;  %2344 = vmatmul.bf16.gmra.mxu2 %v2132_v0  ;;  %v1978_v0 = vsel %vm10720_vm5, %v1976_v14, %v1977_v32  ;;  %v3694_v14 = vsel %vm10507_vm2, %v3689_v54, %v3693_v50  ;;  %v3708_v50 = vrot.slane %v3706_v20, 4  ;;  %v10306_v54 = vld [vmem:[#allocation2 + $0x14c] sm:$0x1] }
 0x225   :  { %v2974_v43 = vadd.f32 %v2857_v10, %v2419_v2  ;;  %v1622_v42 = vpop.f32.mrf.mxu1  ;;  %v2094_v41 = vunpack.c.l.b16 %v1978_v0  ;;  %v3703_v10 = vrot.slane %v3701_v1, 5  ;;  %v3938_v1 = vunpack.c.l.b16 %v3694_v14 }
 0x226   :  { %v1623_v49 = vadd.f32 %v1622_v42, %v10912_v30  ;;  %v1730_v30 = vld [vmem:[#allocation2 + $0x144] sm:$0xe] }
 0x227   :  { %v11159_v18 = vadd.f32 %v4147_v63, %v2974_v43  ;;  %v2305_v9 = vpop.f32.mrf.mxu2  ;;  %v3699_v63 = vrot.slane %v3698_v19, 4 }
 0x228   :  { %v2420_v2 = vadd.f32 %v2305_v9, %v1621_v35  ;;  %v3715_v35 = vshll.u32 %v3085_v11, 16  ;;  %v10305_v9 = vld [vmem:[#allocation2 + $0x148] sm:$0xf] }
 0x229   :  { %14124 = vst [vmem:[#allocation45_spill] sm:$0xff] %v11159_v18  ;;  %2899 = vmatmul.bf16.gmra.mxu3 %v10137_v56  ;;  %v2133_v56 = vpack.c.b16 %v2094_v41, %v2093_v58  ;;  %v3704_v32 = vsel %vm10507_vm2, %v3699_v63, %v3703_v10  ;;  %v1981_v24 = vrot.slane %v10305_v9, 5  ;;  %v3711_v58 = vrot.slane %v3709_v31, 5 }
 0x22a   :  { %v1984_v63 = vrot.slane %v10306_v54, 5  ;;  %v3721_v10 = vrot.slane %v3719_v52, 4  ;;  %v10083_v52 = vld [vmem:[#allocation2 + $0x144] sm:$0xff] }
 0x22b   :  { %v4150_v55 = vpop.f32.mrf.mxu0  ;;  %v1983_v41 = vrot.slane %v1981_v24, 4 }
 0x22c   :  { %v2860_v38 = vpop.f32.mrf.mxu3 }
 0x22d   :  { %v2975_v43 = vadd.f32 %v2860_v38, %v2420_v2  ;;  %v1625_v47 = vpop.f32.mrf.mxu1  ;;  %v3939_v2 = vunpack.c.l.b16 %v3704_v32  ;;  %v3717_v38 = vrot.slane %v3715_v35, 5  ;;  %v1985_v32 = vsel %vm10720_vm5, %v1983_v41, %v1984_v63 }
 0x22e   :  { %4189 = vmatmul.bf16.gmra.mxu0 %v3977_v22  ;;  %v10138_v22 = vld [vmem:[#allocation2 + $0x144] sm:$0xff] }
 0x22f   :  { %v11166_v37 = vadd.f32 %v4150_v55, %v2975_v43  ;;  %v2307_v51 = vpop.f32.mrf.mxu2  ;;  %v1626_v43 = vadd.f32 %v1625_v47, %v10736_v26  ;;  %v3722_v20 = vor.u32 %v3721_v10, %v3717_v38  ;;  %v3087_v26 = vld [vmem:[#allocation2 + $0x15c] sm:$0xf] }
 0x230   :  { %1664 = vmatmul.bf16.gmra.mxu1 %v10082_v61  ;;  %v2421_v6 = vadd.f32 %v2307_v51, %v1623_v49  ;;  %v9507_v61 = vrot.slane %v1730_v30, 9  ;;  %v3086_v49 = vld [vmem:[#allocation2 + $0x158] sm:$0x1]  ;;  %v3978_v51 = vpack.c.b16 %v3939_v2, %v3938_v1  ;;  %v3730_v54 = vshrl.u32 %v3087_v26, 16 }
 0x231   :  { %14125 = vst [vmem:[#allocation46_spill] sm:$0xff] %v11166_v37  ;;  %v3725_v35 = vshll.u32 %v3086_v49, 16  ;;  %v3723_v2 = vrot.slane %v3722_v20, 4  ;;  %v1731_v49 = vld [vmem:[#allocation2 + $0x150] sm:$0xe] }
 0x233   :  { %v4152_v19 = vpop.f32.mrf.mxu0 }
 0x234   :  { %v2862_v42 = vpop.f32.mrf.mxu3  ;;  %2349 = vmatmul.bf16.gmra.mxu2 %v2133_v56  ;;  %v1982_v56 = vsel %vm10720_vm5, %v9507_v61, %v1981_v24  ;;  %v3727_v61 = vrot.slane %v3725_v35, 5 }
 0x235   :  { %v2976_v0 = vadd.f32 %v2862_v42, %v2421_v6  ;;  %v1627_v55 = vpop.f32.mrf.mxu1  ;;  %v3712_v6 = vor.u32 %v3711_v58, %v3708_v50  ;;  %v2095_v30 = vunpack.c.l.b16 %v1982_v56  ;;  %v2096_v42 = vunpack.c.l.b16 %v1985_v32 }
 0x236   :  { %v3733_v58 = vshll.u32 %v3087_v26, 16 }
 0x237   :  { %v11173_v36 = vadd.f32 %v4152_v19, %v2976_v0  ;;  %v2310_v11 = vpop.f32.mrf.mxu2  ;;  %v3088_v0 = vld [vmem:[#allocation2 + $0x160] sm:$0xf]  ;;  %v3713_v1 = vrot.slane %v3712_v6, 4  ;;  %v3732_v6 = vrot.slane %v3730_v54, 4 }
 0x238   :  { %v2422_v14 = vadd.f32 %v2310_v11, %v1626_v43  ;;  %v3739_v63 = vshll.u32 %v3088_v0, 16  ;;  %v3743_v10 = vshrl.u32 %v3088_v0, 16  ;;  %v2134_v11 = vpack.c.b16 %v2096_v42, %v2095_v30  ;;  %v10308_v0 = vld [vmem:[#allocation2 + $0x158] sm:$0x1] }
 0x239   :  { %14126 = vst [vmem:[#allocation47_spill] sm:$0xff] %v11173_v36  ;;  %2904 = vmatmul.bf16.gmra.mxu3 %v10138_v22  ;;  %v14127_v22 = vld [vmem:[#allocation12_spill] sm:$0xff]  ;;  %v3735_v35 = vrot.slane %v3733_v58, 5  ;;  %v14149_v36 = vld [vmem:[#allocation34_spill] sm:$0xff] }
 0x23a   :  { %v1628_v24 = vadd.f32 %v1627_v55, %v14127_v22  ;;  %v3728_v55 = vsel %vm10507_vm2, %v3723_v2, %v3727_v61  ;;  %v1991_v22 = vrot.slane %v10308_v0, 5 }
 0x23b   :  { %v4155_v31 = vpop.f32.mrf.mxu0  ;;  %v3736_v54 = vor.u32 %v3735_v35, %v3732_v6  ;;  %v3091_v6 = vld [vmem:[#allocation2 + $0x16c] sm:$0xf] }
 0x23c   :  { %v2865_v9 = vpop.f32.mrf.mxu3 }
 0x23d   :  { %v2977_v47 = vadd.f32 %v2865_v9, %v2422_v14  ;;  %v1630_v19 = vpop.f32.mrf.mxu1  ;;  %v10307_v14 = vld [vmem:[#allocation2 + $0x154] sm:$0xf]  ;;  %v3741_v9 = vrot.slane %v3739_v63, 5 }
 0x23e   :  { %4194 = vmatmul.bf16.gmra.mxu0 %v3978_v51  ;;  %v1988_v56 = vrot.slane %v10307_v14, 5  ;;  %v3718_v51 = vsel %vm10507_vm2, %v3713_v1, %v3717_v38  ;;  %v3941_v14 = vunpack.c.l.b16 %v3728_v55  ;;  %v14129_v38 = vld [vmem:[#allocation14_spill] sm:$0xff] }
 0x23f   :  { %v11180_v41 = vadd.f32 %v4155_v31, %v2977_v47  ;;  %v2312_v50 = vpop.f32.mrf.mxu2  ;;  %v9508_v31 = vrot.slane %v1731_v49, 9  ;;  %v10139_v47 = vld [vmem:[#allocation2 + $0x150] sm:$0xff]  ;;  %v1631_v1 = vadd.f32 %v1630_v19, %v14129_v38 }
 0x240   :  { %1669 = vmatmul.bf16.gmra.mxu1 %v10083_v52  ;;  %v2423_v43 = vadd.f32 %v2312_v50, %v1628_v24  ;;  %v3745_v52 = vrot.slane %v3743_v10, 4  ;;  %v1990_v42 = vrot.slane %v1988_v56, 4  ;;  %v3089_v24 = vld [vmem:[#allocation2 + $0x164] sm:$0x1]  ;;  %v3940_v50 = vunpack.c.l.b16 %v3718_v51 }
 0x241   :  { %14128 = vst [vmem:[#allocation12_spill] sm:$0xff] %v11180_v41  ;;  %v1989_v61 = vsel %vm10720_vm5, %v9508_v31, %v1988_v56  ;;  %v3749_v63 = vshll.u32 %v3089_v24, 16  ;;  %v3090_v56 = vld [vmem:[#allocation2 + $0x168] sm:$0xf] }
 0x242   :  { %v3746_v58 = vor.u32 %v3745_v52, %v3741_v9  ;;  %v2097_v51 = vunpack.c.l.b16 %v1989_v61  ;;  %v14131_v31 = vld [vmem:[#allocation16_spill] sm:$0xff]  ;;  %v10309_v61 = vld [vmem:[#allocation2 + $0x160] sm:$0xf] }
 0x243   :  { %v4157_v32 = vpop.f32.mrf.mxu0  ;;  %v3751_v0 = vrot.slane %v3749_v63, 5 }
 0x244   :  { %v2867_v20 = vpop.f32.mrf.mxu3  ;;  %2354 = vmatmul.bf16.gmra.mxu2 %v2134_v11  ;;  %v3979_v11 = vpack.c.b16 %v3941_v14, %v3940_v50  ;;  %v3754_v14 = vshrl.u32 %v3090_v56, 16 }
 0x245   :  { %v2978_v26 = vadd.f32 %v2867_v20, %v2423_v43  ;;  %v1632_v30 = vpop.f32.mrf.mxu1  ;;  %v1992_v43 = vsel %vm10720_vm5, %v1990_v42, %v1991_v22  ;;  %v10084_v20 = vld [vmem:[#allocation2 + $0x150] sm:$0xff] }
 0x246   :  { %v2098_v19 = vunpack.c.l.b16 %v1992_v43  ;;  %v1633_v35 = vadd.f32 %v1632_v30, %v14131_v31  ;;  %v1732_v30 = vld [vmem:[#allocation2 + $0x15c] sm:$0xe] }
 0x247   :  { %v11187_v41 = vadd.f32 %v4157_v32, %v2978_v26  ;;  %v2315_v2 = vpop.f32.mrf.mxu2  ;;  %v3737_v32 = vrot.slane %v3736_v54, 4  ;;  %v3747_v26 = vrot.slane %v3746_v58, 4  ;;  %v1995_v54 = vrot.slane %v10309_v61, 5  ;;  %v14133_v31 = vld [vmem:[#allocation18_spill] sm:$0xff] }
 0x248   :  { %v2424_v10 = vadd.f32 %v2315_v2, %v1631_v1  ;;  %v2135_v42 = vpack.c.b16 %v2098_v19, %v2097_v51  ;;  %v3757_v1 = vshll.u32 %v3090_v56, 16  ;;  %v3763_v2 = vshll.u32 %v3091_v6, 16  ;;  %v10140_v51 = vld [vmem:[#allocation2 + $0x15c] sm:$0xff] }
 0x249   :  { %14130 = vst [vmem:[#allocation14_spill] sm:$0xff] %v11187_v41  ;;  %2909 = vmatmul.bf16.gmra.mxu3 %v10139_v47  ;;  %v3742_v22 = vsel %vm10507_vm2, %v3737_v32, %v3741_v9  ;;  %v3752_v24 = vsel %vm10507_vm2, %v3747_v26, %v3751_v0  ;;  %v3767_v58 = vshrl.u32 %v3091_v6, 16  ;;  %v3756_v9 = vrot.slane %v3754_v14, 4  ;;  %v10310_v0 = vld [vmem:[#allocation2 + $0x164] sm:$0x1] }
 0x24a   :  { %v3942_v43 = vunpack.c.l.b16 %v3742_v22  ;;  %v11200_v19 = vrot.slane %v3763_v2, 5  ;;  %v9509_v32 = vrot.slane %v1732_v30, 9  ;;  %v1997_v26 = vrot.slane %v1995_v54, 4  ;;  %v3092_v22 = vld [vmem:[#allocation2 + $0x170] sm:$0x1] }
 0x24b   :  { %v4160_v49 = vpop.f32.mrf.mxu0  ;;  %v3769_v56 = vrot.slane %v3767_v58, 4  ;;  %v3773_v58 = vshll.u32 %v3092_v22, 16  ;;  %v10202_v30 = vld [vmem:[#allocation5 + $0x180] sm:$0xff] }
 0x24c   :  { %v2870_v55 = vpop.f32.mrf.mxu3  ;;  %5406 = vmatpush.bf16.msra.mxu2 %v10202_v30  ;;  %v1733_v30 = vld [vmem:[#allocation2 + $0x168] sm:$0xe] }
 0x24d   :  { %v2979_v38 = vadd.f32 %v2870_v55, %v2424_v10  ;;  %v1635_v41 = vpop.f32.mrf.mxu1  ;;  %v3770_v2 = vor.u32 %v3769_v56, %v11200_v19 }
 0x24e   :  { %4199 = vmatmul.bf16.gmra.mxu0 %v3979_v11  ;;  %v3943_v11 = vunpack.c.l.b16 %v3752_v24  ;;  %v1636_v6 = vadd.f32 %v1635_v41, %v14133_v31  ;;  %v10210_v31 = vld [vmem:[#allocation5 + $0x1c0] sm:$0xff] }
 0x24f   :  { %v11194_v52 = vadd.f32 %v4160_v49, %v2979_v38  ;;  %v2317_v47 = vpop.f32.mrf.mxu2  ;;  %v1998_v38 = vrot.slane %v10310_v0, 5  ;;  %6696 = vmatpush.bf16.msra.mxu3 %v10210_v31 }
 0x250   :  { %1674 = vmatmul.bf16.gmra.mxu1 %v10084_v20  ;;  %v2425_v50 = vadd.f32 %v2317_v47, %v1633_v35  ;;  %v3759_v20 = vrot.slane %v3757_v1, 5  ;;  %v3980_v24 = vpack.c.b16 %v3943_v11, %v3942_v43  ;;  %v3094_v11 = vld [vmem:[#allocation2 + $0x178] sm:$0xf] }
 0x251   :  { %14132 = vst [vmem:[#allocation16_spill] sm:$0xff] %v11194_v52  ;;  %v1999_v14 = vsel %vm10720_vm5, %v1997_v26, %v1998_v38  ;;  %v10162_v26 = vld [vmem:[#allocation5 + $0x140] sm:$0xff]  ;;  %v3775_v38 = vrot.slane %v3773_v58, 5 }
 0x252   :  { %v3760_v1 = vor.u32 %v3759_v20, %v3756_v9  ;;  %v2100_v43 = vunpack.c.l.b16 %v1999_v14  ;;  %v14135_v9 = vld [vmem:[#allocation20_spill] sm:$0xff]  ;;  %4851 = vmatpush.bf16.msra.mxu1 %v10162_v26 }
 0x253   :  { %v4162_v63 = vpop.f32.mrf.mxu0 }
 0x254   :  { %v2872_v10 = vpop.f32.mrf.mxu3  ;;  %2359 = vmatmul.bf16.gmra.mxu2 %v2135_v42 }
 0x255   :  { %v2980_v49 = vadd.f32 %v2872_v10, %v2425_v50  ;;  %v1637_v55 = vpop.f32.mrf.mxu1  ;;  %v1996_v50 = vsel %vm10720_vm5, %v9509_v32, %v1995_v54  ;;  %v3093_v10 = vld [vmem:[#allocation2 + $0x174] sm:$0xf]  ;;  %v3761_v54 = vrot.slane %v3760_v1, 4  ;;  %v3771_v32 = vrot.slane %v3770_v2, 4 }
 0x256   :  { %v1638_v20 = vadd.f32 %v1637_v55, %v14135_v9  ;;  %v3778_v56 = vshrl.u32 %v3093_v10, 16  ;;  %v3781_v22 = vshll.u32 %v3093_v10, 16 }
 0x257   :  { %v11203_v35 = vadd.f32 %v4162_v63, %v2980_v49  ;;  %v2320_v47 = vpop.f32.mrf.mxu2  ;;  %v10085_v63 = vld [vmem:[#allocation2 + $0x15c] sm:$0xff]  ;;  %v3766_v55 = vsel %vm10507_vm2, %v3761_v54, %v11200_v19 }
 0x258   :  { %v2426_v42 = vadd.f32 %v2320_v47, %v1636_v6  ;;  %v3780_v58 = vrot.slane %v3778_v56, 4  ;;  %v3944_v19 = vunpack.c.l.b16 %v3766_v55 }
 0x259   :  { %14134 = vst [vmem:[#allocation18_spill] sm:$0xff] %v11203_v35  ;;  %2914 = vmatmul.bf16.gmra.mxu3 %v10140_v51  ;;  %v2099_v51 = vunpack.c.l.b16 %v1996_v50  ;;  %v14137_v35 = vld [vmem:[#allocation22_spill] sm:$0xff] }
 0x25b   :  { %v4165_v61 = vpop.f32.mrf.mxu0  ;;  %v2136_v14 = vpack.c.b16 %v2100_v43, %v2099_v51  ;;  %v10141_v43 = vld [vmem:[#allocation2 + $0x168] sm:$0xff] }
 0x25c   :  { %v2875_v41 = vpop.f32.mrf.mxu3 }
 0x25d   :  { %v2981_v49 = vadd.f32 %v2875_v41, %v2426_v42  ;;  %v1640_v0 = vpop.f32.mrf.mxu1  ;;  %v3787_v42 = vshll.u32 %v3094_v11, 16  ;;  %v3791_v41 = vshrl.u32 %v3094_v11, 16  ;;  %v3783_v11 = vrot.slane %v3781_v22, 5 }
 0x25e   :  { %4204 = vmatmul.bf16.gmra.mxu0 %v3980_v24  ;;  %v10311_v24 = vld [vmem:[#allocation2 + $0x16c] sm:$0xf] }
 0x25f   :  { %v11211_v6 = vadd.f32 %v4165_v61, %v2981_v49  ;;  %v2322_v47 = vpop.f32.mrf.mxu2  ;;  %v2002_v1 = vrot.slane %v10311_v24, 5  ;;  %v3776_v61 = vsel %vm10507_vm2, %v3771_v32, %v3775_v38  ;;  %v9510_v49 = vrot.slane %v1733_v30, 9 }
 0x260   :  { %1679 = vmatmul.bf16.gmra.mxu1 %v10085_v63  ;;  %v2427_v50 = vadd.f32 %v2322_v47, %v1638_v20  ;;  %v10218_v63 = vld [vmem:[#allocation5 + $0x200] sm:$0xff]  ;;  %v3789_v31 = vrot.slane %v3787_v42, 5  ;;  %v3793_v9 = vrot.slane %v3791_v41, 4  ;;  %v3945_v54 = vunpack.c.l.b16 %v3776_v61 }
 0x261   :  { %14136 = vst [vmem:[#allocation20_spill] sm:$0xff] %v11211_v6  ;;  %v2004_v26 = vrot.slane %v2002_v1, 4  ;;  %v10312_v47 = vld [vmem:[#allocation2 + $0x170] sm:$0x1]  ;;  %v3095_v6 = vld [vmem:[#allocation2 + $0x17c] sm:$0x1]  ;;  %7474 = vmatpush.bf16.msra.mxu0 %v10218_v63  ;;  %v1641_v32 = vadd.f32 %v1640_v0, %v14137_v35  ;;  %v2003_v22 = vsel %vm10720_vm5, %v9510_v49, %v2002_v1  ;;  %v3784_v42 = vor.u32 %v3783_v11, %v3780_v58 }
 0x262   :  { %v2005_v24 = vrot.slane %v10312_v47, 5  ;;  %v3794_v41 = vor.u32 %v3793_v9, %v3789_v31  ;;  %v2101_v55 = vunpack.c.l.b16 %v2003_v22  ;;  %v10086_v47 = vld [vmem:[#allocation2 + $0x168] sm:$0xff]  ;;  %v3096_v1 = vld [vmem:[#allocation2 + $0x180] sm:$0xf]  ;;  %v3097_v58 = vld [vmem:[#allocation2 + $0x184] sm:$0xf] }
 0x263   :  { %v4167_v2 = vpop.f32.mrf.mxu0  ;;  %v3785_v0 = vrot.slane %v3784_v42, 4  ;;  %v10313_v22 = vld [vmem:[#allocation2 + $0x178] sm:$0xf] }
 0x264   :  { %v2877_v10 = vpop.f32.mrf.mxu3  ;;  %2364 = vmatmul.bf16.gmra.mxu2 %v2136_v14  ;;  %v2006_v30 = vsel %vm10720_vm5, %v2004_v26, %v2005_v24  ;;  %v2009_v42 = vrot.slane %v10313_v22, 5 }
 0x265   :  { %v2982_v51 = vadd.f32 %v2877_v10, %v2427_v50  ;;  %v1642_v20 = vpop.f32.mrf.mxu1  ;;  %v3797_v50 = vshll.u32 %v3095_v6, 16  ;;  %v3981_v10 = vpack.c.b16 %v3945_v54, %v3944_v19  ;;  %v2102_v35 = vunpack.c.l.b16 %v2006_v30  ;;  %v14139_v6 = vld [vmem:[#allocation24_spill] sm:$0xff] }
 0x266   :  { %v1643_v49 = vadd.f32 %v1642_v20, %v14139_v6  ;;  %v3790_v26 = vsel %vm10507_vm2, %v3785_v0, %v3789_v31  ;;  %v3802_v54 = vshrl.u32 %v3096_v1, 16  ;;  %v1734_v20 = vld [vmem:[#allocation2 + $0x174] sm:$0xe]  ;;  %v2011_v0 = vrot.slane %v2009_v42, 4  ;;  %v14141_v6 = vld [vmem:[#allocation26_spill] sm:$0xff] }
 0x267   :  { %v11219_v38 = vadd.f32 %v4167_v2, %v2982_v51  ;;  %v2325_v56 = vpop.f32.mrf.mxu2  ;;  %v3795_v2 = vrot.slane %v3794_v41, 4  ;;  %v3799_v51 = vrot.slane %v3797_v50, 5  ;;  %v3815_v41 = vshrl.u32 %v3097_v58, 16 }
 0x268   :  { %v2428_v14 = vadd.f32 %v2325_v56, %v1641_v32  ;;  %v3805_v32 = vshll.u32 %v3096_v1, 16  ;;  %v3811_v56 = vshll.u32 %v3097_v58, 16  ;;  %v3804_v31 = vrot.slane %v3802_v54, 4  ;;  %v3098_v58 = vld [vmem:[#allocation2 + $0x188] sm:$0x1] }
 0x269   :  { %14138 = vst [vmem:[#allocation22_spill] sm:$0xff] %v11219_v38  ;;  %2919 = vmatmul.bf16.gmra.mxu3 %v10141_v43  ;;  %v2137_v43 = vpack.c.b16 %v2102_v35, %v2101_v55  ;;  %v3800_v24 = vsel %vm10507_vm2, %v3795_v2, %v3799_v51  ;;  %v9511_v35 = vrot.slane %v1734_v20, 9  ;;  %v10314_v2 = vld [vmem:[#allocation2 + $0x17c] sm:$0x1]  ;;  %v3817_v1 = vrot.slane %v3815_v41, 4 }
 0x26a   :  { %v3947_v30 = vunpack.c.l.b16 %v3800_v24  ;;  %v2012_v51 = vrot.slane %v10314_v2, 5  ;;  %v3099_v41 = vld [vmem:[#allocation2 + $0x18c] sm:$0xf]  ;;  %v3100_v2 = vld [vmem:[#allocation2 + $0x190] sm:$0xf] }
 0x26b   :  { %v4170_v63 = vpop.f32.mrf.mxu0 }
 0x26c   :  { %v2880_v61 = vpop.f32.mrf.mxu3  ;;  %v2013_v54 = vsel %vm10720_vm5, %v2011_v0, %v2012_v51  ;;  %v3835_v0 = vshll.u32 %v3100_v2, 16  ;;  %v3839_v51 = vshrl.u32 %v3100_v2, 16  ;;  %v3101_v2 = vld [vmem:[#allocation2 + $0x194] sm:$0x1] }
 0x26d   :  { %v2983_v38 = vadd.f32 %v2880_v61, %v2428_v14  ;;  %v1645_v52 = vpop.f32.mrf.mxu1  ;;  %v3946_v14 = vunpack.c.l.b16 %v3790_v26  ;;  %v3807_v61 = vrot.slane %v3805_v32, 5 }
 0x26e   :  { %4209 = vmatmul.bf16.gmra.mxu0 %v3981_v10 }
 0x26f   :  { %v11226_v11 = vadd.f32 %v4170_v63, %v2983_v38  ;;  %v2327_v9 = vpop.f32.mrf.mxu2  ;;  %v10142_v63 = vld [vmem:[#allocation2 + $0x174] sm:$0xff]  ;;  %v3982_v26 = vpack.c.b16 %v3947_v30, %v3946_v14 }
 0x270   :  { %1684 = vmatmul.bf16.gmra.mxu1 %v10086_v47  ;;  %v2429_v19 = vadd.f32 %v2327_v9, %v1643_v49  ;;  %v3813_v47 = vrot.slane %v3811_v56, 5  ;;  %v1646_v49 = vadd.f32 %v1645_v52, %v14141_v6  ;;  %v3821_v56 = vshll.u32 %v3098_v58, 16  ;;  %v10087_v52 = vld [vmem:[#allocation2 + $0x174] sm:$0xff] }
 0x271   :  { %14140 = vst [vmem:[#allocation24_spill] sm:$0xff] %v11226_v11 }
 0x272   :  { %v3818_v32 = vor.u32 %v3817_v1, %v3813_v47 }
 0x273   :  { %v4172_v50 = vpop.f32.mrf.mxu0 }
 0x274   :  { %v2882_v38 = vpop.f32.mrf.mxu3  ;;  %2369 = vmatmul.bf16.gmra.mxu2 %v2137_v43  ;;  %v3808_v43 = vor.u32 %v3807_v61, %v3804_v31  ;;  %v3819_v30 = vrot.slane %v3818_v32, 4  ;;  %v3823_v31 = vrot.slane %v3821_v56, 5  ;;  %v3826_v61 = vshrl.u32 %v3099_v41, 16 }
 0x275   :  { %v2984_v10 = vadd.f32 %v2882_v38, %v2429_v19  ;;  %v1647_v55 = vpop.f32.mrf.mxu1  ;;  %v2010_v19 = vsel %vm10720_vm5, %v9511_v35, %v2009_v42  ;;  %v3829_v42 = vshll.u32 %v3099_v41, 16  ;;  %v14143_v35 = vld [vmem:[#allocation28_spill] sm:$0xff]  ;;  %v3837_v41 = vrot.slane %v3835_v0, 5 }
 0x276   :  { %v2103_v6 = vunpack.c.l.b16 %v2010_v19  ;;  %v3809_v14 = vrot.slane %v3808_v43, 4  ;;  %v10315_v43 = vld [vmem:[#allocation2 + $0x184] sm:$0xf] }
 0x277   :  { %v11233_v9 = vadd.f32 %v4172_v50, %v2984_v10  ;;  %v2330_v22 = vpop.f32.mrf.mxu2  ;;  %v2016_v19 = vrot.slane %v10315_v43, 5  ;;  %v3831_v32 = vrot.slane %v3829_v42, 5  ;;  %v3845_v43 = vshll.u32 %v3101_v2, 16 }
 0x278   :  { %v2430_v24 = vadd.f32 %v2330_v22, %v1646_v49  ;;  %v1648_v49 = vadd.f32 %v1647_v55, %v14143_v35  ;;  %v1735_v55 = vld [vmem:[#allocation2 + $0x180] sm:$0xe] }
 0x279   :  { %14142 = vst [vmem:[#allocation26_spill] sm:$0xff] %v11233_v9  ;;  %2924 = vmatmul.bf16.gmra.mxu3 %v10142_v63  ;;  %v2104_v63 = vunpack.c.l.b16 %v2013_v54  ;;  %v3828_v54 = vrot.slane %v3826_v61, 4 }
 0x27b   :  { %v4175_v20 = vpop.f32.mrf.mxu0  ;;  %v2138_v9 = vpack.c.b16 %v2104_v63, %v2103_v6 }
 0x27c   :  { %v2885_v38 = vpop.f32.mrf.mxu3 }
 0x27d   :  { %v2985_v50 = vadd.f32 %v2885_v38, %v2430_v24  ;;  %v1650_v10 = vpop.f32.mrf.mxu1  ;;  %v3814_v24 = vsel %vm10507_vm2, %v3809_v14, %v3813_v47  ;;  %v3841_v38 = vrot.slane %v3839_v51, 4  ;;  %v9512_v47 = vrot.slane %v1735_v55, 9 }
 0x27e   :  { %4214 = vmatmul.bf16.gmra.mxu0 %v3982_v26  ;;  %v3824_v26 = vsel %vm10507_vm2, %v3819_v30, %v3823_v31  ;;  %v3948_v6 = vunpack.c.l.b16 %v3814_v24  ;;  %v2018_v14 = vrot.slane %v2016_v19, 4  ;;  %v3832_v31 = vor.u32 %v3831_v32, %v3828_v54 }
 0x27f   :  { %v11240_v1 = vadd.f32 %v4175_v20, %v2985_v50  ;;  %v2332_v58 = vpop.f32.mrf.mxu2  ;;  %v3949_v63 = vunpack.c.l.b16 %v3824_v26  ;;  %v3842_v42 = vor.u32 %v3841_v38, %v3837_v41  ;;  %v3847_v54 = vrot.slane %v3845_v43, 5 }
 0x280   :  { %1689 = vmatmul.bf16.gmra.mxu1 %v10087_v52  ;;  %v2431_v22 = vadd.f32 %v2332_v58, %v1648_v49  ;;  %v10143_v52 = vld [vmem:[#allocation2 + $0x180] sm:$0xff]  ;;  %v10316_v49 = vld [vmem:[#allocation2 + $0x188] sm:$0x1]  ;;  %v14145_v58 = vld [vmem:[#allocation30_spill] sm:$0xff]  ;;  %v3833_v55 = vrot.slane %v3832_v31, 4 }
 0x281   :  { %14144 = vst [vmem:[#allocation28_spill] sm:$0xff] %v11240_v1  ;;  %v2019_v30 = vrot.slane %v10316_v49, 5  ;;  %v1651_v61 = vadd.f32 %v1650_v10, %v14145_v58  ;;  %v10088_v10 = vld [vmem:[#allocation2 + $0x180] sm:$0xff]  ;;  %v3102_v49 = vld [vmem:[#allocation2 + $0x198] sm:$0xf] }
 0x282   :  { %v3850_v31 = vshrl.u32 %v3102_v49, 16 }
 0x283   :  { %v4177_v56 = vpop.f32.mrf.mxu0  ;;  %v2020_v24 = vsel %vm10720_vm5, %v2018_v14, %v2019_v30  ;;  %v3103_v14 = vld [vmem:[#allocation2 + $0x19c] sm:$0xf] }
 0x284   :  { %v2887_v20 = vpop.f32.mrf.mxu3  ;;  %2374 = vmatmul.bf16.gmra.mxu2 %v2138_v9  ;;  %v2017_v9 = vsel %vm10720_vm5, %v9512_v47, %v2016_v19  ;;  %v3838_v19 = vsel %vm10507_vm2, %v3833_v55, %v3837_v41  ;;  %v10319_v41 = vld [vmem:[#allocation2 + $0x14] sm:$0x1] }
 0x285   :  { %v2986_v50 = vadd.f32 %v2887_v20, %v2431_v22  ;;  %v1652_v35 = vpop.f32.mrf.mxu1  ;;  %v3983_v22 = vpack.c.b16 %v3949_v63, %v3948_v6  ;;  %v3843_v20 = vrot.slane %v3842_v42, 4  ;;  %v14147_v63 = vld [vmem:[#allocation32_spill] sm:$0xff]  ;;  %v4432_v55 = vrot.slane %v10319_v41, 5 }
 0x286   :  { %v1653_v58 = vadd.f32 %v1652_v35, %v14147_v63 }
 0x287   :  { %v11247_v1 = vadd.f32 %v4177_v56, %v2986_v50  ;;  %v2335_v0 = vpop.f32.mrf.mxu2  ;;  %v2105_v56 = vunpack.c.l.b16 %v2017_v9  ;;  %v2106_v50 = vunpack.c.l.b16 %v2020_v24  ;;  %v3848_v47 = vsel %vm10507_vm2, %v3843_v20, %v3847_v54 }
 0x288   :  { %v2432_v51 = vadd.f32 %v2335_v0, %v1651_v61  ;;  %v3853_v61 = vshll.u32 %v3102_v49, 16  ;;  %v3950_v24 = vunpack.c.l.b16 %v3838_v19  ;;  %v3951_v35 = vunpack.c.l.b16 %v3848_v47  ;;  %v4299_v49 = vld [vmem:[#allocation2 + $0xc] sm:$0xe] }
 0x289   :  { %14146 = vst [vmem:[#allocation30_spill] sm:$0xff] %v11247_v1  ;;  %2929 = vmatmul.bf16.gmra.mxu3 %v10143_v52  ;;  %v10317_v52 = vld [vmem:[#allocation2 + $0x10] sm:$0xf]  ;;  %v2139_v0 = vpack.c.b16 %v2106_v50, %v2105_v56  ;;  %v3863_v20 = vshrl.u32 %v3103_v14, 16  ;;  %v9738_v19 = vrot.slane %v4299_v49, 9 }
 0x28a   :  { %v4429_v6 = vrot.slane %v10317_v52, 5  ;;  %v3855_v11 = vrot.slane %v3853_v61, 5  ;;  %v3984_v47 = vpack.c.b16 %v3951_v35, %v3950_v24  ;;  %v11265_v61 = vld [vmem:[#allocation2 + $0x1c] sm:$0xf] }
 0x28b   :  { %v4180_v26 = vpop.f32.mrf.mxu0  ;;  %v3865_v37 = vrot.slane %v3863_v20, 4 }
 0x28c   :  { %v2890_v32 = vpop.f32.mrf.mxu3  ;;  %v4431_v52 = vrot.slane %v4429_v6, 4 }
 0x28d   :  { %v2987_v38 = vadd.f32 %v2890_v32, %v2432_v51  ;;  %v1655_v2 = vpop.f32.mrf.mxu1  ;;  %v1736_v51 = vld [vmem:[#allocation2 + $0x18c] sm:$0xe]  ;;  %v3859_v32 = vshll.u32 %v3103_v14, 16  ;;  %v4430_v14 = vsel %vm10720_vm5, %v9738_v19, %v4429_v6 }
 0x28e   :  { %4219 = vmatmul.bf16.gmra.mxu0 %v3983_v22  ;;  %v10318_v22 = vld [vmem:[#allocation2 + $0x190] sm:$0xf]  ;;  %v9513_v1 = vrot.slane %v1736_v51, 9  ;;  %v1656_v41 = vadd.f32 %v1655_v2, %v14149_v36  ;;  %v3104_v51 = vld [vmem:[#allocation2 + $0x1a0] sm:$0x1]  ;;  %v4668_v24 = vunpack.c.l.b16 %v4430_v14 }
 0x28f   :  { %v2337_v30 = vpop.f32.mrf.mxu2  ;;  %v11258_v42 = vadd.f32 %v4180_v26, %v2987_v38  ;;  %v2023_v9 = vrot.slane %v10318_v22, 5  ;;  %v10144_v38 = vld [vmem:[#allocation2 + $0x18c] sm:$0xff]  ;;  %v3861_v22 = vrot.slane %v3859_v32, 5 }
 0x290   :  { %1694 = vmatmul.bf16.gmra.mxu1 %v10088_v10  ;;  %v2433_v43 = vadd.f32 %v2337_v30, %v1653_v58  ;;  %v3852_v10 = vrot.slane %v3850_v31, 4  ;;  %v10320_v58 = vld [vmem:[#allocation2 + $0x194] sm:$0x1]  ;;  %v4433_v31 = vsel %vm10720_vm5, %v4431_v52, %v4432_v55  ;;  %v5738_v52 = vshll.u32 %v11265_v61, 16 }
 0x291   :  { %14148 = vst [vmem:[#allocation32_spill] sm:$0xff] %v11258_v42  ;;  %v2025_v50 = vrot.slane %v2023_v9, 4  ;;  %v2026_v30 = vrot.slane %v10320_v58, 5  ;;  %v5632_v42 = vld [vmem:[#allocation2 + $0x18] sm:$0xf]  ;;  %v4669_v35 = vunpack.c.l.b16 %v4433_v31  ;;  %v5742_v55 = vshrl.u32 %v11265_v61, 16 }
 0x292   :  { %v5729_v2 = vshrl.u32 %v5632_v42, 16  ;;  %v5732_v6 = vshll.u32 %v5632_v42, 16  ;;  %v10089_v58 = vld [vmem:[#allocation2 + $0x18c] sm:$0xff]  ;;  %v5740_v31 = vrot.slane %v5738_v52, 5 }
 0x293   :  { %v4182_v63 = vpop.f32.mrf.mxu0  ;;  %v2027_v36 = vsel %vm10720_vm5, %v2025_v50, %v2026_v30  ;;  %v11271_v20 = vpack.c.b16 %v4669_v35, %v4668_v24  ;;  %v14151_v24 = vld [vmem:[#allocation36_spill] sm:$0xff] }
 0x294   :  { %v2892_v54 = vpop.f32.mrf.mxu3  ;;  %2379 = vmatmul.bf16.gmra.mxu2 %v2139_v0  ;;  %v2024_v0 = vsel %vm10720_vm5, %v9513_v1, %v2023_v9  ;;  %v3866_v9 = vor.u32 %v3865_v37, %v3861_v22  ;;  %v2108_v14 = vunpack.c.l.b16 %v2027_v36  ;;  %v5731_v42 = vrot.slane %v5729_v2, 4 }
 0x295   :  { %v2988_v26 = vadd.f32 %v2892_v54, %v2433_v43  ;;  %v1657_v56 = vpop.f32.mrf.mxu1  ;;  %v3856_v54 = vor.u32 %v3855_v11, %v3852_v10  ;;  %v3869_v11 = vshll.u32 %v3104_v51, 16  ;;  %v5734_v30 = vrot.slane %v5732_v6, 5 }
 0x296   :  { %v1658_v35 = vadd.f32 %v1657_v56, %v14151_v24  ;;  %v3867_v18 = vrot.slane %v3866_v9, 4 }
 0x297   :  { %v2340_v43 = vpop.f32.mrf.mxu2  ;;  %v11275_v49 = vadd.f32 %v4182_v63, %v2988_v26  ;;  %v3857_v50 = vrot.slane %v3856_v54, 4  ;;  %v3871_v63 = vrot.slane %v3869_v11, 5  ;;  %v5634_v26 = vld [vmem:[#allocation2 + $0x20] sm:$0x1]  ;;  %v5735_v54 = vor.u32 %v5734_v30, %v5731_v42  ;;  %v5635_v42 = vld [vmem:[#allocation2 + $0x24] sm:$0xf] }
 0x298   :  { %v2434_v32 = vadd.f32 %v2340_v43, %v1656_v41  ;;  %v2107_v41 = vunpack.c.l.b16 %v2024_v0  ;;  %v5744_v43 = vrot.slane %v5742_v55, 4  ;;  %v5748_v36 = vshll.u32 %v5634_v26, 16  ;;  %v10145_v55 = vld [vmem:[#allocation2 + $0x198] sm:$0xff] }
 0x299   :  { %2934 = vmatmul.bf16.gmra.mxu3 %v10144_v38  ;;  %14150 = vst [vmem:[#allocation34_spill] sm:$0xff] %v11275_v49  ;;  %v3862_v0 = vsel %vm10507_vm2, %v3857_v50, %v3861_v22  ;;  %v3872_v6 = vsel %vm10507_vm2, %v3867_v18, %v3871_v63  ;;  %v6922_v22 = vld [vmem:[#allocation2 + $0x18] sm:$0xe]  ;;  %v11286_v18 = vld [vmem:[#allocation2 + $0x28] sm:$0xf] }
 0x29a   :  { %v3952_v9 = vunpack.c.l.b16 %v3862_v0  ;;  %v9994_v63 = vrot.slane %v6922_v22, 9  ;;  %v5753_v0 = vshrl.u32 %v5635_v42, 16 }
 0x29b   :  { %v4185_v1 = vpop.f32.mrf.mxu0 }
 0x29c   :  { %v2895_v10 = vpop.f32.mrf.mxu3 }
 0x29d   :  { %v2989_v38 = vadd.f32 %v2895_v10, %v2434_v32  ;;  %v1660_v19 = vpop.f32.mrf.mxu1  ;;  %v2140_v32 = vpack.c.b16 %v2108_v14, %v2107_v41  ;;  %v5736_v10 = vrot.slane %v5735_v54, 4  ;;  %v7052_v14 = vrot.slane %v11265_v61, 5 }
 0x29e   :  { %4224 = vmatmul.bf16.gmra.mxu0 %v3984_v47  ;;  %v5745_v47 = vor.u32 %v5744_v43, %v5740_v31 }
 0x29f   :  { %v2342_v49 = vpop.f32.mrf.mxu2  ;;  %v11278_v37 = vadd.f32 %v4185_v1, %v2989_v38  ;;  %v3953_v1 = vunpack.c.l.b16 %v3872_v6  ;;  %v14153_v38 = vld [vmem:[#allocation38_spill] sm:$0xff]  ;;  %v5741_v24 = vsel %vm10507_vm2, %v5736_v10, %v5740_v31  ;;  %v5766_v6 = vshrl.u32 %v11286_v18, 16 }
 0x2a0   :  { %1699 = vmatmul.bf16.gmra.mxu1 %v10089_v58  ;;  %v2435_v51 = vadd.f32 %v2342_v49, %v1658_v35  ;;  %v5746_v49 = vrot.slane %v5745_v47, 4  ;;  %v5750_v58 = vrot.slane %v5748_v36, 5  ;;  %v1661_v41 = vadd.f32 %v1660_v19, %v14153_v38 }
 0x2a1   :  { %14152 = vst [vmem:[#allocation36_spill] sm:$0xff] %v11278_v37  ;;  %v3985_v43 = vpack.c.b16 %v3953_v1, %v3952_v9  ;;  %v7055_v19 = vrot.slane %v5634_v26, 5  ;;  %v5756_v47 = vshll.u32 %v5635_v42, 16  ;;  %v5762_v36 = vshll.u32 %v11286_v18, 16  ;;  %v10321_v9 = vld [vmem:[#allocation2 + $0x1c] sm:$0xf] }
 0x2a2   :  { %v5751_v35 = vsel %vm10507_vm2, %v5746_v49, %v5750_v58  ;;  %v4436_v31 = vrot.slane %v10321_v9, 5  ;;  %v6513_v1 = vunpack.c.l.b16 %v5741_v24  ;;  %v4300_v49 = vld [vmem:[#allocation2 + $0x18] sm:$0xe]  ;;  %v14155_v58 = vld [vmem:[#allocation40_spill] sm:$0xff]  ;;  %v7053_v26 = vsel %vm10720_vm5, %v9994_v63, %v7052_v14 }
 0x2a3   :  { %v4187_v2 = vpop.f32.mrf.mxu0  ;;  %v6514_v10 = vunpack.c.l.b16 %v5751_v35  ;;  %v5758_v22 = vrot.slane %v5756_v47, 5  ;;  %v5768_v42 = vrot.slane %v5766_v6, 4  ;;  %v10170_v24 = vld [vmem:[#allocation2 + $0x18] sm:$0xff]  ;;  %v9739_v35 = vrot.slane %v4300_v49, 9 }
 0x2a4   :  { %v2897_v56 = vpop.f32.mrf.mxu3  ;;  %2384 = vmatmul.bf16.gmra.mxu2 %v2140_v32  ;;  %v7054_v32 = vrot.slane %v7052_v14, 4  ;;  %v11306_v14 = vld [vmem:[#allocation2 + $0x2c] sm:$0x1] }
 0x2a5   :  { %v2990_v52 = vadd.f32 %v2897_v56, %v2435_v51  ;;  %v1662_v11 = vpop.f32.mrf.mxu1  ;;  %v5772_v47 = vshll.u32 %v11306_v14, 16  ;;  %v4437_v6 = vsel %vm10720_vm5, %v9739_v35, %v4436_v31 }
 0x2a6   :  { %v1663_v38 = vadd.f32 %v1662_v11, %v14155_v58  ;;  %v4438_v11 = vrot.slane %v4436_v31, 4  ;;  %v6923_v31 = vld [vmem:[#allocation2 + $0x24] sm:$0xe] }
 0x2a7   :  { %v2345_v50 = vpop.f32.mrf.mxu2  ;;  %v11292_v54 = vadd.f32 %v4187_v2, %v2990_v52  ;;  %v7056_v2 = vsel %vm10720_vm5, %v7054_v32, %v7055_v19  ;;  %v5755_v52 = vrot.slane %v5753_v0, 4  ;;  %v7291_v32 = vunpack.c.l.b16 %v7053_v26  ;;  %v5638_v26 = vld [vmem:[#allocation2 + $0x30] sm:$0xf] }
 0x2a8   :  { %v2436_v30 = vadd.f32 %v2345_v50, %v1661_v41  ;;  %v11302_v50 = vrot.slane %v5762_v36, 5  ;;  %v6577_v0 = vpack.c.b16 %v6514_v10, %v6513_v1  ;;  %v7292_v58 = vunpack.c.l.b16 %v7056_v2 }
 0x2a9   :  { %2939 = vmatmul.bf16.gmra.mxu3 %v10145_v55  ;;  %14154 = vst [vmem:[#allocation38_spill] sm:$0xff] %v11292_v54  ;;  %v4670_v2 = vunpack.c.l.b16 %v4437_v6  ;;  %v5777_v35 = vshrl.u32 %v5638_v26, 16  ;;  %v9995_v6 = vrot.slane %v6923_v31, 9  ;;  %v7062_v31 = vrot.slane %v11306_v14, 5 }
 0x2aa   :  { %v5769_v49 = vor.u32 %v5768_v42, %v11302_v50  ;;  %v7355_v1 = vpack.c.b16 %v7292_v58, %v7291_v32 }
 0x2ab   :  { %v4190_v51 = vpop.f32.mrf.mxu0 }
 0x2ac   :  { %v2900_v61 = vpop.f32.mrf.mxu3 }
 0x2ad   :  { %v2991_v56 = vadd.f32 %v2900_v61, %v2436_v30  ;;  %v1665_v55 = vpop.f32.mrf.mxu1  ;;  %v10322_v61 = vld [vmem:[#allocation2 + $0x20] sm:$0x1] }
 0x2ae   :  { %4229 = vmatmul.bf16.gmra.mxu0 %v3985_v43  ;;  %v4439_v9 = vrot.slane %v10322_v61, 5  ;;  %v11315_v61 = vld [vmem:[#allocation2 + $0x34] sm:$0xf] }
 0x2af   :  { %v2347_v41 = vpop.f32.mrf.mxu2  ;;  %v11304_v30 = vadd.f32 %v4190_v51, %v2991_v56  ;;  %v5790_v42 = vshrl.u32 %v11315_v61, 16 }
 0x2b0   :  { %4852 = vmatmul.bf16.vlgmr.msra.gmra.mxu1 %v11271_v20  ;;  %v2437_v43 = vadd.f32 %v2347_v41, %v1663_v38  ;;  %v5759_v20 = vor.u32 %v5758_v22, %v5755_v52  ;;  %v4440_v56 = vsel %vm10720_vm5, %v4438_v11, %v4439_v9  ;;  %v14157_v38 = vld [vmem:[#allocation11_spill] sm:$0xff]  ;;  %v5786_v11 = vshll.u32 %v11315_v61, 16 }
 0x2b1   :  { %14156 = vst [vmem:[#allocation40_spill] sm:$0xff] %v11304_v30  ;;  %v1666_v41 = vadd.f32 %v1665_v55, %v14157_v38  ;;  %v4671_v52 = vunpack.c.l.b16 %v4440_v56  ;;  %v5780_v30 = vshll.u32 %v5638_v26, 16  ;;  %v7059_v9 = vrot.slane %v11286_v18, 5  ;;  %v4301_v26 = vld [vmem:[#allocation2 + $0x24] sm:$0xe] }
 0x2b3   :  { %v4192_v63 = vpop.f32.mrf.mxu0  ;;  %v4733_v58 = vpack.c.b16 %v4671_v52, %v4670_v2  ;;  %v5782_v18 = vrot.slane %v5780_v30, 5  ;;  %v14159_v2 = vld [vmem:[#allocation13_spill] sm:$0xff] }
 0x2b4   :  { %v2902_v19 = vpop.f32.mrf.mxu3  ;;  %5407 = vmatmul.bf16.vlgmr.msra.gmra.mxu2 %v10170_v24  ;;  %v5770_v24 = vrot.slane %v5769_v49, 4  ;;  %v10323_v49 = vld [vmem:[#allocation2 + $0x28] sm:$0xf] }
 0x2b5   :  { %v2992_v36 = vadd.f32 %v2902_v19, %v2437_v43  ;;  %v1667_v51 = vpop.f32.mrf.mxu1  ;;  %v5760_v43 = vrot.slane %v5759_v20, 4  ;;  %v5774_v19 = vrot.slane %v5772_v47, 5 }
 0x2b6   :  { %v1668_v52 = vadd.f32 %v1667_v51, %v14159_v2 }
 0x2b7   :  { %v2350_v10 = vpop.f32.mrf.mxu2  ;;  %v11320_v38 = vadd.f32 %v4192_v63, %v2992_v36  ;;  %v5765_v20 = vsel %vm10507_vm2, %v5760_v43, %v11302_v50  ;;  %v5775_v47 = vsel %vm10507_vm2, %v5770_v24, %v5774_v19  ;;  %v11327_v63 = vrot.slane %v5786_v11, 5 }
 0x2b8   :  { %v2438_v22 = vadd.f32 %v2350_v10, %v1666_v41  ;;  %v4443_v41 = vrot.slane %v10323_v49, 5  ;;  %v5779_v10 = vrot.slane %v5777_v35, 4  ;;  %v5792_v36 = vrot.slane %v5790_v42, 4  ;;  %v10171_v35 = vld [vmem:[#allocation2 + $0x24] sm:$0xff]  ;;  %v10324_v49 = vld [vmem:[#allocation2 + $0x2c] sm:$0x1] }
 0x2b9   :  { %6697 = vmatmul.bf16.vlgmr.msra.gmra.mxu3 %v6577_v0  ;;  %14158 = vst [vmem:[#allocation11_spill] sm:$0xff] %v11320_v38  ;;  %v6515_v43 = vunpack.c.l.b16 %v5765_v20  ;;  %v6516_v24 = vunpack.c.l.b16 %v5775_v47  ;;  %v9740_v11 = vrot.slane %v4301_v26, 9  ;;  %v4446_v51 = vrot.slane %v10324_v49, 5 }
 0x2ba   :  { %v4445_v42 = vrot.slane %v4443_v41, 4  ;;  %v5783_v2 = vor.u32 %v5782_v18, %v5779_v10  ;;  %v5793_v14 = vor.u32 %v5792_v36, %v11327_v63 }
 0x2bb   :  { %v4195_v55 = vpop.f32.mrf.mxu0 }
 0x2bc   :  { %v2905_v32 = vpop.f32.mrf.mxu3  ;;  %v4447_v26 = vsel %vm10720_vm5, %v4445_v42, %v4446_v51  ;;  %v5784_v18 = vrot.slane %v5783_v2, 4  ;;  %v5794_v36 = vrot.slane %v5793_v14, 4 }
 0x2bd   :  { %v2993_v0 = vadd.f32 %v2905_v32, %v2438_v22  ;;  %v1670_v56 = vpop.f32.mrf.mxu1  ;;  %v7061_v22 = vrot.slane %v7059_v9, 4  ;;  %v11331_v32 = vld [vmem:[#allocation2 + $0x38] sm:$0x1] }
 0x2be   :  { %7475 = vmatmul.bf16.vlgmr.msra.gmra.mxu0 %v7355_v1  ;;  %v7060_v1 = vsel %vm10720_vm5, %v9995_v6, %v7059_v9  ;;  %v5796_v38 = vshll.u32 %v11331_v32, 16 }
 0x2bf   :  { %v2352_v50 = vpop.f32.mrf.mxu2  ;;  %v11335_v19 = vadd.f32 %v4195_v55, %v2993_v0  ;;  %v7293_v47 = vunpack.c.l.b16 %v7060_v1  ;;  %v6578_v55 = vpack.c.b16 %v6516_v24, %v6515_v43  ;;  %v4444_v0 = vsel %vm10720_vm5, %v9740_v11, %v4443_v41  ;;  %v5641_v43 = vld [vmem:[#allocation2 + $0x3c] sm:$0xf] }
 0x2c0   :  { %4857 = vmatmul.bf16.gmra.mxu1 %v4733_v58  ;;  %v2439_v30 = vadd.f32 %v2352_v50, %v1668_v52  ;;  %v7063_v58 = vsel %vm10720_vm5, %v7061_v22, %v7062_v31  ;;  %v5798_v52 = vrot.slane %v5796_v38, 5  ;;  %v14161_v50 = vld [vmem:[#allocation15_spill] sm:$0xff]  ;;  %v7066_v22 = vrot.slane %v11315_v61, 5 }
 0x2c1   :  { %14160 = vst [vmem:[#allocation13_spill] sm:$0xff] %v11335_v19  ;;  %v7294_v10 = vunpack.c.l.b16 %v7063_v58  ;;  %v1671_v49 = vadd.f32 %v1670_v56, %v14161_v50  ;;  %v6924_v19 = vld [vmem:[#allocation2 + $0x30] sm:$0xe]  ;;  %v4672_v1 = vunpack.c.l.b16 %v4444_v0  ;;  %v5789_v11 = vsel %vm10507_vm2, %v5784_v18, %v11327_v63 }
 0x2c2   :  { %v5799_v38 = vsel %vm10507_vm2, %v5794_v36, %v5798_v52  ;;  %v9996_v56 = vrot.slane %v6924_v19, 9  ;;  %v7068_v51 = vrot.slane %v7066_v22, 4  ;;  %v7069_v61 = vrot.slane %v11331_v32, 5  ;;  %v4302_v52 = vld [vmem:[#allocation2 + $0x30] sm:$0xe] }
 0x2c3   :  { %v4197_v54 = vpop.f32.mrf.mxu0  ;;  %v7356_v41 = vpack.c.b16 %v7294_v10, %v7293_v47  ;;  %v5801_v2 = vshrl.u32 %v5641_v43, 16  ;;  %v10325_v10 = vld [vmem:[#allocation2 + $0x34] sm:$0xf]  ;;  %v6517_v19 = vunpack.c.l.b16 %v5789_v11  ;;  %v6518_v36 = vunpack.c.l.b16 %v5799_v38 }
 0x2c4   :  { %v2907_v20 = vpop.f32.mrf.mxu3  ;;  %5412 = vmatmul.bf16.gmra.mxu2 %v10171_v35  ;;  %v11347_v35 = vld [vmem:[#allocation2 + $0x40] sm:$0xf]  ;;  %v4450_v18 = vrot.slane %v10325_v10, 5  ;;  %v14163_v50 = vld [vmem:[#allocation17_spill] sm:$0xff]  ;;  %v9741_v38 = vrot.slane %v4302_v52, 9 }
 0x2c5   :  { %v2994_v9 = vadd.f32 %v2907_v20, %v2439_v30  ;;  %v1672_v6 = vpop.f32.mrf.mxu1  ;;  %v4673_v30 = vunpack.c.l.b16 %v4447_v26  ;;  %v5810_v47 = vshll.u32 %v11347_v35, 16  ;;  %v5814_v0 = vshrl.u32 %v11347_v35, 16  ;;  %v10172_v11 = vld [vmem:[#allocation2 + $0x30] sm:$0xff] }
 0x2c6   :  { %v1673_v32 = vadd.f32 %v1672_v6, %v14163_v50  ;;  %v10326_v6 = vld [vmem:[#allocation2 + $0x38] sm:$0x1]  ;;  %v11368_v50 = vld [vmem:[#allocation2 + $0x44] sm:$0x1] }
 0x2c7   :  { %v2355_v31 = vpop.f32.mrf.mxu2  ;;  %v11355_v14 = vadd.f32 %v4197_v54, %v2994_v9  ;;  %v4734_v20 = vpack.c.b16 %v4673_v30, %v4672_v1  ;;  %v7067_v54 = vsel %vm10720_vm5, %v9996_v56, %v7066_v22  ;;  %v7070_v9 = vsel %vm10720_vm5, %v7068_v51, %v7069_v61 }
 0x2c8   :  { %v2440_v24 = vadd.f32 %v2355_v31, %v1671_v49  ;;  %v5803_v49 = vrot.slane %v5801_v2, 4  ;;  %v11364_v30 = vrot.slane %v5810_v47, 5  ;;  %v4453_v10 = vrot.slane %v10326_v6, 5  ;;  %v11377_v6 = vld [vmem:[#allocation2 + $0x4c] sm:$0xf] }
 0x2c9   :  { %6702 = vmatmul.bf16.gmra.mxu3 %v6578_v55  ;;  %14162 = vst [vmem:[#allocation15_spill] sm:$0xff] %v11355_v14  ;;  %v5804_v55 = vshll.u32 %v5641_v43, 16  ;;  %v5816_v43 = vrot.slane %v5814_v0, 4  ;;  %v7295_v56 = vunpack.c.l.b16 %v7067_v54  ;;  %v6579_v61 = vpack.c.b16 %v6518_v36, %v6517_v19  ;;  %v5644_v54 = vld [vmem:[#allocation2 + $0x48] sm:$0xf] }
 0x2ca   :  { %v7296_v2 = vunpack.c.l.b16 %v7070_v9  ;;  %v4451_v0 = vsel %vm10720_vm5, %v9741_v38, %v4450_v18  ;;  %v5825_v38 = vshrl.u32 %v5644_v54, 16 }
 0x2cb   :  { %v4200_v42 = vpop.f32.mrf.mxu0  ;;  %v5806_v1 = vrot.slane %v5804_v55, 5  ;;  %v5820_v55 = vshll.u32 %v11368_v50, 16  ;;  %v5817_v52 = vor.u32 %v5816_v43, %v11364_v30  ;;  %v4674_v9 = vunpack.c.l.b16 %v4451_v0 }
 0x2cc   :  { %v2910_v58 = vpop.f32.mrf.mxu3  ;;  %v7357_v19 = vpack.c.b16 %v7296_v2, %v7295_v56  ;;  %v5838_v43 = vshrl.u32 %v11377_v6, 16 }
 0x2cd   :  { %v2995_v26 = vadd.f32 %v2910_v58, %v2440_v24  ;;  %v1675_v63 = vpop.f32.mrf.mxu1  ;;  %v4452_v58 = vrot.slane %v4450_v18, 4  ;;  %v6925_v18 = vld [vmem:[#allocation2 + $0x3c] sm:$0xe] }
 0x2ce   :  { %7480 = vmatmul.bf16.gmra.mxu0 %v7356_v41  ;;  %v9997_v0 = vrot.slane %v6925_v18, 9  ;;  %v7076_v18 = vrot.slane %v11368_v50, 5 }
 0x2cf   :  { %v2357_v31 = vpop.f32.mrf.mxu2  ;;  %v11366_v24 = vadd.f32 %v4200_v42, %v2995_v26  ;;  %v4454_v26 = vsel %vm10720_vm5, %v4452_v58, %v4453_v10  ;;  %v5834_v58 = vshll.u32 %v11377_v6, 16  ;;  %v7073_v10 = vrot.slane %v11347_v35, 5 }
 0x2d0   :  { %4862 = vmatmul.bf16.gmra.mxu1 %v4734_v20  ;;  %v2441_v41 = vadd.f32 %v2357_v31, %v1673_v32  ;;  %v5807_v20 = vor.u32 %v5806_v1, %v5803_v49  ;;  %v14165_v32 = vld [vmem:[#allocation19_spill] sm:$0xff]  ;;  %v4675_v49 = vunpack.c.l.b16 %v4454_v26 }
 0x2d1   :  { %14164 = vst [vmem:[#allocation17_spill] sm:$0xff] %v11366_v24  ;;  %v1676_v31 = vadd.f32 %v1675_v63, %v14165_v32  ;;  %v5828_v24 = vshll.u32 %v5644_v54, 16  ;;  %v4303_v54 = vld [vmem:[#allocation2 + $0x3c] sm:$0xe] }
 0x2d2   :  { %v4735_v2 = vpack.c.b16 %v4675_v49, %v4674_v9  ;;  %v14167_v9 = vld [vmem:[#allocation21_spill] sm:$0xff] }
 0x2d3   :  { %v4202_v22 = vpop.f32.mrf.mxu0  ;;  %v5830_v35 = vrot.slane %v5828_v24, 5 }
 0x2d4   :  { %v2912_v51 = vpop.f32.mrf.mxu3  ;;  %5417 = vmatmul.bf16.gmra.mxu2 %v10172_v11  ;;  %v5818_v11 = vrot.slane %v5817_v52, 4  ;;  %v10327_v52 = vld [vmem:[#allocation2 + $0x40] sm:$0xf] }
 0x2d5   :  { %v2996_v47 = vadd.f32 %v2912_v51, %v2441_v41  ;;  %v1677_v42 = vpop.f32.mrf.mxu1  ;;  %v5808_v41 = vrot.slane %v5807_v20, 4  ;;  %v5822_v51 = vrot.slane %v5820_v55, 5 }
 0x2d6   :  { %v1678_v49 = vadd.f32 %v1677_v42, %v14167_v9 }
 0x2d7   :  { %v2360_v36 = vpop.f32.mrf.mxu2  ;;  %v11382_v32 = vadd.f32 %v4202_v22, %v2996_v47  ;;  %v5813_v20 = vsel %vm10507_vm2, %v5808_v41, %v11364_v30  ;;  %v5823_v55 = vsel %vm10507_vm2, %v5818_v11, %v5822_v51  ;;  %v11389_v22 = vrot.slane %v5834_v58, 5 }
 0x2d8   :  { %v2442_v1 = vadd.f32 %v2360_v36, %v1676_v31  ;;  %v4457_v31 = vrot.slane %v10327_v52, 5  ;;  %v5827_v36 = vrot.slane %v5825_v38, 4  ;;  %v5840_v47 = vrot.slane %v5838_v43, 4  ;;  %v10173_v38 = vld [vmem:[#allocation2 + $0x3c] sm:$0xff]  ;;  %v10328_v52 = vld [vmem:[#allocation2 + $0x44] sm:$0x1] }
 0x2d9   :  { %6707 = vmatmul.bf16.gmra.mxu3 %v6579_v61  ;;  %14166 = vst [vmem:[#allocation19_spill] sm:$0xff] %v11382_v32  ;;  %v6519_v41 = vunpack.c.l.b16 %v5813_v20  ;;  %v6520_v11 = vunpack.c.l.b16 %v5823_v55  ;;  %v9742_v58 = vrot.slane %v4303_v54, 9  ;;  %v4460_v42 = vrot.slane %v10328_v52, 5 }
 0x2da   :  { %v4459_v43 = vrot.slane %v4457_v31, 4  ;;  %v5831_v9 = vor.u32 %v5830_v35, %v5827_v36  ;;  %v5841_v50 = vor.u32 %v5840_v47, %v11389_v22 }
 0x2db   :  { %v4205_v63 = vpop.f32.mrf.mxu0 }
 0x2dc   :  { %v2915_v56 = vpop.f32.mrf.mxu3  ;;  %v4461_v54 = vsel %vm10720_vm5, %v4459_v43, %v4460_v42  ;;  %v5832_v35 = vrot.slane %v5831_v9, 4  ;;  %v5842_v47 = vrot.slane %v5841_v50, 4 }
 0x2dd   :  { %v2997_v61 = vadd.f32 %v2915_v56, %v2442_v1  ;;  %v1680_v26 = vpop.f32.mrf.mxu1  ;;  %v7075_v1 = vrot.slane %v7073_v10, 4  ;;  %v11393_v56 = vld [vmem:[#allocation2 + $0x50] sm:$0x1] }
 0x2de   :  { %7485 = vmatmul.bf16.gmra.mxu0 %v7357_v19  ;;  %v7074_v19 = vsel %vm10720_vm5, %v9997_v0, %v7073_v10  ;;  %v5844_v32 = vshll.u32 %v11393_v56, 16 }
 0x2df   :  { %v2362_v30 = vpop.f32.mrf.mxu2  ;;  %v11397_v51 = vadd.f32 %v4205_v63, %v2997_v61  ;;  %v7297_v55 = vunpack.c.l.b16 %v7074_v19  ;;  %v6580_v63 = vpack.c.b16 %v6520_v11, %v6519_v41  ;;  %v4458_v61 = vsel %vm10720_vm5, %v9742_v58, %v4457_v31  ;;  %v5647_v41 = vld [vmem:[#allocation2 + $0x54] sm:$0xf] }
 0x2e0   :  { %4867 = vmatmul.bf16.gmra.mxu1 %v4735_v2  ;;  %v2443_v24 = vadd.f32 %v2362_v30, %v1678_v49  ;;  %v7077_v2 = vsel %vm10720_vm5, %v7075_v1, %v7076_v18  ;;  %v5846_v49 = vrot.slane %v5844_v32, 5  ;;  %v14169_v30 = vld [vmem:[#allocation23_spill] sm:$0xff]  ;;  %v7080_v1 = vrot.slane %v11377_v6, 5 }
 0x2e1   :  { %14168 = vst [vmem:[#allocation21_spill] sm:$0xff] %v11397_v51  ;;  %v7298_v36 = vunpack.c.l.b16 %v7077_v2  ;;  %v1681_v52 = vadd.f32 %v1680_v26, %v14169_v30  ;;  %v6926_v51 = vld [vmem:[#allocation2 + $0x48] sm:$0xe]  ;;  %v4676_v19 = vunpack.c.l.b16 %v4458_v61  ;;  %v5837_v58 = vsel %vm10507_vm2, %v5832_v35, %v11389_v22  ;;  %v14171_v30 = vld [vmem:[#allocation25_spill] sm:$0xff] }
 0x2e2   :  { %v5847_v32 = vsel %vm10507_vm2, %v5842_v47, %v5846_v49  ;;  %v9998_v26 = vrot.slane %v6926_v51, 9  ;;  %v7082_v42 = vrot.slane %v7080_v1, 4  ;;  %v7083_v6 = vrot.slane %v11393_v56, 5  ;;  %v4304_v49 = vld [vmem:[#allocation2 + $0x48] sm:$0xe] }
 0x2e3   :  { %v4207_v14 = vpop.f32.mrf.mxu0  ;;  %v7358_v31 = vpack.c.b16 %v7298_v36, %v7297_v55  ;;  %v5849_v9 = vshrl.u32 %v5647_v41, 16  ;;  %v10329_v36 = vld [vmem:[#allocation2 + $0x4c] sm:$0xf]  ;;  %v6521_v51 = vunpack.c.l.b16 %v5837_v58  ;;  %v6522_v47 = vunpack.c.l.b16 %v5847_v32 }
 0x2e4   :  { %v2917_v20 = vpop.f32.mrf.mxu3  ;;  %5422 = vmatmul.bf16.gmra.mxu2 %v10173_v38  ;;  %v11409_v38 = vld [vmem:[#allocation2 + $0x58] sm:$0xf]  ;;  %v4464_v35 = vrot.slane %v10329_v36, 5  ;;  %v10174_v58 = vld [vmem:[#allocation2 + $0x48] sm:$0xff]  ;;  %v9743_v32 = vrot.slane %v4304_v49, 9 }
 0x2e5   :  { %v2998_v10 = vadd.f32 %v2917_v20, %v2443_v24  ;;  %v1682_v0 = vpop.f32.mrf.mxu1  ;;  %v4677_v24 = vunpack.c.l.b16 %v4461_v54  ;;  %v5858_v55 = vshll.u32 %v11409_v38, 16  ;;  %v5862_v61 = vshrl.u32 %v11409_v38, 16 }
 0x2e6   :  { %v1683_v56 = vadd.f32 %v1682_v0, %v14171_v30  ;;  %v10330_v0 = vld [vmem:[#allocation2 + $0x50] sm:$0x1]  ;;  %v11430_v30 = vld [vmem:[#allocation2 + $0x5c] sm:$0x1] }
 0x2e7   :  { %v2365_v18 = vpop.f32.mrf.mxu2  ;;  %v11417_v50 = vadd.f32 %v4207_v14, %v2998_v10  ;;  %v4736_v20 = vpack.c.b16 %v4677_v24, %v4676_v19  ;;  %v7081_v14 = vsel %vm10720_vm5, %v9998_v26, %v7080_v1  ;;  %v7084_v10 = vsel %vm10720_vm5, %v7082_v42, %v7083_v6 }
 0x2e8   :  { %v2444_v11 = vadd.f32 %v2365_v18, %v1681_v52  ;;  %v5851_v52 = vrot.slane %v5849_v9, 4  ;;  %v11426_v24 = vrot.slane %v5858_v55, 5  ;;  %v4467_v36 = vrot.slane %v10330_v0, 5  ;;  %v11439_v0 = vld [vmem:[#allocation2 + $0x64] sm:$0xf] }
 0x2e9   :  { %6712 = vmatmul.bf16.gmra.mxu3 %v6580_v63  ;;  %14170 = vst [vmem:[#allocation23_spill] sm:$0xff] %v11417_v50  ;;  %v5852_v63 = vshll.u32 %v5647_v41, 16  ;;  %v5864_v41 = vrot.slane %v5862_v61, 4  ;;  %v7299_v26 = vunpack.c.l.b16 %v7081_v14  ;;  %v6581_v6 = vpack.c.b16 %v6522_v47, %v6521_v51  ;;  %v5650_v14 = vld [vmem:[#allocation2 + $0x60] sm:$0xf] }
 0x2ea   :  { %v7300_v9 = vunpack.c.l.b16 %v7084_v10  ;;  %v4465_v61 = vsel %vm10720_vm5, %v9743_v32, %v4464_v35  ;;  %v5873_v32 = vshrl.u32 %v5650_v14, 16 }
 0x2eb   :  { %v4210_v43 = vpop.f32.mrf.mxu0  ;;  %v5854_v19 = vrot.slane %v5852_v63, 5  ;;  %v5868_v63 = vshll.u32 %v11430_v30, 16  ;;  %v5865_v49 = vor.u32 %v5864_v41, %v11426_v24  ;;  %v4678_v10 = vunpack.c.l.b16 %v4465_v61 }
 0x2ec   :  { %v2920_v2 = vpop.f32.mrf.mxu3  ;;  %v7359_v51 = vpack.c.b16 %v7300_v9, %v7299_v26  ;;  %v5886_v41 = vshrl.u32 %v11439_v0, 16 }
 0x2ed   :  { %v2999_v54 = vadd.f32 %v2920_v2, %v2444_v11  ;;  %v1685_v22 = vpop.f32.mrf.mxu1  ;;  %v4466_v2 = vrot.slane %v4464_v35, 4  ;;  %v6927_v35 = vld [vmem:[#allocation2 + $0x54] sm:$0xe] }
 0x2ee   :  { %7490 = vmatmul.bf16.gmra.mxu0 %v7358_v31  ;;  %v9999_v61 = vrot.slane %v6927_v35, 9  ;;  %v7090_v35 = vrot.slane %v11430_v30, 5 }
 0x2ef   :  { %v2367_v18 = vpop.f32.mrf.mxu2  ;;  %v11428_v11 = vadd.f32 %v4210_v43, %v2999_v54  ;;  %v4468_v54 = vsel %vm10720_vm5, %v4466_v2, %v4467_v36  ;;  %v5882_v2 = vshll.u32 %v11439_v0, 16  ;;  %v7087_v36 = vrot.slane %v11409_v38, 5 }
 0x2f0   :  { %4872 = vmatmul.bf16.gmra.mxu1 %v4736_v20  ;;  %v2445_v31 = vadd.f32 %v2367_v18, %v1683_v56  ;;  %v5855_v20 = vor.u32 %v5854_v19, %v5851_v52  ;;  %v14173_v56 = vld [vmem:[#allocation27_spill] sm:$0xff]  ;;  %v4679_v52 = vunpack.c.l.b16 %v4468_v54 }
 0x2f1   :  { %14172 = vst [vmem:[#allocation25_spill] sm:$0xff] %v11428_v11  ;;  %v1686_v18 = vadd.f32 %v1685_v22, %v14173_v56  ;;  %v5876_v11 = vshll.u32 %v5650_v14, 16  ;;  %v4305_v14 = vld [vmem:[#allocation2 + $0x54] sm:$0xe] }
 0x2f2   :  { %v4737_v9 = vpack.c.b16 %v4679_v52, %v4678_v10  ;;  %v14175_v10 = vld [vmem:[#allocation29_spill] sm:$0xff] }
 0x2f3   :  { %v4212_v1 = vpop.f32.mrf.mxu0  ;;  %v5878_v38 = vrot.slane %v5876_v11, 5 }
 0x2f4   :  { %v2922_v42 = vpop.f32.mrf.mxu3  ;;  %5427 = vmatmul.bf16.gmra.mxu2 %v10174_v58  ;;  %v5866_v58 = vrot.slane %v5865_v49, 4  ;;  %v10331_v49 = vld [vmem:[#allocation2 + $0x58] sm:$0xf] }
 0x2f5   :  { %v3000_v55 = vadd.f32 %v2922_v42, %v2445_v31  ;;  %v1687_v43 = vpop.f32.mrf.mxu1  ;;  %v5856_v31 = vrot.slane %v5855_v20, 4  ;;  %v5870_v42 = vrot.slane %v5868_v63, 5 }
 0x2f6   :  { %v1688_v52 = vadd.f32 %v1687_v43, %v14175_v10 }
 0x2f7   :  { %v2370_v47 = vpop.f32.mrf.mxu2  ;;  %v11444_v56 = vadd.f32 %v4212_v1, %v3000_v55  ;;  %v5861_v20 = vsel %vm10507_vm2, %v5856_v31, %v11426_v24  ;;  %v5871_v63 = vsel %vm10507_vm2, %v5866_v58, %v5870_v42  ;;  %v11451_v1 = vrot.slane %v5882_v2, 5 }
 0x2f8   :  { %v2446_v19 = vadd.f32 %v2370_v47, %v1686_v18  ;;  %v4471_v18 = vrot.slane %v10331_v49, 5  ;;  %v5875_v47 = vrot.slane %v5873_v32, 4  ;;  %v5888_v55 = vrot.slane %v5886_v41, 4  ;;  %v10175_v32 = vld [vmem:[#allocation2 + $0x54] sm:$0xff]  ;;  %v10332_v49 = vld [vmem:[#allocation2 + $0x5c] sm:$0x1] }
 0x2f9   :  { %6717 = vmatmul.bf16.gmra.mxu3 %v6581_v6  ;;  %14174 = vst [vmem:[#allocation27_spill] sm:$0xff] %v11444_v56  ;;  %v6523_v31 = vunpack.c.l.b16 %v5861_v20  ;;  %v6524_v58 = vunpack.c.l.b16 %v5871_v63  ;;  %v9744_v2 = vrot.slane %v4305_v14, 9  ;;  %v4474_v43 = vrot.slane %v10332_v49, 5 }
 0x2fa   :  { %v4473_v41 = vrot.slane %v4471_v18, 4  ;;  %v5879_v10 = vor.u32 %v5878_v38, %v5875_v47  ;;  %v5889_v30 = vor.u32 %v5888_v55, %v11451_v1 }
 0x2fb   :  { %v4215_v22 = vpop.f32.mrf.mxu0 }
 0x2fc   :  { %v2925_v26 = vpop.f32.mrf.mxu3  ;;  %v4475_v14 = vsel %vm10720_vm5, %v4473_v41, %v4474_v43  ;;  %v5880_v38 = vrot.slane %v5879_v10, 4  ;;  %v5890_v55 = vrot.slane %v5889_v30, 4 }
 0x2fd   :  { %v3001_v6 = vadd.f32 %v2925_v26, %v2446_v19  ;;  %v1690_v54 = vpop.f32.mrf.mxu1  ;;  %v7089_v19 = vrot.slane %v7087_v36, 4  ;;  %v11455_v26 = vld [vmem:[#allocation2 + $0x68] sm:$0x1] }
 0x2fe   :  { %7495 = vmatmul.bf16.gmra.mxu0 %v7359_v51  ;;  %v7088_v51 = vsel %vm10720_vm5, %v9999_v61, %v7087_v36  ;;  %v5892_v56 = vshll.u32 %v11455_v26, 16 }
 0x2ff   :  { %v2372_v24 = vpop.f32.mrf.mxu2  ;;  %v11459_v42 = vadd.f32 %v4215_v22, %v3001_v6  ;;  %v7301_v63 = vunpack.c.l.b16 %v7088_v51  ;;  %v6582_v22 = vpack.c.b16 %v6524_v58, %v6523_v31  ;;  %v4472_v6 = vsel %vm10720_vm5, %v9744_v2, %v4471_v18  ;;  %v5653_v31 = vld [vmem:[#allocation2 + $0x6c] sm:$0xf] }
 0x300   :  { %4877 = vmatmul.bf16.gmra.mxu1 %v4737_v9  ;;  %v2447_v11 = vadd.f32 %v2372_v24, %v1688_v52  ;;  %v7091_v9 = vsel %vm10720_vm5, %v7089_v19, %v7090_v35  ;;  %v5894_v52 = vrot.slane %v5892_v56, 5  ;;  %v14177_v24 = vld [vmem:[#allocation31_spill] sm:$0xff]  ;;  %v7094_v19 = vrot.slane %v11439_v0, 5 }
 0x301   :  { %14176 = vst [vmem:[#allocation29_spill] sm:$0xff] %v11459_v42  ;;  %v7302_v47 = vunpack.c.l.b16 %v7091_v9  ;;  %v1691_v49 = vadd.f32 %v1690_v54, %v14177_v24  ;;  %v6928_v42 = vld [vmem:[#allocation2 + $0x60] sm:$0xe]  ;;  %v4680_v51 = vunpack.c.l.b16 %v4472_v6  ;;  %v5885_v2 = vsel %vm10507_vm2, %v5880_v38, %v11451_v1  ;;  %v14179_v24 = vld [vmem:[#allocation33_spill] sm:$0xff] }
 0x302   :  { %v5895_v56 = vsel %vm10507_vm2, %v5890_v55, %v5894_v52  ;;  %v10000_v54 = vrot.slane %v6928_v42, 9  ;;  %v7096_v43 = vrot.slane %v7094_v19, 4  ;;  %v7097_v0 = vrot.slane %v11455_v26, 5  ;;  %v4306_v52 = vld [vmem:[#allocation2 + $0x60] sm:$0xe] }
 0x303   :  { %v4217_v50 = vpop.f32.mrf.mxu0  ;;  %v7360_v18 = vpack.c.b16 %v7302_v47, %v7301_v63  ;;  %v5897_v10 = vshrl.u32 %v5653_v31, 16  ;;  %v10333_v47 = vld [vmem:[#allocation2 + $0x64] sm:$0xf]  ;;  %v6525_v42 = vunpack.c.l.b16 %v5885_v2  ;;  %v6526_v55 = vunpack.c.l.b16 %v5895_v56 }
 0x304   :  { %v2927_v20 = vpop.f32.mrf.mxu3  ;;  %5432 = vmatmul.bf16.gmra.mxu2 %v10175_v32  ;;  %v11471_v32 = vld [vmem:[#allocation2 + $0x70] sm:$0xf]  ;;  %v4478_v38 = vrot.slane %v10333_v47, 5  ;;  %v10176_v2 = vld [vmem:[#allocation2 + $0x60] sm:$0xff]  ;;  %v9745_v56 = vrot.slane %v4306_v52, 9 }
 0x305   :  { %v3002_v36 = vadd.f32 %v2927_v20, %v2447_v11  ;;  %v1692_v61 = vpop.f32.mrf.mxu1  ;;  %v4681_v11 = vunpack.c.l.b16 %v4475_v14  ;;  %v5906_v63 = vshll.u32 %v11471_v32, 16  ;;  %v5910_v6 = vshrl.u32 %v11471_v32, 16  ;;  %v10334_v47 = vld [vmem:[#allocation2 + $0x68] sm:$0x1]  ;;  %v14181_v52 = vld [vmem:[#allocation35_spill] sm:$0xff] }
 0x306   :  { %v1693_v26 = vadd.f32 %v1692_v61, %v14179_v24  ;;  %v4481_v61 = vrot.slane %v10334_v47, 5  ;;  %v11490_v24 = vld [vmem:[#allocation2 + $0x74] sm:$0x1]  ;;  %v6929_v47 = vld [vmem:[#allocation2 + $0x6c] sm:$0xe] }
 0x307   :  { %v2375_v35 = vpop.f32.mrf.mxu2  ;;  %v11479_v30 = vadd.f32 %v4217_v50, %v3002_v36  ;;  %v4738_v20 = vpack.c.b16 %v4681_v11, %v4680_v51  ;;  %v7095_v50 = vsel %vm10720_vm5, %v10000_v54, %v7094_v19  ;;  %v7098_v36 = vsel %vm10720_vm5, %v7096_v43, %v7097_v0 }
 0x308   :  { %v2448_v58 = vadd.f32 %v2375_v35, %v1691_v49  ;;  %v5899_v49 = vrot.slane %v5897_v10, 4  ;;  %v5908_v11 = vrot.slane %v5906_v63, 5  ;;  %v7303_v54 = vunpack.c.l.b16 %v7095_v50  ;;  %v11498_v50 = vld [vmem:[#allocation2 + $0x7c] sm:$0xf] }
 0x309   :  { %6722 = vmatmul.bf16.gmra.mxu3 %v6582_v22  ;;  %14178 = vst [vmem:[#allocation31_spill] sm:$0xff] %v11479_v30  ;;  %v5900_v22 = vshll.u32 %v5653_v31, 16  ;;  %v5912_v31 = vrot.slane %v5910_v6, 4  ;;  %v6583_v43 = vpack.c.b16 %v6526_v55, %v6525_v42  ;;  %v7304_v0 = vunpack.c.l.b16 %v7098_v36 }
 0x30a   :  { %v4479_v63 = vsel %vm10720_vm5, %v9745_v56, %v4478_v38 }
 0x30b   :  { %v4220_v41 = vpop.f32.mrf.mxu0  ;;  %v5902_v51 = vrot.slane %v5900_v22, 5  ;;  %v7361_v42 = vpack.c.b16 %v7304_v0, %v7303_v54  ;;  %v4682_v36 = vunpack.c.l.b16 %v4479_v63  ;;  %v10335_v63 = vld [vmem:[#allocation2 + $0x70] sm:$0xf] }
 0x30c   :  { %v2930_v9 = vpop.f32.mrf.mxu3 }
 0x30d   :  { %v3003_v14 = vadd.f32 %v2930_v9, %v2448_v58  ;;  %v1695_v1 = vpop.f32.mrf.mxu1  ;;  %v4480_v9 = vrot.slane %v4478_v38, 4  ;;  %v5903_v10 = vor.u32 %v5902_v51, %v5899_v49  ;;  %v7101_v38 = vrot.slane %v11471_v32, 5 }
 0x30e   :  { %7500 = vmatmul.bf16.gmra.mxu0 %v7360_v18 }
 0x30f   :  { %v2377_v35 = vpop.f32.mrf.mxu2  ;;  %v11488_v58 = vadd.f32 %v4220_v41, %v3003_v14  ;;  %v4482_v6 = vsel %vm10720_vm5, %v4480_v9, %v4481_v61  ;;  %v5913_v14 = vor.u32 %v5912_v31, %v5908_v11  ;;  %v5904_v51 = vrot.slane %v5903_v10, 4 }
 0x310   :  { %4882 = vmatmul.bf16.gmra.mxu1 %v4738_v20  ;;  %v2449_v18 = vadd.f32 %v2377_v35, %v1693_v26  ;;  %v5916_v20 = vshll.u32 %v11490_v24, 16  ;;  %v1696_v26 = vadd.f32 %v1695_v1, %v14181_v52  ;;  %v5656_v35 = vld [vmem:[#allocation2 + $0x78] sm:$0xf]  ;;  %v4683_v49 = vunpack.c.l.b16 %v4482_v6 }
 0x311   :  { %14180 = vst [vmem:[#allocation33_spill] sm:$0xff] %v11488_v58  ;;  %v5921_v56 = vshrl.u32 %v5656_v35, 16  ;;  %v5924_v9 = vshll.u32 %v5656_v35, 16  ;;  %v5930_v31 = vshll.u32 %v11498_v50, 16  ;;  %v5934_v1 = vshrl.u32 %v11498_v50, 16 }
 0x312   :  { %v4739_v0 = vpack.c.b16 %v4683_v49, %v4682_v36  ;;  %v10001_v10 = vrot.slane %v6929_v47, 9  ;;  %v7104_v35 = vrot.slane %v11490_v24, 5  ;;  %v14183_v49 = vld [vmem:[#allocation37_spill] sm:$0xff] }
 0x313   :  { %v4222_v19 = vpop.f32.mrf.mxu0  ;;  %v5936_v36 = vrot.slane %v5934_v1, 4 }
 0x314   :  { %v2932_v30 = vpop.f32.mrf.mxu3  ;;  %5437 = vmatmul.bf16.gmra.mxu2 %v10176_v2  ;;  %v5918_v2 = vrot.slane %v5916_v20, 5  ;;  %v4485_v20 = vrot.slane %v10335_v63, 5  ;;  %v10336_v63 = vld [vmem:[#allocation2 + $0x74] sm:$0x1] }
 0x315   :  { %v3004_v22 = vadd.f32 %v2932_v30, %v2449_v18  ;;  %v1697_v41 = vpop.f32.mrf.mxu1  ;;  %v5914_v18 = vrot.slane %v5913_v14, 4  ;;  %v4488_v58 = vrot.slane %v10336_v63, 5 }
 0x317   :  { %v2380_v55 = vpop.f32.mrf.mxu2  ;;  %v11503_v52 = vadd.f32 %v4222_v19, %v3004_v22  ;;  %v5919_v32 = vsel %vm10507_vm2, %v5914_v18, %v5918_v2  ;;  %v5923_v19 = vrot.slane %v5921_v56, 4  ;;  %v5926_v22 = vrot.slane %v5924_v9, 5  ;;  %v11513_v18 = vld [vmem:[#allocation2 + $0x80] sm:$0x1]  ;;  %v8209_v9 = vld [vmem:[#allocation7 + $0xc] sm:$0x1] }
 0x318   :  { %v2450_v30 = vadd.f32 %v2380_v55, %v1696_v26  ;;  %v7103_v26 = vrot.slane %v7101_v38, 4  ;;  %v4307_v55 = vld [vmem:[#allocation2 + $0x6c] sm:$0xe]  ;;  %v6528_v56 = vunpack.c.l.b16 %v5919_v32  ;;  %v8210_v32 = vsel %vm11523_vm8, 0, %v8209_v9 }
 0x319   :  { %6727 = vmatmul.bf16.gmra.mxu3 %v6583_v43  ;;  %14182 = vst [vmem:[#allocation35_spill] sm:$0xff] %v11503_v52  ;;  %v5909_v43 = vsel %vm10507_vm2, %v5904_v51, %v5908_v11  ;;  %v11510_v52 = vrot.slane %v5930_v31, 5  ;;  %v1698_v11 = vadd.f32 %v1697_v41, %v14183_v49  ;;  %v7102_v41 = vsel %vm10720_vm5, %v10001_v10, %v7101_v38 }
 0x31a   :  { %v6527_v51 = vunpack.c.l.b16 %v5909_v43  ;;  %v7105_v31 = vsel %vm10720_vm5, %v7103_v26, %v7104_v35  ;;  %v5927_v1 = vor.u32 %v5926_v22, %v5923_v19  ;;  %v14185_v43 = vmov 0  ;;  %8211 = vst [vmem:[#allocation7 + $0xc] sm:$0x1] %v8210_v32 }
 0x31b   :  { %v4225_v61 = vpop.f32.mrf.mxu0  ;;  %v14186_v43 = vsel %vm11523_vm8, 4294967295, %v14185_v43  ;;  %v7305_v19 = vunpack.c.l.b16 %v7102_v41  ;;  %v7306_v22 = vunpack.c.l.b16 %v7105_v31 }
 0x31c   :  { %v2935_v54 = vpop.f32.mrf.mxu3  ;;  %14187 = vst [vmem:[#allocation48_spill] sm:$0xff] %v14186_v43  ;;  %v6584_v35 = vpack.c.b16 %v6528_v56, %v6527_v51  ;;  %v5928_v49 = vrot.slane %v5927_v1, 4  ;;  %v11539_v51 = vld [vmem:[#allocation2 + $0x88] sm:$0xf]  ;;  %v6930_v1 = vld [vmem:[#allocation2 + $0x78] sm:$0xe] }
 0x31d   :  { %v3005_v6 = vadd.f32 %v2935_v54, %v2450_v30  ;;  %v1700_v14 = vpop.f32.mrf.mxu1  ;;  %v9746_v30 = vrot.slane %v4307_v55, 9  ;;  %v4487_v54 = vrot.slane %v4485_v20, 4 }
 0x31e   :  { %7505 = vmatmul.bf16.gmra.mxu0 %v7361_v42  ;;  %v10177_v42 = vld [vmem:[#allocation2 + $0x6c] sm:$0xff] }
 0x31f   :  { %v2382_v47 = vpop.f32.mrf.mxu2  ;;  %v11515_v2 = vadd.f32 %v4225_v61, %v3005_v6  ;;  %v5940_v6 = vshll.u32 %v11513_v18, 16  ;;  %v4486_v38 = vsel %vm10720_vm5, %v9746_v30, %v4485_v20  ;;  %v4489_v10 = vsel %vm10720_vm5, %v4487_v54, %v4488_v58  ;;  %v5659_v30 = vld [vmem:[#allocation2 + $0x84] sm:$0xf] }
 0x320   :  { %4887 = vmatmul.bf16.gmra.mxu1 %v4739_v0  ;;  %v2451_v24 = vadd.f32 %v2382_v47, %v1698_v11  ;;  %v5937_v0 = vor.u32 %v5936_v36, %v11510_v52  ;;  %v14188_v47 = vld [vmem:[#allocation39_spill] sm:$0xff]  ;;  %v4684_v9 = vunpack.c.l.b16 %v4486_v38  ;;  %v14189_v54 = vmov 0 }
 0x321   :  { %14184 = vst [vmem:[#allocation37_spill] sm:$0xff] %v11515_v2  ;;  %v1701_v63 = vadd.f32 %v1700_v14, %v14188_v47  ;;  %v4685_v2 = vunpack.c.l.b16 %v4489_v10  ;;  %v5942_v37 = vrot.slane %v5940_v6, 5  ;;  %v14190_v54 = vsel %vm11535_vm11, 4294967295, %v14189_v54  ;;  %v4308_v47 = vld [vmem:[#allocation2 + $0x78] sm:$0xe] }
 0x322   :  { %v5938_v11 = vrot.slane %v5937_v0, 4  ;;  %14191 = vst [vmem:[#allocation39_spill] sm:$0xff] %v14190_v54  ;;  %v7108_v14 = vrot.slane %v11498_v50, 5  ;;  %v8308_v0 = vld [vmem:[#allocation7 + $0x14] sm:$0xf]  ;;  %v5945_v6 = vshrl.u32 %v5659_v30, 16 }
 0x323   :  { %v4227_v61 = vpop.f32.mrf.mxu0  ;;  %v4740_v41 = vpack.c.b16 %v4685_v2, %v4684_v9  ;;  %v8309_v38 = vsel %vm11535_vm11, 0, %v8308_v0  ;;  %v5948_v10 = vshll.u32 %v5659_v30, 16  ;;  %v10337_v2 = vld [vmem:[#allocation2 + $0x7c] sm:$0xf]  ;;  %v7111_v30 = vrot.slane %v11513_v18, 5 }
 0x324   :  { %v2937_v55 = vpop.f32.mrf.mxu3  ;;  %5442 = vmatmul.bf16.gmra.mxu2 %v10177_v42  ;;  %v5933_v42 = vsel %vm10507_vm2, %v5928_v49, %v11510_v52  ;;  %v5943_v31 = vsel %vm10507_vm2, %v5938_v11, %v5942_v37  ;;  %v5958_v52 = vshrl.u32 %v11539_v51, 16  ;;  %8310 = vst [vmem:[#allocation7 + $0x14] sm:$0xf] %v8309_v38  ;;  %v14193_v37 = vld [vmem:[#allocation42_spill] sm:$0xff]  ;;  %v5947_v0 = vrot.slane %v5945_v6, 4 }
 0x325   :  { %v3006_v26 = vadd.f32 %v2937_v55, %v2451_v24  ;;  %v1702_v36 = vpop.f32.mrf.mxu1  ;;  %v7362_v24 = vpack.c.b16 %v7306_v22, %v7305_v19  ;;  %v4492_v22 = vrot.slane %v10337_v2, 5  ;;  %v6529_v11 = vunpack.c.l.b16 %v5933_v42  ;;  %v8212_v6 = vld [vmem:[#allocation7 + $0x18] sm:$0x1] }
 0x326   :  { %v5960_v38 = vrot.slane %v5958_v52, 4  ;;  %v9747_v42 = vrot.slane %v4308_v47, 9  ;;  %v8213_v52 = vsel %vm11523_vm8, 0, %v8212_v6 }
 0x327   :  { %v2385_v20 = vpop.f32.mrf.mxu2  ;;  %v11547_v32 = vadd.f32 %v4227_v61, %v3006_v26  ;;  %v6530_v61 = vunpack.c.l.b16 %v5943_v31  ;;  %v10002_v26 = vrot.slane %v6930_v1, 9  ;;  %v4494_v31 = vrot.slane %v4492_v22, 4  ;;  %v10338_v1 = vld [vmem:[#allocation2 + $0x80] sm:$0x1]  ;;  %8214 = vst [vmem:[#allocation7 + $0x18] sm:$0x1] %v8213_v52 }
 0x328   :  { %v2452_v58 = vadd.f32 %v2385_v20, %v1701_v63  ;;  %v14194_v63 = vld [vmem:[#allocation41_spill] sm:$0xff]  ;;  %v7110_v20 = vrot.slane %v7108_v14, 4 }
 0x329   :  { %6732 = vmatmul.bf16.gmra.mxu3 %v6584_v35  ;;  %14192 = vst [vmem:[#allocation49_spill] sm:$0xff] %v11547_v32  ;;  %v5954_v35 = vshll.u32 %v11539_v51, 16  ;;  %v1703_v9 = vadd.f32 %v1702_v36, %v14194_v63  ;;  %v7109_v18 = vsel %vm10720_vm5, %v10002_v26, %v7108_v14  ;;  %v4493_v63 = vsel %vm10720_vm5, %v9747_v42, %v4492_v22  ;;  %v8311_v52 = vld [vmem:[#allocation7 + $0x20] sm:$0xf] }
 0x32a   :  { %v5964_v26 = vshll.u32 %v11560_v44, 16 }
 0x32b   :  { %v4230_v56 = vpop.f32.mrf.mxu0 }
 0x32c   :  { %v2940_v55 = vpop.f32.mrf.mxu3  ;;  %v5966_v42 = vrot.slane %v5964_v26, 5 }
 0x32d   :  { %v3007_v50 = vadd.f32 %v2940_v55, %v2452_v58  ;;  %v4853_v19 = vpop.f32.mrf.mxu1  ;;  %v5950_v58 = vrot.slane %v5948_v10, 5  ;;  %v11556_v55 = vrot.slane %v5954_v35, 5  ;;  %v6585_v35 = vpack.c.b16 %v6530_v61, %v6529_v11 }
 0x32e   :  { %7510 = vmatmul.bf16.gmra.mxu0 %v7362_v24  ;;  %v5013_v49 = vadd.f32 %v4853_v19, %v14193_v37  ;;  %v10178_v19 = vld [vmem:[#allocation2 + $0x78] sm:$0xff]  ;;  %v4495_v37 = vrot.slane %v10338_v1, 5  ;;  %v6931_v1 = vld [vmem:[#allocation2 + $0x84] sm:$0xe] }
 0x32f   :  { %v2387_v32 = vpop.f32.mrf.mxu2  ;;  %v11558_v2 = vadd.f32 %v4230_v56, %v3007_v50  ;;  %v5951_v56 = vor.u32 %v5950_v58, %v5947_v0  ;;  %v4686_v58 = vunpack.c.l.b16 %v4493_v63 }
 0x330   :  { %4892 = vmatmul.bf16.gmra.mxu1 %v4740_v41  ;;  %v2453_v24 = vadd.f32 %v2387_v32, %v1703_v9  ;;  %v7112_v41 = vsel %vm10720_vm5, %v7110_v20, %v7111_v30  ;;  %v5961_v32 = vor.u32 %v5960_v38, %v11556_v55  ;;  %v4496_v14 = vsel %vm10720_vm5, %v4494_v31, %v4495_v37  ;;  %v5662_v20 = vld [vmem:[#allocation2 + $0x90] sm:$0xf]  ;;  %v11575_v30 = vld [vmem:[#allocation2 + $0x94] sm:$0xf] }
 0x331   :  { %14195 = vst [vmem:[#allocation42_spill] sm:$0xff] %v11558_v2  ;;  %v7307_v9 = vunpack.c.l.b16 %v7109_v18  ;;  %v7308_v11 = vunpack.c.l.b16 %v7112_v41  ;;  %v4687_v38 = vunpack.c.l.b16 %v4496_v14  ;;  %v5969_v31 = vshrl.u32 %v5662_v20, 16 }
 0x332   :  { %v5962_v22 = vrot.slane %v5961_v32, 4  ;;  %v5972_v6 = vshll.u32 %v5662_v20, 16  ;;  %v5978_v18 = vshll.u32 %v11575_v30, 16  ;;  %v5982_v41 = vshrl.u32 %v11575_v30, 16  ;;  %v10339_v32 = vld [vmem:[#allocation2 + $0x88] sm:$0xf] }
 0x333   :  { %v4232_v36 = vpop.f32.mrf.mxu0  ;;  %v7363_v37 = vpack.c.b16 %v7308_v11, %v7307_v9  ;;  %v4499_v14 = vrot.slane %v10339_v32, 5 }
 0x334   :  { %v2942_v10 = vpop.f32.mrf.mxu3  ;;  %5447 = vmatmul.bf16.gmra.mxu2 %v10178_v19 }
 0x335   :  { %v3008_v50 = vadd.f32 %v2942_v10, %v2453_v24  ;;  %v4855_v47 = vpop.f32.mrf.mxu1  ;;  %v5952_v24 = vrot.slane %v5951_v56, 4  ;;  %v7115_v10 = vrot.slane %v11539_v51, 5  ;;  %v4741_v56 = vpack.c.b16 %v4687_v38, %v4686_v58 }
 0x336   :  { %v5014_v61 = vadd.f32 %v4855_v47, %v10947_v15  ;;  %v5967_v51 = vsel %vm10507_vm2, %v5962_v22, %v5966_v42  ;;  %v11590_v58 = vrot.slane %v5978_v18, 5  ;;  %v5984_v38 = vrot.slane %v5982_v41, 4  ;;  %v10340_v22 = vld [vmem:[#allocation2 + $0x8c] sm:$0x1] }
 0x337   :  { %v5408_v0 = vpop.f32.mrf.mxu2  ;;  %v11580_v47 = vadd.f32 %v4232_v36, %v3008_v50  ;;  %v5957_v11 = vsel %vm10507_vm2, %v5952_v24, %v11556_v55  ;;  %v4309_v36 = vld [vmem:[#allocation2 + $0x84] sm:$0xe]  ;;  %v5971_v50 = vrot.slane %v5969_v31, 4  ;;  %v4501_v24 = vrot.slane %v4499_v14, 4 }
 0x338   :  { %v5568_v19 = vadd.f32 %v5408_v0, %v5013_v49  ;;  %v8312_v49 = vsel %vm11535_vm11, 0, %v8311_v52  ;;  %v5974_v0 = vrot.slane %v5972_v6, 5  ;;  %v7118_v52 = vrot.slane %v11560_v44, 5 }
 0x339   :  { %6737 = vmatmul.bf16.gmra.mxu3 %v6585_v35  ;;  %14196 = vst [vmem:[#allocation41_spill] sm:$0xff] %v11580_v47  ;;  %v10003_v35 = vrot.slane %v6931_v1, 9  ;;  %v9748_v55 = vrot.slane %v4309_v36, 9  ;;  %v4502_v42 = vrot.slane %v10340_v22, 5  ;;  %v6532_v6 = vunpack.c.l.b16 %v5967_v51 }
 0x33a   :  { %8313 = vst [vmem:[#allocation7 + $0x20] sm:$0xf] %v8312_v49  ;;  %v11595_v49 = vld [vmem:[#allocation2 + $0x98] sm:$0x1]  ;;  %v5975_v41 = vor.u32 %v5974_v0, %v5971_v50 }
 0x33b   :  { %v7476_v15 = vpop.f32.mrf.mxu0  ;;  %v7116_v18 = vsel %vm10720_vm5, %v10003_v35, %v7115_v10 }
 0x33c   :  { %v6698_v63 = vpop.f32.mrf.mxu3  ;;  %v7309_v36 = vunpack.c.l.b16 %v7116_v18 }
 0x33d   :  { %v6858_v26 = vadd.f32 %v6698_v63, %v5568_v19  ;;  %v4858_v9 = vpop.f32.mrf.mxu1  ;;  %v7117_v19 = vrot.slane %v7115_v10, 4 }
 0x33e   :  { %7515 = vmatmul.bf16.gmra.mxu0 %v7363_v37  ;;  %v5015_v20 = vadd.f32 %v4858_v9, %v10954_v16  ;;  %v10179_v37 = vld [vmem:[#allocation2 + $0x84] sm:$0xff]  ;;  %v6531_v16 = vunpack.c.l.b16 %v5957_v11  ;;  %v4503_v11 = vsel %vm10720_vm5, %v4501_v24, %v4502_v42  ;;  %v5665_v42 = vld [vmem:[#allocation2 + $0x9c] sm:$0xf] }
 0x33f   :  { %v11592_v1 = vadd.f32 %v7476_v15, %v6858_v26  ;;  %v5410_v63 = vpop.f32.mrf.mxu2  ;;  %v5985_v15 = vor.u32 %v5984_v38, %v11590_v58  ;;  %v7119_v44 = vsel %vm10720_vm5, %v7117_v19, %v7118_v52  ;;  %v8215_v26 = vld [vmem:[#allocation7 + $0x24] sm:$0x1]  ;;  %v5976_v19 = vrot.slane %v5975_v41, 4 }
 0x340   :  { %4897 = vmatmul.bf16.gmra.mxu1 %v4741_v56  ;;  %v5569_v31 = vadd.f32 %v5410_v63, %v5014_v61  ;;  %v5988_v56 = vshll.u32 %v11595_v49, 16  ;;  %v4500_v61 = vsel %vm10720_vm5, %v9748_v55, %v4499_v14  ;;  %v8216_v10 = vsel %vm11523_vm8, 0, %v8215_v26 }
 0x341   :  { %v6586_v51 = vpack.c.b16 %v6532_v6, %v6531_v16  ;;  %8217 = vst [vmem:[#allocation7 + $0x24] sm:$0x1] %v8216_v10  ;;  %v7310_v0 = vunpack.c.l.b16 %v7119_v44  ;;  %v5986_v52 = vrot.slane %v5985_v15, 4  ;;  %v4688_v14 = vunpack.c.l.b16 %v4500_v61  ;;  %v6932_v15 = vld [vmem:[#allocation2 + $0x90] sm:$0xe] }
 0x342   :  { %v4689_v55 = vunpack.c.l.b16 %v4503_v11  ;;  %v5990_v22 = vrot.slane %v5988_v56, 5  ;;  %v7122_v16 = vrot.slane %v11575_v30, 5  ;;  %v5993_v44 = vshrl.u32 %v5665_v42, 16 }
 0x343   :  { %v7478_v32 = vpop.f32.mrf.mxu0 }
 0x344   :  { %v6700_v9 = vpop.f32.mrf.mxu3  ;;  %5452 = vmatmul.bf16.gmra.mxu2 %v10179_v37  ;;  %v7364_v37 = vpack.c.b16 %v7310_v0, %v7309_v36  ;;  %v4742_v18 = vpack.c.b16 %v4689_v55, %v4688_v14  ;;  %v5991_v41 = vsel %vm10507_vm2, %v5986_v52, %v5990_v22  ;;  %v4310_v0 = vld [vmem:[#allocation2 + $0x90] sm:$0xe]  ;;  %v7124_v14 = vrot.slane %v7122_v16, 4 }
 0x345   :  { %v6859_v35 = vadd.f32 %v6700_v9, %v5569_v31  ;;  %v4860_v50 = vpop.f32.mrf.mxu1  ;;  %v11612_v31 = vld [vmem:[#allocation2 + $0xa0] sm:$0xf]  ;;  %v5996_v9 = vshll.u32 %v5665_v42, 16  ;;  %v6534_v52 = vunpack.c.l.b16 %v5991_v41  ;;  %v7125_v55 = vrot.slane %v11595_v49, 5 }
 0x346   :  { %v5016_v38 = vadd.f32 %v4860_v50, %v10963_v4  ;;  %v5981_v4 = vsel %vm10507_vm2, %v5976_v19, %v11590_v58  ;;  %v6002_v61 = vshll.u32 %v11612_v31, 16  ;;  %v6006_v30 = vshrl.u32 %v11612_v31, 16 }
 0x347   :  { %v11610_v63 = vadd.f32 %v7478_v32, %v6859_v35  ;;  %v5413_v24 = vpop.f32.mrf.mxu2  ;;  %v8314_v32 = vld [vmem:[#allocation7 + $0x2c] sm:$0xf]  ;;  %v10341_v35 = vld [vmem:[#allocation2 + $0x94] sm:$0xf]  ;;  %v6533_v36 = vunpack.c.l.b16 %v5981_v4  ;;  %v10004_v50 = vrot.slane %v6932_v15, 9  ;;  %v5998_v42 = vrot.slane %v5996_v9, 5 }
 0x348   :  { %v5570_v26 = vadd.f32 %v5413_v24, %v5015_v20  ;;  %v8315_v20 = vsel %vm11535_vm11, 0, %v8314_v32  ;;  %v4506_v58 = vrot.slane %v10341_v35, 5  ;;  %v5995_v24 = vrot.slane %v5993_v44, 4  ;;  %v10342_v4 = vld [vmem:[#allocation2 + $0x98] sm:$0x1] }
 0x349   :  { %6742 = vmatmul.bf16.gmra.mxu3 %v6586_v51  ;;  %8316 = vst [vmem:[#allocation7 + $0x2c] sm:$0xf] %v8315_v20  ;;  %v6008_v32 = vrot.slane %v6006_v30, 4  ;;  %v9749_v20 = vrot.slane %v4310_v0, 9  ;;  %v4509_v15 = vrot.slane %v10342_v4, 5  ;;  %v7123_v41 = vsel %vm10720_vm5, %v10004_v50, %v7122_v16 }
 0x34a   :  { %v7126_v49 = vsel %vm10720_vm5, %v7124_v14, %v7125_v55  ;;  %v6587_v9 = vpack.c.b16 %v6534_v52, %v6533_v36  ;;  %v7311_v14 = vunpack.c.l.b16 %v7123_v41  ;;  %v14197_v52 = vld [vmem:[#allocation43_spill] sm:$0xff] }
 0x34b   :  { %v7481_v6 = vpop.f32.mrf.mxu0  ;;  %v4507_v0 = vsel %vm10720_vm5, %v9749_v20, %v4506_v58  ;;  %v7312_v36 = vunpack.c.l.b16 %v7126_v49 }
 0x34c   :  { %v6703_v56 = vpop.f32.mrf.mxu3 }
 0x34d   :  { %v6860_v11 = vadd.f32 %v6703_v56, %v5570_v26  ;;  %v4863_v10 = vpop.f32.mrf.mxu1  ;;  %v11628_v26 = vrot.slane %v6002_v61, 5  ;;  %v5999_v61 = vor.u32 %v5998_v42, %v5995_v24  ;;  %v11647_v42 = vld [vmem:[#allocation2 + $0xac] sm:$0xf] }
 0x34e   :  { %7520 = vmatmul.bf16.gmra.mxu0 %v7364_v37  ;;  %v5017_v51 = vadd.f32 %v4863_v10, %v10971_v33  ;;  %v10180_v37 = vld [vmem:[#allocation2 + $0x90] sm:$0xff]  ;;  %v4508_v33 = vrot.slane %v4506_v58, 4  ;;  %v11630_v10 = vld [vmem:[#allocation2 + $0xa4] sm:$0x1]  ;;  %v6026_v49 = vshll.u32 %v11647_v42, 16 }
 0x34f   :  { %v11625_v19 = vadd.f32 %v7481_v6, %v6860_v11  ;;  %v5415_v22 = vpop.f32.mrf.mxu2  ;;  %v6012_v50 = vshll.u32 %v11630_v10, 16  ;;  %v6000_v4 = vrot.slane %v5999_v61, 4 }
 0x350   :  { %4902 = vmatmul.bf16.gmra.mxu1 %v4742_v18  ;;  %v5571_v56 = vadd.f32 %v5415_v22, %v5016_v38  ;;  %v8218_v18 = vld [vmem:[#allocation7 + $0x30] sm:$0x1]  ;;  %v6009_v38 = vor.u32 %v6008_v32, %v11628_v26  ;;  %v4510_v16 = vsel %vm10720_vm5, %v4508_v33, %v4509_v15  ;;  %v5668_v22 = vld [vmem:[#allocation2 + $0xa8] sm:$0xf]  ;;  %v6933_v15 = vld [vmem:[#allocation2 + $0x9c] sm:$0xe] }
 0x351   :  { %v8219_v30 = vsel %vm11523_vm8, 0, %v8218_v18  ;;  %v6014_v33 = vrot.slane %v6012_v50, 5  ;;  %v6017_v18 = vshrl.u32 %v5668_v22, 16  ;;  %v6020_v41 = vshll.u32 %v5668_v22, 16 }
 0x352   :  { %8220 = vst [vmem:[#allocation7 + $0x30] sm:$0x1] %v8219_v30  ;;  %v6010_v20 = vrot.slane %v6009_v38, 4  ;;  %v6030_v30 = vshrl.u32 %v11647_v42, 16 }
 0x353   :  { %v7483_v6 = vpop.f32.mrf.mxu0  ;;  %v6019_v22 = vrot.slane %v6017_v18, 4 }
 0x354   :  { %v6705_v44 = vpop.f32.mrf.mxu3  ;;  %5457 = vmatmul.bf16.gmra.mxu2 %v10180_v37  ;;  %v4691_v37 = vunpack.c.l.b16 %v4510_v16  ;;  %v10005_v16 = vrot.slane %v6933_v15, 9  ;;  %v6032_v15 = vrot.slane %v6030_v30, 4 }
 0x355   :  { %v6861_v11 = vadd.f32 %v6705_v44, %v5571_v56  ;;  %v4865_v35 = vpop.f32.mrf.mxu1  ;;  %v4690_v56 = vunpack.c.l.b16 %v4507_v0  ;;  %v7365_v44 = vpack.c.b16 %v7312_v36, %v7311_v14  ;;  %v6005_v14 = vsel %vm10507_vm2, %v6000_v4, %v11628_v26 }
 0x356   :  { %v5018_v55 = vadd.f32 %v4865_v35, %v14197_v52  ;;  %v8317_v35 = vld [vmem:[#allocation7 + $0x38] sm:$0xf]  ;;  %v6015_v36 = vsel %vm10507_vm2, %v6010_v20, %v6014_v33  ;;  %v10344_v20 = vld [vmem:[#allocation2 + $0xa4] sm:$0x1] }
 0x357   :  { %v11645_v24 = vadd.f32 %v7483_v6, %v6861_v11  ;;  %v5418_v32 = vpop.f32.mrf.mxu2  ;;  %v7129_v11 = vrot.slane %v11612_v31, 5  ;;  %v4743_v0 = vpack.c.b16 %v4691_v37, %v4690_v56  ;;  %v4311_v31 = vld [vmem:[#allocation2 + $0x9c] sm:$0xe]  ;;  %v6022_v56 = vrot.slane %v6020_v41, 5 }
 0x358   :  { %v5572_v58 = vadd.f32 %v5418_v32, %v5017_v51  ;;  %v8318_v51 = vsel %vm11535_vm11, 0, %v8317_v35  ;;  %v11660_v37 = vrot.slane %v6026_v49, 5  ;;  %v9750_v26 = vrot.slane %v4311_v31, 9 }
 0x359   :  { %6747 = vmatmul.bf16.gmra.mxu3 %v6587_v9  ;;  %v10343_v9 = vld [vmem:[#allocation2 + $0xa0] sm:$0xf]  ;;  %8319 = vst [vmem:[#allocation7 + $0x38] sm:$0xf] %v8318_v51  ;;  %v4516_v33 = vrot.slane %v10344_v20, 5  ;;  %v6536_v41 = vunpack.c.l.b16 %v6015_v36  ;;  %v7130_v49 = vsel %vm10720_vm5, %v10005_v16, %v7129_v11  ;;  %v6023_v30 = vor.u32 %v6022_v56, %v6019_v22 }
 0x35a   :  { %v4513_v61 = vrot.slane %v10343_v9, 5  ;;  %v11665_v51 = vld [vmem:[#allocation2 + $0xb0] sm:$0x1]  ;;  %v7313_v22 = vunpack.c.l.b16 %v7130_v49 }
 0x35b   :  { %v7486_v6 = vpop.f32.mrf.mxu0 }
 0x35c   :  { %v6708_v52 = vpop.f32.mrf.mxu3  ;;  %v4515_v4 = vrot.slane %v4513_v61, 4 }
 0x35d   :  { %v6862_v38 = vadd.f32 %v6708_v52, %v5572_v58  ;;  %v4868_v50 = vpop.f32.mrf.mxu1  ;;  %v7131_v58 = vrot.slane %v7129_v11, 4  ;;  %v7132_v52 = vrot.slane %v11630_v10, 5 }
 0x35e   :  { %7525 = vmatmul.bf16.gmra.mxu0 %v7365_v44  ;;  %v5019_v32 = vadd.f32 %v4868_v50, %v10986_v28  ;;  %v10181_v44 = vld [vmem:[#allocation2 + $0x9c] sm:$0xff]  ;;  %v6535_v28 = vunpack.c.l.b16 %v6005_v14  ;;  %v8221_v50 = vld [vmem:[#allocation7 + $0x3c] sm:$0x1]  ;;  %v4517_v14 = vsel %vm10720_vm5, %v4515_v4, %v4516_v33  ;;  %v5671_v33 = vld [vmem:[#allocation2 + $0xb4] sm:$0xf] }
 0x35f   :  { %v11662_v35 = vadd.f32 %v7486_v6, %v6862_v38  ;;  %v5420_v9 = vpop.f32.mrf.mxu2  ;;  %v6033_v6 = vor.u32 %v6032_v15, %v11660_v37  ;;  %v7133_v10 = vsel %vm10720_vm5, %v7131_v58, %v7132_v52  ;;  %v8222_v11 = vsel %vm11523_vm8, 0, %v8221_v50 }
 0x360   :  { %4907 = vmatmul.bf16.gmra.mxu1 %v4743_v0  ;;  %v5573_v18 = vadd.f32 %v5420_v9, %v5018_v55  ;;  %v6036_v0 = vshll.u32 %v11665_v51, 16  ;;  %v4514_v55 = vsel %vm10720_vm5, %v9750_v26, %v4513_v61  ;;  %v6588_v36 = vpack.c.b16 %v6536_v41, %v6535_v28  ;;  %8223 = vst [vmem:[#allocation7 + $0x3c] sm:$0x1] %v8222_v11 }
 0x361   :  { %v7314_v15 = vunpack.c.l.b16 %v7133_v10  ;;  %v6024_v52 = vrot.slane %v6023_v30, 4  ;;  %v6034_v9 = vrot.slane %v6033_v6, 4  ;;  %v4692_v61 = vunpack.c.l.b16 %v4514_v55  ;;  %v6934_v30 = vld [vmem:[#allocation2 + $0xa8] sm:$0xe] }
 0x362   :  { %v4693_v26 = vunpack.c.l.b16 %v4517_v14  ;;  %v6038_v47 = vrot.slane %v6036_v0, 5  ;;  %v7136_v6 = vrot.slane %v11647_v42, 5  ;;  %v6041_v10 = vshrl.u32 %v5671_v33, 16 }
 0x363   :  { %v7488_v38 = vpop.f32.mrf.mxu0  ;;  %v6029_v28 = vsel %vm10507_vm2, %v6024_v52, %v11660_v37 }
 0x364   :  { %v6710_v31 = vpop.f32.mrf.mxu3  ;;  %5462 = vmatmul.bf16.gmra.mxu2 %v10181_v44  ;;  %v7366_v44 = vpack.c.b16 %v7314_v15, %v7313_v22  ;;  %v6039_v49 = vsel %vm10507_vm2, %v6034_v9, %v6038_v47  ;;  %v6537_v42 = vunpack.c.l.b16 %v6029_v28  ;;  %v10006_v22 = vrot.slane %v6934_v30, 9  ;;  %v10346_v28 = vld [vmem:[#allocation2 + $0xb0] sm:$0x1] }
 0x365   :  { %v6863_v16 = vadd.f32 %v6710_v31, %v5573_v18  ;;  %v4870_v56 = vpop.f32.mrf.mxu1  ;;  %v11682_v18 = vld [vmem:[#allocation2 + $0xb8] sm:$0xf]  ;;  %v6044_v31 = vshll.u32 %v5671_v33, 16  ;;  %v6538_v52 = vunpack.c.l.b16 %v6039_v49  ;;  %v7138_v9 = vrot.slane %v7136_v6, 4 }
 0x366   :  { %v5020_v58 = vadd.f32 %v4870_v56, %v10993_v62  ;;  %v4744_v62 = vpack.c.b16 %v4693_v26, %v4692_v61  ;;  %v6050_v55 = vshll.u32 %v11682_v18, 16  ;;  %v6054_v14 = vshrl.u32 %v11682_v18, 16  ;;  %v4312_v56 = vld [vmem:[#allocation2 + $0xa8] sm:$0xe] }
 0x367   :  { %v11680_v20 = vadd.f32 %v7488_v38, %v6863_v16  ;;  %v5423_v4 = vpop.f32.mrf.mxu2  ;;  %v8320_v38 = vld [vmem:[#allocation7 + $0x44] sm:$0xf]  ;;  %v10345_v16 = vld [vmem:[#allocation2 + $0xac] sm:$0xf]  ;;  %v7139_v61 = vrot.slane %v11665_v51, 5  ;;  %v6046_v33 = vrot.slane %v6044_v31, 5  ;;  %v7137_v49 = vsel %vm10720_vm5, %v10006_v22, %v7136_v6 }
 0x368   :  { %v5574_v50 = vadd.f32 %v5423_v4, %v5019_v32  ;;  %v8321_v32 = vsel %vm11535_vm11, 0, %v8320_v38  ;;  %v6043_v4 = vrot.slane %v6041_v10, 4  ;;  %v6056_v38 = vrot.slane %v6054_v14, 4 }
 0x369   :  { %6752 = vmatmul.bf16.gmra.mxu3 %v6588_v36  ;;  %8322 = vst [vmem:[#allocation7 + $0x44] sm:$0xf] %v8321_v32  ;;  %v4520_v36 = vrot.slane %v10345_v16, 5  ;;  %v9751_v32 = vrot.slane %v4312_v56, 9  ;;  %v4523_v30 = vrot.slane %v10346_v28, 5  ;;  %v7140_v51 = vsel %vm10720_vm5, %v7138_v9, %v7139_v61 }
 0x36a   :  { %v6589_v31 = vpack.c.b16 %v6538_v52, %v6537_v42  ;;  %v7315_v9 = vunpack.c.l.b16 %v7137_v49  ;;  %v7316_v42 = vunpack.c.l.b16 %v7140_v51  ;;  %v5674_v61 = vld [vmem:[#allocation2 + $0xc0] sm:$0xf]  ;;  %v6935_v28 = vld [vmem:[#allocation2 + $0xb4] sm:$0xe] }
 0x36b   :  { %v7491_v41 = vpop.f32.mrf.mxu0  ;;  %v4521_v56 = vsel %vm10720_vm5, %v9751_v32, %v4520_v36  ;;  %v6068_v49 = vshll.u32 %v5674_v61, 16 }
 0x36c   :  { %v6713_v0 = vpop.f32.mrf.mxu3 }
 0x36d   :  { %v6864_v37 = vadd.f32 %v6713_v0, %v5574_v50  ;;  %v4873_v11 = vpop.f32.mrf.mxu1  ;;  %v11698_v50 = vrot.slane %v6050_v55, 5  ;;  %v6047_v55 = vor.u32 %v6046_v33, %v6043_v4  ;;  %v11717_v4 = vld [vmem:[#allocation2 + $0xc4] sm:$0xf] }
 0x36e   :  { %7530 = vmatmul.bf16.gmra.mxu0 %v7366_v44  ;;  %v5021_v47 = vadd.f32 %v4873_v11, %v11000_v53  ;;  %v10182_v44 = vld [vmem:[#allocation2 + $0xa8] sm:$0xff]  ;;  %v4522_v53 = vrot.slane %v4520_v36, 4  ;;  %v11700_v11 = vld [vmem:[#allocation2 + $0xbc] sm:$0x1]  ;;  %v6074_v51 = vshll.u32 %v11717_v4, 16 }
 0x36f   :  { %v11695_v15 = vadd.f32 %v7491_v41, %v6864_v37  ;;  %v5425_v26 = vpop.f32.mrf.mxu2  ;;  %v6060_v22 = vshll.u32 %v11700_v11, 16 }
 0x370   :  { %4912 = vmatmul.bf16.gmra.mxu1 %v4744_v62  ;;  %v5575_v0 = vadd.f32 %v5425_v26, %v5020_v58  ;;  %v8224_v62 = vld [vmem:[#allocation7 + $0x48] sm:$0x1]  ;;  %v6057_v58 = vor.u32 %v6056_v38, %v11698_v50  ;;  %v4524_v6 = vsel %vm10720_vm5, %v4522_v53, %v4523_v30  ;;  %v4694_v38 = vunpack.c.l.b16 %v4521_v56 }
 0x371   :  { %v8225_v14 = vsel %vm11523_vm8, 0, %v8224_v62  ;;  %v6062_v53 = vrot.slane %v6060_v22, 5  ;;  %v6065_v30 = vshrl.u32 %v5674_v61, 16  ;;  %v7367_v62 = vpack.c.b16 %v7316_v42, %v7315_v9 }
 0x372   :  { %8226 = vst [vmem:[#allocation7 + $0x48] sm:$0x1] %v8225_v14  ;;  %v6058_v32 = vrot.slane %v6057_v58, 4  ;;  %v8323_v14 = vld [vmem:[#allocation7 + $0x50] sm:$0xf]  ;;  %v10007_v56 = vrot.slane %v6935_v28, 9 }
 0x373   :  { %v7493_v41 = vpop.f32.mrf.mxu0  ;;  %v6067_v42 = vrot.slane %v6065_v30, 4 }
 0x374   :  { %v6715_v10 = vpop.f32.mrf.mxu3  ;;  %5467 = vmatmul.bf16.gmra.mxu2 %v10182_v44  ;;  %v6048_v44 = vrot.slane %v6047_v55, 4  ;;  %v6063_v9 = vsel %vm10507_vm2, %v6058_v32, %v6062_v53  ;;  %v10348_v32 = vld [vmem:[#allocation2 + $0xbc] sm:$0x1] }
 0x375   :  { %v6865_v37 = vadd.f32 %v6715_v10, %v5575_v0  ;;  %v4875_v16 = vpop.f32.mrf.mxu1  ;;  %v4695_v0 = vunpack.c.l.b16 %v4524_v6  ;;  %v7143_v10 = vrot.slane %v11682_v18, 5  ;;  %v4313_v18 = vld [vmem:[#allocation2 + $0xb4] sm:$0xe]  ;;  %v4530_v53 = vrot.slane %v10348_v32, 5 }
 0x376   :  { %v5022_v52 = vadd.f32 %v4875_v16, %v11007_v59  ;;  %v6078_v59 = vshrl.u32 %v11717_v4, 16  ;;  %v6053_v22 = vsel %vm10507_vm2, %v6048_v44, %v11698_v50  ;;  %v9752_v50 = vrot.slane %v4313_v18, 9 }
 0x377   :  { %v11715_v26 = vadd.f32 %v7493_v41, %v6865_v37  ;;  %v5428_v33 = vpop.f32.mrf.mxu2  ;;  %v4745_v16 = vpack.c.b16 %v4695_v0, %v4694_v38  ;;  %v11730_v38 = vrot.slane %v6074_v51, 5  ;;  %v7144_v51 = vsel %vm10720_vm5, %v10007_v56, %v7143_v10 }
 0x378   :  { %v5576_v36 = vadd.f32 %v5428_v33, %v5021_v47  ;;  %v8324_v47 = vsel %vm11535_vm11, 0, %v8323_v14  ;;  %v6070_v33 = vrot.slane %v6068_v49, 5  ;;  %v6080_v0 = vrot.slane %v6078_v59, 4 }
 0x379   :  { %6757 = vmatmul.bf16.gmra.mxu3 %v6589_v31  ;;  %v10347_v31 = vld [vmem:[#allocation2 + $0xb8] sm:$0xf]  ;;  %8325 = vst [vmem:[#allocation7 + $0x50] sm:$0xf] %v8324_v47  ;;  %v7146_v14 = vrot.slane %v11700_v11, 5  ;;  %v6540_v49 = vunpack.c.l.b16 %v6063_v9  ;;  %v7317_v18 = vunpack.c.l.b16 %v7144_v51 }
 0x37a   :  { %v4527_v55 = vrot.slane %v10347_v31, 5  ;;  %v11735_v47 = vld [vmem:[#allocation2 + $0xc8] sm:$0x1]  ;;  %v6071_v59 = vor.u32 %v6070_v33, %v6067_v42 }
 0x37b   :  { %v7496_v41 = vpop.f32.mrf.mxu0 }
 0x37c   :  { %v6718_v37 = vpop.f32.mrf.mxu3  ;;  %v4529_v44 = vrot.slane %v4527_v55, 4 }
 0x37d   :  { %v6866_v58 = vadd.f32 %v6718_v37, %v5576_v36  ;;  %v4878_v6 = vpop.f32.mrf.mxu1  ;;  %v7145_v36 = vrot.slane %v7143_v10, 4 }
 0x37e   :  { %7535 = vmatmul.bf16.gmra.mxu0 %v7367_v62  ;;  %v5023_v61 = vadd.f32 %v4878_v6, %v11014_v60  ;;  %v10183_v62 = vld [vmem:[#allocation2 + $0xb4] sm:$0xff]  ;;  %v6539_v60 = vunpack.c.l.b16 %v6053_v22  ;;  %v4531_v22 = vsel %vm10720_vm5, %v4529_v44, %v4530_v53  ;;  %v5677_v53 = vld [vmem:[#allocation2 + $0xcc] sm:$0xf] }
 0x37f   :  { %v11732_v28 = vadd.f32 %v7496_v41, %v6866_v58  ;;  %v5430_v37 = vpop.f32.mrf.mxu2  ;;  %v6081_v41 = vor.u32 %v6080_v0, %v11730_v38  ;;  %v7147_v11 = vsel %vm10720_vm5, %v7145_v36, %v7146_v14  ;;  %v8227_v58 = vld [vmem:[#allocation7 + $0x54] sm:$0x1]  ;;  %v6072_v36 = vrot.slane %v6071_v59, 4  ;;  %v6936_v59 = vld [vmem:[#allocation2 + $0xc0] sm:$0xe] }
 0x380   :  { %4917 = vmatmul.bf16.gmra.mxu1 %v4745_v16  ;;  %v5577_v30 = vadd.f32 %v5430_v37, %v5022_v52  ;;  %v6084_v16 = vshll.u32 %v11735_v47, 16  ;;  %v4528_v52 = vsel %vm10720_vm5, %v9752_v50, %v4527_v55  ;;  %v8228_v10 = vsel %vm11523_vm8, 0, %v8227_v58 }
 0x381   :  { %v6590_v9 = vpack.c.b16 %v6540_v49, %v6539_v60  ;;  %8229 = vst [vmem:[#allocation7 + $0x54] sm:$0x1] %v8228_v10  ;;  %v7318_v33 = vunpack.c.l.b16 %v7147_v11  ;;  %v6082_v14 = vrot.slane %v6081_v41, 4  ;;  %v4696_v55 = vunpack.c.l.b16 %v4528_v52 }
 0x382   :  { %v4697_v50 = vunpack.c.l.b16 %v4531_v22  ;;  %v6086_v32 = vrot.slane %v6084_v16, 5  ;;  %v6077_v60 = vsel %vm10507_vm2, %v6072_v36, %v11730_v38  ;;  %v7150_v41 = vrot.slane %v11717_v4, 5 }
 0x383   :  { %v7498_v31 = vpop.f32.mrf.mxu0  ;;  %v6089_v11 = vshrl.u32 %v5677_v53, 16  ;;  %v6541_v4 = vunpack.c.l.b16 %v6077_v60  ;;  %v10350_v60 = vld [vmem:[#allocation2 + $0xc8] sm:$0x1] }
 0x384   :  { %v6720_v6 = vpop.f32.mrf.mxu3  ;;  %5472 = vmatmul.bf16.gmra.mxu2 %v10183_v62  ;;  %v7368_v62 = vpack.c.b16 %v7318_v33, %v7317_v18  ;;  %v6087_v51 = vsel %vm10507_vm2, %v6082_v14, %v6086_v32  ;;  %v4314_v33 = vld [vmem:[#allocation2 + $0xc0] sm:$0xe] }
 0x385   :  { %v6867_v56 = vadd.f32 %v6720_v6, %v5577_v30  ;;  %v4880_v42 = vpop.f32.mrf.mxu1  ;;  %v11752_v30 = vld [vmem:[#allocation2 + $0xd0] sm:$0xf]  ;;  %v6092_v6 = vshll.u32 %v5677_v53, 16  ;;  %v6542_v14 = vunpack.c.l.b16 %v6087_v51 }
 0x386   :  { %v5024_v0 = vadd.f32 %v4880_v42, %v11023_v57  ;;  %v4746_v57 = vpack.c.b16 %v4697_v50, %v4696_v55  ;;  %v6098_v52 = vshll.u32 %v11752_v30, 16  ;;  %v6102_v22 = vshrl.u32 %v11752_v30, 16 }
 0x387   :  { %v11750_v37 = vadd.f32 %v7498_v31, %v6867_v56  ;;  %v5433_v44 = vpop.f32.mrf.mxu2  ;;  %v8326_v31 = vld [vmem:[#allocation7 + $0x5c] sm:$0xf]  ;;  %v10349_v56 = vld [vmem:[#allocation2 + $0xc4] sm:$0xf]  ;;  %v10008_v42 = vrot.slane %v6936_v59, 9  ;;  %v7152_v55 = vrot.slane %v7150_v41, 4 }
 0x388   :  { %v5578_v58 = vadd.f32 %v5433_v44, %v5023_v61  ;;  %v8327_v61 = vsel %vm11535_vm11, 0, %v8326_v31  ;;  %v7153_v50 = vrot.slane %v11735_v47, 5  ;;  %v6091_v44 = vrot.slane %v6089_v11, 4 }
 0x389   :  { %14198 = vst [vmem:[#allocation43_spill] sm:$0xff] %v11750_v37  ;;  %6762 = vmatmul.bf16.gmra.mxu3 %v6590_v9  ;;  %v4534_v9 = vrot.slane %v10349_v56, 5  ;;  %v6094_v53 = vrot.slane %v6092_v6, 5  ;;  %v6104_v31 = vrot.slane %v6102_v22, 4  ;;  %v4537_v59 = vrot.slane %v10350_v60, 5 }
 0x38a   :  { %8328 = vst [vmem:[#allocation7 + $0x5c] sm:$0xf] %v8327_v61  ;;  %v9753_v61 = vrot.slane %v4314_v33, 9  ;;  %v7151_v51 = vsel %vm10720_vm5, %v10008_v42, %v7150_v41  ;;  %v7154_v47 = vsel %vm10720_vm5, %v7152_v55, %v7153_v50  ;;  %v6591_v6 = vpack.c.b16 %v6542_v14, %v6541_v4  ;;  %v5680_v50 = vld [vmem:[#allocation2 + $0xf0] sm:$0xf] }
 0x38b   :  { %v7501_v49 = vpop.f32.mrf.mxu0  ;;  %v7319_v55 = vunpack.c.l.b16 %v7151_v51  ;;  %v7320_v4 = vunpack.c.l.b16 %v7154_v47  ;;  %v6937_v60 = vld [vmem:[#allocation2 + $0xcc] sm:$0xe]  ;;  %v6116_v51 = vshll.u32 %v5680_v50, 16 }
 0x38c   :  { %v6723_v16 = vpop.f32.mrf.mxu3  ;;  %v4535_v33 = vsel %vm10720_vm5, %v9753_v61, %v4534_v9 }
 0x38d   :  { %v6868_v38 = vadd.f32 %v6723_v16, %v5578_v58  ;;  %v4883_v10 = vpop.f32.mrf.mxu1  ;;  %v11768_v58 = vrot.slane %v6098_v52, 5  ;;  %v6095_v52 = vor.u32 %v6094_v53, %v6091_v44  ;;  %v11787_v44 = vld [vmem:[#allocation2 + $0xf4] sm:$0xf] }
 0x38e   :  { %7540 = vmatmul.bf16.gmra.mxu0 %v7368_v62  ;;  %v5025_v18 = vadd.f32 %v4883_v10, %v11031_v13  ;;  %v10184_v62 = vld [vmem:[#allocation2 + $0xc0] sm:$0xff]  ;;  %v4536_v13 = vrot.slane %v4534_v9, 4  ;;  %v11770_v10 = vld [vmem:[#allocation2 + $0xd4] sm:$0x1]  ;;  %v6122_v47 = vshll.u32 %v11787_v44, 16 }
 0x38f   :  { %v11765_v36 = vadd.f32 %v7501_v49, %v6868_v38  ;;  %v5435_v32 = vpop.f32.mrf.mxu2  ;;  %v6108_v42 = vshll.u32 %v11770_v10, 16 }
 0x390   :  { %4922 = vmatmul.bf16.gmra.mxu1 %v4746_v57  ;;  %v5579_v16 = vadd.f32 %v5435_v32, %v5024_v0  ;;  %v8230_v57 = vld [vmem:[#allocation7 + $0x60] sm:$0x1]  ;;  %v6105_v0 = vor.u32 %v6104_v31, %v11768_v58  ;;  %v4538_v41 = vsel %vm10720_vm5, %v4536_v13, %v4537_v59  ;;  %v4698_v31 = vunpack.c.l.b16 %v4535_v33 }
 0x391   :  { %14199 = vst [vmem:[#allocation50_spill] sm:$0xff] %v11765_v36  ;;  %v8231_v22 = vsel %vm11523_vm8, 0, %v8230_v57  ;;  %v6110_v13 = vrot.slane %v6108_v42, 5  ;;  %v6113_v59 = vshrl.u32 %v5680_v50, 16  ;;  %v7369_v57 = vpack.c.b16 %v7320_v4, %v7319_v55 }
 0x392   :  { %8232 = vst [vmem:[#allocation7 + $0x60] sm:$0x1] %v8231_v22  ;;  %v6106_v61 = vrot.slane %v6105_v0, 4  ;;  %v8329_v22 = vld [vmem:[#allocation7 + $0x68] sm:$0xf]  ;;  %v10009_v33 = vrot.slane %v6937_v60, 9 }
 0x393   :  { %v7503_v49 = vpop.f32.mrf.mxu0  ;;  %v6115_v4 = vrot.slane %v6113_v59, 4 }
 0x394   :  { %v6725_v11 = vpop.f32.mrf.mxu3  ;;  %5477 = vmatmul.bf16.gmra.mxu2 %v10184_v62  ;;  %v6096_v62 = vrot.slane %v6095_v52, 4  ;;  %v6111_v55 = vsel %vm10507_vm2, %v6106_v61, %v6110_v13  ;;  %v10352_v61 = vld [vmem:[#allocation2 + $0xec] sm:$0x1] }
 0x395   :  { %v6869_v38 = vadd.f32 %v6725_v11, %v5579_v16  ;;  %v4885_v56 = vpop.f32.mrf.mxu1  ;;  %v4699_v16 = vunpack.c.l.b16 %v4538_v41  ;;  %v7157_v11 = vrot.slane %v11752_v30, 5  ;;  %v4315_v30 = vld [vmem:[#allocation2 + $0xe4] sm:$0xe]  ;;  %v4544_v13 = vrot.slane %v10352_v61, 5 }
 0x396   :  { %v5026_v14 = vadd.f32 %v4885_v56, %v11039_v21  ;;  %v6126_v21 = vshrl.u32 %v11787_v44, 16  ;;  %v6101_v42 = vsel %vm10507_vm2, %v6096_v62, %v11768_v58  ;;  %v9754_v58 = vrot.slane %v4315_v30, 9 }
 0x397   :  { %v11785_v32 = vadd.f32 %v7503_v49, %v6869_v38  ;;  %v5438_v53 = vpop.f32.mrf.mxu2  ;;  %v4747_v56 = vpack.c.b16 %v4699_v16, %v4698_v31  ;;  %v11800_v31 = vrot.slane %v6122_v47, 5  ;;  %v7158_v47 = vsel %vm10720_vm5, %v10009_v33, %v7157_v11 }
 0x398   :  { %v5580_v9 = vadd.f32 %v5438_v53, %v5025_v18  ;;  %v8330_v18 = vsel %vm11535_vm11, 0, %v8329_v22  ;;  %v6118_v53 = vrot.slane %v6116_v51, 5  ;;  %v6128_v16 = vrot.slane %v6126_v21, 4 }
 0x399   :  { %14200 = vst [vmem:[#allocation51_spill] sm:$0xff] %v11785_v32  ;;  %6767 = vmatmul.bf16.gmra.mxu3 %v6591_v6  ;;  %v10351_v6 = vld [vmem:[#allocation2 + $0xe8] sm:$0xf]  ;;  %v7160_v22 = vrot.slane %v11770_v10, 5  ;;  %v6544_v51 = vunpack.c.l.b16 %v6111_v55  ;;  %v7321_v30 = vunpack.c.l.b16 %v7158_v47 }
 0x39a   :  { %v4541_v52 = vrot.slane %v10351_v6, 5  ;;  %8331 = vst [vmem:[#allocation7 + $0x68] sm:$0xf] %v8330_v18  ;;  %v11805_v18 = vld [vmem:[#allocation2 + $0xf8] sm:$0x1]  ;;  %v6119_v21 = vor.u32 %v6118_v53, %v6115_v4 }
 0x39b   :  { %v7506_v49 = vpop.f32.mrf.mxu0 }
 0x39c   :  { %v6728_v38 = vpop.f32.mrf.mxu3  ;;  %v4543_v62 = vrot.slane %v4541_v52, 4 }
 0x39d   :  { %v6870_v0 = vadd.f32 %v6728_v38, %v5580_v9  ;;  %v4888_v41 = vpop.f32.mrf.mxu1  ;;  %v7159_v9 = vrot.slane %v7157_v11, 4 }
 0x39e   :  { %7545 = vmatmul.bf16.gmra.mxu0 %v7369_v57  ;;  %v5027_v50 = vadd.f32 %v4888_v41, %v11046_v29  ;;  %v10185_v57 = vld [vmem:[#allocation2 + $0xcc] sm:$0xff]  ;;  %v6543_v29 = vunpack.c.l.b16 %v6101_v42  ;;  %v4545_v42 = vsel %vm10720_vm5, %v4543_v62, %v4544_v13  ;;  %v5683_v13 = vld [vmem:[#allocation2 + $0xfc] sm:$0xf] }
 0x39f   :  { %v11802_v60 = vadd.f32 %v7506_v49, %v6870_v0  ;;  %v5440_v38 = vpop.f32.mrf.mxu2  ;;  %v6129_v49 = vor.u32 %v6128_v16, %v11800_v31  ;;  %v7161_v10 = vsel %vm10720_vm5, %v7159_v9, %v7160_v22  ;;  %v8233_v0 = vld [vmem:[#allocation7 + $0x6c] sm:$0x1]  ;;  %v6120_v9 = vrot.slane %v6119_v21, 4  ;;  %v6938_v21 = vld [vmem:[#allocation2 + $0xf0] sm:$0xe] }
 0x3a0   :  { %4927 = vmatmul.bf16.gmra.mxu1 %v4747_v56  ;;  %v5581_v59 = vadd.f32 %v5440_v38, %v5026_v14  ;;  %v6132_v56 = vshll.u32 %v11805_v18, 16  ;;  %v4542_v14 = vsel %vm10720_vm5, %v9754_v58, %v4541_v52  ;;  %v8234_v11 = vsel %vm11523_vm8, 0, %v8233_v0 }
 0x3a1   :  { %14201 = vst [vmem:[#allocation52_spill] sm:$0xff] %v11802_v60  ;;  %v6592_v55 = vpack.c.b16 %v6544_v51, %v6543_v29  ;;  %v7322_v53 = vunpack.c.l.b16 %v7161_v10  ;;  %v6130_v22 = vrot.slane %v6129_v49, 4  ;;  %v4700_v52 = vunpack.c.l.b16 %v4542_v14 }
 0x3a2   :  { %8235 = vst [vmem:[#allocation7 + $0x6c] sm:$0x1] %v8234_v11  ;;  %v4701_v58 = vunpack.c.l.b16 %v4545_v42  ;;  %v6134_v61 = vrot.slane %v6132_v56, 5  ;;  %v6125_v29 = vsel %vm10507_vm2, %v6120_v9, %v11800_v31  ;;  %v7164_v49 = vrot.slane %v11787_v44, 5 }
 0x3a3   :  { %v7508_v6 = vpop.f32.mrf.mxu0  ;;  %v6137_v10 = vshrl.u32 %v5683_v13, 16  ;;  %v6545_v44 = vunpack.c.l.b16 %v6125_v29  ;;  %v10354_v29 = vld [vmem:[#allocation2 + $0xf8] sm:$0x1] }
 0x3a4   :  { %v6730_v41 = vpop.f32.mrf.mxu3  ;;  %5482 = vmatmul.bf16.gmra.mxu2 %v10185_v57  ;;  %v7370_v57 = vpack.c.b16 %v7322_v53, %v7321_v30  ;;  %v6135_v47 = vsel %vm10507_vm2, %v6130_v22, %v6134_v61  ;;  %v4316_v53 = vld [vmem:[#allocation2 + $0xf0] sm:$0xe] }
 0x3a5   :  { %v6871_v33 = vadd.f32 %v6730_v41, %v5581_v59  ;;  %v4890_v4 = vpop.f32.mrf.mxu1  ;;  %v11822_v59 = vld [vmem:[#allocation2 + $0x100] sm:$0xf]  ;;  %v6140_v41 = vshll.u32 %v5683_v13, 16  ;;  %v6546_v22 = vunpack.c.l.b16 %v6135_v47 }
 0x3a6   :  { %v5028_v16 = vadd.f32 %v4890_v4, %v11053_v17  ;;  %v4748_v17 = vpack.c.b16 %v4701_v58, %v4700_v52  ;;  %v6146_v14 = vshll.u32 %v11822_v59, 16  ;;  %v6150_v42 = vshrl.u32 %v11822_v59, 16 }
 0x3a7   :  { %v11820_v38 = vadd.f32 %v7508_v6, %v6871_v33  ;;  %v5443_v62 = vpop.f32.mrf.mxu2  ;;  %v8332_v6 = vld [vmem:[#allocation7 + $0x74] sm:$0xf]  ;;  %v10353_v33 = vld [vmem:[#allocation2 + $0xf4] sm:$0xf]  ;;  %v10010_v4 = vrot.slane %v6938_v21, 9  ;;  %v7166_v52 = vrot.slane %v7164_v49, 4 }
 0x3a8   :  { %v5582_v0 = vadd.f32 %v5443_v62, %v5027_v50  ;;  %v8333_v50 = vsel %vm11535_vm11, 0, %v8332_v6  ;;  %v7167_v58 = vrot.slane %v11805_v18, 5  ;;  %v6139_v62 = vrot.slane %v6137_v10, 4 }
 0x3a9   :  { %14202 = vst [vmem:[#allocation53_spill] sm:$0xff] %v11820_v38  ;;  %6772 = vmatmul.bf16.gmra.mxu3 %v6592_v55  ;;  %v4548_v55 = vrot.slane %v10353_v33, 5  ;;  %v6142_v13 = vrot.slane %v6140_v41, 5  ;;  %v6152_v6 = vrot.slane %v6150_v42, 4  ;;  %v4551_v21 = vrot.slane %v10354_v29, 5 }
 0x3aa   :  { %8334 = vst [vmem:[#allocation7 + $0x74] sm:$0xf] %v8333_v50  ;;  %v9755_v50 = vrot.slane %v4316_v53, 9  ;;  %v7165_v47 = vsel %vm10720_vm5, %v10010_v4, %v7164_v49  ;;  %v7168_v18 = vsel %vm10720_vm5, %v7166_v52, %v7167_v58  ;;  %v6593_v41 = vpack.c.b16 %v6546_v22, %v6545_v44  ;;  %v5686_v58 = vld [vmem:[#allocation2 + $0x108] sm:$0xf] }
 0x3ab   :  { %v7511_v51 = vpop.f32.mrf.mxu0  ;;  %v7323_v52 = vunpack.c.l.b16 %v7165_v47  ;;  %v7324_v44 = vunpack.c.l.b16 %v7168_v18  ;;  %v6939_v29 = vld [vmem:[#allocation2 + $0xfc] sm:$0xe]  ;;  %v6164_v47 = vshll.u32 %v5686_v58, 16 }
 0x3ac   :  { %v6733_v56 = vpop.f32.mrf.mxu3  ;;  %v4549_v53 = vsel %vm10720_vm5, %v9755_v50, %v4548_v55 }
 0x3ad   :  { %v6872_v31 = vadd.f32 %v6733_v56, %v5582_v0  ;;  %v4893_v11 = vpop.f32.mrf.mxu1  ;;  %v11838_v0 = vrot.slane %v6146_v14, 5  ;;  %v6143_v14 = vor.u32 %v6142_v13, %v6139_v62  ;;  %v11857_v62 = vld [vmem:[#allocation2 + $0x10c] sm:$0xf] }
 0x3ae   :  { %7550 = vmatmul.bf16.gmra.mxu0 %v7370_v57  ;;  %v5029_v30 = vadd.f32 %v4893_v11, %v11060_v23  ;;  %v10186_v57 = vld [vmem:[#allocation2 + $0xf0] sm:$0xff]  ;;  %v4550_v23 = vrot.slane %v4548_v55, 4  ;;  %v11840_v11 = vld [vmem:[#allocation2 + $0x104] sm:$0x1]  ;;  %v6170_v18 = vshll.u32 %v11857_v62, 16 }
 0x3af   :  { %v11835_v9 = vadd.f32 %v7511_v51, %v6872_v31  ;;  %v5445_v61 = vpop.f32.mrf.mxu2  ;;  %v6156_v4 = vshll.u32 %v11840_v11, 16 }
 0x3b0   :  { %4932 = vmatmul.bf16.gmra.mxu1 %v4748_v17  ;;  %v5583_v56 = vadd.f32 %v5445_v61, %v5028_v16  ;;  %v8236_v17 = vld [vmem:[#allocation7 + $0x78] sm:$0x1]  ;;  %v6153_v16 = vor.u32 %v6152_v6, %v11838_v0  ;;  %v4552_v49 = vsel %vm10720_vm5, %v4550_v23, %v4551_v21  ;;  %v4702_v6 = vunpack.c.l.b16 %v4549_v53 }
 0x3b1   :  { %14203 = vst [vmem:[#allocation54_spill] sm:$0xff] %v11835_v9  ;;  %v8237_v42 = vsel %vm11523_vm8, 0, %v8236_v17  ;;  %v6158_v23 = vrot.slane %v6156_v4, 5  ;;  %v6161_v21 = vshrl.u32 %v5686_v58, 16  ;;  %v7371_v17 = vpack.c.b16 %v7324_v44, %v7323_v52 }
 0x3b2   :  { %8238 = vst [vmem:[#allocation7 + $0x78] sm:$0x1] %v8237_v42  ;;  %v6154_v50 = vrot.slane %v6153_v16, 4  ;;  %v8335_v42 = vld [vmem:[#allocation7 + $0x80] sm:$0xf]  ;;  %v10011_v53 = vrot.slane %v6939_v29, 9 }
 0x3b3   :  { %v7513_v51 = vpop.f32.mrf.mxu0  ;;  %v6163_v44 = vrot.slane %v6161_v21, 4 }
 0x3b4   :  { %v6735_v10 = vpop.f32.mrf.mxu3  ;;  %5487 = vmatmul.bf16.gmra.mxu2 %v10186_v57  ;;  %v6144_v57 = vrot.slane %v6143_v14, 4  ;;  %v6159_v52 = vsel %vm10507_vm2, %v6154_v50, %v6158_v23  ;;  %v10356_v50 = vld [vmem:[#allocation2 + $0x104] sm:$0x1] }
 0x3b5   :  { %v6873_v31 = vadd.f32 %v6735_v10, %v5583_v56  ;;  %v4895_v33 = vpop.f32.mrf.mxu1  ;;  %v4703_v56 = vunpack.c.l.b16 %v4552_v49  ;;  %v7171_v10 = vrot.slane %v11822_v59, 5  ;;  %v4317_v59 = vld [vmem:[#allocation2 + $0xfc] sm:$0xe]  ;;  %v4558_v23 = vrot.slane %v10356_v50, 5 }
 0x3b6   :  { %v5030_v22 = vadd.f32 %v4895_v33, %v11067_v27  ;;  %v6174_v27 = vshrl.u32 %v11857_v62, 16  ;;  %v6149_v4 = vsel %vm10507_vm2, %v6144_v57, %v11838_v0  ;;  %v9756_v0 = vrot.slane %v4317_v59, 9 }
 0x3b7   :  { %v11855_v61 = vadd.f32 %v7513_v51, %v6873_v31  ;;  %v5448_v13 = vpop.f32.mrf.mxu2  ;;  %v4749_v33 = vpack.c.b16 %v4703_v56, %v4702_v6  ;;  %v11870_v6 = vrot.slane %v6170_v18, 5  ;;  %v7172_v18 = vsel %vm10720_vm5, %v10011_v53, %v7171_v10 }
 0x3b8   :  { %v5584_v55 = vadd.f32 %v5448_v13, %v5029_v30  ;;  %v8336_v30 = vsel %vm11535_vm11, 0, %v8335_v42  ;;  %v6166_v13 = vrot.slane %v6164_v47, 5  ;;  %v6176_v56 = vrot.slane %v6174_v27, 4 }
 0x3b9   :  { %14204 = vst [vmem:[#allocation55_spill] sm:$0xff] %v11855_v61  ;;  %6777 = vmatmul.bf16.gmra.mxu3 %v6593_v41  ;;  %v10355_v41 = vld [vmem:[#allocation2 + $0x100] sm:$0xf]  ;;  %v7174_v42 = vrot.slane %v11840_v11, 5  ;;  %v6548_v47 = vunpack.c.l.b16 %v6159_v52  ;;  %v7325_v59 = vunpack.c.l.b16 %v7172_v18 }
 0x3ba   :  { %v4555_v14 = vrot.slane %v10355_v41, 5  ;;  %8337 = vst [vmem:[#allocation7 + $0x80] sm:$0xf] %v8336_v30  ;;  %v11875_v30 = vld [vmem:[#allocation2 + $0x110] sm:$0x1]  ;;  %v6167_v27 = vor.u32 %v6166_v13, %v6163_v44 }
 0x3bb   :  { %v7516_v51 = vpop.f32.mrf.mxu0 }
 0x3bc   :  { %v6738_v31 = vpop.f32.mrf.mxu3  ;;  %v4557_v57 = vrot.slane %v4555_v14, 4 }
 0x3bd   :  { %v6874_v16 = vadd.f32 %v6738_v31, %v5584_v55  ;;  %v4898_v49 = vpop.f32.mrf.mxu1  ;;  %v7173_v55 = vrot.slane %v7171_v10, 4 }
 0x3be   :  { %7555 = vmatmul.bf16.gmra.mxu0 %v7371_v17  ;;  %v5031_v58 = vadd.f32 %v4898_v49, %v11074_v48  ;;  %v10187_v17 = vld [vmem:[#allocation2 + $0xfc] sm:$0xff]  ;;  %v6547_v48 = vunpack.c.l.b16 %v6149_v4  ;;  %v4559_v4 = vsel %vm10720_vm5, %v4557_v57, %v4558_v23  ;;  %v5689_v23 = vld [vmem:[#allocation2 + $0x114] sm:$0xf] }
 0x3bf   :  { %v11872_v29 = vadd.f32 %v7516_v51, %v6874_v16  ;;  %v5450_v31 = vpop.f32.mrf.mxu2  ;;  %v6177_v51 = vor.u32 %v6176_v56, %v11870_v6  ;;  %v7175_v11 = vsel %vm10720_vm5, %v7173_v55, %v7174_v42  ;;  %v8239_v16 = vld [vmem:[#allocation7 + $0x84] sm:$0x1]  ;;  %v6168_v55 = vrot.slane %v6167_v27, 4  ;;  %v6940_v27 = vld [vmem:[#allocation2 + $0x108] sm:$0xe] }
 0x3c0   :  { %4937 = vmatmul.bf16.gmra.mxu1 %v4749_v33  ;;  %v5585_v21 = vadd.f32 %v5450_v31, %v5030_v22  ;;  %v6180_v33 = vshll.u32 %v11875_v30, 16  ;;  %v4556_v22 = vsel %vm10720_vm5, %v9756_v0, %v4555_v14  ;;  %v8240_v10 = vsel %vm11523_vm8, 0, %v8239_v16 }
 0x3c1   :  { %14205 = vst [vmem:[#allocation56_spill] sm:$0xff] %v11872_v29  ;;  %v6594_v52 = vpack.c.b16 %v6548_v47, %v6547_v48  ;;  %v7326_v13 = vunpack.c.l.b16 %v7175_v11  ;;  %v6178_v42 = vrot.slane %v6177_v51, 4  ;;  %v4704_v14 = vunpack.c.l.b16 %v4556_v22 }
 0x3c2   :  { %8241 = vst [vmem:[#allocation7 + $0x84] sm:$0x1] %v8240_v10  ;;  %v4705_v0 = vunpack.c.l.b16 %v4559_v4  ;;  %v6182_v50 = vrot.slane %v6180_v33, 5  ;;  %v6173_v48 = vsel %vm10507_vm2, %v6168_v55, %v11870_v6  ;;  %v7178_v51 = vrot.slane %v11857_v62, 5 }
 0x3c3   :  { %v7518_v41 = vpop.f32.mrf.mxu0  ;;  %v6185_v11 = vshrl.u32 %v5689_v23, 16  ;;  %v6549_v62 = vunpack.c.l.b16 %v6173_v48  ;;  %v10358_v48 = vld [vmem:[#allocation2 + $0x110] sm:$0x1] }
 0x3c4   :  { %v6740_v49 = vpop.f32.mrf.mxu3  ;;  %5492 = vmatmul.bf16.gmra.mxu2 %v10187_v17  ;;  %v7372_v17 = vpack.c.b16 %v7326_v13, %v7325_v59  ;;  %v6183_v18 = vsel %vm10507_vm2, %v6178_v42, %v6182_v50  ;;  %v4318_v13 = vld [vmem:[#allocation2 + $0x108] sm:$0xe] }
 0x3c5   :  { %v6875_v53 = vadd.f32 %v6740_v49, %v5585_v21  ;;  %v4900_v44 = vpop.f32.mrf.mxu1  ;;  %v11892_v21 = vld [vmem:[#allocation2 + $0x118] sm:$0xf]  ;;  %v6188_v49 = vshll.u32 %v5689_v23, 16  ;;  %v6550_v42 = vunpack.c.l.b16 %v6183_v18 }
 0x3c6   :  { %v5032_v56 = vadd.f32 %v4900_v44, %v11083_v5  ;;  %v4750_v5 = vpack.c.b16 %v4705_v0, %v4704_v14  ;;  %v6194_v22 = vshll.u32 %v11892_v21, 16  ;;  %v6198_v4 = vshrl.u32 %v11892_v21, 16 }
 0x3c7   :  { %v11890_v31 = vadd.f32 %v7518_v41, %v6875_v53  ;;  %v5453_v57 = vpop.f32.mrf.mxu2  ;;  %v8338_v41 = vld [vmem:[#allocation7 + $0x8c] sm:$0xf]  ;;  %v10357_v53 = vld [vmem:[#allocation2 + $0x10c] sm:$0xf]  ;;  %v10012_v44 = vrot.slane %v6940_v27, 9  ;;  %v7180_v14 = vrot.slane %v7178_v51, 4 }
 0x3c8   :  { %v5586_v16 = vadd.f32 %v5453_v57, %v5031_v58  ;;  %v8339_v58 = vsel %vm11535_vm11, 0, %v8338_v41  ;;  %v7181_v0 = vrot.slane %v11875_v30, 5  ;;  %v6187_v57 = vrot.slane %v6185_v11, 4 }
 0x3c9   :  { %14206 = vst [vmem:[#allocation57_spill] sm:$0xff] %v11890_v31  ;;  %6782 = vmatmul.bf16.gmra.mxu3 %v6594_v52  ;;  %v4562_v52 = vrot.slane %v10357_v53, 5  ;;  %v6190_v23 = vrot.slane %v6188_v49, 5  ;;  %v6200_v41 = vrot.slane %v6198_v4, 4  ;;  %v4565_v27 = vrot.slane %v10358_v48, 5 }
 0x3ca   :  { %8340 = vst [vmem:[#allocation7 + $0x8c] sm:$0xf] %v8339_v58  ;;  %v9757_v58 = vrot.slane %v4318_v13, 9  ;;  %v7179_v18 = vsel %vm10720_vm5, %v10012_v44, %v7178_v51  ;;  %v7182_v30 = vsel %vm10720_vm5, %v7180_v14, %v7181_v0  ;;  %v6595_v49 = vpack.c.b16 %v6550_v42, %v6549_v62  ;;  %v5692_v0 = vld [vmem:[#allocation2 + $0x120] sm:$0xf] }
 0x3cb   :  { %v7521_v47 = vpop.f32.mrf.mxu0  ;;  %v7327_v14 = vunpack.c.l.b16 %v7179_v18  ;;  %v7328_v62 = vunpack.c.l.b16 %v7182_v30  ;;  %v6941_v48 = vld [vmem:[#allocation2 + $0x114] sm:$0xe]  ;;  %v6212_v18 = vshll.u32 %v5692_v0, 16 }
 0x3cc   :  { %v6743_v33 = vpop.f32.mrf.mxu3  ;;  %v4563_v13 = vsel %vm10720_vm5, %v9757_v58, %v4562_v52 }
 0x3cd   :  { %v6876_v6 = vadd.f32 %v6743_v33, %v5586_v16  ;;  %v4903_v10 = vpop.f32.mrf.mxu1  ;;  %v11908_v16 = vrot.slane %v6194_v22, 5  ;;  %v6191_v22 = vor.u32 %v6190_v23, %v6187_v57  ;;  %v11927_v57 = vld [vmem:[#allocation2 + $0x124] sm:$0xf] }
 0x3ce   :  { %7560 = vmatmul.bf16.gmra.mxu0 %v7372_v17  ;;  %v5033_v59 = vadd.f32 %v4903_v10, %v11091_v3  ;;  %v10188_v17 = vld [vmem:[#allocation2 + $0x108] sm:$0xff]  ;;  %v4564_v3 = vrot.slane %v4562_v52, 4  ;;  %v11910_v10 = vld [vmem:[#allocation2 + $0x11c] sm:$0x1]  ;;  %v6218_v30 = vshll.u32 %v11927_v57, 16 }
 0x3cf   :  { %v11905_v55 = vadd.f32 %v7521_v47, %v6876_v6  ;;  %v5455_v50 = vpop.f32.mrf.mxu2  ;;  %v6204_v44 = vshll.u32 %v11910_v10, 16 }
 0x3d0   :  { %4942 = vmatmul.bf16.gmra.mxu1 %v4750_v5  ;;  %v5587_v33 = vadd.f32 %v5455_v50, %v5032_v56  ;;  %v8242_v5 = vld [vmem:[#allocation7 + $0x90] sm:$0x1]  ;;  %v6201_v56 = vor.u32 %v6200_v41, %v11908_v16  ;;  %v4566_v51 = vsel %vm10720_vm5, %v4564_v3, %v4565_v27  ;;  %v4706_v41 = vunpack.c.l.b16 %v4563_v13 }
 0x3d1   :  { %14207 = vst [vmem:[#allocation58_spill] sm:$0xff] %v11905_v55  ;;  %v8243_v4 = vsel %vm11523_vm8, 0, %v8242_v5  ;;  %v6206_v3 = vrot.slane %v6204_v44, 5  ;;  %v6209_v27 = vshrl.u32 %v5692_v0, 16  ;;  %v7373_v5 = vpack.c.b16 %v7328_v62, %v7327_v14 }
 0x3d2   :  { %8244 = vst [vmem:[#allocation7 + $0x90] sm:$0x1] %v8243_v4  ;;  %v6202_v58 = vrot.slane %v6201_v56, 4  ;;  %v8341_v4 = vld [vmem:[#allocation7 + $0x98] sm:$0xf]  ;;  %v10013_v13 = vrot.slane %v6941_v48, 9 }
 0x3d3   :  { %v7523_v47 = vpop.f32.mrf.mxu0  ;;  %v6211_v62 = vrot.slane %v6209_v27, 4 }
 0x3d4   :  { %v6745_v11 = vpop.f32.mrf.mxu3  ;;  %5497 = vmatmul.bf16.gmra.mxu2 %v10188_v17  ;;  %v6192_v17 = vrot.slane %v6191_v22, 4  ;;  %v6207_v14 = vsel %vm10507_vm2, %v6202_v58, %v6206_v3  ;;  %v10360_v58 = vld [vmem:[#allocation2 + $0x11c] sm:$0x1] }
 0x3d5   :  { %v6877_v6 = vadd.f32 %v6745_v11, %v5587_v33  ;;  %v4905_v53 = vpop.f32.mrf.mxu1  ;;  %v4707_v33 = vunpack.c.l.b16 %v4566_v51  ;;  %v7185_v11 = vrot.slane %v11892_v21, 5  ;;  %v4319_v21 = vld [vmem:[#allocation2 + $0x114] sm:$0xe]  ;;  %v4572_v3 = vrot.slane %v10360_v58, 5 }
 0x3d6   :  { %v5034_v42 = vadd.f32 %v4905_v53, %v11099_v45  ;;  %v6222_v45 = vshrl.u32 %v11927_v57, 16  ;;  %v6197_v44 = vsel %vm10507_vm2, %v6192_v17, %v11908_v16  ;;  %v9758_v16 = vrot.slane %v4319_v21, 9 }
 0x3d7   :  { %v11925_v50 = vadd.f32 %v7523_v47, %v6877_v6  ;;  %v5458_v23 = vpop.f32.mrf.mxu2  ;;  %v4751_v53 = vpack.c.b16 %v4707_v33, %v4706_v41  ;;  %v11940_v41 = vrot.slane %v6218_v30, 5  ;;  %v7186_v30 = vsel %vm10720_vm5, %v10013_v13, %v7185_v11 }
 0x3d8   :  { %v5588_v52 = vadd.f32 %v5458_v23, %v5033_v59  ;;  %v8342_v59 = vsel %vm11535_vm11, 0, %v8341_v4  ;;  %v6214_v23 = vrot.slane %v6212_v18, 5  ;;  %v6224_v33 = vrot.slane %v6222_v45, 4 }
 0x3d9   :  { %14208 = vst [vmem:[#allocation59_spill] sm:$0xff] %v11925_v50  ;;  %6787 = vmatmul.bf16.gmra.mxu3 %v6595_v49  ;;  %v10359_v49 = vld [vmem:[#allocation2 + $0x118] sm:$0xf]  ;;  %v7188_v4 = vrot.slane %v11910_v10, 5  ;;  %v6552_v18 = vunpack.c.l.b16 %v6207_v14  ;;  %v7329_v21 = vunpack.c.l.b16 %v7186_v30 }
 0x3da   :  { %v4569_v22 = vrot.slane %v10359_v49, 5  ;;  %8343 = vst [vmem:[#allocation7 + $0x98] sm:$0xf] %v8342_v59  ;;  %v11945_v59 = vld [vmem:[#allocation2 + $0x128] sm:$0x1]  ;;  %v6215_v45 = vor.u32 %v6214_v23, %v6211_v62 }
 0x3db   :  { %v7526_v47 = vpop.f32.mrf.mxu0 }
 0x3dc   :  { %v6748_v6 = vpop.f32.mrf.mxu3  ;;  %v4571_v17 = vrot.slane %v4569_v22, 4 }
 0x3dd   :  { %v6878_v56 = vadd.f32 %v6748_v6, %v5588_v52  ;;  %v4908_v51 = vpop.f32.mrf.mxu1  ;;  %v7187_v52 = vrot.slane %v7185_v11, 4 }
 0x3de   :  { %7565 = vmatmul.bf16.gmra.mxu0 %v7373_v5  ;;  %v5035_v0 = vadd.f32 %v4908_v51, %v11106_v12  ;;  %v10189_v5 = vld [vmem:[#allocation2 + $0x114] sm:$0xff]  ;;  %v6551_v12 = vunpack.c.l.b16 %v6197_v44  ;;  %v4573_v44 = vsel %vm10720_vm5, %v4571_v17, %v4572_v3  ;;  %v5695_v3 = vld [vmem:[#allocation2 + $0x12c] sm:$0xf] }
 0x3df   :  { %v11942_v48 = vadd.f32 %v7526_v47, %v6878_v56  ;;  %v5460_v6 = vpop.f32.mrf.mxu2  ;;  %v6225_v47 = vor.u32 %v6224_v33, %v11940_v41  ;;  %v7189_v10 = vsel %vm10720_vm5, %v7187_v52, %v7188_v4  ;;  %v8245_v56 = vld [vmem:[#allocation7 + $0x9c] sm:$0x1]  ;;  %v6216_v52 = vrot.slane %v6215_v45, 4  ;;  %v6942_v45 = vld [vmem:[#allocation2 + $0x120] sm:$0xe] }
 0x3e0   :  { %4947 = vmatmul.bf16.gmra.mxu1 %v4751_v53  ;;  %v5589_v27 = vadd.f32 %v5460_v6, %v5034_v42  ;;  %v6228_v53 = vshll.u32 %v11945_v59, 16  ;;  %v4570_v42 = vsel %vm10720_vm5, %v9758_v16, %v4569_v22  ;;  %v8246_v11 = vsel %vm11523_vm8, 0, %v8245_v56 }
 0x3e1   :  { %14209 = vst [vmem:[#allocation60_spill] sm:$0xff] %v11942_v48  ;;  %v6596_v14 = vpack.c.b16 %v6552_v18, %v6551_v12  ;;  %v7330_v23 = vunpack.c.l.b16 %v7189_v10  ;;  %v6226_v4 = vrot.slane %v6225_v47, 4  ;;  %v4708_v22 = vunpack.c.l.b16 %v4570_v42 }
 0x3e2   :  { %8247 = vst [vmem:[#allocation7 + $0x9c] sm:$0x1] %v8246_v11  ;;  %v4709_v16 = vunpack.c.l.b16 %v4573_v44  ;;  %v6230_v58 = vrot.slane %v6228_v53, 5  ;;  %v6221_v12 = vsel %vm10507_vm2, %v6216_v52, %v11940_v41  ;;  %v7192_v47 = vrot.slane %v11927_v57, 5 }
 0x3e3   :  { %v7528_v49 = vpop.f32.mrf.mxu0  ;;  %v6233_v10 = vshrl.u32 %v5695_v3, 16  ;;  %v6553_v57 = vunpack.c.l.b16 %v6221_v12  ;;  %v10362_v12 = vld [vmem:[#allocation2 + $0x128] sm:$0x1] }
 0x3e4   :  { %v6750_v51 = vpop.f32.mrf.mxu3  ;;  %5502 = vmatmul.bf16.gmra.mxu2 %v10189_v5  ;;  %v7374_v5 = vpack.c.b16 %v7330_v23, %v7329_v21  ;;  %v6231_v30 = vsel %vm10507_vm2, %v6226_v4, %v6230_v58  ;;  %v4320_v23 = vld [vmem:[#allocation2 + $0x120] sm:$0xe] }
 0x3e5   :  { %v6879_v13 = vadd.f32 %v6750_v51, %v5589_v27  ;;  %v4910_v62 = vpop.f32.mrf.mxu1  ;;  %v11962_v27 = vld [vmem:[#allocation2 + $0x130] sm:$0xf]  ;;  %v6236_v51 = vshll.u32 %v5695_v3, 16  ;;  %v6554_v4 = vunpack.c.l.b16 %v6231_v30 }
 0x3e6   :  { %v5036_v33 = vadd.f32 %v4910_v62, %v11113_v46  ;;  %v4752_v46 = vpack.c.b16 %v4709_v16, %v4708_v22  ;;  %v6242_v42 = vshll.u32 %v11962_v27, 16  ;;  %v6246_v44 = vshrl.u32 %v11962_v27, 16 }
 0x3e7   :  { %v11960_v6 = vadd.f32 %v7528_v49, %v6879_v13  ;;  %v5463_v17 = vpop.f32.mrf.mxu2  ;;  %v8344_v49 = vld [vmem:[#allocation7 + $0xa4] sm:$0xf]  ;;  %v10361_v13 = vld [vmem:[#allocation2 + $0x124] sm:$0xf]  ;;  %v10014_v62 = vrot.slane %v6942_v45, 9  ;;  %v7194_v22 = vrot.slane %v7192_v47, 4 }
 0x3e8   :  { %v5590_v56 = vadd.f32 %v5463_v17, %v5035_v0  ;;  %v8345_v0 = vsel %vm11535_vm11, 0, %v8344_v49  ;;  %v7195_v16 = vrot.slane %v11945_v59, 5  ;;  %v6235_v17 = vrot.slane %v6233_v10, 4 }
 0x3e9   :  { %14210 = vst [vmem:[#allocation61_spill] sm:$0xff] %v11960_v6  ;;  %6792 = vmatmul.bf16.gmra.mxu3 %v6596_v14  ;;  %v4576_v14 = vrot.slane %v10361_v13, 5  ;;  %v6238_v3 = vrot.slane %v6236_v51, 5  ;;  %v6248_v49 = vrot.slane %v6246_v44, 4  ;;  %v4579_v45 = vrot.slane %v10362_v12, 5 }
 0x3ea   :  { %8346 = vst [vmem:[#allocation7 + $0xa4] sm:$0xf] %v8345_v0  ;;  %v9759_v0 = vrot.slane %v4320_v23, 9  ;;  %v7193_v30 = vsel %vm10720_vm5, %v10014_v62, %v7192_v47  ;;  %v7196_v59 = vsel %vm10720_vm5, %v7194_v22, %v7195_v16  ;;  %v6597_v51 = vpack.c.b16 %v6554_v4, %v6553_v57  ;;  %v5698_v16 = vld [vmem:[#allocation2 + $0x138] sm:$0xf] }
 0x3eb   :  { %v7531_v18 = vpop.f32.mrf.mxu0  ;;  %v7331_v22 = vunpack.c.l.b16 %v7193_v30  ;;  %v7332_v57 = vunpack.c.l.b16 %v7196_v59  ;;  %v6943_v12 = vld [vmem:[#allocation2 + $0x12c] sm:$0xe]  ;;  %v6260_v30 = vshll.u32 %v5698_v16, 16 }
 0x3ec   :  { %v6753_v53 = vpop.f32.mrf.mxu3  ;;  %v4577_v23 = vsel %vm10720_vm5, %v9759_v0, %v4576_v14 }
 0x3ed   :  { %v6880_v41 = vadd.f32 %v6753_v53, %v5590_v56  ;;  %v4913_v11 = vpop.f32.mrf.mxu1  ;;  %v11978_v56 = vrot.slane %v6242_v42, 5  ;;  %v6239_v42 = vor.u32 %v6238_v3, %v6235_v17  ;;  %v11997_v17 = vld [vmem:[#allocation2 + $0x13c] sm:$0xf] }
 0x3ee   :  { %7570 = vmatmul.bf16.gmra.mxu0 %v7374_v5  ;;  %v5037_v21 = vadd.f32 %v4913_v11, %v11120_v40  ;;  %v10190_v5 = vld [vmem:[#allocation2 + $0x120] sm:$0xff]  ;;  %v4578_v40 = vrot.slane %v4576_v14, 4  ;;  %v11980_v11 = vld [vmem:[#allocation2 + $0x134] sm:$0x1]  ;;  %v6266_v59 = vshll.u32 %v11997_v17, 16 }
 0x3ef   :  { %v11975_v52 = vadd.f32 %v7531_v18, %v6880_v41  ;;  %v5465_v58 = vpop.f32.mrf.mxu2  ;;  %v6252_v62 = vshll.u32 %v11980_v11, 16 }
 0x3f0   :  { %4952 = vmatmul.bf16.gmra.mxu1 %v4752_v46  ;;  %v5591_v53 = vadd.f32 %v5465_v58, %v5036_v33  ;;  %v8248_v46 = vld [vmem:[#allocation7 + $0xa8] sm:$0x1]  ;;  %v6249_v33 = vor.u32 %v6248_v49, %v11978_v56  ;;  %v4580_v47 = vsel %vm10720_vm5, %v4578_v40, %v4579_v45  ;;  %v4710_v49 = vunpack.c.l.b16 %v4577_v23 }
 0x3f1   :  { %14211 = vst [vmem:[#allocation62_spill] sm:$0xff] %v11975_v52  ;;  %v8249_v44 = vsel %vm11523_vm8, 0, %v8248_v46  ;;  %v6254_v40 = vrot.slane %v6252_v62, 5  ;;  %v6257_v45 = vshrl.u32 %v5698_v16, 16  ;;  %v7375_v46 = vpack.c.b16 %v7332_v57, %v7331_v22 }
 0x3f2   :  { %8250 = vst [vmem:[#allocation7 + $0xa8] sm:$0x1] %v8249_v44  ;;  %v6250_v0 = vrot.slane %v6249_v33, 4  ;;  %v8347_v44 = vld [vmem:[#allocation7 + $0xb0] sm:$0xf]  ;;  %v10015_v23 = vrot.slane %v6943_v12, 9 }
 0x3f3   :  { %v7533_v18 = vpop.f32.mrf.mxu0  ;;  %v6259_v57 = vrot.slane %v6257_v45, 4 }
 0x3f4   :  { %v6755_v10 = vpop.f32.mrf.mxu3  ;;  %5507 = vmatmul.bf16.gmra.mxu2 %v10190_v5  ;;  %v6240_v5 = vrot.slane %v6239_v42, 4  ;;  %v6255_v22 = vsel %vm10507_vm2, %v6250_v0, %v6254_v40  ;;  %v10364_v0 = vld [vmem:[#allocation2 + $0x134] sm:$0x1] }
 0x3f5   :  { %v6881_v41 = vadd.f32 %v6755_v10, %v5591_v53  ;;  %v4915_v13 = vpop.f32.mrf.mxu1  ;;  %v4711_v53 = vunpack.c.l.b16 %v4580_v47  ;;  %v7199_v10 = vrot.slane %v11962_v27, 5  ;;  %v4321_v27 = vld [vmem:[#allocation2 + $0x12c] sm:$0xe]  ;;  %v4586_v40 = vrot.slane %v10364_v0, 5 }
 0x3f6   :  { %v5038_v4 = vadd.f32 %v4915_v13, %v11127_v8  ;;  %v6270_v8 = vshrl.u32 %v11997_v17, 16  ;;  %v6245_v62 = vsel %vm10507_vm2, %v6240_v5, %v11978_v56  ;;  %v9760_v56 = vrot.slane %v4321_v27, 9 }
 0x3f7   :  { %v11995_v58 = vadd.f32 %v7533_v18, %v6881_v41  ;;  %v5468_v3 = vpop.f32.mrf.mxu2  ;;  %v4753_v13 = vpack.c.b16 %v4711_v53, %v4710_v49  ;;  %v12010_v49 = vrot.slane %v6266_v59, 5  ;;  %v7200_v59 = vsel %vm10720_vm5, %v10015_v23, %v7199_v10 }
 0x3f8   :  { %v5592_v14 = vadd.f32 %v5468_v3, %v5037_v21  ;;  %v8348_v21 = vsel %vm11535_vm11, 0, %v8347_v44  ;;  %v6262_v3 = vrot.slane %v6260_v30, 5  ;;  %v6272_v53 = vrot.slane %v6270_v8, 4 }
 0x3f9   :  { %14212 = vst [vmem:[#allocation63_spill] sm:$0xff] %v11995_v58  ;;  %6797 = vmatmul.bf16.gmra.mxu3 %v6597_v51  ;;  %v10363_v51 = vld [vmem:[#allocation2 + $0x130] sm:$0xf]  ;;  %v7202_v44 = vrot.slane %v11980_v11, 5  ;;  %v6556_v30 = vunpack.c.l.b16 %v6255_v22  ;;  %v7333_v27 = vunpack.c.l.b16 %v7200_v59 }
 0x3fa   :  { %v4583_v42 = vrot.slane %v10363_v51, 5  ;;  %8349 = vst [vmem:[#allocation7 + $0xb0] sm:$0xf] %v8348_v21  ;;  %v12015_v21 = vld [vmem:[#allocation2 + $0x140] sm:$0x1]  ;;  %v6263_v8 = vor.u32 %v6262_v3, %v6259_v57 }
 0x3fb   :  { %v7536_v18 = vpop.f32.mrf.mxu0 }
 0x3fc   :  { %v6758_v41 = vpop.f32.mrf.mxu3  ;;  %v4585_v5 = vrot.slane %v4583_v42, 4 }
 0x3fd   :  { %v6882_v33 = vadd.f32 %v6758_v41, %v5592_v14  ;;  %v4918_v47 = vpop.f32.mrf.mxu1  ;;  %v7201_v14 = vrot.slane %v7199_v10, 4 }
 0x3fe   :  { %7575 = vmatmul.bf16.gmra.mxu0 %v7375_v46  ;;  %v5039_v16 = vadd.f32 %v4918_v47, %v11134_v34  ;;  %v10191_v46 = vld [vmem:[#allocation2 + $0x12c] sm:$0xff]  ;;  %v6555_v34 = vunpack.c.l.b16 %v6245_v62  ;;  %v4587_v62 = vsel %vm10720_vm5, %v4585_v5, %v4586_v40  ;;  %v5701_v40 = vld [vmem:[#allocation2 + $0x144] sm:$0xf] }
 0x3ff   :  { %v12012_v12 = vadd.f32 %v7536_v18, %v6882_v33  ;;  %v5470_v41 = vpop.f32.mrf.mxu2  ;;  %v6273_v18 = vor.u32 %v6272_v53, %v12010_v49  ;;  %v7203_v11 = vsel %vm10720_vm5, %v7201_v14, %v7202_v44  ;;  %v8251_v33 = vld [vmem:[#allocation7 + $0xb4] sm:$0x1]  ;;  %v6264_v14 = vrot.slane %v6263_v8, 4  ;;  %v6944_v8 = vld [vmem:[#allocation2 + $0x138] sm:$0xe] }
 0x400   :  { %4957 = vmatmul.bf16.gmra.mxu1 %v4753_v13  ;;  %v5593_v45 = vadd.f32 %v5470_v41, %v5038_v4  ;;  %v6276_v13 = vshll.u32 %v12015_v21, 16  ;;  %v4584_v4 = vsel %vm10720_vm5, %v9760_v56, %v4583_v42  ;;  %v8252_v10 = vsel %vm11523_vm8, 0, %v8251_v33 }
 0x401   :  { %14213 = vst [vmem:[#allocation64_spill] sm:$0xff] %v12012_v12  ;;  %v6598_v22 = vpack.c.b16 %v6556_v30, %v6555_v34  ;;  %v7334_v3 = vunpack.c.l.b16 %v7203_v11  ;;  %v6274_v44 = vrot.slane %v6273_v18, 4  ;;  %v4712_v42 = vunpack.c.l.b16 %v4584_v4 }
 0x402   :  { %8253 = vst [vmem:[#allocation7 + $0xb4] sm:$0x1] %v8252_v10  ;;  %v4713_v56 = vunpack.c.l.b16 %v4587_v62  ;;  %v6278_v0 = vrot.slane %v6276_v13, 5  ;;  %v6269_v34 = vsel %vm10507_vm2, %v6264_v14, %v12010_v49  ;;  %v7206_v18 = vrot.slane %v11997_v17, 5  ;;  %v4322_v14 = vld [vmem:[#allocation2 + $0x138] sm:$0xe] }
 0x403   :  { %v7538_v51 = vpop.f32.mrf.mxu0  ;;  %v6281_v11 = vshrl.u32 %v5701_v40, 16  ;;  %v6557_v17 = vunpack.c.l.b16 %v6269_v34  ;;  %v10366_v34 = vld [vmem:[#allocation2 + $0x140] sm:$0x1] }
 0x404   :  { %v6760_v47 = vpop.f32.mrf.mxu3  ;;  %5512 = vmatmul.bf16.gmra.mxu2 %v10191_v46  ;;  %v7376_v46 = vpack.c.b16 %v7334_v3, %v7333_v27  ;;  %v6279_v59 = vsel %vm10507_vm2, %v6274_v44, %v6278_v0  ;;  %v14215_v27 = vld [vmem:[#allocation44_spill] sm:$0xff]  ;;  %v10016_v3 = vrot.slane %v6944_v8, 9  ;;  %v7209_v0 = vrot.slane %v12015_v21, 5 }
 0x405   :  { %v6883_v23 = vadd.f32 %v6760_v47, %v5593_v45  ;;  %v4920_v57 = vpop.f32.mrf.mxu1  ;;  %v12032_v45 = vld [vmem:[#allocation2 + $0x148] sm:$0xf]  ;;  %v6284_v47 = vshll.u32 %v5701_v40, 16  ;;  %v6283_v40 = vrot.slane %v6281_v11, 4  ;;  %v4593_v8 = vrot.slane %v10366_v34, 5 }
 0x406   :  { %v5040_v53 = vadd.f32 %v4920_v57, %v11143_v39  ;;  %v4754_v39 = vpack.c.b16 %v4713_v56, %v4712_v42  ;;  %v6290_v4 = vshll.u32 %v12032_v45, 16  ;;  %v6294_v62 = vshrl.u32 %v12032_v45, 16 }
 0x407   :  { %v12030_v41 = vadd.f32 %v7538_v51, %v6883_v23  ;;  %v5473_v5 = vpop.f32.mrf.mxu2  ;;  %v8350_v51 = vld [vmem:[#allocation7 + $0xbc] sm:$0xf]  ;;  %v10365_v23 = vld [vmem:[#allocation2 + $0x13c] sm:$0xf]  ;;  %v6558_v42 = vunpack.c.l.b16 %v6279_v59  ;;  %v7208_v56 = vrot.slane %v7206_v18, 4  ;;  %v7207_v59 = vsel %vm10720_vm5, %v10016_v3, %v7206_v18 }
 0x408   :  { %v5594_v33 = vadd.f32 %v5473_v5, %v5039_v16  ;;  %v8351_v16 = vsel %vm11535_vm11, 0, %v8350_v51  ;;  %v12048_v51 = vrot.slane %v6290_v4, 5 }
 0x409   :  { %14214 = vst [vmem:[#allocation65_spill] sm:$0xff] %v12030_v41  ;;  %6802 = vmatmul.bf16.gmra.mxu3 %v6598_v22  ;;  %v4590_v22 = vrot.slane %v10365_v23, 5  ;;  %v9761_v23 = vrot.slane %v4322_v14, 9  ;;  %v7210_v21 = vsel %vm10720_vm5, %v7208_v56, %v7209_v0  ;;  %v7335_v56 = vunpack.c.l.b16 %v7207_v59 }
 0x40a   :  { %8352 = vst [vmem:[#allocation7 + $0xbc] sm:$0xf] %v8351_v16 }
 0x40b   :  { %v7541_v30 = vpop.f32.mrf.mxu0 }
 0x40c   :  { %v6763_v13 = vpop.f32.mrf.mxu3 }
 0x40d   :  { %v6884_v49 = vadd.f32 %v6763_v13, %v5594_v33  ;;  %v4923_v10 = vpop.f32.mrf.mxu1  ;;  %v6286_v33 = vrot.slane %v6284_v47, 5  ;;  %v6296_v13 = vrot.slane %v6294_v62, 4  ;;  %v6599_v47 = vpack.c.b16 %v6558_v42, %v6557_v17  ;;  %v14217_v42 = vld [vmem:[#allocation45_spill] sm:$0xff] }
 0x40e   :  { %7580 = vmatmul.bf16.gmra.mxu0 %v7376_v46  ;;  %v5041_v57 = vadd.f32 %v4923_v10, %v14215_v27  ;;  %v10192_v46 = vld [vmem:[#allocation2 + $0x138] sm:$0xff]  ;;  %v4592_v10 = vrot.slane %v4590_v22, 4  ;;  %v12050_v27 = vld [vmem:[#allocation2 + $0x14c] sm:$0x1]  ;;  %v7336_v17 = vunpack.c.l.b16 %v7210_v21 }
 0x40f   :  { %v12045_v44 = vadd.f32 %v7541_v30, %v6884_v49  ;;  %v5475_v5 = vpop.f32.mrf.mxu2  ;;  %v6287_v4 = vor.u32 %v6286_v33, %v6283_v40  ;;  %v6300_v3 = vshll.u32 %v12050_v27, 16  ;;  %v5704_v40 = vld [vmem:[#allocation2 + $0x150] sm:$0xf] }
 0x410   :  { %4962 = vmatmul.bf16.gmra.mxu1 %v4754_v39  ;;  %v5595_v16 = vadd.f32 %v5475_v5, %v5040_v53  ;;  %v8254_v39 = vld [vmem:[#allocation7 + $0xc0] sm:$0x1]  ;;  %v6297_v53 = vor.u32 %v6296_v13, %v12048_v51  ;;  %v4591_v5 = vsel %vm10720_vm5, %v9761_v23, %v4590_v22  ;;  %v4594_v18 = vsel %vm10720_vm5, %v4592_v10, %v4593_v8  ;;  %v12067_v13 = vld [vmem:[#allocation2 + $0x154] sm:$0xf]  ;;  %v6945_v8 = vld [vmem:[#allocation2 + $0x144] sm:$0xe] }
 0x411   :  { %14216 = vst [vmem:[#allocation44_spill] sm:$0xff] %v12045_v44  ;;  %v8255_v62 = vsel %vm11523_vm8, 0, %v8254_v39  ;;  %v4715_v34 = vunpack.c.l.b16 %v4594_v18  ;;  %v6288_v39 = vrot.slane %v6287_v4, 4  ;;  %v6302_v10 = vrot.slane %v6300_v3, 5 }
 0x412   :  { %8256 = vst [vmem:[#allocation7 + $0xc0] sm:$0x1] %v8255_v62  ;;  %v6298_v23 = vrot.slane %v6297_v53, 4  ;;  %v7377_v62 = vpack.c.b16 %v7336_v17, %v7335_v56  ;;  %v6308_v59 = vshll.u32 %v5704_v40, 16  ;;  %v6314_v21 = vshll.u32 %v12067_v13, 16 }
 0x413   :  { %v7543_v30 = vpop.f32.mrf.mxu0  ;;  %v10017_v18 = vrot.slane %v6945_v8, 9  ;;  %v6293_v56 = vsel %vm10507_vm2, %v6288_v39, %v12048_v51 }
 0x414   :  { %v6765_v11 = vpop.f32.mrf.mxu3  ;;  %5517 = vmatmul.bf16.gmra.mxu2 %v10192_v46  ;;  %v4714_v46 = vunpack.c.l.b16 %v4591_v5  ;;  %v6303_v17 = vsel %vm10507_vm2, %v6298_v23, %v6302_v10  ;;  %v12080_v8 = vrot.slane %v6314_v21, 5  ;;  %v10368_v23 = vld [vmem:[#allocation2 + $0x14c] sm:$0x1] }
 0x415   :  { %v6885_v49 = vadd.f32 %v6765_v11, %v5595_v16  ;;  %v4925_v14 = vpop.f32.mrf.mxu1  ;;  %v6305_v11 = vshrl.u32 %v5704_v40, 16  ;;  %v4600_v10 = vrot.slane %v10368_v23, 5 }
 0x416   :  { %v5042_v0 = vadd.f32 %v4925_v14, %v14217_v42  ;;  %v6318_v14 = vshrl.u32 %v12067_v13, 16  ;;  %v8353_v42 = vld [vmem:[#allocation7 + $0xc8] sm:$0xf]  ;;  %v4755_v5 = vpack.c.b16 %v4715_v34, %v4714_v46  ;;  %v6310_v34 = vrot.slane %v6308_v59, 5 }
 0x417   :  { %v12065_v33 = vadd.f32 %v7543_v30, %v6885_v49  ;;  %v5478_v16 = vpop.f32.mrf.mxu2  ;;  %v7213_v49 = vrot.slane %v12032_v45, 5  ;;  %v4323_v45 = vld [vmem:[#allocation2 + $0x144] sm:$0xe]  ;;  %v6307_v40 = vrot.slane %v6305_v11, 4  ;;  %v6560_v59 = vunpack.c.l.b16 %v6303_v17 }
 0x418   :  { %v5596_v22 = vadd.f32 %v5478_v16, %v5041_v57  ;;  %v8354_v57 = vsel %vm11535_vm11, 0, %v8353_v42  ;;  %v14219_v16 = vld [vmem:[#allocation46_spill] sm:$0xff]  ;;  %v6320_v42 = vrot.slane %v6318_v14, 4  ;;  %v9762_v51 = vrot.slane %v4323_v45, 9  ;;  %v8257_v45 = vld [vmem:[#allocation7 + $0xe4] sm:$0x1] }
 0x419   :  { %14218 = vst [vmem:[#allocation45_spill] sm:$0xff] %v12065_v33  ;;  %6807 = vmatmul.bf16.gmra.mxu3 %v6599_v47  ;;  %v10367_v47 = vld [vmem:[#allocation2 + $0x148] sm:$0xf]  ;;  %v7214_v21 = vsel %vm10720_vm5, %v10017_v18, %v7213_v49  ;;  %v6311_v14 = vor.u32 %v6310_v34, %v6307_v40 }
 0x41a   :  { %v4597_v4 = vrot.slane %v10367_v47, 5  ;;  %8355 = vst [vmem:[#allocation7 + $0xc8] sm:$0xf] %v8354_v57  ;;  %v12085_v57 = vld [vmem:[#allocation2 + $0x158] sm:$0x1]  ;;  %v7337_v17 = vunpack.c.l.b16 %v7214_v21 }
 0x41b   :  { %v7546_v30 = vpop.f32.mrf.mxu0 }
 0x41c   :  { %v6768_v2 = vpop.f32.mrf.mxu3  ;;  %v4599_v39 = vrot.slane %v4597_v4, 4 }
 0x41d   :  { %v6886_v53 = vadd.f32 %v6768_v2, %v5596_v22  ;;  %v4928_v3 = vpop.f32.mrf.mxu1  ;;  %v7215_v2 = vrot.slane %v7213_v49, 4  ;;  %v7216_v22 = vrot.slane %v12050_v27, 5  ;;  %v8258_v49 = vsel %vm11523_vm8, 0, %v8257_v45 }
 0x41e   :  { %7585 = vmatmul.bf16.gmra.mxu0 %v7377_v62  ;;  %v5043_v46 = vadd.f32 %v4928_v3, %v14219_v16  ;;  %v10193_v62 = vld [vmem:[#allocation2 + $0x144] sm:$0xff]  ;;  %v6559_v3 = vunpack.c.l.b16 %v6293_v56  ;;  %8259 = vst [vmem:[#allocation7 + $0xe4] sm:$0x1] %v8258_v49 }
 0x41f   :  { %v12082_v47 = vadd.f32 %v7546_v30, %v6886_v53  ;;  %v5480_v33 = vpop.f32.mrf.mxu2  ;;  %v6321_v30 = vor.u32 %v6320_v42, %v12080_v8  ;;  %v7217_v27 = vsel %vm10720_vm5, %v7215_v2, %v7216_v22  ;;  %v14221_v42 = vld [vmem:[#allocation47_spill] sm:$0xff]  ;;  %v6312_v22 = vrot.slane %v6311_v14, 4 }
 0x420   :  { %4967 = vmatmul.bf16.gmra.mxu1 %v4755_v5  ;;  %v5597_v11 = vadd.f32 %v5480_v33, %v5042_v0  ;;  %v6324_v5 = vshll.u32 %v12085_v57, 16  ;;  %v4598_v0 = vsel %vm10720_vm5, %v9762_v51, %v4597_v4  ;;  %v4601_v33 = vsel %vm10720_vm5, %v4599_v39, %v4600_v10  ;;  %v5707_v10 = vld [vmem:[#allocation2 + $0x15c] sm:$0xf] }
 0x421   :  { %14220 = vst [vmem:[#allocation46_spill] sm:$0xff] %v12082_v47  ;;  %v6600_v56 = vpack.c.b16 %v6560_v59, %v6559_v3  ;;  %v7338_v34 = vunpack.c.l.b16 %v7217_v27  ;;  %v6322_v23 = vrot.slane %v6321_v30, 4  ;;  %v4716_v4 = vunpack.c.l.b16 %v4598_v0  ;;  %v6946_v30 = vld [vmem:[#allocation2 + $0x150] sm:$0xe]  ;;  %v8356_v27 = vld [vmem:[#allocation7 + $0xec] sm:$0xf] }
 0x422   :  { %v4717_v51 = vunpack.c.l.b16 %v4601_v33  ;;  %v6326_v44 = vrot.slane %v6324_v5, 5  ;;  %v6317_v3 = vsel %vm10507_vm2, %v6312_v22, %v12080_v8  ;;  %v6329_v5 = vshrl.u32 %v5707_v10, 16 }
 0x423   :  { %v7548_v53 = vpop.f32.mrf.mxu0  ;;  %v6332_v0 = vshll.u32 %v5707_v10, 16 }
 0x424   :  { %v6770_v16 = vpop.f32.mrf.mxu3  ;;  %5522 = vmatmul.bf16.gmra.mxu2 %v10193_v62  ;;  %v7378_v62 = vpack.c.b16 %v7338_v34, %v7337_v17  ;;  %v4756_v21 = vpack.c.b16 %v4717_v51, %v4716_v4  ;;  %v6327_v14 = vsel %vm10507_vm2, %v6322_v23, %v6326_v44  ;;  %v14223_v44 = vld [vmem:[#allocation12_spill] sm:$0xff]  ;;  %v10018_v34 = vrot.slane %v6946_v30, 9 }
 0x425   :  { %v6887_v18 = vadd.f32 %v6770_v16, %v5597_v11  ;;  %v4930_v40 = vpop.f32.mrf.mxu1  ;;  %v12102_v11 = vld [vmem:[#allocation2 + $0x160] sm:$0xf]  ;;  %v6562_v23 = vunpack.c.l.b16 %v6327_v14  ;;  %v7223_v51 = vrot.slane %v12085_v57, 5  ;;  %v6331_v10 = vrot.slane %v6329_v5, 4 }
 0x426   :  { %v5044_v2 = vadd.f32 %v4930_v40, %v14221_v42  ;;  %v6338_v33 = vshll.u32 %v12102_v11, 16  ;;  %v6342_v49 = vshrl.u32 %v12102_v11, 16  ;;  %v4324_v42 = vld [vmem:[#allocation2 + $0x150] sm:$0xe] }
 0x427   :  { %v12100_v47 = vadd.f32 %v7548_v53, %v6887_v18  ;;  %v5483_v39 = vpop.f32.mrf.mxu2  ;;  %v7220_v53 = vrot.slane %v12067_v13, 5  ;;  %v6561_v13 = vunpack.c.l.b16 %v6317_v3  ;;  %v10370_v3 = vld [vmem:[#allocation2 + $0x158] sm:$0x1] }
 0x428   :  { %v5598_v45 = vadd.f32 %v5483_v39, %v5043_v46  ;;  %v8357_v46 = vsel %vm11535_vm11, 0, %v8356_v27  ;;  %v12118_v27 = vrot.slane %v6338_v33, 5  ;;  %v4607_v30 = vrot.slane %v10370_v3, 5 }
 0x429   :  { %14222 = vst [vmem:[#allocation47_spill] sm:$0xff] %v12100_v47  ;;  %6812 = vmatmul.bf16.gmra.mxu3 %v6600_v56  ;;  %v10369_v56 = vld [vmem:[#allocation2 + $0x154] sm:$0xf]  ;;  %v7222_v4 = vrot.slane %v7220_v53, 4  ;;  %v7221_v14 = vsel %vm10720_vm5, %v10018_v34, %v7220_v53 }
 0x42a   :  { %8358 = vst [vmem:[#allocation7 + $0xec] sm:$0xf] %v8357_v46  ;;  %v4604_v17 = vrot.slane %v10369_v56, 5  ;;  %v9763_v56 = vrot.slane %v4324_v42, 9 }
 0x42b   :  { %v7551_v59 = vpop.f32.mrf.mxu0  ;;  %v7224_v57 = vsel %vm10720_vm5, %v7222_v4, %v7223_v51  ;;  %v7339_v4 = vunpack.c.l.b16 %v7221_v14 }
 0x42c   :  { %v6773_v16 = vpop.f32.mrf.mxu3 }
 0x42d   :  { %v6888_v8 = vadd.f32 %v6773_v16, %v5598_v45  ;;  %v4933_v18 = vpop.f32.mrf.mxu1  ;;  %v6334_v45 = vrot.slane %v6332_v0, 5  ;;  %v6344_v16 = vrot.slane %v6342_v49, 4  ;;  %v6601_v0 = vpack.c.b16 %v6562_v23, %v6561_v13  ;;  %v14225_v23 = vld [vmem:[#allocation14_spill] sm:$0xff] }
 0x42e   :  { %7590 = vmatmul.bf16.gmra.mxu0 %v7378_v62  ;;  %v5045_v40 = vadd.f32 %v4933_v18, %v14223_v44  ;;  %v10194_v62 = vld [vmem:[#allocation2 + $0x150] sm:$0xff]  ;;  %v4606_v18 = vrot.slane %v4604_v17, 4  ;;  %v12120_v44 = vld [vmem:[#allocation2 + $0x164] sm:$0x1]  ;;  %v7340_v13 = vunpack.c.l.b16 %v7224_v57 }
 0x42f   :  { %v12115_v22 = vadd.f32 %v7551_v59, %v6888_v8  ;;  %v5485_v39 = vpop.f32.mrf.mxu2  ;;  %v6335_v33 = vor.u32 %v6334_v45, %v6331_v10  ;;  %v6348_v34 = vshll.u32 %v12120_v44, 16  ;;  %v5710_v10 = vld [vmem:[#allocation2 + $0x168] sm:$0xf] }
 0x430   :  { %4972 = vmatmul.bf16.gmra.mxu1 %v4756_v21  ;;  %v5599_v46 = vadd.f32 %v5485_v39, %v5044_v2  ;;  %v8260_v21 = vld [vmem:[#allocation7 + $0xf0] sm:$0x1]  ;;  %v6345_v2 = vor.u32 %v6344_v16, %v12118_v27  ;;  %v4605_v39 = vsel %vm10720_vm5, %v9763_v56, %v4604_v17  ;;  %v4608_v53 = vsel %vm10720_vm5, %v4606_v18, %v4607_v30  ;;  %v12137_v16 = vld [vmem:[#allocation2 + $0x16c] sm:$0xf]  ;;  %v6947_v30 = vld [vmem:[#allocation2 + $0x15c] sm:$0xe] }
 0x431   :  { %14224 = vst [vmem:[#allocation12_spill] sm:$0xff] %v12115_v22  ;;  %v8261_v49 = vsel %vm11523_vm8, 0, %v8260_v21  ;;  %v4719_v3 = vunpack.c.l.b16 %v4608_v53  ;;  %v6336_v21 = vrot.slane %v6335_v33, 4  ;;  %v6350_v18 = vrot.slane %v6348_v34, 5 }
 0x432   :  { %8262 = vst [vmem:[#allocation7 + $0xf0] sm:$0x1] %v8261_v49  ;;  %v6346_v56 = vrot.slane %v6345_v2, 4  ;;  %v7379_v49 = vpack.c.b16 %v7340_v13, %v7339_v4  ;;  %v6356_v14 = vshll.u32 %v5710_v10, 16  ;;  %v6362_v57 = vshll.u32 %v12137_v16, 16 }
 0x433   :  { %v7553_v59 = vpop.f32.mrf.mxu0  ;;  %v10019_v53 = vrot.slane %v6947_v30, 9  ;;  %v6341_v4 = vsel %vm10507_vm2, %v6336_v21, %v12118_v27 }
 0x434   :  { %v6775_v5 = vpop.f32.mrf.mxu3  ;;  %5527 = vmatmul.bf16.gmra.mxu2 %v10194_v62  ;;  %v4718_v62 = vunpack.c.l.b16 %v4605_v39  ;;  %v6351_v13 = vsel %vm10507_vm2, %v6346_v56, %v6350_v18  ;;  %v12150_v30 = vrot.slane %v6362_v57, 5  ;;  %v10372_v56 = vld [vmem:[#allocation2 + $0x164] sm:$0x1] }
 0x435   :  { %v6889_v8 = vadd.f32 %v6775_v5, %v5599_v46  ;;  %v4935_v42 = vpop.f32.mrf.mxu1  ;;  %v6353_v5 = vshrl.u32 %v5710_v10, 16  ;;  %v4614_v18 = vrot.slane %v10372_v56, 5 }
 0x436   :  { %v5046_v51 = vadd.f32 %v4935_v42, %v14225_v23  ;;  %v6366_v42 = vshrl.u32 %v12137_v16, 16  ;;  %v8359_v23 = vld [vmem:[#allocation7 + $0xf8] sm:$0xf]  ;;  %v4757_v39 = vpack.c.b16 %v4719_v3, %v4718_v62  ;;  %v6358_v3 = vrot.slane %v6356_v14, 5 }
 0x437   :  { %v12135_v45 = vadd.f32 %v7553_v59, %v6889_v8  ;;  %v5488_v46 = vpop.f32.mrf.mxu2  ;;  %v7227_v8 = vrot.slane %v12102_v11, 5  ;;  %v4325_v11 = vld [vmem:[#allocation2 + $0x15c] sm:$0xe]  ;;  %v6355_v10 = vrot.slane %v6353_v5, 4  ;;  %v6564_v14 = vunpack.c.l.b16 %v6351_v13 }
 0x438   :  { %v5600_v17 = vadd.f32 %v5488_v46, %v5045_v40  ;;  %v8360_v40 = vsel %vm11535_vm11, 0, %v8359_v23  ;;  %v14227_v46 = vld [vmem:[#allocation16_spill] sm:$0xff]  ;;  %v6368_v23 = vrot.slane %v6366_v42, 4  ;;  %v9764_v27 = vrot.slane %v4325_v11, 9 }
 0x439   :  { %14226 = vst [vmem:[#allocation14_spill] sm:$0xff] %v12135_v45  ;;  %6817 = vmatmul.bf16.gmra.mxu3 %v6601_v0  ;;  %v10371_v0 = vld [vmem:[#allocation2 + $0x160] sm:$0xf]  ;;  %v7228_v57 = vsel %vm10720_vm5, %v10019_v53, %v7227_v8  ;;  %v6359_v42 = vor.u32 %v6358_v3, %v6355_v10  ;;  %v8263_v11 = vld [vmem:[#allocation7 + $0xfc] sm:$0x1] }
 0x43a   :  { %v4611_v33 = vrot.slane %v10371_v0, 5  ;;  %8361 = vst [vmem:[#allocation7 + $0xf8] sm:$0xf] %v8360_v40  ;;  %v12155_v40 = vld [vmem:[#allocation2 + $0x170] sm:$0x1]  ;;  %v7341_v13 = vunpack.c.l.b16 %v7228_v57 }
 0x43b   :  { %v7556_v59 = vpop.f32.mrf.mxu0 }
 0x43c   :  { %v6778_v45 = vpop.f32.mrf.mxu3  ;;  %v4613_v21 = vrot.slane %v4611_v33, 4 }
 0x43d   :  { %v6890_v2 = vadd.f32 %v6778_v45, %v5600_v17  ;;  %v4938_v34 = vpop.f32.mrf.mxu1  ;;  %v7229_v45 = vrot.slane %v7227_v8, 4  ;;  %v7230_v17 = vrot.slane %v12120_v44, 5  ;;  %v8264_v8 = vsel %vm11523_vm8, 0, %v8263_v11 }
 0x43e   :  { %7595 = vmatmul.bf16.gmra.mxu0 %v7379_v49  ;;  %v5047_v62 = vadd.f32 %v4938_v34, %v14227_v46  ;;  %v10195_v49 = vld [vmem:[#allocation2 + $0x15c] sm:$0xff]  ;;  %v6563_v34 = vunpack.c.l.b16 %v6341_v4  ;;  %8265 = vst [vmem:[#allocation7 + $0xfc] sm:$0x1] %v8264_v8 }
 0x43f   :  { %v12152_v0 = vadd.f32 %v7556_v59, %v6890_v2  ;;  %v5490_v22 = vpop.f32.mrf.mxu2  ;;  %v6369_v59 = vor.u32 %v6368_v23, %v12150_v30  ;;  %v7231_v44 = vsel %vm10720_vm5, %v7229_v45, %v7230_v17  ;;  %v14229_v23 = vld [vmem:[#allocation18_spill] sm:$0xff]  ;;  %v6360_v17 = vrot.slane %v6359_v42, 4 }
 0x440   :  { %4977 = vmatmul.bf16.gmra.mxu1 %v4757_v39  ;;  %v5601_v5 = vadd.f32 %v5490_v22, %v5046_v51  ;;  %v6372_v39 = vshll.u32 %v12155_v40, 16  ;;  %v4612_v22 = vsel %vm10720_vm5, %v9764_v27, %v4611_v33  ;;  %v4615_v51 = vsel %vm10720_vm5, %v4613_v21, %v4614_v18  ;;  %v5713_v18 = vld [vmem:[#allocation2 + $0x174] sm:$0xf] }
 0x441   :  { %14228 = vst [vmem:[#allocation16_spill] sm:$0xff] %v12152_v0  ;;  %v6602_v4 = vpack.c.b16 %v6564_v14, %v6563_v34  ;;  %v7342_v3 = vunpack.c.l.b16 %v7231_v44  ;;  %v6370_v56 = vrot.slane %v6369_v59, 4  ;;  %v4720_v33 = vunpack.c.l.b16 %v4612_v22  ;;  %v6948_v59 = vld [vmem:[#allocation2 + $0x168] sm:$0xe]  ;;  %v8362_v44 = vld [vmem:[#allocation7 + $0x104] sm:$0xf] }
 0x442   :  { %v4721_v27 = vunpack.c.l.b16 %v4615_v51  ;;  %v6374_v47 = vrot.slane %v6372_v39, 5  ;;  %v6365_v34 = vsel %vm10507_vm2, %v6360_v17, %v12150_v30  ;;  %v6377_v39 = vshrl.u32 %v5713_v18, 16 }
 0x443   :  { %v7558_v2 = vpop.f32.mrf.mxu0  ;;  %v6380_v22 = vshll.u32 %v5713_v18, 16 }
 0x444   :  { %v6780_v46 = vpop.f32.mrf.mxu3  ;;  %5532 = vmatmul.bf16.gmra.mxu2 %v10195_v49  ;;  %v7380_v49 = vpack.c.b16 %v7342_v3, %v7341_v13  ;;  %v4758_v57 = vpack.c.b16 %v4721_v27, %v4720_v33  ;;  %v6375_v42 = vsel %vm10507_vm2, %v6370_v56, %v6374_v47  ;;  %v14231_v47 = vld [vmem:[#allocation20_spill] sm:$0xff]  ;;  %v10020_v3 = vrot.slane %v6948_v59, 9 }
 0x445   :  { %v6891_v53 = vadd.f32 %v6780_v46, %v5601_v5  ;;  %v4940_v10 = vpop.f32.mrf.mxu1  ;;  %v12172_v5 = vld [vmem:[#allocation2 + $0x178] sm:$0xf]  ;;  %v6566_v56 = vunpack.c.l.b16 %v6375_v42  ;;  %v7237_v27 = vrot.slane %v12155_v40, 5  ;;  %v6379_v18 = vrot.slane %v6377_v39, 4 }
 0x446   :  { %v5048_v45 = vadd.f32 %v4940_v10, %v14229_v23  ;;  %v6386_v51 = vshll.u32 %v12172_v5, 16  ;;  %v6390_v8 = vshrl.u32 %v12172_v5, 16  ;;  %v4326_v23 = vld [vmem:[#allocation2 + $0x168] sm:$0xe] }
 0x447   :  { %v12170_v0 = vadd.f32 %v7558_v2, %v6891_v53  ;;  %v5493_v21 = vpop.f32.mrf.mxu2  ;;  %v7234_v2 = vrot.slane %v12137_v16, 5  ;;  %v6565_v16 = vunpack.c.l.b16 %v6365_v34  ;;  %v10374_v34 = vld [vmem:[#allocation2 + $0x170] sm:$0x1] }
 0x448   :  { %v5602_v11 = vadd.f32 %v5493_v21, %v5047_v62  ;;  %v8363_v62 = vsel %vm11535_vm11, 0, %v8362_v44  ;;  %v12188_v44 = vrot.slane %v6386_v51, 5  ;;  %v4621_v59 = vrot.slane %v10374_v34, 5 }
 0x449   :  { %14230 = vst [vmem:[#allocation18_spill] sm:$0xff] %v12170_v0  ;;  %6822 = vmatmul.bf16.gmra.mxu3 %v6602_v4  ;;  %v10373_v4 = vld [vmem:[#allocation2 + $0x16c] sm:$0xf]  ;;  %v7236_v33 = vrot.slane %v7234_v2, 4  ;;  %v7235_v42 = vsel %vm10720_vm5, %v10020_v3, %v7234_v2 }
 0x44a   :  { %8364 = vst [vmem:[#allocation7 + $0x104] sm:$0xf] %v8363_v62  ;;  %v4618_v13 = vrot.slane %v10373_v4, 5  ;;  %v9765_v4 = vrot.slane %v4326_v23, 9 }
 0x44b   :  { %v7561_v14 = vpop.f32.mrf.mxu0  ;;  %v7238_v40 = vsel %vm10720_vm5, %v7236_v33, %v7237_v27  ;;  %v7343_v33 = vunpack.c.l.b16 %v7235_v42 }
 0x44c   :  { %v6783_v46 = vpop.f32.mrf.mxu3 }
 0x44d   :  { %v6892_v30 = vadd.f32 %v6783_v46, %v5602_v11  ;;  %v4943_v53 = vpop.f32.mrf.mxu1  ;;  %v6382_v11 = vrot.slane %v6380_v22, 5  ;;  %v6392_v46 = vrot.slane %v6390_v8, 4  ;;  %v6603_v22 = vpack.c.b16 %v6566_v56, %v6565_v16  ;;  %v14233_v56 = vld [vmem:[#allocation22_spill] sm:$0xff] }
 0x44e   :  { %7600 = vmatmul.bf16.gmra.mxu0 %v7380_v49  ;;  %v5049_v10 = vadd.f32 %v4943_v53, %v14231_v47  ;;  %v10196_v49 = vld [vmem:[#allocation2 + $0x168] sm:$0xff]  ;;  %v4620_v53 = vrot.slane %v4618_v13, 4  ;;  %v12190_v47 = vld [vmem:[#allocation2 + $0x17c] sm:$0x1]  ;;  %v7344_v16 = vunpack.c.l.b16 %v7238_v40 }
 0x44f   :  { %v12185_v17 = vadd.f32 %v7561_v14, %v6892_v30  ;;  %v5495_v21 = vpop.f32.mrf.mxu2  ;;  %v6383_v51 = vor.u32 %v6382_v11, %v6379_v18  ;;  %v6396_v3 = vshll.u32 %v12190_v47, 16  ;;  %v5716_v18 = vld [vmem:[#allocation2 + $0x180] sm:$0xf] }
 0x450   :  { %4982 = vmatmul.bf16.gmra.mxu1 %v4758_v57  ;;  %v5603_v62 = vadd.f32 %v5495_v21, %v5048_v45  ;;  %v8266_v57 = vld [vmem:[#allocation7 + $0x108] sm:$0x1]  ;;  %v6393_v45 = vor.u32 %v6392_v46, %v12188_v44  ;;  %v4619_v21 = vsel %vm10720_vm5, %v9765_v4, %v4618_v13  ;;  %v4622_v2 = vsel %vm10720_vm5, %v4620_v53, %v4621_v59  ;;  %v12207_v46 = vld [vmem:[#allocation2 + $0x184] sm:$0xf]  ;;  %v6949_v59 = vld [vmem:[#allocation2 + $0x174] sm:$0xe] }
 0x451   :  { %14232 = vst [vmem:[#allocation20_spill] sm:$0xff] %v12185_v17  ;;  %v8267_v8 = vsel %vm11523_vm8, 0, %v8266_v57  ;;  %v4723_v34 = vunpack.c.l.b16 %v4622_v2  ;;  %v6384_v57 = vrot.slane %v6383_v51, 4  ;;  %v6398_v53 = vrot.slane %v6396_v3, 5 }
 0x452   :  { %8268 = vst [vmem:[#allocation7 + $0x108] sm:$0x1] %v8267_v8  ;;  %v6394_v4 = vrot.slane %v6393_v45, 4  ;;  %v7381_v8 = vpack.c.b16 %v7344_v16, %v7343_v33  ;;  %v6404_v42 = vshll.u32 %v5716_v18, 16  ;;  %v6410_v40 = vshll.u32 %v12207_v46, 16 }
 0x453   :  { %v7563_v14 = vpop.f32.mrf.mxu0  ;;  %v10021_v2 = vrot.slane %v6949_v59, 9  ;;  %v6389_v33 = vsel %vm10507_vm2, %v6384_v57, %v12188_v44 }
 0x454   :  { %v6785_v39 = vpop.f32.mrf.mxu3  ;;  %5537 = vmatmul.bf16.gmra.mxu2 %v10196_v49  ;;  %v4722_v49 = vunpack.c.l.b16 %v4619_v21  ;;  %v6399_v16 = vsel %vm10507_vm2, %v6394_v4, %v6398_v53  ;;  %v12220_v59 = vrot.slane %v6410_v40, 5  ;;  %v10376_v4 = vld [vmem:[#allocation2 + $0x17c] sm:$0x1] }
 0x455   :  { %v6893_v30 = vadd.f32 %v6785_v39, %v5603_v62  ;;  %v4945_v23 = vpop.f32.mrf.mxu1  ;;  %v6401_v39 = vshrl.u32 %v5716_v18, 16  ;;  %v4628_v53 = vrot.slane %v10376_v4, 5 }
 0x456   :  { %v5050_v27 = vadd.f32 %v4945_v23, %v14233_v56  ;;  %v6414_v23 = vshrl.u32 %v12207_v46, 16  ;;  %v8365_v56 = vld [vmem:[#allocation7 + $0x110] sm:$0xf]  ;;  %v4759_v21 = vpack.c.b16 %v4723_v34, %v4722_v49  ;;  %v6406_v34 = vrot.slane %v6404_v42, 5 }
 0x457   :  { %v12205_v11 = vadd.f32 %v7563_v14, %v6893_v30  ;;  %v5498_v62 = vpop.f32.mrf.mxu2  ;;  %v7241_v30 = vrot.slane %v12172_v5, 5  ;;  %v4327_v5 = vld [vmem:[#allocation2 + $0x174] sm:$0xe]  ;;  %v6403_v18 = vrot.slane %v6401_v39, 4  ;;  %v6568_v42 = vunpack.c.l.b16 %v6399_v16 }
 0x458   :  { %v5604_v13 = vadd.f32 %v5498_v62, %v5049_v10  ;;  %v8366_v10 = vsel %vm11535_vm11, 0, %v8365_v56  ;;  %v14235_v62 = vld [vmem:[#allocation24_spill] sm:$0xff]  ;;  %v6416_v56 = vrot.slane %v6414_v23, 4  ;;  %v9766_v44 = vrot.slane %v4327_v5, 9  ;;  %v8269_v5 = vld [vmem:[#allocation7 + $0x114] sm:$0x1] }
 0x459   :  { %14234 = vst [vmem:[#allocation22_spill] sm:$0xff] %v12205_v11  ;;  %6827 = vmatmul.bf16.gmra.mxu3 %v6603_v22  ;;  %v10375_v22 = vld [vmem:[#allocation2 + $0x178] sm:$0xf]  ;;  %v7242_v40 = vsel %vm10720_vm5, %v10021_v2, %v7241_v30  ;;  %v6407_v23 = vor.u32 %v6406_v34, %v6403_v18 }
 0x45a   :  { %v4625_v51 = vrot.slane %v10375_v22, 5  ;;  %8367 = vst [vmem:[#allocation7 + $0x110] sm:$0xf] %v8366_v10  ;;  %v12225_v10 = vld [vmem:[#allocation2 + $0x188] sm:$0x1]  ;;  %v7345_v16 = vunpack.c.l.b16 %v7242_v40 }
 0x45b   :  { %v7566_v14 = vpop.f32.mrf.mxu0 }
 0x45c   :  { %v6788_v11 = vpop.f32.mrf.mxu3  ;;  %v4627_v57 = vrot.slane %v4625_v51, 4 }
 0x45d   :  { %v6894_v45 = vadd.f32 %v6788_v11, %v5604_v13  ;;  %v4948_v3 = vpop.f32.mrf.mxu1  ;;  %v7243_v11 = vrot.slane %v7241_v30, 4  ;;  %v7244_v13 = vrot.slane %v12190_v47, 5  ;;  %v8270_v30 = vsel %vm11523_vm8, 0, %v8269_v5 }
 0x45e   :  { %7605 = vmatmul.bf16.gmra.mxu0 %v7381_v8  ;;  %v5051_v49 = vadd.f32 %v4948_v3, %v14235_v62  ;;  %v10197_v8 = vld [vmem:[#allocation2 + $0x174] sm:$0xff]  ;;  %v6567_v3 = vunpack.c.l.b16 %v6389_v33  ;;  %8271 = vst [vmem:[#allocation7 + $0x114] sm:$0x1] %v8270_v30 }
 0x45f   :  { %v12222_v22 = vadd.f32 %v7566_v14, %v6894_v45  ;;  %v5500_v17 = vpop.f32.mrf.mxu2  ;;  %v6417_v14 = vor.u32 %v6416_v56, %v12220_v59  ;;  %v7245_v47 = vsel %vm10720_vm5, %v7243_v11, %v7244_v13  ;;  %v14237_v56 = vld [vmem:[#allocation26_spill] sm:$0xff]  ;;  %v6408_v13 = vrot.slane %v6407_v23, 4 }
 0x460   :  { %4987 = vmatmul.bf16.gmra.mxu1 %v4759_v21  ;;  %v5605_v39 = vadd.f32 %v5500_v17, %v5050_v27  ;;  %v6420_v21 = vshll.u32 %v12225_v10, 16  ;;  %v4626_v17 = vsel %vm10720_vm5, %v9766_v44, %v4625_v51  ;;  %v4629_v27 = vsel %vm10720_vm5, %v4627_v57, %v4628_v53  ;;  %v5719_v53 = vld [vmem:[#allocation2 + $0x18c] sm:$0xf] }
 0x461   :  { %14236 = vst [vmem:[#allocation24_spill] sm:$0xff] %v12222_v22  ;;  %v6604_v33 = vpack.c.b16 %v6568_v42, %v6567_v3  ;;  %v7346_v34 = vunpack.c.l.b16 %v7245_v47  ;;  %v6418_v4 = vrot.slane %v6417_v14, 4  ;;  %v4724_v51 = vunpack.c.l.b16 %v4626_v17  ;;  %v6950_v14 = vld [vmem:[#allocation2 + $0x180] sm:$0xe]  ;;  %v8368_v47 = vld [vmem:[#allocation7 + $0x11c] sm:$0xf] }
 0x462   :  { %v4725_v44 = vunpack.c.l.b16 %v4629_v27  ;;  %v6422_v0 = vrot.slane %v6420_v21, 5  ;;  %v6413_v3 = vsel %vm10507_vm2, %v6408_v13, %v12220_v59  ;;  %v6425_v21 = vshrl.u32 %v5719_v53, 16 }
 0x463   :  { %v7568_v45 = vpop.f32.mrf.mxu0  ;;  %v6428_v17 = vshll.u32 %v5719_v53, 16 }
 0x464   :  { %v6790_v62 = vpop.f32.mrf.mxu3  ;;  %5542 = vmatmul.bf16.gmra.mxu2 %v10197_v8  ;;  %v7382_v8 = vpack.c.b16 %v7346_v34, %v7345_v16  ;;  %v4760_v40 = vpack.c.b16 %v4725_v44, %v4724_v51  ;;  %v6423_v23 = vsel %vm10507_vm2, %v6418_v4, %v6422_v0  ;;  %v14239_v0 = vld [vmem:[#allocation28_spill] sm:$0xff]  ;;  %v10022_v34 = vrot.slane %v6950_v14, 9 }
 0x465   :  { %v6895_v2 = vadd.f32 %v6790_v62, %v5605_v39  ;;  %v4950_v18 = vpop.f32.mrf.mxu1  ;;  %v12242_v39 = vld [vmem:[#allocation2 + $0x190] sm:$0xf]  ;;  %v6570_v4 = vunpack.c.l.b16 %v6423_v23  ;;  %v7251_v44 = vrot.slane %v12225_v10, 5  ;;  %v6427_v53 = vrot.slane %v6425_v21, 4 }
 0x466   :  { %v5052_v11 = vadd.f32 %v4950_v18, %v14237_v56  ;;  %v6434_v27 = vshll.u32 %v12242_v39, 16  ;;  %v6438_v30 = vshrl.u32 %v12242_v39, 16  ;;  %v4328_v56 = vld [vmem:[#allocation2 + $0x180] sm:$0xe] }
 0x467   :  { %v12240_v22 = vadd.f32 %v7568_v45, %v6895_v2  ;;  %v5503_v57 = vpop.f32.mrf.mxu2  ;;  %v7248_v45 = vrot.slane %v12207_v46, 5  ;;  %v6569_v46 = vunpack.c.l.b16 %v6413_v3  ;;  %v10378_v3 = vld [vmem:[#allocation2 + $0x188] sm:$0x1] }
 0x468   :  { %v5606_v5 = vadd.f32 %v5503_v57, %v5051_v49  ;;  %v8369_v49 = vsel %vm11535_vm11, 0, %v8368_v47  ;;  %v12258_v47 = vrot.slane %v6434_v27, 5  ;;  %v4635_v14 = vrot.slane %v10378_v3, 5 }
 0x469   :  { %14238 = vst [vmem:[#allocation26_spill] sm:$0xff] %v12240_v22  ;;  %6832 = vmatmul.bf16.gmra.mxu3 %v6604_v33  ;;  %v10377_v33 = vld [vmem:[#allocation2 + $0x184] sm:$0xf]  ;;  %v7250_v51 = vrot.slane %v7248_v45, 4  ;;  %v7249_v23 = vsel %vm10720_vm5, %v10022_v34, %v7248_v45 }
 0x46a   :  { %8370 = vst [vmem:[#allocation7 + $0x11c] sm:$0xf] %v8369_v49  ;;  %v4632_v16 = vrot.slane %v10377_v33, 5  ;;  %v9767_v33 = vrot.slane %v4328_v56, 9 }
 0x46b   :  { %v7571_v42 = vpop.f32.mrf.mxu0  ;;  %v7252_v10 = vsel %vm10720_vm5, %v7250_v51, %v7251_v44  ;;  %v7347_v51 = vunpack.c.l.b16 %v7249_v23  ;;  %v7255_v23 = vrot.slane %v12242_v39, 5 }
 0x46c   :  { %v6793_v62 = vpop.f32.mrf.mxu3 }
 0x46d   :  { %v6896_v59 = vadd.f32 %v6793_v62, %v5606_v5  ;;  %v4953_v2 = vpop.f32.mrf.mxu1  ;;  %v6430_v5 = vrot.slane %v6428_v17, 5  ;;  %v6440_v62 = vrot.slane %v6438_v30, 4  ;;  %v6605_v17 = vpack.c.b16 %v6570_v4, %v6569_v46  ;;  %v14241_v4 = vld [vmem:[#allocation30_spill] sm:$0xff] }
 0x46e   :  { %7610 = vmatmul.bf16.gmra.mxu0 %v7382_v8  ;;  %v5053_v18 = vadd.f32 %v4953_v2, %v14239_v0  ;;  %v10198_v8 = vld [vmem:[#allocation2 + $0x180] sm:$0xff]  ;;  %v4634_v2 = vrot.slane %v4632_v16, 4  ;;  %v12260_v0 = vld [vmem:[#allocation2 + $0x194] sm:$0x1]  ;;  %v7348_v46 = vunpack.c.l.b16 %v7252_v10  ;;  %v8371_v10 = vld [vmem:[#allocation7 + $0x128] sm:$0xf] }
 0x46f   :  { %v12255_v13 = vadd.f32 %v7571_v42, %v6896_v59  ;;  %v5505_v57 = vpop.f32.mrf.mxu2  ;;  %v6431_v27 = vor.u32 %v6430_v5, %v6427_v53  ;;  %v6444_v34 = vshll.u32 %v12260_v0, 16 }
 0x470   :  { %4992 = vmatmul.bf16.gmra.mxu1 %v4760_v40  ;;  %v5607_v49 = vadd.f32 %v5505_v57, %v5052_v11  ;;  %v8272_v40 = vld [vmem:[#allocation7 + $0x120] sm:$0x1]  ;;  %v6441_v11 = vor.u32 %v6440_v62, %v12258_v47  ;;  %v4633_v57 = vsel %vm10720_vm5, %v9767_v33, %v4632_v16  ;;  %v4636_v45 = vsel %vm10720_vm5, %v4634_v2, %v4635_v14  ;;  %v6951_v14 = vld [vmem:[#allocation2 + $0x18c] sm:$0xe] }
 0x471   :  { %14240 = vst [vmem:[#allocation28_spill] sm:$0xff] %v12255_v13  ;;  %v8273_v30 = vsel %vm11523_vm8, 0, %v8272_v40  ;;  %v4726_v62 = vunpack.c.l.b16 %v4633_v57  ;;  %v6432_v40 = vrot.slane %v6431_v27, 4  ;;  %v6446_v33 = vrot.slane %v6444_v34, 5  ;;  %v10379_v34 = vld [vmem:[#allocation2 + $0x190] sm:$0xf] }
 0x472   :  { %8274 = vst [vmem:[#allocation7 + $0x120] sm:$0x1] %v8273_v30  ;;  %v6442_v16 = vrot.slane %v6441_v11, 4  ;;  %v7383_v2 = vpack.c.b16 %v7348_v46, %v7347_v51  ;;  %v8372_v57 = vsel %vm11535_vm11, 0, %v8371_v10  ;;  %v4639_v51 = vrot.slane %v10379_v34, 5  ;;  %v14243_v46 = vld [vmem:[#allocation32_spill] sm:$0xff] }
 0x473   :  { %v7573_v42 = vpop.f32.mrf.mxu0  ;;  %8373 = vst [vmem:[#allocation7 + $0x128] sm:$0xf] %v8372_v57 }
 0x474   :  { %v6795_v21 = vpop.f32.mrf.mxu3  ;;  %5547 = vmatmul.bf16.gmra.mxu2 %v10198_v8  ;;  %v5722_v8 = vld [vmem:[#allocation2 + $0x198] sm:$0xf]  ;;  %v6447_v39 = vsel %vm10507_vm2, %v6442_v16, %v6446_v33 }
 0x475   :  { %v6897_v59 = vadd.f32 %v6795_v21, %v5607_v49  ;;  %v4955_v56 = vpop.f32.mrf.mxu1  ;;  %v4727_v49 = vunpack.c.l.b16 %v4636_v45  ;;  %v12277_v21 = vld [vmem:[#allocation2 + $0x19c] sm:$0xf]  ;;  %v6437_v45 = vsel %vm10507_vm2, %v6432_v40, %v12258_v47  ;;  %v6572_v40 = vunpack.c.l.b16 %v6447_v39 }
 0x476   :  { %v5054_v44 = vadd.f32 %v4955_v56, %v14241_v4  ;;  %v6449_v56 = vshrl.u32 %v5722_v8, 16  ;;  %v6571_v47 = vunpack.c.l.b16 %v6437_v45 }
 0x477   :  { %v12275_v53 = vadd.f32 %v7573_v42, %v6897_v59  ;;  %v5508_v5 = vpop.f32.mrf.mxu2  ;;  %v6452_v42 = vshll.u32 %v5722_v8, 16  ;;  %v4761_v4 = vpack.c.b16 %v4727_v49, %v4726_v62  ;;  %v10023_v62 = vrot.slane %v6951_v14, 9  ;;  %v4329_v8 = vld [vmem:[#allocation2 + $0x18c] sm:$0xe]  ;;  %v10380_v14 = vld [vmem:[#allocation2 + $0x194] sm:$0x1] }
 0x478   :  { %v5608_v3 = vadd.f32 %v5508_v5, %v5053_v18  ;;  %v6458_v18 = vshll.u32 %v12277_v21, 16  ;;  %v7258_v49 = vrot.slane %v12260_v0, 5  ;;  %v9768_v34 = vrot.slane %v4329_v8, 9  ;;  %v12295_v0 = vld [vmem:[#allocation2 + $0x1a0] sm:$0x1] }
 0x479   :  { %14242 = vst [vmem:[#allocation30_spill] sm:$0xff] %v12275_v53  ;;  %6837 = vmatmul.bf16.gmra.mxu3 %v6605_v17  ;;  %v6462_v17 = vshrl.u32 %v12277_v21, 16  ;;  %v6454_v53 = vrot.slane %v6452_v42, 5  ;;  %v6606_v45 = vpack.c.b16 %v6572_v40, %v6571_v47 }
 0x47a   :  { %v12293_v16 = vrot.slane %v6458_v18, 5  ;;  %v4640_v8 = vsel %vm10720_vm5, %v9768_v34, %v4639_v51 }
 0x47b   :  { %v7576_v30 = vpop.f32.mrf.mxu0  ;;  %v6464_v33 = vrot.slane %v6462_v17, 4 }
 0x47c   :  { %v6798_v59 = vpop.f32.mrf.mxu3 }
 0x47d   :  { %v6898_v27 = vadd.f32 %v6798_v59, %v5608_v3  ;;  %v4958_v11 = vpop.f32.mrf.mxu1  ;;  %v7257_v3 = vrot.slane %v7255_v23, 4  ;;  %v6451_v59 = vrot.slane %v6449_v56, 4  ;;  %v7256_v56 = vsel %vm10720_vm5, %v10023_v62, %v7255_v23 }
 0x47e   :  { %7615 = vmatmul.bf16.gmra.mxu0 %v7383_v2  ;;  %v5055_v5 = vadd.f32 %v4958_v11, %v14243_v46  ;;  %v10199_v2 = vld [vmem:[#allocation2 + $0x18c] sm:$0xff]  ;;  %v4641_v11 = vrot.slane %v4639_v51, 4  ;;  %v4642_v46 = vrot.slane %v10380_v14, 5  ;;  %v6468_v62 = vshll.u32 %v12295_v0, 16  ;;  %v6952_v14 = vld [vmem:[#allocation2 + $0x198] sm:$0xe] }
 0x47f   :  { %v12291_v10 = vadd.f32 %v7576_v30, %v6898_v27  ;;  %v5510_v13 = vpop.f32.mrf.mxu2  ;;  %v7259_v42 = vsel %vm10720_vm5, %v7257_v3, %v7258_v49  ;;  %v8275_v27 = vld [vmem:[#allocation7 + $0x12c] sm:$0x1] }
 0x480   :  { %4997 = vmatmul.bf16.gmra.mxu1 %v4761_v4  ;;  %v5609_v57 = vadd.f32 %v5510_v13, %v5054_v44  ;;  %v6455_v4 = vor.u32 %v6454_v53, %v6451_v59  ;;  %v6465_v13 = vor.u32 %v6464_v33, %v12293_v16  ;;  %v8276_v44 = vsel %vm11523_vm8, 0, %v8275_v27  ;;  %v14245_v3 = vld [vmem:[#allocation34_spill] sm:$0xff] }
 0x481   :  { %14244 = vst [vmem:[#allocation32_spill] sm:$0xff] %v12291_v10  ;;  %v4643_v23 = vsel %vm10720_vm5, %v4641_v11, %v4642_v46  ;;  %v7349_v53 = vunpack.c.l.b16 %v7256_v56  ;;  %v7350_v49 = vunpack.c.l.b16 %v7259_v42  ;;  %v7262_v27 = vrot.slane %v12277_v21, 5  ;;  %v8374_v42 = vld [vmem:[#allocation7 + $0x134] sm:$0xf] }
 0x482   :  { %8277 = vst [vmem:[#allocation7 + $0x12c] sm:$0x1] %v8276_v44  ;;  %v6456_v40 = vrot.slane %v6455_v4, 4  ;;  %v6466_v34 = vrot.slane %v6465_v13, 4  ;;  %v6470_v11 = vrot.slane %v6468_v62, 5  ;;  %v7265_v21 = vrot.slane %v12295_v0, 5 }
 0x483   :  { %v7578_v30 = vpop.f32.mrf.mxu0  ;;  %v7384_v46 = vpack.c.b16 %v7350_v49, %v7349_v53  ;;  %v12316_v4 = vld [vmem:[#allocation2 + $0x1a8] sm:$0xf]  ;;  %v10381_v62 = vld [vmem:[#allocation2 + $0x19c] sm:$0xf] }
 0x484   :  { %v6800_v18 = vpop.f32.mrf.mxu3  ;;  %5552 = vmatmul.bf16.gmra.mxu2 %v10199_v2  ;;  %v4729_v2 = vunpack.c.l.b16 %v4643_v23  ;;  %v6461_v56 = vsel %vm10507_vm2, %v6456_v40, %v12293_v16  ;;  %v6471_v23 = vsel %vm10507_vm2, %v6466_v34, %v6470_v11  ;;  %v4646_v16 = vrot.slane %v10381_v62, 5  ;;  %v14247_v49 = vld [vmem:[#allocation36_spill] sm:$0xff]  ;;  %v4330_v40 = vld [vmem:[#allocation2 + $0x198] sm:$0xe] }
 0x485   :  { %v6899_v17 = vadd.f32 %v6800_v18, %v5609_v57  ;;  %v4960_v39 = vpop.f32.mrf.mxu1  ;;  %v4728_v57 = vunpack.c.l.b16 %v4640_v8  ;;  %v5725_v18 = vld [vmem:[#allocation2 + $0x1a4] sm:$0xf]  ;;  %v7264_v8 = vrot.slane %v7262_v27, 4  ;;  %v6486_v0 = vshrl.u32 %v12316_v4, 16 }
 0x486   :  { %v5056_v59 = vadd.f32 %v4960_v39, %v14245_v3  ;;  %v6473_v53 = vshrl.u32 %v5725_v18, 16 }
 0x487   :  { %v12310_v47 = vadd.f32 %v7578_v30, %v6899_v17  ;;  %v5513_v33 = vpop.f32.mrf.mxu2  ;;  %v10024_v30 = vrot.slane %v6952_v14, 9  ;;  %v4762_v39 = vpack.c.b16 %v4729_v2, %v4728_v57  ;;  %v6482_v57 = vshll.u32 %v12316_v4, 16 }
 0x488   :  { %v5610_v51 = vadd.f32 %v5513_v33, %v5055_v5  ;;  %v8375_v5 = vsel %vm11535_vm11, 0, %v8374_v42  ;;  %v6476_v33 = vshll.u32 %v5725_v18, 16  ;;  %v6574_v42 = vunpack.c.l.b16 %v6471_v23 }
 0x489   :  { %14246 = vst [vmem:[#allocation34_spill] sm:$0xff] %v12310_v47  ;;  %6842 = vmatmul.bf16.gmra.mxu3 %v6606_v45  ;;  %v7263_v34 = vsel %vm10720_vm5, %v10024_v30, %v7262_v27  ;;  %v7266_v11 = vsel %vm10720_vm5, %v7264_v8, %v7265_v21  ;;  %v4648_v18 = vrot.slane %v4646_v16, 4 }
 0x48a   :  { %8376 = vst [vmem:[#allocation7 + $0x134] sm:$0xf] %v8375_v5  ;;  %v9769_v5 = vrot.slane %v4330_v40, 9  ;;  %v6478_v47 = vrot.slane %v6476_v33, 5  ;;  %v7351_v22 = vunpack.c.l.b16 %v7263_v34  ;;  %v14249_v40 = vld [vmem:[#allocation38_spill] sm:$0xff] }
 0x48b   :  { %v7581_v44 = vpop.f32.mrf.mxu0 }
 0x48c   :  { %v6803_v17 = vpop.f32.mrf.mxu3  ;;  %v4647_v21 = vsel %vm10720_vm5, %v9769_v5, %v4646_v16 }
 0x48d   :  { %v6900_v45 = vadd.f32 %v6803_v17, %v5610_v51  ;;  %v4963_v13 = vpop.f32.mrf.mxu1  ;;  %v6573_v51 = vunpack.c.l.b16 %v6461_v56  ;;  %v10200_v17 = vld [vmem:[#allocation2 + $0x198] sm:$0xff]  ;;  %v8278_v56 = vld [vmem:[#allocation7 + $0x138] sm:$0x1]  ;;  %v4730_v34 = vunpack.c.l.b16 %v4647_v21 }
 0x48e   :  { %7620 = vmatmul.bf16.gmra.mxu0 %v7384_v46  ;;  %v5057_v3 = vadd.f32 %v4963_v13, %v14247_v49  ;;  %v10382_v13 = vld [vmem:[#allocation2 + $0x1a0] sm:$0x1]  ;;  %v6475_v49 = vrot.slane %v6473_v53, 4  ;;  %v8279_v27 = vsel %vm11523_vm8, 0, %v8278_v56 }
 0x48f   :  { %v12326_v2 = vadd.f32 %v7581_v44, %v6900_v45  ;;  %v5515_v14 = vpop.f32.mrf.mxu2  ;;  %v4649_v62 = vrot.slane %v10382_v13, 5  ;;  %v6484_v44 = vrot.slane %v6482_v57, 5  ;;  %v6488_v45 = vrot.slane %v6486_v0, 4  ;;  %8280 = vst [vmem:[#allocation7 + $0x138] sm:$0x1] %v8279_v27 }
 0x490   :  { %5002 = vmatmul.bf16.gmra.mxu1 %v4762_v39  ;;  %v5611_v46 = vadd.f32 %v5515_v14, %v5056_v59  ;;  %v5727_v39 = vld [vmem:[#allocation2 + $0x1ac] sm:$0x1]  ;;  %v6607_v10 = vpack.c.b16 %v6574_v42, %v6573_v51  ;;  %v7352_v59 = vunpack.c.l.b16 %v7266_v11  ;;  %v6479_v57 = vor.u32 %v6478_v47, %v6475_v49  ;;  %v6953_v47 = vld [vmem:[#allocation2 + $0x1a4] sm:$0xe] }
 0x491   :  { %14248 = vst [vmem:[#allocation36_spill] sm:$0xff] %v12326_v2  ;;  %v4650_v53 = vsel %vm10720_vm5, %v4648_v18, %v4649_v62  ;;  %v6489_v0 = vor.u32 %v6488_v45, %v6484_v44  ;;  %v6492_v14 = vshll.u32 %v5727_v39, 16  ;;  %v7269_v18 = vrot.slane %v12316_v4, 5  ;;  %v8377_v62 = vld [vmem:[#allocation7 + $0x140] sm:$0xf] }
 0x492   :  { %v6480_v13 = vrot.slane %v6479_v57, 4  ;;  %v7272_v21 = vrot.slane %v5727_v39, 5  ;;  %v10201_v57 = vld [vmem:[#allocation2 + $0x1a4] sm:$0xff] }
 0x493   :  { %v7583_v2 = vpop.f32.mrf.mxu0  ;;  %v6490_v56 = vrot.slane %v6489_v0, 4  ;;  %v6494_v16 = vrot.slane %v6492_v14, 5 }
 0x494   :  { %v6805_v23 = vpop.f32.mrf.mxu3  ;;  %5557 = vmatmul.bf16.gmra.mxu2 %v10200_v17  ;;  %v7385_v17 = vpack.c.b16 %v7352_v59, %v7351_v22  ;;  %v6485_v22 = vsel %vm10507_vm2, %v6480_v13, %v6484_v44  ;;  %v10025_v59 = vrot.slane %v6953_v47, 9  ;;  %v8380_v47 = vld [vmem:[#allocation7 + $0x14c] sm:$0xf] }
 0x495   :  { %v6901_v30 = vadd.f32 %v6805_v23, %v5611_v46  ;;  %v4965_v8 = vpop.f32.mrf.mxu1  ;;  %v4731_v46 = vunpack.c.l.b16 %v4650_v53  ;;  %v6575_v0 = vunpack.c.l.b16 %v6485_v22  ;;  %v14255_v22 = vld [vmem:[#allocation13_spill] sm:$0xff] }
 0x496   :  { %v5058_v33 = vadd.f32 %v4965_v8, %v14249_v40  ;;  %v7271_v8 = vrot.slane %v7269_v18, 4 }
 0x497   :  { %v12339_v51 = vadd.f32 %v7583_v2, %v6901_v30  ;;  %v5518_v42 = vpop.f32.mrf.mxu2  ;;  %v4763_v27 = vpack.c.b16 %v4731_v46, %v4730_v34  ;;  %v8378_v2 = vsel %vm11535_vm11, 0, %v8377_v62  ;;  %v6495_v30 = vsel %vm10507_vm2, %v6490_v56, %v6494_v16  ;;  %v14253_v16 = vld [vmem:[#allocation11_spill] sm:$0xff] }
 0x498   :  { %v5612_v11 = vadd.f32 %v5518_v42, %v5057_v3  ;;  %8379 = vst [vmem:[#allocation7 + $0x140] sm:$0xf] %v8378_v2  ;;  %v6576_v14 = vunpack.c.l.b16 %v6495_v30  ;;  %v7270_v34 = vsel %vm10720_vm5, %v10025_v59, %v7269_v18  ;;  %v7273_v44 = vsel %vm10720_vm5, %v7271_v8, %v7272_v21 }
 0x499   :  { %14250 = vst [vmem:[#allocation38_spill] sm:$0xff] %v12339_v51  ;;  %6847 = vmatmul.bf16.gmra.mxu3 %v6607_v10  ;;  %v14251_v10 = vld [vmem:[#allocation40_spill] sm:$0xff]  ;;  %v7354_v56 = vunpack.c.l.b16 %v7273_v44 }
 0x49a   :  { %v6608_v39 = vpack.c.b16 %v6576_v14, %v6575_v0 }
 0x49b   :  { %v7586_v5 = vpop.f32.mrf.mxu0 }
 0x49c   :  { %v6808_v23 = vpop.f32.mrf.mxu3 }
 0x49d   :  { %v6902_v49 = vadd.f32 %v6808_v23, %v5612_v11  ;;  %v4968_v45 = vpop.f32.mrf.mxu1  ;;  %v8282_v11 = vsel %vm11523_vm8, 0, %v8281_v25 }
 0x49e   :  { %7625 = vmatmul.bf16.gmra.mxu0 %v7385_v17  ;;  %v5059_v3 = vadd.f32 %v4968_v45, %v14251_v10  ;;  %8283 = vst [vmem:[#allocation7 + $0x144] sm:$0x1] %v8282_v11 }
 0x49f   :  { %v12349_v4 = vadd.f32 %v7586_v5, %v6902_v49  ;;  %v5520_v53 = vpop.f32.mrf.mxu2  ;;  %v8381_v49 = vsel %vm11535_vm11, 0, %v8380_v47  ;;  %v14257_v47 = vld [vmem:[#allocation17_spill] sm:$0xff] }
 0x4a0   :  { %5007 = vmatmul.bf16.gmra.mxu1 %v4763_v27  ;;  %v5613_v40 = vadd.f32 %v5520_v53, %v5058_v33  ;;  %v7353_v33 = vunpack.c.l.b16 %v7270_v34  ;;  %8382 = vst [vmem:[#allocation7 + $0x14c] sm:$0xf] %v8381_v49 }
 0x4a1   :  { %14252 = vst [vmem:[#allocation40_spill] sm:$0xff] %v12349_v4 }
 0x4a2   :  { %v7386_v23 = vpack.c.b16 %v7354_v56, %v7353_v33  ;;  %v8383_v33 = vld [vmem:[#allocation7 + $0x158] sm:$0xf] }
 0x4a3   :  { %v7588_v42 = vpop.f32.mrf.mxu0 }
 0x4a4   :  { %v6810_v46 = vpop.f32.mrf.mxu3  ;;  %5562 = vmatmul.bf16.gmra.mxu2 %v10201_v57 }
 0x4a5   :  { %v6903_v17 = vadd.f32 %v6810_v46, %v5613_v40  ;;  %v4970_v13 = vpop.f32.mrf.mxu1  ;;  %v8284_v40 = vld [vmem:[#allocation7 + $0x150] sm:$0x1]  ;;  %v7778_v46 = vmul.f32 %v11610_v63, %v11610_v63 }
 0x4a6   :  { %v5060_v5 = vadd.f32 %v4970_v13, %v14253_v16  ;;  %v8285_v57 = vsel %vm11523_vm8, 0, %v8284_v40  ;;  %v8384_v16 = vsel %vm11535_vm11, 0, %v8383_v33  ;;  %v14258_v33 = vld [vmem:[#allocation19_spill] sm:$0xff] }
 0x4a7   :  { %v12358_v62 = vadd.f32 %v7588_v42, %v6903_v17  ;;  %v5523_v18 = vpop.f32.mrf.mxu2  ;;  %8286 = vst [vmem:[#allocation7 + $0x150] sm:$0x1] %v8285_v57  ;;  %v14256_v42 = vld [vmem:[#allocation15_spill] sm:$0xff]  ;;  %v7777_v17 = vmul.f32 %v11592_v1, %v11592_v1 }
 0x4a8   :  { %v5614_v7 = vadd.f32 %v5523_v18, %v5059_v3  ;;  %8385 = vst [vmem:[#allocation7 + $0x158] sm:$0xf] %v8384_v16 }
 0x4a9   :  { %14254 = vst [vmem:[#allocation11_spill] sm:$0xff] %v12358_v62  ;;  %6852 = vmatmul.bf16.gmra.mxu3 %v6608_v39  ;;  %v7779_v39 = vmul.f32 %v11625_v19, %v11625_v19  ;;  %v7841_v18 = vadd.f32 %v7778_v46, %v7777_v17 }
 0x4ab   :  { %v7591_v27 = vpop.f32.mrf.mxu0 }
 0x4ac   :  { %v6813_v2 = vpop.f32.mrf.mxu3 }
 0x4ad   :  { %v6904_v45 = vadd.f32 %v6813_v2, %v5614_v7  ;;  %v4973_v10 = vpop.f32.mrf.mxu1  ;;  %v7780_v7 = vmul.f32 %v11645_v24, %v11645_v24 }
 0x4ae   :  { %7630 = vmatmul.bf16.gmra.mxu0 %v7386_v23  ;;  %v5061_v30 = vadd.f32 %v4973_v10, %v14255_v22  ;;  %v7781_v10 = vmul.f32 %v11662_v35, %v11662_v35 }
 0x4af   :  { %v12363_v59 = vadd.f32 %v7591_v27, %v6904_v45  ;;  %v5525_v8 = vpop.f32.mrf.mxu2  ;;  %v7842_v45 = vadd.f32 %v7841_v18, %v7779_v39  ;;  %v7784_v39 = vmul.f32 %v11715_v26, %v11715_v26  ;;  %v7785_v18 = vmul.f32 %v11732_v28, %v11732_v28 }
 0x4b0   :  { %v5615_v21 = vadd.f32 %v5525_v8, %v5060_v5  ;;  %v7700_v5 = vadd.f32 %v11610_v63, %v11592_v1 }
 0x4b2   :  { %v7701_v49 = vadd.f32 %v7700_v5, %v11625_v19 }
 0x4b3   :  { %v7593_v53 = vpop.f32.mrf.mxu0 }
 0x4b4   :  { %v6815_v3 = vpop.f32.mrf.mxu3  ;;  %v7702_v8 = vadd.f32 %v7701_v49, %v11645_v24  ;;  %v7786_v49 = vmul.f32 %v11750_v37, %v11750_v37 }
 0x4b5   :  { %v6905_v0 = vadd.f32 %v6815_v3, %v5615_v21  ;;  %v4975_v14 = vpop.f32.mrf.mxu1  ;;  %v7843_v21 = vadd.f32 %v7842_v45, %v7780_v7 }
 0x4b6   :  { %v5062_v34 = vadd.f32 %v4975_v14, %v14256_v42  ;;  %v7703_v3 = vadd.f32 %v7702_v8, %v11662_v35  ;;  %v8287_v42 = vld [vmem:[#allocation7 + $0x15c] sm:$0x1]  ;;  %v7787_v8 = vmul.f32 %v11765_v36, %v11765_v36 }
 0x4b7   :  { %v12368_v44 = vadd.f32 %v7593_v53, %v6905_v0  ;;  %v5528_v25 = vpop.f32.mrf.mxu2  ;;  %v7782_v53 = vmul.f32 %v11680_v20, %v11680_v20  ;;  %v7844_v57 = vadd.f32 %v7843_v21, %v7781_v10  ;;  %v7783_v0 = vmul.f32 %v11695_v15, %v11695_v15 }
 0x4b8   :  { %v5616_v11 = vadd.f32 %v5528_v25, %v5061_v30  ;;  %v8288_v46 = vsel %vm11523_vm8, 0, %v8287_v42 }
 0x4b9   :  { %v7845_v17 = vadd.f32 %v7844_v57, %v7782_v53  ;;  %8289 = vst [vmem:[#allocation7 + $0x15c] sm:$0x1] %v8288_v46  ;;  %v8386_v53 = vld [vmem:[#allocation7 + $0x164] sm:$0xf] }
 0x4bb   :  { %v7596_v13 = vpop.f32.mrf.mxu0  ;;  %v7846_v5 = vadd.f32 %v7845_v17, %v7783_v0 }
 0x4bc   :  { %v6818_v56 = vpop.f32.mrf.mxu3 }
 0x4bd   :  { %v6906_v23 = vadd.f32 %v6818_v56, %v5616_v11  ;;  %v4978_v27 = vpop.f32.mrf.mxu1  ;;  %v7704_v11 = vadd.f32 %v7703_v3, %v11680_v20  ;;  %v8387_v3 = vsel %vm11535_vm11, 0, %v8386_v53  ;;  %v7792_v53 = vmul.f32 %v11855_v61, %v11855_v61 }
 0x4be   :  { %v5063_v2 = vadd.f32 %v4978_v27, %v14257_v47  ;;  %v7847_v47 = vadd.f32 %v7846_v5, %v7784_v39  ;;  %8388 = vst [vmem:[#allocation7 + $0x164] sm:$0xf] %v8387_v3  ;;  %v7789_v39 = vmul.f32 %v11802_v60, %v11802_v60  ;;  %v7790_v5 = vmul.f32 %v11820_v38, %v11820_v38 }
 0x4bf   :  { %v12386_v22 = vadd.f32 %v7596_v13, %v6906_v23  ;;  %v5530_v30 = vpop.f32.mrf.mxu2  ;;  %v7705_v16 = vadd.f32 %v7704_v11, %v11695_v15 }
 0x4c0   :  { %v5617_v40 = vadd.f32 %v5530_v30, %v5062_v34  ;;  %v7848_v30 = vadd.f32 %v7847_v47, %v7785_v18  ;;  %v7791_v47 = vmul.f32 %v11835_v9, %v11835_v9 }
 0x4c1   :  { %v7706_v27 = vadd.f32 %v7705_v16, %v11715_v26 }
 0x4c2   :  { %v7849_v0 = vadd.f32 %v7848_v30, %v7786_v49 }
 0x4c3   :  { %v7598_v14 = vpop.f32.mrf.mxu0  ;;  %v7707_v10 = vadd.f32 %v7706_v27, %v11732_v28 }
 0x4c4   :  { %v6820_v25 = vpop.f32.mrf.mxu3  ;;  %v7850_v17 = vadd.f32 %v7849_v0, %v7787_v8  ;;  %v7793_v0 = vmul.f32 %v11872_v29, %v11872_v29 }
 0x4c5   :  { %v6907_v13 = vadd.f32 %v6820_v25, %v5617_v40  ;;  %v4980_v34 = vpop.f32.mrf.mxu1  ;;  %v7708_v57 = vadd.f32 %v7707_v10, %v11750_v37  ;;  %v14259_v25 = vld [vmem:[#allocation21_spill] sm:$0xff] }
 0x4c6   :  { %v5064_v56 = vadd.f32 %v4980_v34, %v14258_v33 }
 0x4c7   :  { %v12403_v7 = vadd.f32 %v7598_v14, %v6907_v13  ;;  %v5533_v23 = vpop.f32.mrf.mxu2  ;;  %v7788_v14 = vmul.f32 %v11785_v32, %v11785_v32  ;;  %v7709_v11 = vadd.f32 %v7708_v57, %v11765_v36 }
 0x4c8   :  { %v5618_v45 = vadd.f32 %v5533_v23, %v5063_v2 }
 0x4c9   :  { %v7710_v33 = vadd.f32 %v7709_v11, %v11785_v32  ;;  %v7851_v16 = vadd.f32 %v7850_v17, %v7788_v14  ;;  %v7794_v11 = vmul.f32 %v11890_v31, %v11890_v31  ;;  %v14275_v32 = vld [vmem:[#allocation34_spill] sm:$0xff] }
 0x4cb   :  { %v7601_v21 = vpop.f32.mrf.mxu0  ;;  %v7711_v23 = vadd.f32 %v7710_v33, %v11802_v60  ;;  %v7852_v27 = vadd.f32 %v7851_v16, %v7789_v39  ;;  %v7795_v33 = vmul.f32 %v11905_v55, %v11905_v55 }
 0x4cc   :  { %v6823_v40 = vpop.f32.mrf.mxu3 }
 0x4cd   :  { %v6908_v42 = vadd.f32 %v6823_v40, %v5618_v45  ;;  %v4983_v2 = vpop.f32.mrf.mxu1  ;;  %v8290_v45 = vld [vmem:[#allocation7 + $0x168] sm:$0x1]  ;;  %v7712_v8 = vadd.f32 %v7711_v23, %v11820_v38 }
 0x4ce   :  { %v5065_v46 = vadd.f32 %v4983_v2, %v14259_v25  ;;  %v8291_v30 = vsel %vm11523_vm8, 0, %v8290_v45 }
 0x4cf   :  { %v12420_v13 = vadd.f32 %v7601_v21, %v6908_v42  ;;  %v5535_v34 = vpop.f32.mrf.mxu2  ;;  %v7853_v21 = vadd.f32 %v7852_v27, %v7790_v5  ;;  %8292 = vst [vmem:[#allocation7 + $0x168] sm:$0x1] %v8291_v30  ;;  %v7713_v3 = vadd.f32 %v7712_v8, %v11835_v9  ;;  %v8389_v5 = vld [vmem:[#allocation7 + $0x170] sm:$0xf]  ;;  %v7797_v8 = vmul.f32 %v11942_v48, %v11942_v48 }
 0x4d0   :  { %v5619_v18 = vadd.f32 %v5535_v34, %v5064_v56  ;;  %v8390_v23 = vsel %vm11535_vm11, 0, %v8389_v5 }
 0x4d1   :  { %v7854_v57 = vadd.f32 %v7853_v21, %v7791_v47  ;;  %v7714_v2 = vadd.f32 %v7713_v3, %v11855_v61  ;;  %8391 = vst [vmem:[#allocation7 + $0x170] sm:$0xf] %v8390_v23  ;;  %v14271_v61 = vld [vmem:[#allocation26_spill] sm:$0xff] }
 0x4d3   :  { %v7603_v49 = vpop.f32.mrf.mxu0  ;;  %v7855_v25 = vadd.f32 %v7854_v57, %v7792_v53  ;;  %v7715_v39 = vadd.f32 %v7714_v2, %v11872_v29  ;;  %v7798_v57 = vmul.f32 %v11960_v6, %v11960_v6  ;;  %v7799_v2 = vmul.f32 %v11975_v52, %v11975_v52 }
 0x4d4   :  { %v6825_v10 = vpop.f32.mrf.mxu3 }
 0x4d5   :  { %v6909_v40 = vadd.f32 %v6825_v10, %v5619_v18  ;;  %v12433_v56 = vpop.f32.mrf.mxu1  ;;  %v7856_v34 = vadd.f32 %v7855_v25, %v7793_v0  ;;  %v7716_v27 = vadd.f32 %v7715_v39, %v11890_v31 }
 0x4d7   :  { %v12438_v14 = vadd.f32 %v7603_v49, %v6909_v40  ;;  %v5538_v42 = vpop.f32.mrf.mxu2  ;;  %v7857_v47 = vadd.f32 %v7856_v34, %v7794_v11  ;;  %v7796_v49 = vmul.f32 %v11925_v50, %v11925_v50  ;;  %v7717_v10 = vadd.f32 %v7716_v27, %v11905_v55  ;;  %v8293_v11 = vld [vmem:[#allocation7 + $0x174] sm:$0x1] }
 0x4d8   :  { %v5620_v17 = vadd.f32 %v5538_v42, %v5065_v46  ;;  %v8294_v39 = vsel %vm11523_vm8, 0, %v8293_v11  ;;  %v7801_v27 = vmul.f32 %v12012_v12, %v12012_v12 }
 0x4d9   :  { %v7858_v30 = vadd.f32 %v7857_v47, %v7795_v33  ;;  %v7718_v40 = vadd.f32 %v7717_v10, %v11925_v50  ;;  %8295 = vst [vmem:[#allocation7 + $0x174] sm:$0x1] %v8294_v39  ;;  %v7802_v10 = vmul.f32 %v12030_v41, %v12030_v41  ;;  %v14267_v50 = vld [vmem:[#allocation18_spill] sm:$0xff] }
 0x4db   :  { %v7606_v16 = vpop.f32.mrf.mxu0  ;;  %v7859_v3 = vadd.f32 %v7858_v30, %v7796_v49  ;;  %v7719_v0 = vadd.f32 %v7718_v40, %v11942_v48  ;;  %v14260_v40 = vld [vmem:[#allocation44_spill] sm:$0xff] }
 0x4dc   :  { %v6828_v18 = vpop.f32.mrf.mxu3 }
 0x4dd   :  { %v6910_v45 = vadd.f32 %v6828_v18, %v5620_v17  ;;  %v12451_v46 = vpop.f32.mrf.mxu1  ;;  %v7860_v42 = vadd.f32 %v7859_v3, %v7797_v8  ;;  %v7720_v34 = vadd.f32 %v7719_v0, %v11960_v6  ;;  %v7803_v3 = vmul.f32 %v14260_v40, %v14260_v40  ;;  %v8392_v0 = vld [vmem:[#allocation7 + $0x17c] sm:$0xf] }
 0x4df   :  { %v12456_v21 = vadd.f32 %v7606_v16, %v6910_v45  ;;  %v12458_v53 = vpop.f32.mrf.mxu2  ;;  %v7861_v33 = vadd.f32 %v7860_v42, %v7798_v57  ;;  %v7800_v16 = vmul.f32 %v11995_v58, %v11995_v58  ;;  %v7721_v18 = vadd.f32 %v7720_v34, %v11975_v52  ;;  %v14261_v34 = vld [vmem:[#allocation45_spill] sm:$0xff] }
 0x4e1   :  { %v7862_v23 = vadd.f32 %v7861_v33, %v7799_v2  ;;  %v7722_v49 = vadd.f32 %v7721_v18, %v11995_v58  ;;  %v8393_v2 = vsel %vm11535_vm11, 0, %v8392_v0  ;;  %v7804_v33 = vmul.f32 %v14261_v34, %v14261_v34  ;;  %v14263_v58 = vld [vmem:[#allocation47_spill] sm:$0xff] }
 0x4e2   :  { %8394 = vst [vmem:[#allocation7 + $0x17c] sm:$0xf] %v8393_v2 }
 0x4e3   :  { %v12466_v25 = vpop.f32.mrf.mxu0  ;;  %v7863_v45 = vadd.f32 %v7862_v23, %v7800_v16  ;;  %v7723_v30 = vadd.f32 %v7722_v49, %v12012_v12 }
 0x4e4   :  { %v12468_v17 = vpop.f32.mrf.mxu3 }
 0x4e5   :  { %v12475_v5 = vpop.f32.mrf.mxu1  ;;  %v7864_v8 = vadd.f32 %v7863_v45, %v7801_v27  ;;  %v7724_v11 = vadd.f32 %v7723_v30, %v12030_v41  ;;  %v14262_v27 = vld [vmem:[#allocation46_spill] sm:$0xff]  ;;  %v14264_v41 = vld [vmem:[#allocation12_spill] sm:$0xff] }
 0x4e6   :  { %v7805_v49 = vmul.f32 %v14262_v27, %v14262_v27  ;;  %v7807_v2 = vmul.f32 %v14264_v41, %v14264_v41 }
 0x4e7   :  { %v12480_v47 = vpop.f32.mrf.mxu2  ;;  %v7865_v39 = vadd.f32 %v7864_v8, %v7802_v10  ;;  %v7725_v18 = vadd.f32 %v7724_v11, %v14260_v40  ;;  %v7806_v10 = vmul.f32 %v14263_v58, %v14263_v58 }
 0x4e9   :  { %v7866_v23 = vadd.f32 %v7865_v39, %v7803_v3  ;;  %v7726_v12 = vadd.f32 %v7725_v18, %v14261_v34  ;;  %v8296_v3 = vld [vmem:[#allocation7 + $0x180] sm:$0x1] }
 0x4ea   :  { %v8297_v39 = vsel %vm11523_vm8, 0, %v8296_v3 }
 0x4eb   :  { %v12488_v57 = vpop.f32.mrf.mxu0  ;;  %v7867_v0 = vadd.f32 %v7866_v23, %v7804_v33  ;;  %v7727_v30 = vadd.f32 %v7726_v12, %v14262_v27  ;;  %v14265_v23 = vld [vmem:[#allocation14_spill] sm:$0xff]  ;;  %8298 = vst [vmem:[#allocation7 + $0x180] sm:$0x1] %v8297_v39 }
 0x4ec   :  { %v12490_v42 = vpop.f32.mrf.mxu3  ;;  %v7808_v34 = vmul.f32 %v14265_v23, %v14265_v23 }
 0x4ed   :  { %v12497_v16 = vpop.f32.mrf.mxu1  ;;  %v7868_v8 = vadd.f32 %v7867_v0, %v7805_v49  ;;  %v7728_v18 = vadd.f32 %v7727_v30, %v14263_v58  ;;  %v14266_v0 = vld [vmem:[#allocation16_spill] sm:$0xff] }
 0x4ee   :  { %v7809_v27 = vmul.f32 %v14266_v0, %v14266_v0  ;;  %v14268_v58 = vld [vmem:[#allocation20_spill] sm:$0xff] }
 0x4ef   :  { %v12502_v45 = vpop.f32.mrf.mxu2  ;;  %v7869_v33 = vadd.f32 %v7868_v8, %v7806_v10  ;;  %v7729_v12 = vadd.f32 %v7728_v18, %v14264_v41  ;;  %v7810_v10 = vmul.f32 %v14267_v50, %v14267_v50  ;;  %v7811_v39 = vmul.f32 %v14268_v58, %v14268_v58 }
 0x4f1   :  { %v7870_v49 = vadd.f32 %v7869_v33, %v7807_v2  ;;  %v7730_v48 = vadd.f32 %v7729_v12, %v14265_v23  ;;  %v8395_v2 = vld [vmem:[#allocation7 + $0x188] sm:$0xf] }
 0x4f2   :  { %v8396_v33 = vsel %vm11535_vm11, 0, %v8395_v2 }
 0x4f3   :  { %v12510_v52 = vpop.f32.mrf.mxu0  ;;  %v7871_v3 = vadd.f32 %v7870_v49, %v7808_v34  ;;  %v7731_v30 = vadd.f32 %v7730_v48, %v14266_v0  ;;  %v14269_v49 = vld [vmem:[#allocation22_spill] sm:$0xff]  ;;  %8397 = vst [vmem:[#allocation7 + $0x188] sm:$0xf] %v8396_v33 }
 0x4f4   :  { %v12512_v11 = vpop.f32.mrf.mxu3  ;;  %v7812_v23 = vmul.f32 %v14269_v49, %v14269_v49 }
 0x4f5   :  { %v12519_v40 = vpop.f32.mrf.mxu1  ;;  %v7872_v8 = vadd.f32 %v7871_v3, %v7809_v27  ;;  %v7732_v12 = vadd.f32 %v7731_v30, %v14267_v50  ;;  %v14270_v3 = vld [vmem:[#allocation24_spill] sm:$0xff] }
 0x4f6   :  { %v7813_v0 = vmul.f32 %v14270_v3, %v14270_v3  ;;  %v14272_v50 = vld [vmem:[#allocation28_spill] sm:$0xff] }
 0x4f7   :  { %v12524_v6 = vpop.f32.mrf.mxu2  ;;  %v7873_v34 = vadd.f32 %v7872_v8, %v7810_v10  ;;  %v7733_v48 = vadd.f32 %v7732_v12, %v14268_v58  ;;  %v7814_v10 = vmul.f32 %v14271_v61, %v14271_v61  ;;  %v7815_v33 = vmul.f32 %v14272_v50, %v14272_v50 }
 0x4f9   :  { %v7874_v27 = vadd.f32 %v7873_v34, %v7811_v39  ;;  %v7734_v29 = vadd.f32 %v7733_v48, %v14269_v49  ;;  %v8299_v39 = vld [vmem:[#allocation7 + $0x18c] sm:$0x1] }
 0x4fa   :  { %v8300_v34 = vsel %vm11523_vm8, 0, %v8299_v39 }
 0x4fb   :  { %v12532_v55 = vpop.f32.mrf.mxu0  ;;  %v7875_v2 = vadd.f32 %v7874_v27, %v7812_v23  ;;  %v7735_v30 = vadd.f32 %v7734_v29, %v14270_v3  ;;  %v14273_v27 = vld [vmem:[#allocation30_spill] sm:$0xff]  ;;  %8301 = vst [vmem:[#allocation7 + $0x18c] sm:$0x1] %v8300_v34 }
 0x4fc   :  { %v12534_v18 = vpop.f32.mrf.mxu3  ;;  %v7816_v49 = vmul.f32 %v14273_v27, %v14273_v27 }
 0x4fd   :  { %v12541_v41 = vpop.f32.mrf.mxu1  ;;  %v7876_v8 = vadd.f32 %v7875_v2, %v7813_v0  ;;  %v7736_v48 = vadd.f32 %v7735_v30, %v14271_v61  ;;  %v14274_v2 = vld [vmem:[#allocation32_spill] sm:$0xff] }
 0x4fe   :  { %v7817_v3 = vmul.f32 %v14274_v2, %v14274_v2  ;;  %v14276_v61 = vld [vmem:[#allocation36_spill] sm:$0xff] }
 0x4ff   :  { %v12546_v31 = vpop.f32.mrf.mxu2  ;;  %v7877_v23 = vadd.f32 %v7876_v8, %v7814_v10  ;;  %v7737_v29 = vadd.f32 %v7736_v48, %v14272_v50  ;;  %v7818_v10 = vmul.f32 %v14275_v32, %v14275_v32  ;;  %v7819_v34 = vmul.f32 %v14276_v61, %v14276_v61 }
 0x501   :  { %v7878_v0 = vadd.f32 %v7877_v23, %v7815_v33  ;;  %v7738_v60 = vadd.f32 %v7737_v29, %v14273_v27  ;;  %v8398_v33 = vld [vmem:[#allocation7 + $0x194] sm:$0xf] }
 0x502   :  { %v8399_v23 = vsel %vm11535_vm11, 0, %v8398_v33  ;;  %v7823_v33 = vmul.f32 %v12363_v59, %v12363_v59 }
 0x503   :  { %v12554_v9 = vpop.f32.mrf.mxu0  ;;  %v7879_v39 = vadd.f32 %v7878_v0, %v7816_v49  ;;  %v7739_v30 = vadd.f32 %v7738_v60, %v14274_v2  ;;  %v7820_v0 = vmul.f32 %v12339_v51, %v12339_v51  ;;  %8400 = vst [vmem:[#allocation7 + $0x194] sm:$0xf] %v8399_v23 }
 0x504   :  { %v12556_v12 = vpop.f32.mrf.mxu3 }
 0x505   :  { %v12563_v58 = vpop.f32.mrf.mxu1  ;;  %v7880_v8 = vadd.f32 %v7879_v39, %v7817_v3  ;;  %v7740_v29 = vadd.f32 %v7739_v30, %v14275_v32  ;;  %v7821_v39 = vmul.f32 %v12349_v4, %v12349_v4  ;;  %v7822_v30 = vmul.f32 %v12358_v62, %v12358_v62 }
 0x507   :  { %v12568_v38 = vpop.f32.mrf.mxu2  ;;  %v7881_v49 = vadd.f32 %v7880_v8, %v7818_v10  ;;  %v7741_v60 = vadd.f32 %v7740_v29, %v14276_v61  ;;  %v8302_v29 = vld [vmem:[#allocation7 + $0x198] sm:$0x1] }
 0x509   :  { %v7882_v3 = vadd.f32 %v7881_v49, %v7819_v34  ;;  %v7742_v50 = vadd.f32 %v7741_v60, %v12339_v51  ;;  %v14277_v34 = vld [vmem:[#allocation23_spill] sm:$0xff] }
 0x50a   :  { %v5066_v49 = vadd.f32 %v12433_v56, %v14277_v34  ;;  %v7825_v34 = vmul.f32 %v12386_v22, %v12386_v22 }
 0x50b   :  { %v12576_v36 = vpop.f32.mrf.mxu0  ;;  %v7883_v37 = vadd.f32 %v7882_v3, %v7820_v0  ;;  %v7743_v10 = vadd.f32 %v7742_v50, %v12349_v4  ;;  %v8303_v0 = vsel %vm11523_vm8, 0, %v8302_v29 }
 0x50c   :  { %v12578_v48 = vpop.f32.mrf.mxu3  ;;  %8304 = vst [vmem:[#allocation7 + $0x198] sm:$0x1] %v8303_v0  ;;  %v5621_v50 = vadd.f32 %v12458_v53, %v5066_v49  ;;  %v7826_v53 = vmul.f32 %v12403_v7, %v12403_v7  ;;  %v14280_v49 = vld [vmem:[#allocation29_spill] sm:$0xff] }
 0x50d   :  { %v12585_v27 = vpop.f32.mrf.mxu1  ;;  %v7884_v8 = vadd.f32 %v7883_v37, %v7821_v39  ;;  %v7744_v60 = vadd.f32 %v7743_v10, %v12358_v62  ;;  %v7824_v37 = vmul.f32 %v12368_v44, %v12368_v44  ;;  %v14278_v39 = vld [vmem:[#allocation25_spill] sm:$0xff]  ;;  %v14279_v10 = vld [vmem:[#allocation27_spill] sm:$0xff] }
 0x50e   :  { %v5067_v4 = vadd.f32 %v12451_v46, %v14278_v39  ;;  %v6911_v46 = vadd.f32 %v12468_v17, %v5621_v50  ;;  %v14281_v39 = vld [vmem:[#allocation31_spill] sm:$0xff] }
 0x50f   :  { %v5555_v2 = vpop.f32.mrf.mxu2  ;;  %v7885_v3 = vadd.f32 %v7884_v8, %v7822_v30  ;;  %v7745_v51 = vadd.f32 %v7744_v60, %v12363_v59  ;;  %v5068_v30 = vadd.f32 %v12475_v5, %v14279_v10  ;;  %v5069_v60 = vadd.f32 %v12497_v16, %v14280_v49 }
 0x510   :  { %v5622_v29 = vadd.f32 %v12480_v47, %v5067_v4  ;;  %v7827_v5 = vmul.f32 %v12420_v13, %v12420_v13  ;;  %v5070_v17 = vadd.f32 %v12519_v40, %v14281_v39  ;;  %v7828_v16 = vmul.f32 %v12438_v14, %v12438_v14 }
 0x511   :  { %v7886_v56 = vadd.f32 %v7885_v3, %v7823_v33  ;;  %v7746_v0 = vadd.f32 %v7745_v51, %v12368_v44  ;;  %v5623_v33 = vadd.f32 %v12502_v45, %v5068_v30  ;;  %v7829_v30 = vmul.f32 %v12456_v21, %v12456_v21 }
 0x512   :  { %v6912_v51 = vadd.f32 %v12490_v42, %v5622_v29  ;;  %v5625_v10 = vadd.f32 %v12546_v31, %v5070_v17  ;;  %v14282_v42 = vld [vmem:[#allocation33_spill] sm:$0xff]  ;;  %v14283_v31 = vld [vmem:[#allocation35_spill] sm:$0xff] }
 0x513   :  { %v12596_v23 = vpop.f32.mrf.mxu0  ;;  %v7887_v62 = vadd.f32 %v7886_v56, %v7824_v37  ;;  %v7747_v3 = vadd.f32 %v7746_v0, %v12386_v22  ;;  %v5624_v37 = vadd.f32 %v12524_v6, %v5069_v60  ;;  %v5071_v6 = vadd.f32 %v12541_v41, %v14282_v42 }
 0x514   :  { %v12600_v61 = vpop.f32.mrf.mxu3  ;;  %v12646_v0 = vadd.f32 %v12488_v57, %v6912_v51  ;;  %v6915_v57 = vadd.f32 %v12556_v12, %v5625_v10 }
 0x515   :  { %v5005_v43 = vpop.f32.mrf.mxu1  ;;  %v7888_v4 = vadd.f32 %v7887_v62, %v7825_v34  ;;  %v7748_v45 = vadd.f32 %v7747_v3, %v12403_v7  ;;  %v12636_v62 = vadd.f32 %v12466_v25, %v6911_v46  ;;  %v6913_v34 = vadd.f32 %v12512_v11, %v5623_v33 }
 0x516   :  { %v5626_v25 = vadd.f32 %v12568_v38, %v5071_v6  ;;  %v5072_v33 = vadd.f32 %v12563_v58, %v14283_v31  ;;  %v14284_v38 = vld [vmem:[#allocation37_spill] sm:$0xff]  ;;  %v7831_v58 = vmul.f32 %v12646_v0, %v12646_v0  ;;  %v14286_v6 = vld [vmem:[#allocation42_spill] sm:$0xff] }
 0x517   :  { %v5558_v8 = vpop.f32.mrf.mxu2  ;;  %v7889_v56 = vadd.f32 %v7888_v4, %v7826_v53  ;;  %v7749_v29 = vadd.f32 %v7748_v45, %v12420_v13  ;;  %v6914_v53 = vadd.f32 %v12534_v18, %v5624_v37  ;;  %v7830_v60 = vmul.f32 %v12636_v62, %v12636_v62 }
 0x518   :  { %v12656_v3 = vadd.f32 %v12510_v52, %v6913_v34  ;;  %v5627_v4 = vadd.f32 %v5555_v2, %v5072_v33  ;;  %v6916_v17 = vadd.f32 %v12578_v48, %v5626_v25  ;;  %v12673_v34 = vadd.f32 %v12554_v9, %v6915_v57 }
 0x519   :  { %v7890_v40 = vadd.f32 %v7889_v56, %v7827_v5  ;;  %v7750_v11 = vadd.f32 %v7749_v29, %v12438_v14  ;;  %v5073_v5 = vadd.f32 %v12585_v27, %v14284_v38  ;;  %v12665_v39 = vadd.f32 %v12532_v55, %v6914_v53  ;;  %v14285_v56 = vld [vmem:[#allocation49_spill] sm:$0xff] }
 0x51a   :  { %v7832_v27 = vmul.f32 %v12656_v3, %v12656_v3  ;;  %v6917_v55 = vadd.f32 %v12600_v61, %v5627_v4 }
 0x51b   :  { %v12626_v47 = vpop.f32.mrf.mxu0  ;;  %v7891_v49 = vadd.f32 %v7890_v40, %v7828_v16  ;;  %v7751_v18 = vadd.f32 %v7750_v11, %v12456_v21  ;;  %v5628_v12 = vadd.f32 %v5558_v8, %v5073_v5  ;;  %v5074_v16 = vadd.f32 %v5005_v43, %v14285_v56 }
 0x51c   :  { %v6848_v50 = vpop.f32.mrf.mxu3  ;;  %v7833_v8 = vmul.f32 %v12665_v39, %v12665_v39  ;;  %v12681_v43 = vadd.f32 %v12576_v36, %v6916_v17  ;;  %v7834_v11 = vmul.f32 %v12673_v34, %v12673_v34 }
 0x51d   :  { %v5008_v41 = vpop.f32.mrf.mxu1  ;;  %v7892_v37 = vadd.f32 %v7891_v49, %v7829_v30  ;;  %v7752_v45 = vadd.f32 %v7751_v18, %v12636_v62  ;;  %v6918_v53 = vadd.f32 %v6848_v50, %v5628_v12 }
 0x51e   :  { %v5075_v48 = vadd.f32 %v5008_v41, %v14286_v6  ;;  %v10465_v41 = vmov 512.0   ;;  %v7835_v49 = vmul.f32 %v12681_v43, %v12681_v43 }
 0x51f   :  { %v5560_v46 = vpop.f32.mrf.mxu2  ;;  %v7893_v2 = vadd.f32 %v7892_v37, %v7830_v60  ;;  %v7753_v10 = vadd.f32 %v7752_v45, %v12646_v0  ;;  %10257 = vrcp.f32 %v10465_v41  ;;  %v12694_v18 = vadd.f32 %v12626_v47, %v6918_v53 }
 0x520   :  { %v5629_v42 = vadd.f32 %v5560_v46, %v5074_v16  ;;  %v12688_v46 = vadd.f32 %v12596_v23, %v6917_v55 }
 0x521   :  { %v7894_v29 = vadd.f32 %v7893_v2, %v7831_v58  ;;  %v7754_v30 = vadd.f32 %v7753_v10, %v12656_v3  ;;  %v14287_v58 = vld [vmem:[#allocation41_spill] sm:$0xff]  ;;  %v7837_v47 = vmul.f32 %v12694_v18, %v12694_v18 }
 0x522   :  { %v7836_v5 = vmul.f32 %v12688_v46, %v12688_v46 }
 0x523   :  { %v7628_v51 = vpop.f32.mrf.mxu0  ;;  %v7895_v25 = vadd.f32 %v7894_v29, %v7832_v27  ;;  %v7755_v61 = vadd.f32 %v7754_v30, %v12665_v39 }
 0x524   :  { %v6850_v52 = vpop.f32.mrf.mxu3 }
 0x525   :  { %v6919_v31 = vadd.f32 %v6850_v52, %v5629_v42  ;;  %v5010_v33 = vpop.f32.mrf.mxu1  ;;  %v7896_v36 = vadd.f32 %v7895_v25, %v7833_v8  ;;  %v7756_v57 = vadd.f32 %v7755_v61, %v12673_v34  ;;  %v10258_v12 = vpop.eup %10257 }
 0x526   :  { %v5076_v17 = vadd.f32 %v5010_v33, %v14287_v58  ;;  %v7770_v42 = vmul.f32 512.0, %v10258_v12  ;;  %vm7774_vm12 = vweird.f32 %v10258_v12 }
 0x527   :  { %v5563_v40 = vpop.f32.mrf.mxu2  ;;  %v7897_v38 = vadd.f32 %v7896_v36, %v7834_v11  ;;  %v7757_v23 = vadd.f32 %v7756_v57, %v12681_v43  ;;  %v12699_v37 = vadd.f32 %v7628_v51, %v6919_v31 }
 0x528   :  { %v5630_v9 = vadd.f32 %v5563_v40, %v5075_v48  ;;  %v7771_v25 = vsub.f32 1.0, %v7770_v42  ;;  %v8401_v42 = vld [vmem:[#allocation7 + $0x1a0] sm:$0xf] }
 0x529   :  { %v7898_v52 = vadd.f32 %v7897_v38, %v7835_v49  ;;  %v7758_v56 = vadd.f32 %v7757_v23, %v12688_v46  ;;  %v7838_v55 = vmul.f32 %v12699_v37, %v12699_v37 }
 0x52a   :  { %v7772_v36 = vmul.f32 %v10258_v12, %v7771_v25 }
 0x52b   :  { %v7631_v60 = vpop.f32.mrf.mxu0  ;;  %v7899_v27 = vadd.f32 %v7898_v52, %v7836_v5  ;;  %v7759_v10 = vadd.f32 %v7758_v56, %v12694_v18 }
 0x52c   :  { %v6853_v50 = vpop.f32.mrf.mxu3 }
 0x52d   :  { %v6920_v4 = vadd.f32 %v6853_v50, %v5630_v9  ;;  %v7900_v6 = vadd.f32 %v7899_v27, %v7837_v47  ;;  %v7760_v48 = vadd.f32 %v7759_v10, %v12699_v37 }
 0x52f   :  { %v5565_v45 = vpop.f32.mrf.mxu2  ;;  %v7698_v16 = vadd.f32 %v7631_v60, %v6920_v4  ;;  %v7901_v30 = vadd.f32 %v7900_v6, %v7838_v55  ;;  %v7773_v4 = vadd.f32 %v10258_v12, %v7772_v36  ;;  %v8402_v6 = vsel %vm11535_vm11, 0, %v8401_v42 }
 0x530   :  { %v5631_v2 = vadd.f32 %v5565_v45, %v5076_v17  ;;  %8403 = vst [vmem:[#allocation7 + $0x1a0] sm:$0xf] %v8402_v6  ;;  %v14296_v6 = vld [vmem:[#allocation57_spill] sm:$0xff] }
 0x531   :  { %v7839_v29 = vmul.f32 %v7698_v16, %v7698_v16  ;;  %v7761_v53 = vadd.f32 %v7760_v48, %v7698_v16  ;;  %v7775_v17 = vsel %vm7774_vm12, %v10258_v12, %v7773_v4 }
 0x533   :  { %v7633_v40 = vpop.f32.mrf.mxu0  ;;  %v7902_v11 = vadd.f32 %v7901_v30, %v7839_v29  ;;  %v7914_v30 = vld [vmem:[%s13986_s2] sm:$0x1]  ;;  %s10467_s2 = smov [#allocation7]  }
 0x534   :  { %v6855_v51 = vpop.f32.mrf.mxu3 }
 0x535   :  { %v6921_v8 = vadd.f32 %v6855_v51, %v5631_v2 }
 0x537   :  { %v7699_v9 = vadd.f32 %v7633_v40, %v6921_v8 }
 0x539   :  { %v7762_v61 = vadd.f32 %v7761_v53, %v7699_v9  ;;  %v7840_v31 = vmul.f32 %v7699_v9, %v7699_v9 }
 0x53b   :  { %v7763_v33 = vrot.slane %v7762_v61, 4  ;;  %v7903_v41 = vadd.f32 %v7902_v11, %v7840_v31 }
 0x53d   :  { %v7764_v49 = vadd.f32 %v7763_v33, %v7762_v61  ;;  %v7904_v60 = vrot.slane %v7903_v41, 4  ;;  %v7927_v61 = vld [vmem:[%s13987_s3] sm:$0x1]  ;;  %s9274_s3 = sshll.u32 %s10467_s2, 4  ;;  %s9275_s3 = int_to_ptr.vmem [resolvable:$true] %s9274_s3 }
 0x53f   :  { %v7765_v50 = vrot.slane %v7764_v49, 2  ;;  %v7905_v57 = vadd.f32 %v7904_v60, %v7903_v41 }
 0x541   :  { %v7766_v38 = vadd.f32 %v7765_v50, %v7764_v49  ;;  %v7906_v23 = vrot.slane %v7905_v57, 2 }
 0x543   :  { %v7767_v5 = vrot.slane %v7766_v38, 1  ;;  %v7907_v58 = vadd.f32 %v7906_v23, %v7905_v57  ;;  %v14289_v23 = vld [vmem:[#allocation50_spill] sm:$0xff] }
 0x545   :  { %v7768_v52 = vadd.f32 %v7767_v5, %v7766_v38  ;;  %v7908_v45 = vrot.slane %v7907_v58, 1  ;;  %v14288_v38 = vld [vmem:[#allocation43_spill] sm:$0xff] }
 0x547   :  { %v7776_v56 = vmul.f32 %v7775_v17, %v7768_v52  ;;  %v7909_v47 = vadd.f32 %v7908_v45, %v7907_v58  ;;  %v14290_v58 = vld [vmem:[#allocation51_spill] sm:$0xff]  ;;  %v14292_v52 = vld [vmem:[#allocation53_spill] sm:$0xff] }
 0x549   :  { %v7910_v2 = vmul.f32 %v7909_v47, %v7775_v17  ;;  %v7911_v27 = vmul.f32 %v7776_v56, %v7776_v56  ;;  %v14291_v17 = vld [vmem:[#allocation52_spill] sm:$0xff] }
 0x54b   :  { %v7912_v10 = vsub.f32 %v7910_v2, %v7911_v27  ;;  %v14294_v2 = vld [vmem:[#allocation55_spill] sm:$0xff] }
 0x54d   :  { %v7913_v55 = vmax.f32 %v7912_v10, 0.0  ;;  %v14295_v10 = vld [vmem:[#allocation56_spill] sm:$0xff] }
 0x54f   :  { %v7915_v51 = vadd.f32 1e-05, %v7913_v55 }
 0x551   :  { %10259 = vrsqrt.f32 %v7915_v51  ;;  %vm7922_vm14 = vweird.f32 %v7915_v51 }
 0x557   :  { %v10260_v48 = vpop.eup %10259 }
 0x558   :  { %v7917_v29 = vmul.f32 %v10260_v48, %v7915_v51  ;;  %vm7923_vm13 = vweird.f32 %v10260_v48 }
 0x559   :  { %vm7924_vm15 = vmor %vm7922_vm14, %vm7923_vm13 }
 0x55a   :  { %v7918_v8 = vmul.f32 %v10260_v48, %v7917_v29  ;;  %v14297_v29 = vld [vmem:[#allocation58_spill] sm:$0xff] }
 0x55c   :  { %v7919_v40 = vmul.f32 0.5, %v7918_v8 }
 0x55e   :  { %v7920_v12 = vsub.f32 1.5, %v7919_v40  ;;  %v14298_v40 = vld [vmem:[#allocation59_spill] sm:$0xff] }
 0x560   :  { %v7921_v53 = vmul.f32 %v10260_v48, %v7920_v12 }
 0x562   :  { %v7925_v25 = vsel %vm7924_vm15, %v10260_v48, %v7921_v53 }
 0x563   :  { %v7926_v11 = vmul.f32 %v7925_v25, %v7914_v30  ;;  %v14299_v30 = vld [vmem:[#allocation60_spill] sm:$0xff]  ;;  %v14300_v25 = vld [vmem:[#allocation61_spill] sm:$0xff] }
 0x565   :  { %v7928_v31 = vmul.f32 %v7926_v11, %v7776_v56  ;;  %v12717_v33 = vperm.slane %v7926_v11, 0  ;;  %v14293_v56 = vld [vmem:[#allocation54_spill] sm:$0xff] }
 0x567   :  { %v7929_v41 = vsub.f32 %v7927_v61, %v7928_v31  ;;  %v7995_v36 = vmul.f32 %v12717_v33, %v7698_v16  ;;  %v7996_v49 = vmul.f32 %v12717_v33, %v7699_v9  ;;  %v12723_v60 = vmul.f32 %v12717_v33, %v11592_v1  ;;  %v14301_v61 = vld [vmem:[#allocation62_spill] sm:$0xff] }
 0x568   :  { %v12727_v50 = vmul.f32 %v12717_v33, %v11610_v63  ;;  %v12731_v57 = vmul.f32 %v12717_v33, %v11625_v19  ;;  %v12735_v4 = vmul.f32 %v12717_v33, %v11645_v24  ;;  %v12741_v9 = vmul.f32 %v12717_v33, %v11662_v35 }
 0x569   :  { %v12737_v16 = vperm.slane %v7929_v41, 0  ;;  %v12745_v1 = vmul.f32 %v12717_v33, %v11680_v20  ;;  %v12749_v63 = vmul.f32 %v12717_v33, %v11695_v15  ;;  %v12753_v19 = vmul.f32 %v12717_v33, %v11715_v26 }
 0x56a   :  { %v12757_v24 = vmul.f32 %v12717_v33, %v11732_v28  ;;  %v12761_v35 = vmul.f32 %v12717_v33, %v14288_v38  ;;  %v12765_v20 = vmul.f32 %v12717_v33, %v14289_v23  ;;  %v12771_v26 = vmul.f32 %v12717_v33, %v14290_v58  ;;  %v14304_v23 = vld [vmem:[#allocation64_spill] sm:$0xff] }
 0x56b   :  { %v8062_v5 = vadd.f32 %v12737_v16, %v7995_v36  ;;  %v8063_v15 = vadd.f32 %v12737_v16, %v7996_v49  ;;  %v12775_v28 = vmul.f32 %v12717_v33, %v14291_v17  ;;  %v12779_v45 = vmul.f32 %v12717_v33, %v14292_v52  ;;  %v14303_v49 = vld [vmem:[#allocation63_spill] sm:$0xff]  ;;  %v14306_v17 = vld [vmem:[#allocation44_spill] sm:$0xff] }
 0x56c   :  { %v12783_v47 = vmul.f32 %v12717_v33, %v14293_v56  ;;  %v12787_v27 = vmul.f32 %v12717_v33, %v14294_v2  ;;  %v12791_v55 = vmul.f32 %v12717_v33, %v14295_v10  ;;  %v12795_v48 = vmul.f32 %v12717_v33, %v14296_v6  ;;  %v14307_v56 = vld [vmem:[#allocation45_spill] sm:$0xff]  ;;  %v14308_v10 = vld [vmem:[#allocation46_spill] sm:$0xff] }
 0x56d   :  { %v8126_v51 = vmax.f32 %v8062_v5, 0.0  ;;  %v8127_v42 = vmax.f32 %v8063_v15, 0.0  ;;  %v12799_v8 = vmul.f32 %v12717_v33, %v14297_v29  ;;  %v12803_v12 = vmul.f32 %v12717_v33, %v14298_v40  ;;  %v14305_v15 = vld [vmem:[#allocation65_spill] sm:$0xff]  ;;  %v14310_v40 = vld [vmem:[#allocation47_spill] sm:$0xff] }
 0x56e   :  { %v12807_v53 = vmul.f32 %v12717_v33, %v14299_v30  ;;  %v12811_v11 = vmul.f32 %v12717_v33, %v14300_v25  ;;  %v12815_v31 = vmul.f32 %v12717_v33, %v14301_v61  ;;  %v12821_v38 = vmul.f32 %v12717_v33, %v14303_v49  ;;  %v14312_v25 = vld [vmem:[#allocation12_spill] sm:$0xff]  ;;  %v14314_v49 = vld [vmem:[#allocation14_spill] sm:$0xff] }
 0x56f   :  { %v12817_v41 = vpack.c.bf16 %v8126_v51, %v8126_v51  ;;  %v8191_v36 = vpack.c.bf16 %v8127_v42, %v8127_v42  ;;  %v12825_v5 = vmul.f32 %v12717_v33, %v14304_v23  ;;  %v12829_v58 = vmul.f32 %v12717_v33, %v14305_v15  ;;  %v14316_v15 = vld [vmem:[#allocation16_spill] sm:$0xff] }
 0x570   :  { %v12833_v52 = vmul.f32 %v12717_v33, %v14306_v17  ;;  %v12837_v2 = vmul.f32 %v12717_v33, %v14307_v56  ;;  %v12841_v51 = vmul.f32 %v12717_v33, %v14308_v10  ;;  %v12846_v30 = vmul.f32 %v12717_v33, %v14310_v40  ;;  %v14318_v56 = vld [vmem:[#allocation18_spill] sm:$0xff] }
 0x571   :  { %14302 = vst [vmem:[#allocation13_spill] sm:$0xff] %v12817_v41  ;;  %v8934_v42 = vshrl.u32 %v12817_v41, 16  ;;  %v8942_v6 = vshrl.u32 %v8191_v36, 16  ;;  %v8945_v29 = vshll.u32 %v8191_v36, 16  ;;  %v12850_v61 = vmul.f32 %v12717_v33, %v14312_v25  ;;  %v14321_v41 = vld [vmem:[#allocation20_spill] sm:$0xff]  ;;  %v14323_v25 = vld [vmem:[#allocation22_spill] sm:$0xff] }
 0x572   :  { %14309 = vst [vmem:[#allocation15_spill] sm:$0xff] %v12841_v51  ;;  %v12854_v23 = vmul.f32 %v12717_v33, %v14314_v49  ;;  %v12858_v17 = vmul.f32 %v12717_v33, %v14316_v15  ;;  %v12862_v10 = vmul.f32 %v12717_v33, %v14318_v56  ;;  %v12868_v54 = vmul.f32 %v12717_v33, %v14321_v41  ;;  %v9267_v15 = vld [vmem:[#allocation7 + $0x1a0] sm:$0x1]  ;;  %v14328_v56 = vld [vmem:[#allocation24_spill] sm:$0xff] }
 0x573   :  { %14311 = vst [vmem:[#allocation17_spill] sm:$0xff] %v12846_v30  ;;  %v12864_v36 = vrot.slane %v8934_v42, 7  ;;  %v8944_v40 = vrot.slane %v8942_v6, 7  ;;  %v14325_v49 = vmov 0  ;;  %v12882_v42 = vmul.f32 %v12717_v33, %v14328_v56  ;;  %v14329_v6 = vld [vmem:[#allocation26_spill] sm:$0xff]  ;;  %v14331_v41 = vld [vmem:[#allocation28_spill] sm:$0xff] }
 0x574   :  { %14313 = vst [vmem:[#allocation19_spill] sm:$0xff] %v12850_v61  ;;  %v12872_v61 = vmul.f32 %v12717_v33, %v14323_v25  ;;  %v14326_v49 = vsel %vm12876_vm1, 4294967295, %v14325_v49  ;;  %v14333_v25 = vld [vmem:[#allocation30_spill] sm:$0xff]  ;;  %v14335_v51 = vld [vmem:[#allocation32_spill] sm:$0xff] }
 0x575   :  { %14315 = vst [vmem:[#allocation21_spill] sm:$0xff] %v12854_v23  ;;  %v8947_v23 = vor.u32 %v8945_v29, %v8944_v40  ;;  %v8949_v30 = vrot.slane %v8944_v40, 4  ;;  %v12899_v56 = vmul.f32 %v12717_v33, %v14335_v51 }
 0x576   :  { %14317 = vst [vmem:[#allocation34_spill] sm:$0xff] %v12858_v17  ;;  %v8940_v17 = vrot.slane %v12864_v36, 4 }
 0x577   :  { %14319 = vst [vmem:[#allocation23_spill] sm:$0xff] %v12862_v10  ;;  %v12886_v10 = vmul.f32 %v12717_v33, %v14329_v6  ;;  %v12903_v6 = vmul.f32 %v12717_v33, %v14275_v32  ;;  %v14341_v32 = vld [vmem:[#allocation11_spill] sm:$0xff] }
 0x578   :  { %14320 = vst [vmem:[#allocation25_spill] sm:$0xff] %v12864_v36  ;;  %v8948_v51 = vsel %vm12876_vm1, %v8940_v17, %v8947_v23  ;;  %v9268_v36 = vsel %vm11523_vm8, %v8949_v30, %v9267_v15  ;;  %v12939_v30 = vmul.f32 %v12717_v33, %v12403_v7  ;;  %v12943_v23 = vmul.f32 %v12717_v33, %v12420_v13 }
 0x579   :  { %14322 = vst [vmem:[#allocation27_spill] sm:$0xff] %v12868_v54  ;;  %v12890_v54 = vmul.f32 %v12717_v33, %v14331_v41  ;;  %v7986_v17 = vmul.f32 %v12717_v33, %v12636_v62  ;;  %v7988_v7 = vmul.f32 %v12717_v33, %v12656_v3  ;;  %v7989_v13 = vmul.f32 %v12717_v33, %v12665_v39 }
 0x57a   :  { %14324 = vst [vmem:[#allocation29_spill] sm:$0xff] %v12872_v61  ;;  %v12894_v61 = vmul.f32 %v12717_v33, %v14333_v25  ;;  %v7993_v62 = vmul.f32 %v12717_v33, %v12694_v18  ;;  %v12969_v3 = vadd.f32 %v12737_v16, %v12723_v60  ;;  %v12973_v39 = vadd.f32 %v12737_v16, %v12727_v50 }
 0x57b   :  { %14327 = vst [vmem:[#allocation31_spill] sm:$0xff] %v14326_v49  ;;  %v12989_v18 = vadd.f32 %v12737_v16, %v12745_v1  ;;  %v13001_v60 = vadd.f32 %v12737_v16, %v12757_v24  ;;  %v13005_v50 = vadd.f32 %v12737_v16, %v12761_v35  ;;  %v13021_v1 = vadd.f32 %v12737_v16, %v12779_v45 }
 0x57c   :  { %14330 = vst [vmem:[#allocation33_spill] sm:$0xff] %v12886_v10  ;;  %v14337_v10 = vld [vmem:[#allocation36_spill] sm:$0xff]  ;;  %v13033_v24 = vadd.f32 %v12737_v16, %v12791_v55  ;;  %v13037_v35 = vadd.f32 %v12737_v16, %v12795_v48  ;;  %v13053_v45 = vadd.f32 %v12737_v16, %v12811_v11  ;;  %v13065_v55 = vadd.f32 %v12737_v16, %v12825_v5  ;;  %v14344_v5 = vld [vmem:[#allocation19_spill] sm:$0xff]  ;;  %v14345_v15 = vld [vmem:[#allocation21_spill] sm:$0xff] }
 0x57d   :  { %14332 = vst [vmem:[#allocation35_spill] sm:$0xff] %v12890_v54  ;;  %v12907_v41 = vmul.f32 %v12717_v33, %v14337_v10  ;;  %v14338_v54 = vld [vmem:[#allocation38_spill] sm:$0xff]  ;;  %v12927_v10 = vmul.f32 %v12717_v33, %v12363_v59  ;;  %v7984_v59 = vmul.f32 %v12717_v33, %v12438_v14  ;;  %v7991_v14 = vmul.f32 %v12717_v33, %v12681_v43 }
 0x57e   :  { %14334 = vst [vmem:[#allocation37_spill] sm:$0xff] %v12894_v61  ;;  %v12911_v25 = vmul.f32 %v12717_v33, %v14338_v54  ;;  %v14339_v61 = vld [vmem:[#allocation40_spill] sm:$0xff]  ;;  %v12931_v54 = vmul.f32 %v12717_v33, %v12368_v44  ;;  %v7985_v44 = vmul.f32 %v12717_v33, %v12456_v21  ;;  %v7992_v21 = vmul.f32 %v12717_v33, %v12688_v46 }
 0x57f   :  { %14336 = vst [vmem:[#allocation49_spill] sm:$0xff] %v12903_v6  ;;  %v12915_v29 = vmul.f32 %v12717_v33, %v14339_v61  ;;  %v12923_v6 = vmul.f32 %v12717_v33, %v14341_v32  ;;  %v12935_v61 = vmul.f32 %v12717_v33, %v12386_v22  ;;  %v7987_v22 = vmul.f32 %v12717_v33, %v12646_v0  ;;  %v14349_v32 = vld [vmem:[#allocation23_spill] sm:$0xff] }
 0x580   :  { %9266 = vst [vmem:[#allocation7 + $0x19c] sm:$0xf] %v8948_v51  ;;  %v7994_v0 = vmul.f32 %v12717_v33, %v12699_v37  ;;  %v12981_v43 = vadd.f32 %v12737_v16, %v12735_v4  ;;  %v12985_v46 = vadd.f32 %v12737_v16, %v12741_v9  ;;  %v12993_v37 = vadd.f32 %v12737_v16, %v12749_v63  ;;  %v14347_v51 = vld [vmem:[#allocation34_spill] sm:$0xff]  ;;  %v14351_v40 = vld [vmem:[#allocation27_spill] sm:$0xff] }
 0x581   :  { %9269 = vst [vmem:[#allocation7 + $0x1a0] sm:$0x1] %v9268_v36  ;;  %v7990_v36 = vmul.f32 %v12717_v33, %v12673_v34  ;;  %v12977_v34 = vadd.f32 %v12737_v16, %v12731_v57  ;;  %v12997_v33 = vadd.f32 %v12737_v16, %v12753_v19  ;;  %v13009_v57 = vadd.f32 %v12737_v16, %v12765_v20  ;;  %v14353_v49 = vld [vmem:[#allocation29_spill] sm:$0xff] }
 0x582   :  { %v13013_v4 = vadd.f32 %v12737_v16, %v12771_v26  ;;  %v13017_v9 = vadd.f32 %v12737_v16, %v12775_v28  ;;  %v13025_v63 = vadd.f32 %v12737_v16, %v12783_v47  ;;  %v13029_v19 = vadd.f32 %v12737_v16, %v12787_v27 }
 0x583   :  { %v13041_v20 = vadd.f32 %v12737_v16, %v12799_v8  ;;  %v13045_v26 = vadd.f32 %v12737_v16, %v12803_v12  ;;  %v13049_v28 = vadd.f32 %v12737_v16, %v12807_v53  ;;  %v13057_v47 = vadd.f32 %v12737_v16, %v12815_v31  ;;  %v14342_v53 = vld [vmem:[#allocation15_spill] sm:$0xff]  ;;  %v14343_v31 = vld [vmem:[#allocation17_spill] sm:$0xff] }
 0x584   :  { %v13061_v27 = vadd.f32 %v12737_v16, %v12821_v38  ;;  %v13069_v48 = vadd.f32 %v12737_v16, %v12829_v58  ;;  %v13073_v8 = vadd.f32 %v12737_v16, %v12833_v52  ;;  %v13077_v12 = vadd.f32 %v12737_v16, %v12837_v2 }
 0x585   :  { %v13081_v11 = vadd.f32 %v12737_v16, %v14342_v53  ;;  %v13085_v38 = vadd.f32 %v12737_v16, %v14343_v31  ;;  %v13089_v58 = vadd.f32 %v12737_v16, %v14344_v5  ;;  %v13093_v52 = vadd.f32 %v12737_v16, %v14345_v15 }
 0x586   :  { %v13097_v2 = vadd.f32 %v12737_v16, %v14347_v51  ;;  %v13101_v53 = vadd.f32 %v12737_v16, %v14349_v32  ;;  %v13105_v31 = vadd.f32 %v12737_v16, %v14351_v40  ;;  %v13109_v5 = vadd.f32 %v12737_v16, %v14353_v49 }
 0x587   :  { %14346 = vst [vmem:[#allocation42_spill] sm:$0xff] %v13093_v52  ;;  %v13113_v15 = vadd.f32 %v12737_v16, %v12882_v42  ;;  %v14355_v52 = vld [vmem:[#allocation33_spill] sm:$0xff]  ;;  %v13129_v49 = vadd.f32 %v12737_v16, %v12899_v56  ;;  %v13149_v56 = vadd.f32 %v12737_v16, %v12923_v6  ;;  %v13169_v6 = vadd.f32 %v12737_v16, %v12943_v23 }
 0x588   :  { %14348 = vst [vmem:[#allocation41_spill] sm:$0xff] %v13097_v2  ;;  %v13117_v51 = vadd.f32 %v12737_v16, %v14355_v52  ;;  %v14357_v2 = vld [vmem:[#allocation35_spill] sm:$0xff]  ;;  %v13137_v52 = vadd.f32 %v12737_v16, %v12907_v41  ;;  %v13157_v41 = vadd.f32 %v12737_v16, %v12931_v54  ;;  %v13178_v54 = vadd.f32 %v12737_v16, %v7986_v17 }
 0x589   :  { %14350 = vst [vmem:[#allocation43_spill] sm:$0xff] %v13101_v53  ;;  %v13121_v32 = vadd.f32 %v12737_v16, %v14357_v2  ;;  %v14358_v53 = vld [vmem:[#allocation37_spill] sm:$0xff]  ;;  %v13141_v2 = vadd.f32 %v12737_v16, %v12911_v25  ;;  %v13161_v25 = vadd.f32 %v12737_v16, %v12935_v61  ;;  %v13181_v61 = vadd.f32 %v12737_v16, %v7987_v22 }
 0x58a   :  { %14352 = vst [vmem:[#allocation50_spill] sm:$0xff] %v13105_v31  ;;  %v13125_v40 = vadd.f32 %v12737_v16, %v14358_v53  ;;  %v13145_v53 = vadd.f32 %v12737_v16, %v12915_v29  ;;  %v13165_v29 = vadd.f32 %v12737_v16, %v12939_v30  ;;  %v13187_v30 = vadd.f32 %v12737_v16, %v7989_v13 }
 0x58b   :  { %14354 = vst [vmem:[#allocation51_spill] sm:$0xff] %v13109_v5  ;;  %v14359_v5 = vld [vmem:[#allocation49_spill] sm:$0xff]  ;;  %v13190_v23 = vadd.f32 %v12737_v16, %v7990_v36  ;;  %v13199_v17 = vadd.f32 %v12737_v16, %v7993_v62  ;;  %v13202_v22 = vadd.f32 %v12737_v16, %v7994_v0  ;;  %v8065_v13 = vmax.f32 %v12973_v39, 0.0 }
 0x58c   :  { %14356 = vst [vmem:[#allocation52_spill] sm:$0xff] %v13117_v51  ;;  %v13133_v42 = vadd.f32 %v12737_v16, %v14359_v5  ;;  %v13153_v5 = vadd.f32 %v12737_v16, %v12927_v10  ;;  %v13175_v10 = vadd.f32 %v12737_v16, %v7985_v44  ;;  %v13196_v44 = vadd.f32 %v12737_v16, %v7992_v21 }
 0x58d   :  { %14360 = vst [vmem:[#allocation53_spill] sm:$0xff] %v13149_v56  ;;  %v13172_v56 = vadd.f32 %v12737_v16, %v7984_v59  ;;  %v13193_v59 = vadd.f32 %v12737_v16, %v7991_v14  ;;  %v8067_v36 = vmax.f32 %v12981_v43, 0.0  ;;  %v8068_v14 = vmax.f32 %v12985_v46, 0.0 }
 0x58e   :  { %14361 = vst [vmem:[#allocation54_spill] sm:$0xff] %v13153_v5  ;;  %v8070_v21 = vmax.f32 %v12993_v37, 0.0  ;;  %v8071_v62 = vmax.f32 %v12997_v33, 0.0  ;;  %v8074_v0 = vmax.f32 %v13009_v57, 0.0  ;;  %v8076_v39 = vmax.f32 %v13017_v9, 0.0 }
 0x58f   :  { %14362 = vst [vmem:[#allocation55_spill] sm:$0xff] %v13157_v41  ;;  %v8078_v43 = vmax.f32 %v13025_v63, 0.0  ;;  %v8079_v46 = vmax.f32 %v13029_v19, 0.0  ;;  %v8081_v37 = vmax.f32 %v13037_v35, 0.0  ;;  %v8082_v33 = vmax.f32 %v13041_v20, 0.0 }
 0x590   :  { %14363 = vst [vmem:[#allocation56_spill] sm:$0xff] %v13161_v25  ;;  %v13184_v25 = vadd.f32 %v12737_v16, %v7988_v7  ;;  %v8064_v7 = vmax.f32 %v12969_v3, 0.0  ;;  %v8073_v16 = vmax.f32 %v13005_v50, 0.0  ;;  %v8075_v3 = vmax.f32 %v13013_v4, 0.0 }
 0x591   :  { %14364 = vst [vmem:[#allocation57_spill] sm:$0xff] %v13165_v29  ;;  %v8084_v50 = vmax.f32 %v13049_v28, 0.0  ;;  %v8085_v57 = vmax.f32 %v13053_v45, 0.0  ;;  %v8086_v4 = vmax.f32 %v13057_v47, 0.0  ;;  %v8087_v9 = vmax.f32 %v13061_v27, 0.0  ;;  %v14373_v28 = vld [vmem:[#allocation42_spill] sm:$0xff] }
 0x592   :  { %14365 = vst [vmem:[#allocation58_spill] sm:$0xff] %v13181_v61  ;;  %v8089_v63 = vmax.f32 %v13069_v48, 0.0  ;;  %v8090_v19 = vmax.f32 %v13073_v8, 0.0  ;;  %v8092_v35 = vmax.f32 %v13081_v11, 0.0  ;;  %v8093_v20 = vmax.f32 %v13085_v38, 0.0 }
 0x593   :  { %14366 = vst [vmem:[#allocation59_spill] sm:$0xff] %v13184_v25  ;;  %v8128_v41 = vpack.c.bf16 %v8064_v7, %v8064_v7  ;;  %v8129_v11 = vpack.c.bf16 %v8065_v13, %v8065_v13  ;;  %v8131_v38 = vpack.c.bf16 %v8067_v36, %v8067_v36  ;;  %v8132_v29 = vpack.c.bf16 %v8068_v14, %v8068_v14 }
 0x594   :  { %14367 = vst [vmem:[#allocation60_spill] sm:$0xff] %v13187_v30  ;;  %v8066_v30 = vmax.f32 %v12977_v34, 0.0  ;;  %v8077_v34 = vmax.f32 %v13021_v1, 0.0  ;;  %v8088_v1 = vmax.f32 %v13065_v55, 0.0  ;;  %v13264_v45 = vpack.c.bf16 %v8070_v21, %v8070_v21 }
 0x595   :  { %14368 = vst [vmem:[#allocation61_spill] sm:$0xff] %v13190_v23  ;;  %v14376_v23 = vld [vmem:[#allocation51_spill] sm:$0xff]  ;;  %v13266_v47 = vpack.c.bf16 %v8071_v62, %v8071_v62  ;;  %v13270_v55 = vpack.c.bf16 %v8073_v16, %v8073_v16  ;;  %v13272_v48 = vpack.c.bf16 %v8074_v0, %v8074_v0  ;;  %v13274_v8 = vpack.c.bf16 %v8075_v3, %v8075_v3 }
 0x596   :  { %14369 = vst [vmem:[#allocation62_spill] sm:$0xff] %v13193_v59  ;;  %v8069_v59 = vmax.f32 %v12989_v18, 0.0  ;;  %v8080_v18 = vmax.f32 %v13033_v24, 0.0  ;;  %v8091_v24 = vmax.f32 %v13077_v12, 0.0  ;;  %v8130_v51 = vpack.c.bf16 %v8066_v30, %v8066_v30 }
 0x597   :  { %14370 = vst [vmem:[#allocation63_spill] sm:$0xff] %v13196_v44  ;;  %v14375_v44 = vld [vmem:[#allocation43_spill] sm:$0xff]  ;;  %v13276_v12 = vpack.c.bf16 %v8076_v39, %v8076_v39  ;;  %v13278_v7 = vpack.c.bf16 %v8077_v34, %v8077_v34  ;;  %v13280_v30 = vpack.c.bf16 %v8078_v43, %v8078_v43  ;;  %v13286_v36 = vpack.c.bf16 %v8081_v37, %v8081_v37 }
 0x598   :  { %14371 = vst [vmem:[#allocation64_spill] sm:$0xff] %v13199_v17  ;;  %v8072_v17 = vmax.f32 %v13001_v60, 0.0  ;;  %v8083_v60 = vmax.f32 %v13045_v26, 0.0  ;;  %v13262_v26 = vpack.c.bf16 %v8069_v59, %v8069_v59  ;;  %v13282_v59 = vpack.c.bf16 %v8079_v46, %v8079_v46 }
 0x599   :  { %14372 = vst [vmem:[#allocation65_spill] sm:$0xff] %v13202_v22  ;;  %v14374_v22 = vld [vmem:[#allocation41_spill] sm:$0xff]  ;;  %v13284_v13 = vpack.c.bf16 %v8080_v18, %v8080_v18  ;;  %v13292_v21 = vpack.c.bf16 %v8084_v50, %v8084_v50  ;;  %v13294_v62 = vpack.c.bf16 %v8085_v57, %v8085_v57  ;;  %v13296_v16 = vpack.c.bf16 %v8086_v4, %v8086_v4 }
 0x59a   :  { %v13268_v27 = vpack.c.bf16 %v8072_v17, %v8072_v17  ;;  %v13288_v17 = vpack.c.bf16 %v8082_v33, %v8082_v33  ;;  %v13290_v14 = vpack.c.bf16 %v8083_v60, %v8083_v60  ;;  %v13298_v0 = vpack.c.bf16 %v8087_v9, %v8087_v9 }
 0x59b   :  { %v13300_v3 = vpack.c.bf16 %v8088_v1, %v8088_v1  ;;  %v13302_v39 = vpack.c.bf16 %v8089_v63, %v8089_v63  ;;  %v13304_v34 = vpack.c.bf16 %v8090_v19, %v8090_v19  ;;  %v13306_v43 = vpack.c.bf16 %v8091_v24, %v8091_v24 }
 0x59c   :  { %v13308_v46 = vpack.c.bf16 %v8092_v35, %v8092_v35  ;;  %v13310_v18 = vpack.c.bf16 %v8093_v20, %v8093_v20  ;;  %v8407_v37 = vshrl.u32 %v8128_v41, 16  ;;  %v8410_v33 = vshll.u32 %v8128_v41, 16 }
 0x59d   :  { %v10466_v60 = vmov 0   ;;  %v8415_v50 = vshrl.u32 %v8129_v11, 16  ;;  %v8418_v57 = vshll.u32 %v8129_v11, 16  ;;  %v8424_v4 = vshrl.u32 %v8130_v51, 16 }
 0x59e   :  { %8192 = vst [vmem:[#allocation7] sm:$0xf] %v10466_v60  ;;  %v8427_v9 = vshll.u32 %v8130_v51, 16  ;;  %v8409_v1 = vrot.slane %v8407_v37, 7  ;;  %v8432_v63 = vshrl.u32 %v8131_v38, 16  ;;  %v8435_v5 = vshll.u32 %v8131_v38, 16 }
 0x59f   :  { %8193 = vst [vmem:[#allocation7 + $0x4] sm:$0xf] %v10466_v60  ;;  %v8441_v19 = vshrl.u32 %v8132_v29, 16  ;;  %v13312_v24 = vrot.slane %v8415_v50, 7  ;;  %v8426_v35 = vrot.slane %v8424_v4, 7  ;;  %v8444_v31 = vshll.u32 %v8132_v29, 16 }
 0x5a0   :  { %8194 = vst [vmem:[#allocation7 + $0x8] sm:$0xf] %v10466_v60  ;;  %v8449_v20 = vshrl.u32 %v13262_v26, 16  ;;  %v13315_v41 = vor.u32 %v8410_v33, %v8409_v1  ;;  %v8413_v25 = vrot.slane %v8409_v1, 4  ;;  %v13317_v61 = vrot.slane %v8432_v63, 7 }
 0x5a1   :  { %8195 = vst [vmem:[#allocation7 + $0xd8] sm:$0xf] %v10466_v60  ;;  %v8443_v11 = vrot.slane %v8441_v19, 7  ;;  %v14383_v51 = vmax.f32 %v13089_v58, 0.0  ;;  %v8420_v38 = vor.u32 %v8418_v57, %v13312_v24  ;;  %v13325_v50 = vor.u32 %v8427_v9, %v8426_v35 }
 0x5a2   :  { %14381 = vst [vmem:[#allocation44_spill] sm:$0xff] %v13315_v41  ;;  %v8430_v29 = vrot.slane %v8426_v35, 4  ;;  %v14385_v4 = vmax.f32 %v14373_v28, 0.0  ;;  %v8437_v1 = vor.u32 %v8435_v5, %v13317_v61  ;;  %v13337_v41 = vrot.slane %v8449_v20, 7 }
 0x5a3   :  { %14382 = vst [vmem:[#allocation45_spill] sm:$0xff] %v13317_v61  ;;  %v13322_v37 = vpack.c.bf16 %v14383_v51, %v14383_v51  ;;  %v13333_v63 = vor.u32 %v8444_v31, %v8443_v11  ;;  %v8447_v58 = vrot.slane %v8443_v11, 4  ;;  %v8421_v51 = vsel %vm12876_vm1, %v8413_v25, %v8420_v38 }
 0x5a4   :  { %8196 = vst [vmem:[#allocation7 + $0xdc] sm:$0xf] %v10466_v60  ;;  %v13330_v33 = vpack.c.bf16 %v14385_v4, %v14385_v4  ;;  %v8452_v57 = vshll.u32 %v13262_v26, 16  ;;  %v8458_v9 = vshrl.u32 %v13264_v45, 16  ;;  %v14389_v28 = vmax.f32 %v14374_v22, 0.0 }
 0x5a5   :  { %14384 = vst [vmem:[#allocation46_spill] sm:$0xff] %v13325_v50  ;;  %v14390_v5 = vmax.f32 %v14375_v44, 0.0  ;;  %v8438_v25 = vsel %vm12876_vm1, %v8430_v29, %v8437_v1  ;;  %v8466_v20 = vshrl.u32 %v13266_v47, 16  ;;  %v8461_v22 = vshll.u32 %v13264_v45, 16 }
 0x5a6   :  { %8197 = vst [vmem:[#allocation7 + $0xe0] sm:$0xf] %v10466_v60  ;;  %v13344_v35 = vpack.c.bf16 %v14389_v28, %v14389_v28  ;;  %v8454_v26 = vor.u32 %v8452_v57, %v13337_v41  ;;  %v8460_v11 = vrot.slane %v8458_v9, 7  ;;  %v8475_v38 = vshrl.u32 %v13268_v27, 16 }
 0x5a7   :  { %14386 = vst [vmem:[#allocation47_spill] sm:$0xff] %v13333_v63  ;;  %v13349_v31 = vpack.c.bf16 %v14390_v5, %v14390_v5  ;;  %v13357_v4 = vrot.slane %v8466_v20, 7  ;;  %v8469_v44 = vshll.u32 %v13266_v47, 16  ;;  %v8478_v28 = vshll.u32 %v13268_v27, 16  ;;  %v14391_v27 = vld [vmem:[#allocation50_spill] sm:$0xff] }
 0x5a8   :  { %8199 = vst [vmem:[#allocation7 + $0xcc] sm:$0xf] %v10466_v60  ;;  %v8483_v5 = vshrl.u32 %v13270_v55, 16  ;;  %v8455_v29 = vsel %vm12876_vm1, %v8447_v58, %v8454_v26  ;;  %v13364_v1 = vor.u32 %v8461_v22, %v8460_v11  ;;  %v8464_v57 = vrot.slane %v8460_v11, 4 }
 0x5a9   :  { %14388 = vst [vmem:[#allocation12_spill] sm:$0xff] %v13337_v41  ;;  %v8477_v9 = vrot.slane %v8475_v38, 7  ;;  %v8471_v45 = vor.u32 %v8469_v44, %v13357_v4  ;;  %v8486_v20 = vshll.u32 %v13270_v55, 16  ;;  %v8492_v47 = vshrl.u32 %v13272_v48, 16 }
 0x5aa   :  { %8200 = vst [vmem:[#allocation7 + $0xd0] sm:$0xf] %v10466_v60  ;;  %v13367_v63 = vrot.slane %v8483_v5, 7  ;;  %v14392_v50 = vmax.f32 %v14391_v27, 0.0  ;;  %v8500_v26 = vshrl.u32 %v13274_v8, 16  ;;  %v8495_v55 = vshll.u32 %v13272_v48, 16 }
 0x5ab   :  { %8201 = vst [vmem:[#allocation7 + $0xd4] sm:$0xf] %v10466_v60  ;;  %v13376_v61 = vor.u32 %v8478_v28, %v8477_v9  ;;  %v8481_v58 = vrot.slane %v8477_v9, 4  ;;  %v8494_v22 = vrot.slane %v8492_v47, 7  ;;  %v14393_v38 = vmax.f32 %v14376_v23, 0.0 }
 0x5ac   :  { %8202 = vst [vmem:[#allocation7 + $0x1a4] sm:$0xf] %v10466_v60  ;;  %v13374_v41 = vpack.c.bf16 %v14392_v50, %v14392_v50  ;;  %v8488_v11 = vor.u32 %v8486_v20, %v13367_v63  ;;  %v13388_v44 = vrot.slane %v8500_v26, 7  ;;  %v8503_v28 = vshll.u32 %v13274_v8, 16 }
 0x5ad   :  { %8203 = vst [vmem:[#allocation7 + $0x1a8] sm:$0xf] %v10466_v60  ;;  %v13386_v50 = vpack.c.bf16 %v14393_v38, %v14393_v38  ;;  %v8498_v9 = vrot.slane %v8494_v22, 4  ;;  %v8517_v48 = vshrl.u32 %v13278_v7, 16  ;;  %v14394_v23 = vmax.f32 %v13113_v15, 0.0 }
 0x5ae   :  { %8204 = vst [vmem:[#allocation7 + $0x1ac] sm:$0xf] %v10466_v60  ;;  %v8472_v60 = vsel %vm12876_vm1, %v8464_v57, %v8471_v45  ;;  %v8489_v5 = vsel %vm12876_vm1, %v8481_v58, %v8488_v11  ;;  %v13394_v57 = vor.u32 %v8495_v55, %v8494_v22  ;;  %v8505_v45 = vor.u32 %v8503_v28, %v13388_v44 }
 0x5af   :  { %9049 = vst [vmem:[#allocation7 + $0x10] sm:$0xf] %v8421_v51  ;;  %v8509_v51 = vshrl.u32 %v13276_v12, 16  ;;  %v8512_v20 = vshll.u32 %v13276_v12, 16  ;;  %v8520_v47 = vshll.u32 %v13278_v7, 16  ;;  %v8526_v27 = vshrl.u32 %v13280_v30, 16 }
 0x5b0   :  { %9056 = vst [vmem:[#allocation7 + $0x1c] sm:$0xf] %v8438_v25  ;;  %v13400_v25 = vpack.c.bf16 %v14394_v23, %v14394_v23  ;;  %v8534_v58 = vshrl.u32 %v13282_v59, 16  ;;  %v8506_v15 = vsel %vm12876_vm1, %v8498_v9, %v8505_v45  ;;  %v8529_v11 = vshll.u32 %v13280_v30, 16  ;;  %v14395_v7 = vld [vmem:[#allocation52_spill] sm:$0xff] }
 0x5b1   :  { %9063 = vst [vmem:[#allocation7 + $0x28] sm:$0xf] %v8455_v29  ;;  %v8511_v8 = vrot.slane %v8509_v51, 7  ;;  %v13404_v29 = vrot.slane %v8517_v48, 7  ;;  %v8528_v12 = vrot.slane %v8526_v27, 7  ;;  %v8537_v38 = vshll.u32 %v13282_v59, 16 }
 0x5b2   :  { %9070 = vst [vmem:[#allocation7 + $0x34] sm:$0xf] %v8472_v60  ;;  %v13415_v55 = vrot.slane %v8534_v58, 7  ;;  %v14396_v28 = vmax.f32 %v14395_v7, 0.0  ;;  %v8546_v9 = vshll.u32 %v13284_v13, 16  ;;  %v8551_v48 = vshrl.u32 %v13286_v36, 16 }
 0x5b3   :  { %9077 = vst [vmem:[#allocation7 + $0x40] sm:$0xf] %v8489_v5  ;;  %v13411_v26 = vor.u32 %v8512_v20, %v8511_v8  ;;  %v8515_v60 = vrot.slane %v8511_v8, 4  ;;  %v8522_v22 = vor.u32 %v8520_v47, %v13404_v29  ;;  %v8543_v5 = vshrl.u32 %v13284_v13, 16 }
 0x5b4   :  { %9084 = vst [vmem:[#allocation7 + $0x4c] sm:$0xf] %v8506_v15  ;;  %v13421_v51 = vpack.c.bf16 %v14396_v28, %v14396_v28  ;;  %v13428_v23 = vor.u32 %v8529_v11, %v8528_v12  ;;  %v8532_v45 = vrot.slane %v8528_v12, 4  ;;  %v8539_v59 = vor.u32 %v8537_v38, %v13415_v55 }
 0x5b5   :  { %v8523_v30 = vsel %vm12876_vm1, %v8515_v60, %v8522_v22  ;;  %v8545_v8 = vrot.slane %v8543_v5, 7  ;;  %v13431_v20 = vrot.slane %v8551_v48, 7  ;;  %v8554_v47 = vshll.u32 %v13286_v36, 16 }
 0x5b6   :  { %v8560_v27 = vshrl.u32 %v13288_v17, 16  ;;  %9091 = vst [vmem:[#allocation7 + $0x58] sm:$0xf] %v8523_v30  ;;  %v14397_v13 = vmax.f32 %v13121_v32, 0.0  ;;  %v14398_v15 = vmax.f32 %v13125_v40, 0.0  ;;  %v8540_v11 = vsel %vm12876_vm1, %v8532_v45, %v8539_v59 }
 0x5b7   :  { %v8568_v22 = vshrl.u32 %v13290_v14, 16  ;;  %v13448_v12 = vor.u32 %v8546_v9, %v8545_v8  ;;  %v8549_v36 = vrot.slane %v8545_v8, 4  ;;  %v8556_v38 = vor.u32 %v8554_v47, %v13431_v20  ;;  %9098 = vst [vmem:[#allocation7 + $0x64] sm:$0xf] %v8540_v11 }
 0x5b8   :  { %v13438_v58 = vpack.c.bf16 %v14397_v13, %v14397_v13  ;;  %v13443_v60 = vpack.c.bf16 %v14398_v15, %v14398_v15  ;;  %v8563_v32 = vshll.u32 %v13288_v17, 16  ;;  %v8562_v7 = vrot.slane %v8560_v27, 7 }
 0x5b9   :  { %v13452_v28 = vrot.slane %v8568_v22, 7  ;;  %v8571_v40 = vshll.u32 %v13290_v14, 16  ;;  %v8577_v5 = vshrl.u32 %v13292_v21, 16  ;;  %v14399_v48 = vmax.f32 %v13129_v49, 0.0 }
 0x5ba   :  { %v8557_v9 = vsel %vm12876_vm1, %v8549_v36, %v8556_v38  ;;  %v8585_v45 = vshrl.u32 %v13294_v62, 16  ;;  %v8594_v17 = vshrl.u32 %v13296_v16, 16  ;;  %v13465_v59 = vor.u32 %v8563_v32, %v8562_v7 }
 0x5bb   :  { %v13459_v30 = vpack.c.bf16 %v14399_v48, %v14399_v48  ;;  %v8566_v8 = vrot.slane %v8562_v7, 4  ;;  %v8573_v47 = vor.u32 %v8571_v40, %v13452_v28  ;;  %v8580_v14 = vshll.u32 %v13292_v21, 16  ;;  %9105 = vst [vmem:[#allocation7 + $0x70] sm:$0xf] %v8557_v9 }
 0x5bc   :  { %v8579_v27 = vrot.slane %v8577_v5, 7  ;;  %v13469_v49 = vrot.slane %v8585_v45, 7  ;;  %v8588_v13 = vshll.u32 %v13294_v62, 16  ;;  %v8596_v15 = vrot.slane %v8594_v17, 7 }
 0x5bd   :  { %v8574_v11 = vsel %vm12876_vm1, %v8566_v8, %v8573_v47  ;;  %v8597_v22 = vshll.u32 %v13296_v16, 16  ;;  %v8602_v36 = vshrl.u32 %v13298_v0, 16  ;;  %v8611_v38 = vshrl.u32 %v13300_v3, 16 }
 0x5be   :  { %v13477_v32 = vor.u32 %v8580_v14, %v8579_v27  ;;  %v8583_v7 = vrot.slane %v8579_v27, 4  ;;  %v8590_v21 = vor.u32 %v8588_v13, %v13469_v49  ;;  %v8605_v40 = vshll.u32 %v13298_v0, 16  ;;  %9112 = vst [vmem:[#allocation7 + $0x7c] sm:$0xf] %v8574_v11 }
 0x5bf   :  { %v13481_v5 = vor.u32 %v8597_v22, %v8596_v15  ;;  %v8600_v62 = vrot.slane %v8596_v15, 4  ;;  %v13483_v48 = vrot.slane %v8602_v36, 7  ;;  %v8613_v9 = vrot.slane %v8611_v38, 7 }
 0x5c0   :  { %v14400_v16 = vmax.f32 %v13133_v42, 0.0  ;;  %v8591_v17 = vsel %vm12876_vm1, %v8583_v7, %v8590_v21  ;;  %v8614_v8 = vshll.u32 %v13300_v3, 16  ;;  %v8619_v47 = vshrl.u32 %v13302_v39, 16 }
 0x5c1   :  { %v14401_v0 = vmax.f32 %v13137_v52, 0.0  ;;  %v8607_v27 = vor.u32 %v8605_v40, %v13483_v48  ;;  %v8622_v13 = vshll.u32 %v13302_v39, 16  ;;  %v8628_v42 = vshrl.u32 %v13304_v34, 16  ;;  %9119 = vst [vmem:[#allocation7 + $0x88] sm:$0xf] %v8591_v17 }
 0x5c2   :  { %v13488_v45 = vpack.c.bf16 %v14400_v16, %v14400_v16  ;;  %v13502_v15 = vor.u32 %v8614_v8, %v8613_v9  ;;  %v8617_v11 = vrot.slane %v8613_v9, 4  ;;  %v13504_v22 = vrot.slane %v8619_v47, 7 }
 0x5c3   :  { %v13497_v14 = vpack.c.bf16 %v14401_v0, %v14401_v0  ;;  %v8636_v3 = vshrl.u32 %v13306_v43, 16  ;;  %v8608_v52 = vsel %vm12876_vm1, %v8600_v62, %v8607_v27  ;;  %v8630_v36 = vrot.slane %v8628_v42, 7 }
 0x5c4   :  { %v8631_v38 = vshll.u32 %v13304_v34, 16  ;;  %v8645_v7 = vshrl.u32 %v13308_v46, 16  ;;  %v8624_v39 = vor.u32 %v8622_v13, %v13504_v22  ;;  %v8639_v40 = vshll.u32 %v13306_v43, 16  ;;  %9126 = vst [vmem:[#allocation7 + $0x94] sm:$0xf] %v8608_v52 }
 0x5c5   :  { %v13512_v21 = vrot.slane %v8636_v3, 7  ;;  %v8648_v9 = vshll.u32 %v13308_v46, 16  ;;  %v8634_v17 = vrot.slane %v8630_v36, 4  ;;  %v8653_v62 = vshrl.u32 %v13310_v18, 16 }
 0x5c6   :  { %v13516_v16 = vor.u32 %v8631_v38, %v8630_v36  ;;  %v8647_v8 = vrot.slane %v8645_v7, 7  ;;  %v14402_v47 = vmax.f32 %v13141_v2, 0.0  ;;  %v8625_v0 = vsel %vm12876_vm1, %v8617_v11, %v8624_v39  ;;  %v14404_v36 = vld [vmem:[#allocation53_spill] sm:$0xff] }
 0x5c7   :  { %v8641_v27 = vor.u32 %v8639_v40, %v13512_v21  ;;  %v8656_v43 = vshll.u32 %v13310_v18, 16  ;;  %v13530_v42 = vrot.slane %v8653_v62, 7  ;;  %v8662_v3 = vshrl.u32 %v13322_v37, 16  ;;  %9133 = vst [vmem:[#allocation7 + $0xa0] sm:$0xf] %v8625_v0 }
 0x5c8   :  { %v13522_v34 = vpack.c.bf16 %v14402_v47, %v14402_v47  ;;  %v13528_v46 = vor.u32 %v8648_v9, %v8647_v8  ;;  %v8651_v13 = vrot.slane %v8647_v8, 4  ;;  %v14403_v2 = vmax.f32 %v13145_v53, 0.0 }
 0x5c9   :  { %v14405_v38 = vmax.f32 %v14404_v36, 0.0  ;;  %v8642_v18 = vsel %vm12876_vm1, %v8634_v17, %v8641_v27  ;;  %v8670_v7 = vshrl.u32 %v13330_v33, 16  ;;  %v8658_v39 = vor.u32 %v8656_v43, %v13530_v42 }
 0x5ca   :  { %v13536_v52 = vpack.c.bf16 %v14403_v2, %v14403_v2  ;;  %v8664_v40 = vrot.slane %v8662_v3, 7  ;;  %v8665_v9 = vshll.u32 %v13322_v37, 16  ;;  %v8679_v53 = vshrl.u32 %v13344_v35, 16  ;;  %9140 = vst [vmem:[#allocation7 + $0xac] sm:$0xf] %v8642_v18 }
 0x5cb   :  { %v13541_v11 = vpack.c.bf16 %v14405_v38, %v14405_v38  ;;  %v13549_v8 = vrot.slane %v8670_v7, 7  ;;  %v8673_v62 = vshll.u32 %v13330_v33, 16  ;;  %v8682_v47 = vshll.u32 %v13344_v35, 16  ;;  %v14406_v33 = vld [vmem:[#allocation54_spill] sm:$0xff] }
 0x5cc   :  { %v8687_v0 = vshrl.u32 %v13349_v31, 16  ;;  %v8659_v17 = vsel %vm12876_vm1, %v8651_v13, %v8658_v39  ;;  %v13556_v27 = vor.u32 %v8665_v9, %v8664_v40  ;;  %v8668_v43 = vrot.slane %v8664_v40, 4 }
 0x5cd   :  { %v8681_v3 = vrot.slane %v8679_v53, 7  ;;  %v8675_v37 = vor.u32 %v8673_v62, %v13549_v8  ;;  %v8690_v36 = vshll.u32 %v13349_v31, 16  ;;  %v8696_v38 = vshrl.u32 %v13374_v41, 16  ;;  %9147 = vst [vmem:[#allocation7 + $0xb8] sm:$0xf] %v8659_v17  ;;  %v14409_v62 = vld [vmem:[#allocation55_spill] sm:$0xff] }
 0x5ce   :  { %v13559_v2 = vrot.slane %v8687_v0, 7  ;;  %v14407_v35 = vmax.f32 %v14406_v33, 0.0  ;;  %v8704_v39 = vshrl.u32 %v13386_v50, 16  ;;  %v8699_v31 = vshll.u32 %v13374_v41, 16 }
 0x5cf   :  { %v13568_v7 = vor.u32 %v8682_v47, %v8681_v3  ;;  %v8685_v13 = vrot.slane %v8681_v3, 4  ;;  %v8676_v40 = vsel %vm12876_vm1, %v8668_v43, %v8675_v37  ;;  %v8698_v53 = vrot.slane %v8696_v38, 7  ;;  %v14412_v38 = vld [vmem:[#allocation56_spill] sm:$0xff] }
 0x5d0   :  { %v13566_v18 = vpack.c.bf16 %v14407_v35, %v14407_v35  ;;  %v8692_v9 = vor.u32 %v8690_v36, %v13559_v2  ;;  %v14410_v0 = vmax.f32 %v14409_v62, 0.0  ;;  %v13580_v33 = vrot.slane %v8704_v39, 7  ;;  %9154 = vst [vmem:[#allocation7 + $0xc4] sm:$0xf] %v8676_v40 }
 0x5d1   :  { %14408 = vst [vmem:[#allocation14_spill] sm:$0xff] %v13568_v7  ;;  %v8707_v47 = vshll.u32 %v13386_v50, 16  ;;  %v8713_v3 = vshrl.u32 %v13400_v25, 16  ;;  %v13586_v37 = vor.u32 %v8699_v31, %v8698_v53  ;;  %v8702_v36 = vrot.slane %v8698_v53, 4 }
 0x5d2   :  { %v13578_v17 = vpack.c.bf16 %v14410_v0, %v14410_v0  ;;  %v8693_v43 = vsel %vm12876_vm1, %v8685_v13, %v8692_v9  ;;  %v8721_v41 = vshrl.u32 %v13421_v51, 16  ;;  %v14413_v35 = vmax.f32 %v14412_v38, 0.0 }
 0x5d3   :  { %14411 = vst [vmem:[#allocation16_spill] sm:$0xff] %v13586_v37  ;;  %v8709_v39 = vor.u32 %v8707_v47, %v13580_v33  ;;  %v8715_v0 = vrot.slane %v8713_v3, 7  ;;  %v8716_v50 = vshll.u32 %v13400_v25, 16  ;;  %v8724_v13 = vshll.u32 %v13421_v51, 16  ;;  %v14415_v51 = vld [vmem:[#allocation57_spill] sm:$0xff] }
 0x5d4   :  { %v13592_v62 = vpack.c.bf16 %v14413_v35, %v14413_v35  ;;  %9161 = vst [vmem:[#allocation7 + $0xe8] sm:$0xf] %v8693_v43  ;;  %v13596_v40 = vrot.slane %v8721_v41, 7  ;;  %v8730_v9 = vshrl.u32 %v13438_v58, 16  ;;  %v8738_v53 = vshrl.u32 %v13443_v60, 16 }
 0x5d5   :  { %v8710_v31 = vsel %vm12876_vm1, %v8702_v36, %v8709_v39  ;;  %v13603_v38 = vor.u32 %v8716_v50, %v8715_v0  ;;  %v8719_v35 = vrot.slane %v8715_v0, 4  ;;  %v8733_v47 = vshll.u32 %v13438_v58, 16 }
 0x5d6   :  { %14414 = vst [vmem:[#allocation18_spill] sm:$0xff] %v13592_v62  ;;  %v8726_v3 = vor.u32 %v8724_v13, %v13596_v40  ;;  %v8732_v25 = vrot.slane %v8730_v9, 7  ;;  %v13607_v43 = vrot.slane %v8738_v53, 7  ;;  %v8741_v41 = vshll.u32 %v13443_v60, 16 }
 0x5d7   :  { %9168 = vst [vmem:[#allocation7 + $0xf4] sm:$0xf] %v8710_v31  ;;  %v14416_v37 = vmax.f32 %v14415_v51, 0.0  ;;  %v8747_v36 = vshrl.u32 %v13459_v30, 16  ;;  %v8750_v39 = vshll.u32 %v13459_v30, 16  ;;  %v8755_v0 = vshrl.u32 %v13488_v45, 16 }
 0x5d8   :  { %v8727_v58 = vsel %vm12876_vm1, %v8719_v35, %v8726_v3  ;;  %v13620_v50 = vor.u32 %v8733_v47, %v8732_v25  ;;  %v8736_v13 = vrot.slane %v8732_v25, 4  ;;  %v8743_v60 = vor.u32 %v8741_v41, %v13607_v43 }
 0x5d9   :  { %v13613_v7 = vpack.c.bf16 %v14416_v37, %v14416_v37  ;;  %v8749_v9 = vrot.slane %v8747_v36, 7  ;;  %v13623_v53 = vrot.slane %v8755_v0, 7  ;;  %v8758_v37 = vshll.u32 %v13488_v45, 16  ;;  %9175 = vst [vmem:[#allocation7 + $0x100] sm:$0xf] %v8727_v58 }
 0x5da   :  { %v8764_v31 = vshrl.u32 %v13497_v14, 16  ;;  %v14417_v30 = vmax.f32 %v13169_v6, 0.0  ;;  %v14419_v35 = vmax.f32 %v13172_v56, 0.0  ;;  %v8744_v3 = vsel %vm12876_vm1, %v8736_v13, %v8743_v60 }
 0x5db   :  { %v8772_v25 = vshrl.u32 %v13522_v34, 16  ;;  %v13640_v41 = vor.u32 %v8750_v39, %v8749_v9  ;;  %v8753_v45 = vrot.slane %v8749_v9, 4  ;;  %v8760_v36 = vor.u32 %v8758_v37, %v13623_v53  ;;  %9182 = vst [vmem:[#allocation7 + $0x10c] sm:$0xf] %v8744_v3 }
 0x5dc   :  { %v13630_v51 = vpack.c.bf16 %v14417_v30, %v14417_v30  ;;  %v13635_v47 = vpack.c.bf16 %v14419_v35, %v14419_v35  ;;  %v8767_v6 = vshll.u32 %v13497_v14, 16  ;;  %v8766_v0 = vrot.slane %v8764_v31, 7 }
 0x5dd   :  { %14420 = vst [vmem:[#allocation22_spill] sm:$0xff] %v13640_v41  ;;  %v13644_v58 = vrot.slane %v8772_v25, 7  ;;  %v8775_v56 = vshll.u32 %v13522_v34, 16  ;;  %v8781_v30 = vshrl.u32 %v13536_v52, 16  ;;  %v14421_v35 = vmax.f32 %v13175_v10, 0.0 }
 0x5de   :  { %14418 = vst [vmem:[#allocation20_spill] sm:$0xff] %v13630_v51  ;;  %v8761_v39 = vsel %vm12876_vm1, %v8753_v45, %v8760_v36  ;;  %v8789_v60 = vshrl.u32 %v13541_v11, 16  ;;  %v8798_v14 = vshrl.u32 %v13566_v18, 16  ;;  %v13657_v9 = vor.u32 %v8767_v6, %v8766_v0 }
 0x5df   :  { %v13651_v13 = vpack.c.bf16 %v14421_v35, %v14421_v35  ;;  %v8770_v37 = vrot.slane %v8766_v0, 4  ;;  %v8777_v31 = vor.u32 %v8775_v56, %v13644_v58  ;;  %v8784_v34 = vshll.u32 %v13536_v52, 16  ;;  %9189 = vst [vmem:[#allocation7 + $0x118] sm:$0xf] %v8761_v39 }
 0x5e0   :  { %14423 = vst [vmem:[#allocation26_spill] sm:$0xff] %v13657_v9  ;;  %v8783_v3 = vrot.slane %v8781_v30, 7  ;;  %v13661_v10 = vrot.slane %v8789_v60, 7  ;;  %v8792_v25 = vshll.u32 %v13541_v11, 16  ;;  %v8800_v35 = vrot.slane %v8798_v14, 7 }
 0x5e1   :  { %14422 = vst [vmem:[#allocation24_spill] sm:$0xff] %v13651_v13  ;;  %v8778_v45 = vsel %vm12876_vm1, %v8770_v37, %v8777_v31  ;;  %v8801_v36 = vshll.u32 %v13566_v18, 16  ;;  %v8806_v6 = vshrl.u32 %v13578_v17, 16  ;;  %v8815_v0 = vshrl.u32 %v13592_v62, 16  ;;  %v14428_v18 = vld [vmem:[#allocation62_spill] sm:$0xff]  ;;  %v14429_v31 = vld [vmem:[#allocation63_spill] sm:$0xff] }
 0x5e2   :  { %v13669_v9 = vor.u32 %v8784_v34, %v8783_v3  ;;  %v8787_v56 = vrot.slane %v8783_v3, 4  ;;  %v8794_v52 = vor.u32 %v8792_v25, %v13661_v10  ;;  %v8809_v30 = vshll.u32 %v13578_v17, 16  ;;  %9196 = vst [vmem:[#allocation7 + $0x124] sm:$0xf] %v8778_v45  ;;  %v14430_v25 = vld [vmem:[#allocation64_spill] sm:$0xff] }
 0x5e3   :  { %v13673_v39 = vor.u32 %v8801_v36, %v8800_v35  ;;  %v8804_v11 = vrot.slane %v8800_v35, 4  ;;  %v13675_v60 = vrot.slane %v8806_v6, 7  ;;  %v13677_v14 = vrot.slane %v8815_v0, 7 }
 0x5e4   :  { %14424 = vst [vmem:[#allocation28_spill] sm:$0xff] %v13669_v9  ;;  %v8122_v37 = vmax.f32 %v14428_v18, 0.0  ;;  %v8123_v41 = vmax.f32 %v14429_v31, 0.0  ;;  %v8795_v34 = vsel %vm12876_vm1, %v8787_v56, %v8794_v52  ;;  %v8823_v3 = vshrl.u32 %v13613_v7, 16  ;;  %v14433_v52 = vld [vmem:[#allocation58_spill] sm:$0xff] }
 0x5e5   :  { %14425 = vst [vmem:[#allocation30_spill] sm:$0xff] %v13673_v39  ;;  %v8124_v9 = vmax.f32 %v14430_v25, 0.0  ;;  %v14431_v17 = vmax.f32 %v13178_v54, 0.0  ;;  %v8811_v35 = vor.u32 %v8809_v30, %v13675_v60  ;;  %v8832_v36 = vshrl.u32 %v13630_v51, 16 }
 0x5e6   :  { %14426 = vst [vmem:[#allocation32_spill] sm:$0xff] %v13675_v60  ;;  %v8821_v6 = vrot.slane %v13677_v14, 4  ;;  %v13691_v0 = vrot.slane %v8823_v3, 7  ;;  %v8826_v18 = vshll.u32 %v13613_v7, 16  ;;  %v8840_v56 = vshrl.u32 %v13635_v47, 16 }
 0x5e7   :  { %14427 = vst [vmem:[#allocation36_spill] sm:$0xff] %v13677_v14  ;;  %v8181_v45 = vpack.c.bf16 %v14431_v17, %v14431_v17  ;;  %v14434_v31 = vmax.f32 %v14433_v52, 0.0  ;;  %v8812_v54 = vsel %vm12876_vm1, %v8804_v11, %v8811_v35  ;;  %v13702_v30 = vrot.slane %v8832_v36, 7  ;;  %v14437_v17 = vld [vmem:[#allocation59_spill] sm:$0xff] }
 0x5e8   :  { %9203 = vst [vmem:[#allocation7 + $0x130] sm:$0xf] %v8795_v34  ;;  %v8849_v34 = vshrl.u32 %v13651_v13, 16  ;;  %v14438_v39 = vmax.f32 %v14437_v17, 0.0  ;;  %v8828_v7 = vor.u32 %v8826_v18, %v13691_v0  ;;  %v13709_v51 = vrot.slane %v8840_v56, 7  ;;  %v14444_v17 = vld [vmem:[#allocation65_spill] sm:$0xff] }
 0x5e9   :  { %14432 = vst [vmem:[#allocation38_spill] sm:$0xff] %v13691_v0  ;;  %v13698_v25 = vpack.c.bf16 %v14434_v31, %v14434_v31  ;;  %v8843_v52 = vshll.u32 %v13635_v47, 16  ;;  %v14440_v31 = vld [vmem:[#allocation60_spill] sm:$0xff]  ;;  %v8838_v11 = vrot.slane %v13702_v30, 4  ;;  %v8857_v36 = vshrl.u32 %v8181_v45, 16 }
 0x5ea   :  { %14436 = vst [vmem:[#allocation11_spill] sm:$0xff] %v13702_v30  ;;  %v8183_v3 = vpack.c.bf16 %v14438_v39, %v14438_v39  ;;  %v14441_v14 = vmax.f32 %v14440_v31, 0.0  ;;  %v13718_v35 = vrot.slane %v8849_v34, 7  ;;  %v8125_v13 = vmax.f32 %v14444_v17, 0.0  ;;  %v14445_v39 = vld [vmem:[#allocation61_spill] sm:$0xff] }
 0x5eb   :  { %14435 = vst [vmem:[#allocation40_spill] sm:$0xff] %v13698_v25  ;;  %v14446_v62 = vmax.f32 %v14445_v39, 0.0  ;;  %v8829_v47 = vsel %vm12876_vm1, %v8821_v6, %v8828_v7  ;;  %v8845_v56 = vor.u32 %v8843_v52, %v13709_v51  ;;  %v8860_v31 = vshll.u32 %v8181_v45, 16 }
 0x5ec   :  { %14439 = vst [vmem:[#allocation15_spill] sm:$0xff] %v13709_v51  ;;  %v13715_v60 = vpack.c.bf16 %v14441_v14, %v14441_v14  ;;  %v13728_v14 = vrot.slane %v8857_v36, 7  ;;  %v8866_v34 = vshrl.u32 %v13698_v25, 16  ;;  %v13731_v30 = vpack.c.bf16 %v8122_v37, %v8122_v37 }
 0x5ed   :  { %9210 = vst [vmem:[#allocation7 + $0x13c] sm:$0xf] %v8812_v54  ;;  %v8185_v18 = vpack.c.bf16 %v14446_v62, %v14446_v62  ;;  %v8855_v54 = vrot.slane %v13718_v35, 4  ;;  %v8846_v17 = vsel %vm12876_vm1, %v8838_v11, %v8845_v56  ;;  %v8874_v39 = vshrl.u32 %v8183_v3, 16 }
 0x5ee   :  { %14442 = vst [vmem:[#allocation17_spill] sm:$0xff] %v13715_v60  ;;  %v8187_v62 = vpack.c.bf16 %v8123_v41, %v8123_v41  ;;  %v8862_v0 = vor.u32 %v8860_v31, %v13728_v14  ;;  %v13736_v6 = vrot.slane %v8866_v34, 7  ;;  %v8883_v7 = vshrl.u32 %v13715_v60, 16  ;;  %v9053_v60 = vld [vmem:[#allocation7 + $0x18] sm:$0xf] }
 0x5ef   :  { %14443 = vst [vmem:[#allocation19_spill] sm:$0xff] %v13718_v35  ;;  %v13739_v52 = vpack.c.bf16 %v8124_v9, %v8124_v9  ;;  %v13741_v45 = vrot.slane %v8874_v39, 7  ;;  %v8877_v36 = vshll.u32 %v8183_v3, 16  ;;  %v8189_v37 = vpack.c.bf16 %v8125_v13, %v8125_v13  ;;  %v9050_v13 = vld [vmem:[#allocation7 + $0x14] sm:$0x1] }
 0x5f0   :  { %14447 = vst [vmem:[#allocation21_spill] sm:$0xff] %v13728_v14  ;;  %v8863_v25 = vsel %vm12876_vm1, %v8855_v54, %v8862_v0  ;;  %v8872_v11 = vrot.slane %v13736_v6, 4  ;;  %v13746_v41 = vrot.slane %v8883_v7, 7  ;;  %v8894_v34 = vshll.u32 %v8185_v18, 16 }
 0x5f1   :  { %9217 = vst [vmem:[#allocation7 + $0x148] sm:$0xf] %v8829_v47  ;;  %v8891_v47 = vshrl.u32 %v8185_v18, 16  ;;  %v8879_v56 = vor.u32 %v8877_v36, %v13741_v45  ;;  %v8900_v9 = vshrl.u32 %v13731_v30, 16  ;;  %v8908_v39 = vshrl.u32 %v8187_v62, 16 }
 0x5f2   :  { %14448 = vst [vmem:[#allocation34_spill] sm:$0xff] %v13731_v30  ;;  %v8889_v3 = vrot.slane %v13746_v41, 4  ;;  %v8422_v0 = vrot.slane %v13312_v24, 4  ;;  %v8911_v18 = vshll.u32 %v8187_v62, 16  ;;  %v9057_v30 = vld [vmem:[#allocation7 + $0x20] sm:$0x1] }
 0x5f3   :  { %14449 = vst [vmem:[#allocation23_spill] sm:$0xff] %v13736_v6  ;;  %v13749_v31 = vrot.slane %v8891_v47, 7  ;;  %v8880_v54 = vsel %vm12876_vm1, %v8872_v11, %v8879_v56  ;;  %v13757_v36 = vrot.slane %v8900_v9, 7  ;;  %v13759_v47 = vrot.slane %v8908_v39, 7  ;;  %v9060_v11 = vld [vmem:[#allocation7 + $0x24] sm:$0xf] }
 0x5f4   :  { %9224 = vst [vmem:[#allocation7 + $0x154] sm:$0xf] %v8846_v17  ;;  %v9046_v17 = vld [vmem:[#allocation7 + $0xc] sm:$0xf]  ;;  %v8925_v14 = vshrl.u32 %v8189_v37, 16  ;;  %v14456_v56 = vld [vmem:[#allocation12_spill] sm:$0xff] }
 0x5f5   :  { %14450 = vst [vmem:[#allocation27_spill] sm:$0xff] %v13739_v52  ;;  %v8896_v7 = vor.u32 %v8894_v34, %v13749_v31  ;;  %v8906_v24 = vrot.slane %v13757_v36, 4  ;;  %v8456_v34 = vrot.slane %v14456_v56, 4  ;;  %v8913_v9 = vor.u32 %v8911_v18, %v13759_v47  ;;  %v9064_v62 = vld [vmem:[#allocation7 + $0x2c] sm:$0x1] }
 0x5f6   :  { %14451 = vst [vmem:[#allocation29_spill] sm:$0xff] %v13741_v45  ;;  %v8473_v51 = vrot.slane %v13357_v4, 4  ;;  %v9078_v56 = vld [vmem:[#allocation7 + $0x44] sm:$0x1] }
 0x5f7   :  { %14452 = vst [vmem:[#allocation33_spill] sm:$0xff] %v13746_v41  ;;  %v14455_v41 = vld [vmem:[#allocation45_spill] sm:$0xff]  ;;  %v8897_v6 = vsel %vm12876_vm1, %v8889_v3, %v8896_v7  ;;  %v9051_v7 = vsel %vm11523_vm8, %v8422_v0, %v9050_v13  ;;  %v13780_v18 = vsel %vm12876_vm1, %v8906_v24, %v8913_v9  ;;  %v14461_v13 = vld [vmem:[#allocation47_spill] sm:$0xff]  ;;  %v9074_v0 = vld [vmem:[#allocation7 + $0x3c] sm:$0xf]  ;;  %v8490_v24 = vrot.slane %v13367_v63, 4 }
 0x5f8   :  { %14453 = vst [vmem:[#allocation35_spill] sm:$0xff] %v13749_v31  ;;  %v8439_v45 = vrot.slane %v14455_v41, 4  ;;  %v14457_v31 = vld [vmem:[#allocation44_spill] sm:$0xff]  ;;  %v9061_v4 = vsel %vm11535_vm11, %v14461_v13, %v9060_v11  ;;  %v8507_v11 = vrot.slane %v13388_v44, 4  ;;  %v9085_v9 = vld [vmem:[#allocation7 + $0x50] sm:$0x1]  ;;  %v9075_v19 = vsel %vm11535_vm11, %v13376_v61, %v9074_v0 }
 0x5f9   :  { %9231 = vst [vmem:[#allocation7 + $0x160] sm:$0xf] %v8863_v25  ;;  %v8917_v25 = vshrl.u32 %v13739_v52, 16  ;;  %v13770_v52 = vrot.slane %v8925_v14, 7  ;;  %v9047_v35 = vsel %vm11535_vm11, %v14457_v31, %v9046_v17  ;;  %v14460_v14 = vld [vmem:[#allocation46_spill] sm:$0xff] }
 0x5fa   :  { %14454 = vst [vmem:[#allocation37_spill] sm:$0xff] %v13757_v36  ;;  %v9067_v36 = vld [vmem:[#allocation7 + $0x30] sm:$0xf]  ;;  %v9058_v17 = vsel %vm11523_vm8, %v8439_v45, %v9057_v30  ;;  %v9081_v45 = vld [vmem:[#allocation7 + $0x48] sm:$0xf]  ;;  %v9086_v61 = vsel %vm11523_vm8, %v8507_v11, %v9085_v9  ;;  %v8643_v9 = vrot.slane %v13512_v21, 4 }
 0x5fb   :  { %9238 = vst [vmem:[#allocation7 + $0x16c] sm:$0xf] %v8880_v54  ;;  %v13768_v39 = vrot.slane %v8917_v25, 7  ;;  %v8928_v54 = vshll.u32 %v8189_v37, 16  ;;  %v9054_v37 = vsel %vm11535_vm11, %v14460_v14, %v9053_v60  ;;  %v9071_v25 = vld [vmem:[#allocation7 + $0x38] sm:$0x1]  ;;  %v9068_v30 = vsel %vm11535_vm11, %v13364_v1, %v9067_v36 }
 0x5fc   :  { %9245 = vst [vmem:[#allocation7 + $0x178] sm:$0xf] %v8897_v6  ;;  %v9072_v63 = vsel %vm11523_vm8, %v8473_v51, %v9071_v25  ;;  %v9079_v1 = vsel %vm11523_vm8, %v8490_v24, %v9078_v56  ;;  %v9092_v36 = vld [vmem:[#allocation7 + $0x5c] sm:$0x1]  ;;  %v9082_v44 = vsel %vm11535_vm11, %v13394_v57, %v9081_v45  ;;  %v9095_v51 = vld [vmem:[#allocation7 + $0x60] sm:$0xf] }
 0x5fd   :  { %v8923_v6 = vrot.slane %v13768_v39, 4  ;;  %9048 = vst [vmem:[#allocation7 + $0xc] sm:$0xf] %v9047_v35  ;;  %v8930_v31 = vor.u32 %v8928_v54, %v13770_v52  ;;  %v9065_v35 = vsel %vm11523_vm8, %v8456_v34, %v9064_v62  ;;  %v9088_v34 = vld [vmem:[#allocation7 + $0x54] sm:$0xf]  ;;  %v8524_v62 = vrot.slane %v13404_v29, 4 }
 0x5fe   :  { %9052 = vst [vmem:[#allocation7 + $0x14] sm:$0x1] %v9051_v7  ;;  %v8541_v54 = vrot.slane %v13415_v55, 4  ;;  %v9099_v7 = vld [vmem:[#allocation7 + $0x68] sm:$0x1]  ;;  %v9089_v29 = vsel %vm11535_vm11, %v13411_v26, %v9088_v34  ;;  %v8558_v14 = vrot.slane %v13431_v20, 4  ;;  %v9096_v55 = vsel %vm11535_vm11, %v13428_v23, %v9095_v51 }
 0x5ff   :  { %9055 = vst [vmem:[#allocation7 + $0x18] sm:$0xf] %v9054_v37  ;;  %v13797_v60 = vsel %vm12876_vm1, %v8923_v6, %v8930_v31  ;;  %v9102_v6 = vld [vmem:[#allocation7 + $0x6c] sm:$0xf]  ;;  %v9093_v57 = vsel %vm11523_vm8, %v8524_v62, %v9092_v36  ;;  %v9106_v37 = vld [vmem:[#allocation7 + $0x74] sm:$0x1] }
 0x600   :  { %9059 = vst [vmem:[#allocation7 + $0x20] sm:$0x1] %v9058_v17  ;;  %v9109_v25 = vld [vmem:[#allocation7 + $0x78] sm:$0xf]  ;;  %v8575_v31 = vrot.slane %v13452_v28, 4  ;;  %v9100_v26 = vsel %vm11523_vm8, %v8541_v54, %v9099_v7  ;;  %v9103_v20 = vsel %vm11535_vm11, %v13448_v12, %v9102_v6  ;;  %v9107_v23 = vsel %vm11523_vm8, %v8558_v14, %v9106_v37 }
 0x601   :  { %9062 = vst [vmem:[#allocation7 + $0x24] sm:$0xf] %v9061_v4  ;;  %v9113_v17 = vld [vmem:[#allocation7 + $0x80] sm:$0x1]  ;;  %v9116_v13 = vld [vmem:[#allocation7 + $0x84] sm:$0xf]  ;;  %v9110_v28 = vsel %vm11535_vm11, %v13465_v59, %v9109_v25 }
 0x602   :  { %9066 = vst [vmem:[#allocation7 + $0x2c] sm:$0x1] %v9065_v35  ;;  %v8592_v4 = vrot.slane %v13469_v49, 4  ;;  %v9120_v0 = vld [vmem:[#allocation7 + $0x8c] sm:$0x1]  ;;  %v8609_v35 = vrot.slane %v13483_v48, 4  ;;  %v9114_v12 = vsel %vm11523_vm8, %v8575_v31, %v9113_v17  ;;  %v9117_v49 = vsel %vm11535_vm11, %v13477_v32, %v9116_v13 }
 0x603   :  { %9069 = vst [vmem:[#allocation7 + $0x30] sm:$0xf] %v9068_v30  ;;  %v9123_v24 = vld [vmem:[#allocation7 + $0x90] sm:$0xf]  ;;  %v9127_v56 = vld [vmem:[#allocation7 + $0x98] sm:$0x1] }
 0x604   :  { %9073 = vst [vmem:[#allocation7 + $0x38] sm:$0x1] %v9072_v63  ;;  %v9130_v30 = vld [vmem:[#allocation7 + $0x9c] sm:$0xf]  ;;  %v8626_v45 = vrot.slane %v13504_v22, 4  ;;  %v9121_v59 = vsel %vm11523_vm8, %v8592_v4, %v9120_v0  ;;  %v9124_v48 = vsel %vm11535_vm11, %v13481_v5, %v9123_v24  ;;  %v9128_v32 = vsel %vm11523_vm8, %v8609_v35, %v9127_v56 }
 0x605   :  { %9076 = vst [vmem:[#allocation7 + $0x3c] sm:$0xf] %v9075_v19  ;;  %v9134_v11 = vld [vmem:[#allocation7 + $0xa4] sm:$0x1]  ;;  %v9137_v63 = vld [vmem:[#allocation7 + $0xa8] sm:$0xf]  ;;  %v9131_v22 = vsel %vm11535_vm11, %v13502_v15, %v9130_v30 }
 0x606   :  { %9080 = vst [vmem:[#allocation7 + $0x44] sm:$0x1] %v9079_v1  ;;  %v9141_v19 = vld [vmem:[#allocation7 + $0xb0] sm:$0x1]  ;;  %v9144_v34 = vld [vmem:[#allocation7 + $0xb4] sm:$0xf]  ;;  %v9135_v5 = vsel %vm11523_vm8, %v8626_v45, %v9134_v11  ;;  %v9138_v21 = vsel %vm11535_vm11, %v13516_v16, %v9137_v63 }
 0x607   :  { %9083 = vst [vmem:[#allocation7 + $0x48] sm:$0xf] %v9082_v44  ;;  %v8660_v62 = vrot.slane %v13530_v42, 4  ;;  %v9148_v1 = vld [vmem:[#allocation7 + $0xbc] sm:$0x1]  ;;  %v8677_v44 = vrot.slane %v13549_v8, 4  ;;  %v9142_v15 = vsel %vm11523_vm8, %v8643_v9, %v9141_v19  ;;  %v9145_v42 = vsel %vm11535_vm11, %v13528_v46, %v9144_v34 }
 0x608   :  { %9087 = vst [vmem:[#allocation7 + $0x50] sm:$0x1] %v9086_v61  ;;  %v9151_v36 = vld [vmem:[#allocation7 + $0xc0] sm:$0xf]  ;;  %v9155_v51 = vld [vmem:[#allocation7 + $0xc8] sm:$0x1] }
 0x609   :  { %9090 = vst [vmem:[#allocation7 + $0x54] sm:$0xf] %v9089_v29  ;;  %v9158_v54 = vld [vmem:[#allocation7 + $0xe4] sm:$0xf]  ;;  %v8694_v61 = vrot.slane %v13559_v2, 4  ;;  %v9149_v16 = vsel %vm11523_vm8, %v8660_v62, %v9148_v1  ;;  %v9152_v8 = vsel %vm11535_vm11, %v13556_v27, %v9151_v36  ;;  %v8711_v6 = vrot.slane %v13580_v33, 4 }
 0x60a   :  { %9094 = vst [vmem:[#allocation7 + $0x5c] sm:$0x1] %v9093_v57  ;;  %v9162_v7 = vld [vmem:[#allocation7 + $0xec] sm:$0x1]  ;;  %v9165_v29 = vld [vmem:[#allocation7 + $0xf0] sm:$0xf]  ;;  %v9156_v46 = vsel %vm11523_vm8, %v8677_v44, %v9155_v51 }
 0x60b   :  { %9097 = vst [vmem:[#allocation7 + $0x60] sm:$0xf] %v9096_v55  ;;  %v9169_v14 = vld [vmem:[#allocation7 + $0xf8] sm:$0x1]  ;;  %v14462_v2 = vld [vmem:[#allocation14_spill] sm:$0xff]  ;;  %v8728_v55 = vrot.slane %v13596_v40, 4  ;;  %v9163_v27 = vsel %vm11523_vm8, %v8694_v61, %v9162_v7 }
 0x60c   :  { %9101 = vst [vmem:[#allocation7 + $0x68] sm:$0x1] %v9100_v26  ;;  %v9159_v57 = vsel %vm11535_vm11, %v14462_v2, %v9158_v54  ;;  %v9172_v37 = vld [vmem:[#allocation7 + $0xfc] sm:$0xf]  ;;  %v9176_v25 = vld [vmem:[#allocation7 + $0x104] sm:$0x1] }
 0x60d   :  { %9104 = vst [vmem:[#allocation7 + $0x6c] sm:$0xf] %v9103_v20  ;;  %v14463_v33 = vld [vmem:[#allocation16_spill] sm:$0xff]  ;;  %v9179_v26 = vld [vmem:[#allocation7 + $0x108] sm:$0xf]  ;;  %v8745_v17 = vrot.slane %v13607_v43, 4  ;;  %v9170_v20 = vsel %vm11523_vm8, %v8711_v6, %v9169_v14  ;;  %v9173_v40 = vsel %vm11535_vm11, %v13603_v38, %v9172_v37  ;;  %v9177_v0 = vsel %vm11523_vm8, %v8728_v55, %v9176_v25 }
 0x60e   :  { %9108 = vst [vmem:[#allocation7 + $0x74] sm:$0x1] %v9107_v23  ;;  %v9166_v31 = vsel %vm11535_vm11, %v14463_v33, %v9165_v29  ;;  %v9183_v13 = vld [vmem:[#allocation7 + $0x110] sm:$0x1]  ;;  %v9186_v4 = vld [vmem:[#allocation7 + $0x114] sm:$0xf]  ;;  %v9180_v43 = vsel %vm11535_vm11, %v13620_v50, %v9179_v26 }
 0x60f   :  { %9111 = vst [vmem:[#allocation7 + $0x78] sm:$0xf] %v9110_v28  ;;  %v8762_v23 = vrot.slane %v13623_v53, 4  ;;  %v9190_v28 = vld [vmem:[#allocation7 + $0x11c] sm:$0x1]  ;;  %v8779_v35 = vrot.slane %v13644_v58, 4  ;;  %v9184_v38 = vsel %vm11523_vm8, %v8745_v17, %v9183_v13 }
 0x610   :  { %9115 = vst [vmem:[#allocation7 + $0x80] sm:$0x1] %v9114_v12  ;;  %v9193_v24 = vld [vmem:[#allocation7 + $0x120] sm:$0xf]  ;;  %v9197_v12 = vld [vmem:[#allocation7 + $0x128] sm:$0x1] }
 0x611   :  { %9118 = vst [vmem:[#allocation7 + $0x84] sm:$0xf] %v9117_v49  ;;  %v14464_v53 = vld [vmem:[#allocation22_spill] sm:$0xff]  ;;  %v8796_v30 = vrot.slane %v13661_v10, 4  ;;  %v9191_v50 = vsel %vm11523_vm8, %v8762_v23, %v9190_v28  ;;  %v9204_v45 = vld [vmem:[#allocation7 + $0x134] sm:$0x1]  ;;  %v9198_v19 = vsel %vm11523_vm8, %v8779_v35, %v9197_v12 }
 0x612   :  { %9122 = vst [vmem:[#allocation7 + $0x8c] sm:$0x1] %v9121_v59  ;;  %v9187_v56 = vsel %vm11535_vm11, %v14464_v53, %v9186_v4  ;;  %v9200_v49 = vld [vmem:[#allocation7 + $0x12c] sm:$0xf]  ;;  %v9207_v63 = vld [vmem:[#allocation7 + $0x138] sm:$0xf] }
 0x613   :  { %9125 = vst [vmem:[#allocation7 + $0x90] sm:$0xf] %v9124_v48  ;;  %v14465_v59 = vld [vmem:[#allocation18_spill] sm:$0xff]  ;;  %v14467_v9 = vld [vmem:[#allocation32_spill] sm:$0xff]  ;;  %v9211_v10 = vld [vmem:[#allocation7 + $0x140] sm:$0x1]  ;;  %v9205_v51 = vsel %vm11523_vm8, %v8796_v30, %v9204_v45 }
 0x614   :  { %9129 = vst [vmem:[#allocation7 + $0x98] sm:$0x1] %v9128_v32  ;;  %v8818_v58 = vshll.u32 %v14465_v59, 16  ;;  %v14466_v11 = vld [vmem:[#allocation26_spill] sm:$0xff]  ;;  %v8813_v32 = vrot.slane %v14467_v9, 4  ;;  %v14469_v62 = vld [vmem:[#allocation20_spill] sm:$0xff] }
 0x615   :  { %9132 = vst [vmem:[#allocation7 + $0x9c] sm:$0xf] %v9131_v22  ;;  %v9194_v48 = vsel %vm11535_vm11, %v14466_v11, %v9193_v24  ;;  %v14468_v22 = vld [vmem:[#allocation36_spill] sm:$0xff]  ;;  %v9214_v36 = vld [vmem:[#allocation7 + $0x144] sm:$0xf]  ;;  %v14471_v44 = vld [vmem:[#allocation38_spill] sm:$0xff] }
 0x616   :  { %9136 = vst [vmem:[#allocation7 + $0xa4] sm:$0x1] %v9135_v5  ;;  %v8820_v34 = vor.u32 %v8818_v58, %v14468_v22  ;;  %v8835_v5 = vshll.u32 %v14469_v62, 16  ;;  %v14470_v1 = vld [vmem:[#allocation28_spill] sm:$0xff]  ;;  %v14472_v54 = vld [vmem:[#allocation11_spill] sm:$0xff]  ;;  %v9212_v2 = vsel %vm11523_vm8, %v8813_v32, %v9211_v10  ;;  %v14478_v26 = vld [vmem:[#allocation21_spill] sm:$0xff] }
 0x617   :  { %9139 = vst [vmem:[#allocation7 + $0xa8] sm:$0xf] %v9138_v21  ;;  %v9201_v21 = vsel %vm11535_vm11, %v14470_v1, %v9200_v49  ;;  %v9221_v6 = vld [vmem:[#allocation7 + $0x150] sm:$0xf]  ;;  %v8864_v17 = vrot.slane %v14478_v26, 4  ;;  %v14480_v23 = vld [vmem:[#allocation17_spill] sm:$0xff] }
 0x618   :  { %9143 = vst [vmem:[#allocation7 + $0xb0] sm:$0x1] %v9142_v15  ;;  %v8830_v15 = vrot.slane %v14471_v44, 4  ;;  %v8837_v61 = vor.u32 %v8835_v5, %v14472_v54  ;;  %v14476_v37 = vld [vmem:[#allocation19_spill] sm:$0xff]  ;;  %v9215_v33 = vsel %vm11535_vm11, %v8820_v34, %v9214_v36  ;;  %v9232_v13 = vld [vmem:[#allocation7 + $0x164] sm:$0x1] }
 0x619   :  { %9146 = vst [vmem:[#allocation7 + $0xb4] sm:$0xf] %v9145_v42  ;;  %v9218_v42 = vld [vmem:[#allocation7 + $0x14c] sm:$0x1]  ;;  %v14481_v24 = vld [vmem:[#allocation29_spill] sm:$0xff]  ;;  %v14484_v59 = vld [vmem:[#allocation35_spill] sm:$0xff]  ;;  %v9233_v11 = vsel %vm11523_vm8, %v8864_v17, %v9232_v13 }
 0x61a   :  { %9150 = vst [vmem:[#allocation7 + $0xbc] sm:$0x1] %v9149_v16  ;;  %v14473_v16 = vld [vmem:[#allocation24_spill] sm:$0xff]  ;;  %v9222_v28 = vsel %vm11535_vm11, %v8837_v61, %v9221_v6  ;;  %v8881_v35 = vrot.slane %v14481_v24, 4  ;;  %v9239_v12 = vld [vmem:[#allocation7 + $0x170] sm:$0x1] }
 0x61b   :  { %9153 = vst [vmem:[#allocation7 + $0xc0] sm:$0xf] %v9152_v8  ;;  %v8852_v7 = vshll.u32 %v14473_v16, 16  ;;  %v14474_v8 = vld [vmem:[#allocation30_spill] sm:$0xff]  ;;  %v14482_v53 = vld [vmem:[#allocation33_spill] sm:$0xff]  ;;  %v8898_v58 = vrot.slane %v14484_v59, 4 }
 0x61c   :  { %9157 = vst [vmem:[#allocation7 + $0xc8] sm:$0x1] %v9156_v46  ;;  %v9208_v29 = vsel %vm11535_vm11, %v14474_v8, %v9207_v63  ;;  %v14475_v46 = vld [vmem:[#allocation15_spill] sm:$0xff]  ;;  %v14483_v49 = vld [vmem:[#allocation34_spill] sm:$0xff]  ;;  %v14485_v63 = vld [vmem:[#allocation37_spill] sm:$0xff]  ;;  %v9240_v34 = vsel %vm11523_vm8, %v8881_v35, %v9239_v12  ;;  %v8915_v62 = vrot.slane %v13759_v47, 4 }
 0x61d   :  { %9160 = vst [vmem:[#allocation7 + $0xe4] sm:$0xf] %v9159_v57  ;;  %v8847_v14 = vrot.slane %v14475_v46, 4  ;;  %v9225_v57 = vld [vmem:[#allocation7 + $0x158] sm:$0x1]  ;;  %v8854_v55 = vor.u32 %v8852_v7, %v14476_v37  ;;  %v8903_v30 = vshll.u32 %v14483_v49, 16 }
 0x61e   :  { %9164 = vst [vmem:[#allocation7 + $0xec] sm:$0x1] %v9163_v27  ;;  %v14477_v27 = vld [vmem:[#allocation40_spill] sm:$0xff]  ;;  %v9242_v45 = vld [vmem:[#allocation7 + $0x174] sm:$0xf]  ;;  %v8932_v47 = vrot.slane %v13770_v52, 4 }
 0x61f   :  { %9167 = vst [vmem:[#allocation7 + $0xf0] sm:$0xf] %v9166_v31  ;;  %v8869_v25 = vshll.u32 %v14477_v27, 16  ;;  %v9228_v31 = vld [vmem:[#allocation7 + $0x15c] sm:$0xf]  ;;  %v8905_v9 = vor.u32 %v8903_v30, %v14485_v63  ;;  %v14486_v10 = vld [vmem:[#allocation27_spill] sm:$0xff] }
 0x620   :  { %9171 = vst [vmem:[#allocation7 + $0xf8] sm:$0x1] %v9170_v20  ;;  %v9219_v20 = vsel %vm11523_vm8, %v8830_v15, %v9218_v42  ;;  %v8920_v22 = vshll.u32 %v14486_v10, 16  ;;  %v9253_v1 = vld [vmem:[#allocation7 + $0x188] sm:$0x1]  ;;  %v14487_v15 = vld [vmem:[#allocation13_spill] sm:$0xff] }
 0x621   :  { %9174 = vst [vmem:[#allocation7 + $0xfc] sm:$0xf] %v9173_v40  ;;  %v14479_v40 = vld [vmem:[#allocation23_spill] sm:$0xff]  ;;  %v9256_v44 = vld [vmem:[#allocation7 + $0x18c] sm:$0xf]  ;;  %v14488_v61 = vld [vmem:[#allocation25_spill] sm:$0xff] }
 0x622   :  { %9178 = vst [vmem:[#allocation7 + $0x104] sm:$0x1] %v9177_v0  ;;  %v8871_v4 = vor.u32 %v8869_v25, %v14479_v40  ;;  %v8886_v0 = vshll.u32 %v14480_v23, 16  ;;  %v9260_v54 = vld [vmem:[#allocation7 + $0x194] sm:$0x1] }
 0x623   :  { %9181 = vst [vmem:[#allocation7 + $0x108] sm:$0xf] %v9180_v43  ;;  %v9235_v43 = vld [vmem:[#allocation7 + $0x168] sm:$0xf]  ;;  %v9263_v7 = vld [vmem:[#allocation7 + $0x198] sm:$0xf]  ;;  %v9261_v52 = vsel %vm11523_vm8, %v8932_v47, %v9260_v54 }
 0x624   :  { %9185 = vst [vmem:[#allocation7 + $0x110] sm:$0x1] %v9184_v38  ;;  %v9226_v38 = vsel %vm11523_vm8, %v8847_v14, %v9225_v57  ;;  %v9236_v32 = vsel %vm11535_vm11, %v8871_v4, %v9235_v43 }
 0x625   :  { %9188 = vst [vmem:[#allocation7 + $0x114] sm:$0xf] %v9187_v56  ;;  %v8888_v56 = vor.u32 %v8886_v0, %v14482_v53 }
 0x626   :  { %9192 = vst [vmem:[#allocation7 + $0x11c] sm:$0x1] %v9191_v50  ;;  %v9229_v50 = vsel %vm11535_vm11, %v8854_v55, %v9228_v31 }
 0x627   :  { %9195 = vst [vmem:[#allocation7 + $0x120] sm:$0xf] %v9194_v48  ;;  %v9246_v48 = vld [vmem:[#allocation7 + $0x17c] sm:$0x1]  ;;  %v9243_v5 = vsel %vm11535_vm11, %v8888_v56, %v9242_v45 }
 0x628   :  { %9199 = vst [vmem:[#allocation7 + $0x128] sm:$0x1] %v9198_v19  ;;  %v9249_v19 = vld [vmem:[#allocation7 + $0x180] sm:$0xf]  ;;  %v9247_v36 = vsel %vm11523_vm8, %v8898_v58, %v9246_v48 }
 0x629   :  { %9202 = vst [vmem:[#allocation7 + $0x12c] sm:$0xf] %v9201_v21  ;;  %v8922_v21 = vor.u32 %v8920_v22, %v13768_v39  ;;  %v9250_v42 = vsel %vm11535_vm11, %v8905_v9, %v9249_v19  ;;  %v9254_v39 = vsel %vm11523_vm8, %v8915_v62, %v9253_v1 }
 0x62a   :  { %9206 = vst [vmem:[#allocation7 + $0x134] sm:$0x1] %v9205_v51  ;;  %v8937_v51 = vshll.u32 %v14487_v15, 16 }
 0x62b   :  { %9209 = vst [vmem:[#allocation7 + $0x138] sm:$0xf] %v9208_v29  ;;  %v9257_v8 = vsel %vm11535_vm11, %v8922_v21, %v9256_v44 }
 0x62c   :  { %9213 = vst [vmem:[#allocation7 + $0x140] sm:$0x1] %v9212_v2  ;;  %v8939_v16 = vor.u32 %v8937_v51, %v14488_v61 }
 0x62d   :  { %9216 = vst [vmem:[#allocation7 + $0x144] sm:$0xf] %v9215_v33 }
 0x62e   :  { %9220 = vst [vmem:[#allocation7 + $0x14c] sm:$0x1] %v9219_v20  ;;  %v9264_v29 = vsel %vm11535_vm11, %v8939_v16, %v9263_v7 }
 0x62f   :  { %9223 = vst [vmem:[#allocation7 + $0x150] sm:$0xf] %v9222_v28 }
 0x630   :  { %9227 = vst [vmem:[#allocation7 + $0x158] sm:$0x1] %v9226_v38 }
 0x631   :  { %9230 = vst [vmem:[#allocation7 + $0x15c] sm:$0xf] %v9229_v50 }
 0x632   :  { %9234 = vst [vmem:[#allocation7 + $0x164] sm:$0x1] %v9233_v11 }
 0x633   :  { %9237 = vst [vmem:[#allocation7 + $0x168] sm:$0xf] %v9236_v32 }
 0x634   :  { %9241 = vst [vmem:[#allocation7 + $0x170] sm:$0x1] %v9240_v34 }
 0x635   :  { %9244 = vst [vmem:[#allocation7 + $0x174] sm:$0xf] %v9243_v5 }
 0x636   :  { %9248 = vst [vmem:[#allocation7 + $0x17c] sm:$0x1] %v9247_v36 }
 0x637   :  { %9251 = vst [vmem:[#allocation7 + $0x180] sm:$0xf] %v9250_v42 }
 0x638   :  { %9252 = vst [vmem:[#allocation7 + $0x184] sm:$0xf] %v13780_v18 }
 0x639   :  { %9255 = vst [vmem:[#allocation7 + $0x188] sm:$0x1] %v9254_v39 }
 0x63a   :  { %9258 = vst [vmem:[#allocation7 + $0x18c] sm:$0xf] %v9257_v8 }
 0x63b   :  { %9259 = vst [vmem:[#allocation7 + $0x190] sm:$0xf] %v13797_v60 }
 0x63c   :  { %9262 = vst [vmem:[#allocation7 + $0x194] sm:$0x1] %v9261_v52 }
 0x63d   :  { %9265 = vst [vmem:[#allocation7 + $0x198] sm:$0xf] %v9264_v29 }
 0x63e   :  { %9282 = dma.vmem_to_hbm [thread:$0]  %s9275_s3, 6912, %s9277_s5, [#allocation4], %s10462_s23, %s10462_s23, %s10463_s24  }
 0x63f   :  { %10459 = dma.done.wait [#allocation4], 6912  }
 0x640   :  { %10460 = vsyncadd [#allocation4], 4294960384 }
 0x641   :  { %9287 = vsyncpa [#allocation3], 1 }
 0x642   :  { %9288 = vsyncpa [#allocation6], 1 }
 0x643   :  { %9289 = vsyncpa [#allocation4], 1 }

</bundles_post_ra>
